<compile_context>
chip_gen: v7x
topology: tpu7x:2x2x1
jax: 0.10.0
libtpu: 0.0.40
codegen_flags: <defaults>
</compile_context>

<pallas_src>
import functools
import math

import jax
import jax.numpy as jnp
from jax import lax
from jax.experimental import pallas as pl
from jax.experimental.pallas import tpu as pltpu

BN_EPS = 1e-5


def _ceil_to(x, m):
    return (x + m - 1) // m * m


def _apply_act(y, act):
    if act == "relu":
        return jnp.maximum(y, 0.0)
    if act == "sigmoid":
        return jax.nn.sigmoid(y)
    if act == "elu":
        return jnp.where(y > 0, y, jnp.expm1(y))
    return y


# ----------------------------------------------------------------------------- #
# Pallas kernel: fused matmul (bf16 MXU, f32 accumulation) + bias/act epilogue
# + optional per-channel sum / sum-of-squares for the following BatchNorm.
# ----------------------------------------------------------------------------- #
def _mm_kernel(*refs, act, has_bias, want_stats):
    a_ref, b_ref = refs[0], refs[1]
    pos = 2
    c_ref = None
    if has_bias:
        c_ref = refs[pos]
        pos += 1
    o_ref = refs[pos]
    pos += 1
    if want_stats:
        sum_ref, sq_ref = refs[pos], refs[pos + 1]
        pos += 2
    acc_ref = refs[pos]

    @pl.when(pl.program_id(2) == 0)
    def _():
        acc_ref[...] = jnp.zeros_like(acc_ref)

    acc_ref[...] += jnp.dot(a_ref[...], b_ref[...],
                            preferred_element_type=jnp.float32)

    @pl.when(pl.program_id(2) == pl.num_programs(2) - 1)
    def _():
        y = acc_ref[...]
        if has_bias:
            y = y + c_ref[...]
        y = _apply_act(y, act)
        o_ref[...] = y.astype(o_ref.dtype)          # bf16 writeback (halved HBM bytes)
        if want_stats:
            # per-channel sum / sum-of-squares from the f32 accumulator; broadcast to
            # 8 sublanes so the stat block stays (8, TN) aligned.
            s1 = jnp.sum(y, axis=0, keepdims=True)
            s2 = jnp.sum(y * y, axis=0, keepdims=True)
            sum_ref[...] = jnp.broadcast_to(s1, sum_ref.shape)
            sq_ref[...] = jnp.broadcast_to(s2, sq_ref.shape)


# ----------------------------------------------------------------------------- #
# Tile selection: divisor-based so no pad/slice copies; keep tiles large.
# ----------------------------------------------------------------------------- #
def _pick_m_tile(m):
    if m % 8 == 0:
        for t in (1024, 512, 256, 128, 64, 32, 16, 8):
            if m % t == 0:
                if t >= 64 or m <= 1024:
                    return t, m
                break
    return 512, _ceil_to(m, 512)          # awkward M: pad once (not hit in this net)


def _pick_kn_tile(d):
    if d <= 768:
        return d, d                       # single full-dim block, no zero padding
    if d % 256 == 0:
        return 256, d
    if d % 128 == 0:
        return 128, d
    return 128, _ceil_to(d, 128)


def matmul_fused(a, b, bias=None, act="none", want_stats=False):
    """act(a @ b + bias) on the MXU: bf16 operands, f32 accumulation, bf16 output,
    fused per-column bias/activation epilogue and optional per-column sum /
    sum-of-square outputs (consumed by the following BatchNorm)."""
    M, K = a.shape
    K2, N = b.shape
    assert K == K2
    TM, Mp = _pick_m_tile(M)
    TN, Np = _pick_kn_tile(N)
    TK, Kp = _pick_kn_tile(K)
    # v7x: guarantee >=2 blocks along a "parallel" grid axis so both TensorCores
    # are used on the deep low-resolution layers (harmless on single-TC v5e/v6e).
    if Mp // TM == 1 and Np // TN == 1:
        if TN >= 256 and TN % 256 == 0:
            TN //= 2
        elif TM >= 16:
            TM //= 2
    n_i = Mp // TM

    has_bias = bias is not None
    if want_stats and Mp != M:
        # padded rows must contribute exactly zero to the BN statistics
        assert (not has_bias) and act == "none"

    a_p = a.astype(jnp.bfloat16)
    if (Mp, Kp) != (M, K):
        a_p = jnp.pad(a_p, ((0, Mp - M), (0, Kp - K)))
    b_p = b.astype(jnp.bfloat16)
    if (Kp, Np) != (K, N):
        b_p = jnp.pad(b_p, ((0, Kp - K), (0, Np - N)))

    operands = [a_p, b_p]
    in_specs = [pl.BlockSpec((TM, TK), lambda i, j, k: (i, k)),
                pl.BlockSpec((TK, TN), lambda i, j, k: (k, j))]
    if has_bias:
        c_p = bias.astype(jnp.float32).reshape(1, N)
        if Np != N:
            c_p = jnp.pad(c_p, ((0, 0), (0, Np - N)))
        operands.append(c_p)
        in_specs.append(pl.BlockSpec((1, TN), lambda i, j, k: (0, j)))

    out_shape = [jax.ShapeDtypeStruct((Mp, Np), jnp.bfloat16)]
    out_specs = [pl.BlockSpec((TM, TN), lambda i, j, k: (i, j))]
    if want_stats:
        out_shape += [jax.ShapeDtypeStruct((n_i * 8, Np), jnp.float32)] * 2
        out_specs += [pl.BlockSpec((8, TN), lambda i, j, k: (i, j))] * 2

    outs = pl.pallas_call(
        functools.partial(_mm_kernel, act=act, has_bias=has_bias,
                          want_stats=want_stats),
        out_shape=out_shape,
        grid_spec=pltpu.PrefetchScalarGridSpec(
            num_scalar_prefetch=0,
            grid=(Mp // TM, Np // TN, Kp // TK),
            in_specs=in_specs,
            out_specs=out_specs,
            scratch_shapes=[pltpu.VMEM((TM, TN), jnp.float32)]),
        compiler_params=pltpu.CompilerParams(
            dimension_semantics=("parallel", "parallel", "arbitrary"),
            vmem_limit_bytes=32 * 1024 * 1024),
    )(*operands)

    y = outs[0]
    if (Mp, Np) != (M, N):
        y = y[:M, :N]
    if not want_stats:
        return y, None
    s1 = jnp.sum(outs[1][0::8, :N], axis=0)
    s2 = jnp.sum(outs[2][0::8, :N], axis=0)
    return y, (s1, s2)


# ----------------------------------------------------------------------------- #
# NN building blocks (NHWC, bf16 activations); heavy convs route through Pallas.
# ----------------------------------------------------------------------------- #
def conv2d(x, w, b=None, stride=1, padding=0, dilation=1, act="none",
           want_stats=False):
    """Conv in NHWC with weights (KH,KW,Cin,Cout).

    Heavy convs: bf16 im2col + Pallas fused MXU matmul (bf16 output, f32 stats).
    Skinny convs (stem Cin=3, CoordAtt 1x1s, decoder Cout<64, small K): bf16
    lax.conv_general_dilated with f32 accumulation — no im2col amplification, no
    zero-padded MXU work, no pallas_call launch overhead."""
    N, H, W, Cin = x.shape
    KH, KW, _, Cout = w.shape
    Ho = (H + 2 * padding - dilation * (KH - 1) - 1) // stride + 1
    Wo = (W + 2 * padding - dilation * (KW - 1) - 1) // stride + 1
    M, K = N * Ho * Wo, KH * KW * Cin

    if M >= 16 and Cout >= 64 and K >= 64 and Cin >= 16:
        xb = x.astype(jnp.bfloat16)
        if padding > 0:
            xb = jnp.pad(xb, ((0, 0), (padding, padding),
                              (padding, padding), (0, 0)))
        patches = []
        for kh in range(KH):
            for kw in range(KW):
                patches.append(
                    xb[:, kh * dilation: kh * dilation + (Ho - 1) * stride + 1: stride,
                        kw * dilation: kw * dilation + (Wo - 1) * stride + 1: stride, :])
        p = jnp.stack(patches, axis=3).reshape(M, K)
        y, stats = matmul_fused(p, w.reshape(K, Cout), bias=b, act=act,
                                want_stats=want_stats)
        y = y.reshape(N, Ho, Wo, Cout)
    else:
        y = lax.conv_general_dilated(
            x.astype(jnp.bfloat16), w.astype(jnp.bfloat16),
            window_strides=(stride, stride),
            padding=[(padding, padding), (padding, padding)],
            rhs_dilation=(dilation, dilation),
            dimension_numbers=("NHWC", "HWIO", "NHWC"),
            preferred_element_type=jnp.float32)
        if b is not None:
            y = y + b
        y = _apply_act(y, act)
        stats = None
        if want_stats:
            y2 = y.reshape(M, Cout)
            stats = (jnp.sum(y2, axis=0), jnp.sum(y2 * y2, axis=0))
        y = y.astype(jnp.bfloat16)
    if want_stats:
        return y, stats
    return y


def batchnorm(x, gamma, beta, act="none", stats=None):
    """Training-mode BatchNorm2d (batch statistics) + activation.  Pure jnp so XLA
    fuses the per-channel affine into the consumer (im2col patch gather, residual
    add, max, ...) instead of materializing the tensor a second time."""
    N, H, W, C = x.shape
    M = N * H * W
    if stats is None:
        xf = x.reshape(M, C).astype(jnp.float32)
        s1 = jnp.sum(xf, axis=0)
        s2 = jnp.sum(xf * xf, axis=0)
    else:
        s1, s2 = stats
    mean = s1 / M
    var = jnp.maximum(s2 / M - mean * mean, 0.0)   # biased var, as PyTorch uses
    scale = gamma * lax.rsqrt(var + BN_EPS)
    bias = beta - mean * scale
    y = _apply_act(x.astype(jnp.float32) * scale + bias, act)
    return y.astype(jnp.bfloat16)


def conv_bn_act(x, w, bn, act, stride=1, padding=0, dilation=1):
    y, stats = conv2d(x, w, stride=stride, padding=padding, dilation=dilation,
                      want_stats=True)
    return batchnorm(y, bn["gamma"], bn["beta"], act=act, stats=stats)


def depthwise3x3(x, w):
    # TODO(synk): depthwise 3x3 (FReLU funnel) is a 9-term shifted-sum in plain JAX,
    # not a dedicated Pallas kernel (tiny compute relative to the dense convs).
    N, H, W, C = x.shape
    xp = jnp.pad(x, ((0, 0), (1, 1), (1, 1), (0, 0)))
    out = jnp.zeros((N, H, W, C), jnp.float32)
    for kh in range(3):
        for kw in range(3):
            out = out + xp[:, kh:kh + H, kw:kw + W, :].astype(jnp.float32) * w[kh, kw, :]
    return out.astype(jnp.bfloat16)


def conv3x3_refl(x, w, b, act="none"):
    xp = jnp.pad(x, ((0, 0), (1, 1), (1, 1), (0, 0)), mode="reflect")
    return conv2d(xp, w, b=b, stride=1, padding=0, act=act)


def conv_block(x, p):
    """ConvBlock with use_frelu=True: reflect-pad 3x3 conv -> FReLU."""
    out = conv3x3_refl(x, p["conv_w"], p["conv_b"])
    funnel = depthwise3x3(out, p["frelu_dw"])
    funnel = batchnorm(funnel, p["frelu_bn"]["gamma"], p["frelu_bn"]["beta"])
    return jnp.maximum(out, funnel)


def coord_att(x, p):
    n, h, w, c = x.shape
    xf = x.astype(jnp.float32)
    x_h = jnp.mean(xf, axis=2, keepdims=True)                 # [n,h,1,c]
    x_w = jnp.transpose(jnp.mean(xf, axis=1, keepdims=True),  # [n,1,w,c]
                        (0, 2, 1, 3))                         # [n,w,1,c]
    y = jnp.concatenate([x_h, x_w], axis=1).astype(jnp.bfloat16)  # [n,h+w,1,c]
    y = conv2d(y, p["w1"], b=p["b1"])
    y = batchnorm(y, p["bn1"]["gamma"], p["bn1"]["beta"])
    yf = y.astype(jnp.float32)
    y = (yf * jnp.clip(yf + 3.0, 0.0, 6.0) / 6.0).astype(jnp.bfloat16)  # h_swish
    xh2 = y[:, :h]                                            # [n,h,1,mip]
    xw2 = jnp.transpose(y[:, h:], (0, 2, 1, 3))               # [n,1,w,mip]
    a_h = conv2d(xh2, p["wh"], b=p["bh"], act="sigmoid")      # [n,h,1,oup]
    a_w = conv2d(xw2, p["ww"], b=p["bw"], act="sigmoid")      # [n,1,w,oup]
    return x * a_w * a_h


def maxpool3x3_s2_p1(x):
    N, H, W, C = x.shape
    xp = jnp.pad(x, ((0, 0), (1, 1), (1, 1), (0, 0)), constant_values=-jnp.inf)
    Ho = (H + 2 - 3) // 2 + 1
    Wo = (W + 2 - 3) // 2 + 1
    out = None
    for kh in range(3):
        for kw in range(3):
            sl = xp[:, kh:kh + (Ho - 1) * 2 + 1:2, kw:kw + (Wo - 1) * 2 + 1:2, :]
            out = sl if out is None else jnp.maximum(out, sl)
    return out


def upsample_nearest(x, k):
    # single broadcast + reshape: one materialization (vs two jnp.repeat passes)
    N, H, W, C = x.shape
    x = jnp.broadcast_to(x[:, :, None, :, None, :], (N, H, k, W, k, C))
    return x.reshape(N, H * k, W * k, C)


def basic_block(x, p, stride):
    out = conv_bn_act(x, p["conv1"], p["bn1"], "relu", stride=stride, padding=1)
    out = conv_bn_act(out, p["conv2"], p["bn2"], "none", stride=1, padding=1)
    if "down_conv" in p:
        identity = conv_bn_act(x, p["down_conv"], p["down_bn"], "none",
                               stride=stride, padding=0)
    else:
        identity = x
    return jnp.maximum(out + identity, 0.0)


def aspp(x, p):
    n, h, w, c = x.shape
    x1 = conv_bn_act(x, p["a1_w"], p["a1_bn"], "relu")
    x2 = conv_bn_act(x, p["a2_w"], p["a2_bn"], "relu", padding=2, dilation=2)
    x3 = conv_bn_act(x, p["a3_w"], p["a3_bn"], "relu", padding=4, dilation=4)
    x4 = conv_bn_act(x, p["a4_w"], p["a4_bn"], "relu", padding=6, dilation=6)
    g = jnp.mean(x.astype(jnp.float32), axis=(1, 2), keepdims=True)  # AdaptiveAvgPool2d
    x5 = conv_bn_act(g.astype(jnp.bfloat16), p["gp_w"], p["gp_bn"], "relu")  # [n,1,1,128]
    # bilinear (align_corners=True) from a 1x1 map is a pure broadcast
    x5 = jnp.broadcast_to(x5, (n, h, w, x5.shape[-1]))
    return jnp.concatenate([x1, x2, x3, x4, x5], axis=-1)


# ----------------------------------------------------------------------------- #
# Parameter init (deterministic, synthetic); conv weights pre-cast to bf16 once
# ----------------------------------------------------------------------------- #
_KEY = jax.random.PRNGKey(0)
_CNT = [0]


def _nk():
    _CNT[0] += 1
    return jax.random.fold_in(_KEY, _CNT[0])


def init_conv(cin, cout, k):
    n = k * k * cout
    w = jax.random.normal(_nk(), (k, k, cin, cout), jnp.float32) * math.sqrt(2.0 / n)
    return w.astype(jnp.bfloat16)   # MXU operands are bf16; cast once at init


def init_dw(c):
    return jax.random.normal(_nk(), (3, 3, c), jnp.float32) * math.sqrt(2.0 / (9 * c))


def init_bn(c):
    return {"gamma": jnp.ones((c,), jnp.float32), "beta": jnp.zeros((c,), jnp.float32)}


def make_params():
    def make_block(cin, cout, stride):
        b = {"conv1": init_conv(cin, cout, 3), "bn1": init_bn(cout),
             "conv2": init_conv(cout, cout, 3), "bn2": init_bn(cout)}
        if stride != 1 or cin != cout:
            b["down_conv"] = init_conv(cin, cout, 1)
            b["down_bn"] = init_bn(cout)
        return b

    enc = {
        "conv1_w": init_conv(3, 64, 7), "bn1": init_bn(64),
        "layer1": [make_block(64, 64, 1), make_block(64, 64, 1)],
        "layer2": [make_block(64, 128, 2), make_block(128, 128, 1)],
        "layer3": [make_block(128, 256, 2), make_block(256, 256, 1)],
    }

    aspp_p = {"a1_w": init_conv(256, 128, 1), "a1_bn": init_bn(128),
              "a2_w": init_conv(256, 128, 3), "a2_bn": init_bn(128),
              "a3_w": init_conv(256, 128, 3), "a3_bn": init_bn(128),
              "a4_w": init_conv(256, 128, 3), "a4_bn": init_bn(128),
              "gp_w": init_conv(256, 128, 1), "gp_bn": init_bn(128)}

    def make_convblock(cin, cout):
        return {"conv_w": init_conv(cin, cout, 3),
                "conv_b": jnp.zeros((cout,), jnp.float32),
                "frelu_dw": init_dw(cout),
                "frelu_bn": init_bn(cout)}

    def make_coordatt(inp, oup):
        mip = max(8, inp // 32)
        return {"w1": init_conv(inp, mip, 1), "b1": jnp.zeros((mip,), jnp.float32),
                "bn1": init_bn(mip),
                "wh": init_conv(mip, oup, 1), "bh": jnp.zeros((oup,), jnp.float32),
                "ww": init_conv(mip, oup, 1), "bw": jnp.zeros((oup,), jnp.float32)}

    def make_disp(cin):
        return {"w": init_conv(cin, 3, 3), "b": jnp.zeros((3,), jnp.float32)}

    return {
        "enc": enc,
        "aspp": aspp_p,
        "conv2_w": init_conv(640, 256, 1),
        "bn2": init_bn(256),
        "upconv3_0": make_convblock(256, 128),
        "upconv3_1": make_convblock(256, 128),
        "upconv2_0": make_convblock(128, 64),
        "upconv2_1": make_convblock(128, 64),
        "upconv1_0": make_convblock(64, 32),
        "upconv1_1": make_convblock(96, 32),
        "upconv0_0": make_convblock(32, 16),
        "upconv0_1": make_convblock(16, 16),
        "dispconv0": make_disp(16),
        "coa2": make_coordatt(128, 128),
        "coa3": make_coordatt(64, 64),
        "coa4": make_coordatt(32, 32),
    }


# ----------------------------------------------------------------------------- #
# Net forward (return_feat=False path: only the final dispconv0 output is returned,
# so the dispconv3/2/1 heads of the PyTorch module are dead code and omitted)
# ----------------------------------------------------------------------------- #
def net_forward(params, input_image_nchw):
    x = jnp.transpose(input_image_nchw, (0, 2, 3, 1)).astype(jnp.float32)  # -> NHWC
    x = (x - 0.45) / 0.225

    e = params["enc"]
    f0 = conv_bn_act(x, e["conv1_w"], e["bn1"], "relu", stride=2, padding=3)   # H/2, 64
    x = maxpool3x3_s2_p1(f0)
    x = basic_block(x, e["layer1"][0], 1)
    f1 = basic_block(x, e["layer1"][1], 1)                                     # H/4, 64
    x = basic_block(f1, e["layer2"][0], 2)
    f2 = basic_block(x, e["layer2"][1], 1)                                     # H/8, 128
    x = basic_block(f2, e["layer3"][0], 2)
    f3 = basic_block(x, e["layer3"][1], 1)                                     # H/16, 256

    x = aspp(f3, params["aspp"])                                               # 640 ch
    x = conv_bn_act(x, params["conv2_w"], params["bn2"], "relu")

    # scale 3
    x = conv_block(x, params["upconv3_0"])
    x = jnp.concatenate([upsample_nearest(x, 2), f2], axis=-1)
    x = conv_block(x, params["upconv3_1"])
    x = coord_att(x, params["coa2"])

    # scale 2
    x = conv_block(x, params["upconv2_0"])
    x = jnp.concatenate([upsample_nearest(x, 2), f1], axis=-1)
    x = conv_block(x, params["upconv2_1"])
    x = coord_att(x, params["coa3"])

    # scale 1
    x = conv_block(x, params["upconv1_0"])
    x = jnp.concatenate([upsample_nearest(x, 2), f0], axis=-1)
    x = conv_block(x, params["upconv1_1"])
    x = coord_att(x, params["coa4"])

    # scale 0
    x = conv_block(x, params["upconv0_0"])
    x = upsample_nearest(x, 2)
    x = conv_block(x, params["upconv0_1"])
    x = conv3x3_refl(x, params["dispconv0"]["w"], params["dispconv0"]["b"])

    return jnp.transpose(x, (0, 3, 1, 2)).astype(jnp.float32)                  # -> NCHW


if __name__ == "__main__":
    params = make_params()
    x = jax.random.uniform(jax.random.PRNGKey(0), (2, 3, 64, 64), jnp.float32)
    fwd = jax.jit(net_forward)
    out = jax.block_until_ready(fwd(params, x))
    assert out.shape == (2, 3, 64, 64), out.shape
    assert bool(jnp.all(jnp.isfinite(out)))
    print("KERNEL_OK")
</pallas_src>

<mosaic_0001>
module attributes {stable_mosaic.version = 11 : i64} {
  func.func @_mm_kernel(%arg0: i32, %arg1: i32, %arg2: i32, %arg3: memref<256x576xbf16, #tpu.memory_space<vmem>>, %arg4: memref<576x64xbf16, #tpu.memory_space<vmem>>, %arg5: memref<256x64xbf16, #tpu.memory_space<vmem>>, %arg6: memref<8x64xf32, #tpu.memory_space<vmem>>, %arg7: memref<8x64xf32, #tpu.memory_space<vmem>>, %arg8: memref<256x64xf32, #tpu.memory_space<vmem>>) attributes {dimension_semantics = [#tpu.dimension_semantics<parallel>, #tpu.dimension_semantics<parallel>, #tpu.dimension_semantics<arbitrary>], iteration_bounds = array<i64: 2, 1, 1>, scalar_prefetch = 0 : i64, scratch_operands = 1 : i64, tpu.core_type = #tpu.core_type<tc>, window_params = [{transform_indices = @transform_0, window_bounds = array<i64: 256, 576>}, {transform_indices = @transform_1, window_bounds = array<i64: 576, 64>}, {transform_indices = @transform_2, window_bounds = array<i64: 256, 64>}, {transform_indices = @transform_3, window_bounds = array<i64: 8, 64>}, {transform_indices = @transform_4, window_bounds = array<i64: 8, 64>}]} {
    %c0_i32 = arith.constant 0 : i32
    %0 = arith.cmpi eq, %arg2, %c0_i32 : i32
    %1 = arith.extui %0 : i1 to i32
    %c0_i32_0 = arith.constant 0 : i32
    %2 = arith.cmpi ne, %1, %c0_i32_0 : i32
    scf.if %2 {
      %cst_10 = arith.constant 0.000000e+00 : f32
      %12 = vector.broadcast %cst_10 : f32 to vector<256x64xf32>
      %c0_11 = arith.constant 0 : index
      %c0_12 = arith.constant 0 : index
      %13 = vector.load %arg8[%c0_11, %c0_12] : memref<256x64xf32, #tpu.memory_space<vmem>>, vector<256x64xf32>
      tpu.vector_store %arg8[%c0_11, %c0_12], %12 {strides = array<i32>} : memref<256x64xf32, #tpu.memory_space<vmem>>, vector<256x64xf32>,
    } else {
    }
    %c0 = arith.constant 0 : index
    %c0_1 = arith.constant 0 : index
    %3 = vector.load %arg8[%c0, %c0_1] : memref<256x64xf32, #tpu.memory_space<vmem>>, vector<256x64xf32>
    %c0_2 = arith.constant 0 : index
    %c0_3 = arith.constant 0 : index
    %4 = vector.load %arg3[%c0_2, %c0_3] : memref<256x576xbf16, #tpu.memory_space<vmem>>, vector<256x576xbf16>
    %c0_4 = arith.constant 0 : index
    %c0_5 = arith.constant 0 : index
    %5 = vector.load %arg4[%c0_4, %c0_5] : memref<576x64xbf16, #tpu.memory_space<vmem>>, vector<576x64xbf16>
    %cst = arith.constant dense<0.000000e+00> : vector<256x64xf32>
    %6 = tpu.matmul %4, %5, %cst {dimension_numbers = #tpu.dot_dimension_numbers<[1], [0], [0], [1], [0, 0, 1, 1], [], []>} : vector<256x576xbf16>, vector<576x64xbf16>, vector<256x64xf32> -> vector<256x64xf32>
    %7 = arith.addf %3, %6 : vector<256x64xf32>
    %c0_6 = arith.constant 0 : index
    %c0_7 = arith.constant 0 : index
    %8 = vector.load %arg8[%c0_6, %c0_7] : memref<256x64xf32, #tpu.memory_space<vmem>>, vector<256x64xf32>
    tpu.vector_store %arg8[%c0_6, %c0_7], %7 {strides = array<i32>} : memref<256x64xf32, #tpu.memory_space<vmem>>, vector<256x64xf32>,
    %c0_i32_8 = arith.constant 0 : i32
    %9 = arith.cmpi eq, %arg2, %c0_i32_8 : i32
    %10 = arith.extui %9 : i1 to i32
    %c0_i32_9 = arith.constant 0 : i32
    %11 = arith.cmpi ne, %10, %c0_i32_9 : i32
    scf.if %11 {
      %c0_10 = arith.constant 0 : index
      %c0_11 = arith.constant 0 : index
      %12 = vector.load %arg8[%c0_10, %c0_11] : memref<256x64xf32, #tpu.memory_space<vmem>>, vector<256x64xf32>
      %13 = arith.truncf %12 : vector<256x64xf32> to vector<256x64xbf16>
      %c0_12 = arith.constant 0 : index
      %c0_13 = arith.constant 0 : index
      %14 = vector.load %arg5[%c0_12, %c0_13] : memref<256x64xbf16, #tpu.memory_space<vmem>>, vector<256x64xbf16>
      tpu.vector_store %arg5[%c0_12, %c0_13], %13 {strides = array<i32>} : memref<256x64xbf16, #tpu.memory_space<vmem>>, vector<256x64xbf16>,
      %cst_14 = arith.constant dense<0.000000e+00> : vector<64xf32>
      %15 = vector.multi_reduction <add>, %12, %cst_14 [0] : vector<256x64xf32> to vector<64xf32>
      %16 = vector.shape_cast %15 : vector<64xf32> to vector<1x64xf32>
      %17 = arith.mulf %12, %12 : vector<256x64xf32>
      %cst_15 = arith.constant dense<0.000000e+00> : vector<64xf32>
      %18 = vector.multi_reduction <add>, %17, %cst_15 [0] : vector<256x64xf32> to vector<64xf32>
      %19 = vector.shape_cast %18 : vector<64xf32> to vector<1x64xf32>
      %20 = vector.shape_cast %16 : vector<1x64xf32> to vector<1x64xf32>
      %21 = vector.broadcast %20 : vector<1x64xf32> to vector<8x64xf32>
      %c0_16 = arith.constant 0 : index
      %c0_17 = arith.constant 0 : index
      %22 = vector.load %arg6[%c0_16, %c0_17] : memref<8x64xf32, #tpu.memory_space<vmem>>, vector<8x64xf32>
      tpu.vector_store %arg6[%c0_16, %c0_17], %21 {strides = array<i32>} : memref<8x64xf32, #tpu.memory_space<vmem>>, vector<8x64xf32>,
      %23 = vector.shape_cast %19 : vector<1x64xf32> to vector<1x64xf32>
      %24 = vector.broadcast %23 : vector<1x64xf32> to vector<8x64xf32>
      %c0_18 = arith.constant 0 : index
      %c0_19 = arith.constant 0 : index
      %25 = vector.load %arg7[%c0_18, %c0_19] : memref<8x64xf32, #tpu.memory_space<vmem>>, vector<8x64xf32>
      tpu.vector_store %arg7[%c0_18, %c0_19], %24 {strides = array<i32>} : memref<8x64xf32, #tpu.memory_space<vmem>>, vector<8x64xf32>,
    } else {
    }
    return
  }
  func.func @transform_0(%arg0: i32, %arg1: i32, %arg2: i32) -> (i32, i32) {
    %c0_i32 = arith.constant 0 : i32
    return %arg0, %arg2 : i32, i32
  }
  func.func @transform_1(%arg0: i32, %arg1: i32, %arg2: i32) -> (i32, i32) {
    %c0_i32 = arith.constant 0 : i32
    return %arg2, %arg1 : i32, i32
  }
  func.func @transform_2(%arg0: i32, %arg1: i32, %arg2: i32) -> (i32, i32) {
    %c0_i32 = arith.constant 0 : i32
    return %arg0, %arg1 : i32, i32
  }
  func.func @transform_3(%arg0: i32, %arg1: i32, %arg2: i32) -> (i32, i32) {
    %c0_i32 = arith.constant 0 : i32
    return %arg0, %arg1 : i32, i32
  }
  func.func @transform_4(%arg0: i32, %arg1: i32, %arg2: i32) -> (i32, i32) {
    %c0_i32 = arith.constant 0 : i32
    return %arg0, %arg1 : i32, i32
  }
}

module attributes {stable_mosaic.version = 11 : i64} {
  func.func @_mm_kernel(%arg0: i32, %arg1: i32, %arg2: i32, %arg3: memref<64x576xbf16, #tpu.memory_space<vmem>>, %arg4: memref<576x128xbf16, #tpu.memory_space<vmem>>, %arg5: memref<64x128xbf16, #tpu.memory_space<vmem>>, %arg6: memref<8x128xf32, #tpu.memory_space<vmem>>, %arg7: memref<8x128xf32, #tpu.memory_space<vmem>>, %arg8: memref<64x128xf32, #tpu.memory_space<vmem>>) attributes {dimension_semantics = [#tpu.dimension_semantics<parallel>, #tpu.dimension_semantics<parallel>, #tpu.dimension_semantics<arbitrary>], iteration_bounds = array<i64: 2, 1, 1>, scalar_prefetch = 0 : i64, scratch_operands = 1 : i64, tpu.core_type = #tpu.core_type<tc>, window_params = [{transform_indices = @transform_0, window_bounds = array<i64: 64, 576>}, {transform_indices = @transform_1, window_bounds = array<i64: 576, 128>}, {transform_indices = @transform_2, window_bounds = array<i64: 64, 128>}, {transform_indices = @transform_3, window_bounds = array<i64: 8, 128>}, {transform_indices = @transform_4, window_bounds = array<i64: 8, 128>}]} {
    %c0_i32 = arith.constant 0 : i32
    %0 = arith.cmpi eq, %arg2, %c0_i32 : i32
    %1 = arith.extui %0 : i1 to i32
    %c0_i32_0 = arith.constant 0 : i32
    %2 = arith.cmpi ne, %1, %c0_i32_0 : i32
    scf.if %2 {
      %cst_10 = arith.constant 0.000000e+00 : f32
      %12 = vector.broadcast %cst_10 : f32 to vector<64x128xf32>
      %c0_11 = arith.constant 0 : index
      %c0_12 = arith.constant 0 : index
      %13 = vector.load %arg8[%c0_11, %c0_12] : memref<64x128xf32, #tpu.memory_space<vmem>>, vector<64x128xf32>
      tpu.vector_store %arg8[%c0_11, %c0_12], %12 {strides = array<i32>} : memref<64x128xf32, #tpu.memory_space<vmem>>, vector<64x128xf32>,
    } else {
    }
    %c0 = arith.constant 0 : index
    %c0_1 = arith.constant 0 : index
    %3 = vector.load %arg8[%c0, %c0_1] : memref<64x128xf32, #tpu.memory_space<vmem>>, vector<64x128xf32>
    %c0_2 = arith.constant 0 : index
    %c0_3 = arith.constant 0 : index
    %4 = vector.load %arg3[%c0_2, %c0_3] : memref<64x576xbf16, #tpu.memory_space<vmem>>, vector<64x576xbf16>
    %c0_4 = arith.constant 0 : index
    %c0_5 = arith.constant 0 : index
    %5 = vector.load %arg4[%c0_4, %c0_5] : memref<576x128xbf16, #tpu.memory_space<vmem>>, vector<576x128xbf16>
    %cst = arith.constant dense<0.000000e+00> : vector<64x128xf32>
    %6 = tpu.matmul %4, %5, %cst {dimension_numbers = #tpu.dot_dimension_numbers<[1], [0], [0], [1], [0, 0, 1, 1], [], []>} : vector<64x576xbf16>, vector<576x128xbf16>, vector<64x128xf32> -> vector<64x128xf32>
    %7 = arith.addf %3, %6 : vector<64x128xf32>
    %c0_6 = arith.constant 0 : index
    %c0_7 = arith.constant 0 : index
    %8 = vector.load %arg8[%c0_6, %c0_7] : memref<64x128xf32, #tpu.memory_space<vmem>>, vector<64x128xf32>
    tpu.vector_store %arg8[%c0_6, %c0_7], %7 {strides = array<i32>} : memref<64x128xf32, #tpu.memory_space<vmem>>, vector<64x128xf32>,
    %c0_i32_8 = arith.constant 0 : i32
    %9 = arith.cmpi eq, %arg2, %c0_i32_8 : i32
    %10 = arith.extui %9 : i1 to i32
    %c0_i32_9 = arith.constant 0 : i32
    %11 = arith.cmpi ne, %10, %c0_i32_9 : i32
    scf.if %11 {
      %c0_10 = arith.constant 0 : index
      %c0_11 = arith.constant 0 : index
      %12 = vector.load %arg8[%c0_10, %c0_11] : memref<64x128xf32, #tpu.memory_space<vmem>>, vector<64x128xf32>
      %13 = arith.truncf %12 : vector<64x128xf32> to vector<64x128xbf16>
      %c0_12 = arith.constant 0 : index
      %c0_13 = arith.constant 0 : index
      %14 = vector.load %arg5[%c0_12, %c0_13] : memref<64x128xbf16, #tpu.memory_space<vmem>>, vector<64x128xbf16>
      tpu.vector_store %arg5[%c0_12, %c0_13], %13 {strides = array<i32>} : memref<64x128xbf16, #tpu.memory_space<vmem>>, vector<64x128xbf16>,
      %cst_14 = arith.constant dense<0.000000e+00> : vector<128xf32>
      %15 = vector.multi_reduction <add>, %12, %cst_14 [0] : vector<64x128xf32> to vector<128xf32>
      %16 = vector.shape_cast %15 : vector<128xf32> to vector<1x128xf32>
      %17 = arith.mulf %12, %12 : vector<64x128xf32>
      %cst_15 = arith.constant dense<0.000000e+00> : vector<128xf32>
      %18 = vector.multi_reduction <add>, %17, %cst_15 [0] : vector<64x128xf32> to vector<128xf32>
      %19 = vector.shape_cast %18 : vector<128xf32> to vector<1x128xf32>
      %20 = vector.shape_cast %16 : vector<1x128xf32> to vector<1x128xf32>
      %21 = vector.broadcast %20 : vector<1x128xf32> to vector<8x128xf32>
      %c0_16 = arith.constant 0 : index
      %c0_17 = arith.constant 0 : index
      %22 = vector.load %arg6[%c0_16, %c0_17] : memref<8x128xf32, #tpu.memory_space<vmem>>, vector<8x128xf32>
      tpu.vector_store %arg6[%c0_16, %c0_17], %21 {strides = array<i32>} : memref<8x128xf32, #tpu.memory_space<vmem>>, vector<8x128xf32>,
      %23 = vector.shape_cast %19 : vector<1x128xf32> to vector<1x128xf32>
      %24 = vector.broadcast %23 : vector<1x128xf32> to vector<8x128xf32>
      %c0_18 = arith.constant 0 : index
      %c0_19 = arith.constant 0 : index
      %25 = vector.load %arg7[%c0_18, %c0_19] : memref<8x128xf32, #tpu.memory_space<vmem>>, vector<8x128xf32>
      tpu.vector_store %arg7[%c0_18, %c0_19], %24 {strides = array<i32>} : memref<8x128xf32, #tpu.memory_space<vmem>>, vector<8x128xf32>,
    } else {
    }
    return
  }
  func.func @transform_0(%arg0: i32, %arg1: i32, %arg2: i32) -> (i32, i32) {
    %c0_i32 = arith.constant 0 : i32
    return %arg0, %arg2 : i32, i32
  }
  func.func @transform_1(%arg0: i32, %arg1: i32, %arg2: i32) -> (i32, i32) {
    %c0_i32 = arith.constant 0 : i32
    return %arg2, %arg1 : i32, i32
  }
  func.func @transform_2(%arg0: i32, %arg1: i32, %arg2: i32) -> (i32, i32) {
    %c0_i32 = arith.constant 0 : i32
    return %arg0, %arg1 : i32, i32
  }
  func.func @transform_3(%arg0: i32, %arg1: i32, %arg2: i32) -> (i32, i32) {
    %c0_i32 = arith.constant 0 : i32
    return %arg0, %arg1 : i32, i32
  }
  func.func @transform_4(%arg0: i32, %arg1: i32, %arg2: i32) -> (i32, i32) {
    %c0_i32 = arith.constant 0 : i32
    return %arg0, %arg1 : i32, i32
  }
}

module attributes {stable_mosaic.version = 11 : i64} {
  func.func @_mm_kernel(%arg0: i32, %arg1: i32, %arg2: i32, %arg3: memref<64x128xbf16, #tpu.memory_space<vmem>>, %arg4: memref<128x128xbf16, #tpu.memory_space<vmem>>, %arg5: memref<64x128xbf16, #tpu.memory_space<vmem>>, %arg6: memref<8x128xf32, #tpu.memory_space<vmem>>, %arg7: memref<8x128xf32, #tpu.memory_space<vmem>>, %arg8: memref<64x128xf32, #tpu.memory_space<vmem>>) attributes {dimension_semantics = [#tpu.dimension_semantics<parallel>, #tpu.dimension_semantics<parallel>, #tpu.dimension_semantics<arbitrary>], iteration_bounds = array<i64: 2, 1, 9>, scalar_prefetch = 0 : i64, scratch_operands = 1 : i64, tpu.core_type = #tpu.core_type<tc>, window_params = [{transform_indices = @transform_0, window_bounds = array<i64: 64, 128>}, {transform_indices = @transform_1, window_bounds = array<i64: 128, 128>}, {transform_indices = @transform_2, window_bounds = array<i64: 64, 128>}, {transform_indices = @transform_3, window_bounds = array<i64: 8, 128>}, {transform_indices = @transform_4, window_bounds = array<i64: 8, 128>}]} {
    %c0_i32 = arith.constant 0 : i32
    %0 = arith.cmpi eq, %arg2, %c0_i32 : i32
    %1 = arith.extui %0 : i1 to i32
    %c0_i32_0 = arith.constant 0 : i32
    %2 = arith.cmpi ne, %1, %c0_i32_0 : i32
    scf.if %2 {
      %cst_9 = arith.constant 0.000000e+00 : f32
      %12 = vector.broadcast %cst_9 : f32 to vector<64x128xf32>
      %c0_10 = arith.constant 0 : index
      %c0_11 = arith.constant 0 : index
      %13 = vector.load %arg8[%c0_10, %c0_11] : memref<64x128xf32, #tpu.memory_space<vmem>>, vector<64x128xf32>
      tpu.vector_store %arg8[%c0_10, %c0_11], %12 {strides = array<i32>} : memref<64x128xf32, #tpu.memory_space<vmem>>, vector<64x128xf32>,
    } else {
    }
    %c0 = arith.constant 0 : index
    %c0_1 = arith.constant 0 : index
    %3 = vector.load %arg8[%c0, %c0_1] : memref<64x128xf32, #tpu.memory_space<vmem>>, vector<64x128xf32>
    %c0_2 = arith.constant 0 : index
    %c0_3 = arith.constant 0 : index
    %4 = vector.load %arg3[%c0_2, %c0_3] : memref<64x128xbf16, #tpu.memory_space<vmem>>, vector<64x128xbf16>
    %c0_4 = arith.constant 0 : index
    %c0_5 = arith.constant 0 : index
    %5 = vector.load %arg4[%c0_4, %c0_5] : memref<128x128xbf16, #tpu.memory_space<vmem>>, vector<128x128xbf16>
    %cst = arith.constant dense<0.000000e+00> : vector<64x128xf32>
    %6 = tpu.matmul %4, %5, %cst {dimension_numbers = #tpu.dot_dimension_numbers<[1], [0], [0], [1], [0, 0, 1, 1], [], []>} : vector<64x128xbf16>, vector<128x128xbf16>, vector<64x128xf32> -> vector<64x128xf32>
    %7 = arith.addf %3, %6 : vector<64x128xf32>
    %c0_6 = arith.constant 0 : index
    %c0_7 = arith.constant 0 : index
    %8 = vector.load %arg8[%c0_6, %c0_7] : memref<64x128xf32, #tpu.memory_space<vmem>>, vector<64x128xf32>
    tpu.vector_store %arg8[%c0_6, %c0_7], %7 {strides = array<i32>} : memref<64x128xf32, #tpu.memory_space<vmem>>, vector<64x128xf32>,
    %c8_i32 = arith.constant 8 : i32
    %9 = arith.cmpi eq, %arg2, %c8_i32 : i32
    %10 = arith.extui %9 : i1 to i32
    %c0_i32_8 = arith.constant 0 : i32
    %11 = arith.cmpi ne, %10, %c0_i32_8 : i32
    scf.if %11 {
      %c0_9 = arith.constant 0 : index
      %c0_10 = arith.constant 0 : index
      %12 = vector.load %arg8[%c0_9, %c0_10] : memref<64x128xf32, #tpu.memory_space<vmem>>, vector<64x128xf32>
      %13 = arith.truncf %12 : vector<64x128xf32> to vector<64x128xbf16>
      %c0_11 = arith.constant 0 : index
      %c0_12 = arith.constant 0 : index
      %14 = vector.load %arg5[%c0_11, %c0_12] : memref<64x128xbf16, #tpu.memory_space<vmem>>, vector<64x128xbf16>
      tpu.vector_store %arg5[%c0_11, %c0_12], %13 {strides = array<i32>} : memref<64x128xbf16, #tpu.memory_space<vmem>>, vector<64x128xbf16>,
      %cst_13 = arith.constant dense<0.000000e+00> : vector<128xf32>
      %15 = vector.multi_reduction <add>, %12, %cst_13 [0] : vector<64x128xf32> to vector<128xf32>
      %16 = vector.shape_cast %15 : vector<128xf32> to vector<1x128xf32>
      %17 = arith.mulf %12, %12 : vector<64x128xf32>
      %cst_14 = arith.constant dense<0.000000e+00> : vector<128xf32>
      %18 = vector.multi_reduction <add>, %17, %cst_14 [0] : vector<64x128xf32> to vector<128xf32>
      %19 = vector.shape_cast %18 : vector<128xf32> to vector<1x128xf32>
      %20 = vector.shape_cast %16 : vector<1x128xf32> to vector<1x128xf32>
      %21 = vector.broadcast %20 : vector<1x128xf32> to vector<8x128xf32>
      %c0_15 = arith.constant 0 : index
      %c0_16 = arith.constant 0 : index
      %22 = vector.load %arg6[%c0_15, %c0_16] : memref<8x128xf32, #tpu.memory_space<vmem>>, vector<8x128xf32>
      tpu.vector_store %arg6[%c0_15, %c0_16], %21 {strides = array<i32>} : memref<8x128xf32, #tpu.memory_space<vmem>>, vector<8x128xf32>,
      %23 = vector.shape_cast %19 : vector<1x128xf32> to vector<1x128xf32>
      %24 = vector.broadcast %23 : vector<1x128xf32> to vector<8x128xf32>
      %c0_17 = arith.constant 0 : index
      %c0_18 = arith.constant 0 : index
      %25 = vector.load %arg7[%c0_17, %c0_18] : memref<8x128xf32, #tpu.memory_space<vmem>>, vector<8x128xf32>
      tpu.vector_store %arg7[%c0_17, %c0_18], %24 {strides = array<i32>} : memref<8x128xf32, #tpu.memory_space<vmem>>, vector<8x128xf32>,
    } else {
    }
    return
  }
  func.func @transform_0(%arg0: i32, %arg1: i32, %arg2: i32) -> (i32, i32) {
    %c0_i32 = arith.constant 0 : i32
    return %arg0, %arg2 : i32, i32
  }
  func.func @transform_1(%arg0: i32, %arg1: i32, %arg2: i32) -> (i32, i32) {
    %c0_i32 = arith.constant 0 : i32
    return %arg2, %arg1 : i32, i32
  }
  func.func @transform_2(%arg0: i32, %arg1: i32, %arg2: i32) -> (i32, i32) {
    %c0_i32 = arith.constant 0 : i32
    return %arg0, %arg1 : i32, i32
  }
  func.func @transform_3(%arg0: i32, %arg1: i32, %arg2: i32) -> (i32, i32) {
    %c0_i32 = arith.constant 0 : i32
    return %arg0, %arg1 : i32, i32
  }
  func.func @transform_4(%arg0: i32, %arg1: i32, %arg2: i32) -> (i32, i32) {
    %c0_i32 = arith.constant 0 : i32
    return %arg0, %arg1 : i32, i32
  }
}

module attributes {stable_mosaic.version = 11 : i64} {
  func.func @_mm_kernel(%arg0: i32, %arg1: i32, %arg2: i32, %arg3: memref<64x64xbf16, #tpu.memory_space<vmem>>, %arg4: memref<64x128xbf16, #tpu.memory_space<vmem>>, %arg5: memref<64x128xbf16, #tpu.memory_space<vmem>>, %arg6: memref<8x128xf32, #tpu.memory_space<vmem>>, %arg7: memref<8x128xf32, #tpu.memory_space<vmem>>, %arg8: memref<64x128xf32, #tpu.memory_space<vmem>>) attributes {dimension_semantics = [#tpu.dimension_semantics<parallel>, #tpu.dimension_semantics<parallel>, #tpu.dimension_semantics<arbitrary>], iteration_bounds = array<i64: 2, 1, 1>, scalar_prefetch = 0 : i64, scratch_operands = 1 : i64, tpu.core_type = #tpu.core_type<tc>, window_params = [{transform_indices = @transform_0, window_bounds = array<i64: 64, 64>}, {transform_indices = @transform_1, window_bounds = array<i64: 64, 128>}, {transform_indices = @transform_2, window_bounds = array<i64: 64, 128>}, {transform_indices = @transform_3, window_bounds = array<i64: 8, 128>}, {transform_indices = @transform_4, window_bounds = array<i64: 8, 128>}]} {
    %c0_i32 = arith.constant 0 : i32
    %0 = arith.cmpi eq, %arg2, %c0_i32 : i32
    %1 = arith.extui %0 : i1 to i32
    %c0_i32_0 = arith.constant 0 : i32
    %2 = arith.cmpi ne, %1, %c0_i32_0 : i32
    scf.if %2 {
      %cst_10 = arith.constant 0.000000e+00 : f32
      %12 = vector.broadcast %cst_10 : f32 to vector<64x128xf32>
      %c0_11 = arith.constant 0 : index
      %c0_12 = arith.constant 0 : index
      %13 = vector.load %arg8[%c0_11, %c0_12] : memref<64x128xf32, #tpu.memory_space<vmem>>, vector<64x128xf32>
      tpu.vector_store %arg8[%c0_11, %c0_12], %12 {strides = array<i32>} : memref<64x128xf32, #tpu.memory_space<vmem>>, vector<64x128xf32>,
    } else {
    }
    %c0 = arith.constant 0 : index
    %c0_1 = arith.constant 0 : index
    %3 = vector.load %arg8[%c0, %c0_1] : memref<64x128xf32, #tpu.memory_space<vmem>>, vector<64x128xf32>
    %c0_2 = arith.constant 0 : index
    %c0_3 = arith.constant 0 : index
    %4 = vector.load %arg3[%c0_2, %c0_3] : memref<64x64xbf16, #tpu.memory_space<vmem>>, vector<64x64xbf16>
    %c0_4 = arith.constant 0 : index
    %c0_5 = arith.constant 0 : index
    %5 = vector.load %arg4[%c0_4, %c0_5] : memref<64x128xbf16, #tpu.memory_space<vmem>>, vector<64x128xbf16>
    %cst = arith.constant dense<0.000000e+00> : vector<64x128xf32>
    %6 = tpu.matmul %4, %5, %cst {dimension_numbers = #tpu.dot_dimension_numbers<[1], [0], [0], [1], [0, 0, 1, 1], [], []>} : vector<64x64xbf16>, vector<64x128xbf16>, vector<64x128xf32> -> vector<64x128xf32>
    %7 = arith.addf %3, %6 : vector<64x128xf32>
    %c0_6 = arith.constant 0 : index
    %c0_7 = arith.constant 0 : index
    %8 = vector.load %arg8[%c0_6, %c0_7] : memref<64x128xf32, #tpu.memory_space<vmem>>, vector<64x128xf32>
    tpu.vector_store %arg8[%c0_6, %c0_7], %7 {strides = array<i32>} : memref<64x128xf32, #tpu.memory_space<vmem>>, vector<64x128xf32>,
    %c0_i32_8 = arith.constant 0 : i32
    %9 = arith.cmpi eq, %arg2, %c0_i32_8 : i32
    %10 = arith.extui %9 : i1 to i32
    %c0_i32_9 = arith.constant 0 : i32
    %11 = arith.cmpi ne, %10, %c0_i32_9 : i32
    scf.if %11 {
      %c0_10 = arith.constant 0 : index
      %c0_11 = arith.constant 0 : index
      %12 = vector.load %arg8[%c0_10, %c0_11] : memref<64x128xf32, #tpu.memory_space<vmem>>, vector<64x128xf32>
      %13 = arith.truncf %12 : vector<64x128xf32> to vector<64x128xbf16>
      %c0_12 = arith.constant 0 : index
      %c0_13 = arith.constant 0 : index
      %14 = vector.load %arg5[%c0_12, %c0_13] : memref<64x128xbf16, #tpu.memory_space<vmem>>, vector<64x128xbf16>
      tpu.vector_store %arg5[%c0_12, %c0_13], %13 {strides = array<i32>} : memref<64x128xbf16, #tpu.memory_space<vmem>>, vector<64x128xbf16>,
      %cst_14 = arith.constant dense<0.000000e+00> : vector<128xf32>
      %15 = vector.multi_reduction <add>, %12, %cst_14 [0] : vector<64x128xf32> to vector<128xf32>
      %16 = vector.shape_cast %15 : vector<128xf32> to vector<1x128xf32>
      %17 = arith.mulf %12, %12 : vector<64x128xf32>
      %cst_15 = arith.constant dense<0.000000e+00> : vector<128xf32>
      %18 = vector.multi_reduction <add>, %17, %cst_15 [0] : vector<64x128xf32> to vector<128xf32>
      %19 = vector.shape_cast %18 : vector<128xf32> to vector<1x128xf32>
      %20 = vector.shape_cast %16 : vector<1x128xf32> to vector<1x128xf32>
      %21 = vector.broadcast %20 : vector<1x128xf32> to vector<8x128xf32>
      %c0_16 = arith.constant 0 : index
      %c0_17 = arith.constant 0 : index
      %22 = vector.load %arg6[%c0_16, %c0_17] : memref<8x128xf32, #tpu.memory_space<vmem>>, vector<8x128xf32>
      tpu.vector_store %arg6[%c0_16, %c0_17], %21 {strides = array<i32>} : memref<8x128xf32, #tpu.memory_space<vmem>>, vector<8x128xf32>,
      %23 = vector.shape_cast %19 : vector<1x128xf32> to vector<1x128xf32>
      %24 = vector.broadcast %23 : vector<1x128xf32> to vector<8x128xf32>
      %c0_18 = arith.constant 0 : index
      %c0_19 = arith.constant 0 : index
      %25 = vector.load %arg7[%c0_18, %c0_19] : memref<8x128xf32, #tpu.memory_space<vmem>>, vector<8x128xf32>
      tpu.vector_store %arg7[%c0_18, %c0_19], %24 {strides = array<i32>} : memref<8x128xf32, #tpu.memory_space<vmem>>, vector<8x128xf32>,
    } else {
    }
    return
  }
  func.func @transform_0(%arg0: i32, %arg1: i32, %arg2: i32) -> (i32, i32) {
    %c0_i32 = arith.constant 0 : i32
    return %arg0, %arg2 : i32, i32
  }
  func.func @transform_1(%arg0: i32, %arg1: i32, %arg2: i32) -> (i32, i32) {
    %c0_i32 = arith.constant 0 : i32
    return %arg2, %arg1 : i32, i32
  }
  func.func @transform_2(%arg0: i32, %arg1: i32, %arg2: i32) -> (i32, i32) {
    %c0_i32 = arith.constant 0 : i32
    return %arg0, %arg1 : i32, i32
  }
  func.func @transform_3(%arg0: i32, %arg1: i32, %arg2: i32) -> (i32, i32) {
    %c0_i32 = arith.constant 0 : i32
    return %arg0, %arg1 : i32, i32
  }
  func.func @transform_4(%arg0: i32, %arg1: i32, %arg2: i32) -> (i32, i32) {
    %c0_i32 = arith.constant 0 : i32
    return %arg0, %arg1 : i32, i32
  }
}

module attributes {stable_mosaic.version = 11 : i64} {
  func.func @_mm_kernel(%arg0: i32, %arg1: i32, %arg2: i32, %arg3: memref<32x128xbf16, #tpu.memory_space<vmem>>, %arg4: memref<128x128xbf16, #tpu.memory_space<vmem>>, %arg5: memref<32x128xbf16, #tpu.memory_space<vmem>>, %arg6: memref<8x128xf32, #tpu.memory_space<vmem>>, %arg7: memref<8x128xf32, #tpu.memory_space<vmem>>, %arg8: memref<32x128xf32, #tpu.memory_space<vmem>>) attributes {dimension_semantics = [#tpu.dimension_semantics<parallel>, #tpu.dimension_semantics<parallel>, #tpu.dimension_semantics<arbitrary>], iteration_bounds = array<i64: 1, 2, 9>, scalar_prefetch = 0 : i64, scratch_operands = 1 : i64, tpu.core_type = #tpu.core_type<tc>, window_params = [{transform_indices = @transform_0, window_bounds = array<i64: 32, 128>}, {transform_indices = @transform_1, window_bounds = array<i64: 128, 128>}, {transform_indices = @transform_2, window_bounds = array<i64: 32, 128>}, {transform_indices = @transform_3, window_bounds = array<i64: 8, 128>}, {transform_indices = @transform_4, window_bounds = array<i64: 8, 128>}]} {
    %c0_i32 = arith.constant 0 : i32
    %0 = arith.cmpi eq, %arg2, %c0_i32 : i32
    %1 = arith.extui %0 : i1 to i32
    %c0_i32_0 = arith.constant 0 : i32
    %2 = arith.cmpi ne, %1, %c0_i32_0 : i32
    scf.if %2 {
      %cst_9 = arith.constant 0.000000e+00 : f32
      %12 = vector.broadcast %cst_9 : f32 to vector<32x128xf32>
      %c0_10 = arith.constant 0 : index
      %c0_11 = arith.constant 0 : index
      %13 = vector.load %arg8[%c0_10, %c0_11] : memref<32x128xf32, #tpu.memory_space<vmem>>, vector<32x128xf32>
      tpu.vector_store %arg8[%c0_10, %c0_11], %12 {strides = array<i32>} : memref<32x128xf32, #tpu.memory_space<vmem>>, vector<32x128xf32>,
    } else {
    }
    %c0 = arith.constant 0 : index
    %c0_1 = arith.constant 0 : index
    %3 = vector.load %arg8[%c0, %c0_1] : memref<32x128xf32, #tpu.memory_space<vmem>>, vector<32x128xf32>
    %c0_2 = arith.constant 0 : index
    %c0_3 = arith.constant 0 : index
    %4 = vector.load %arg3[%c0_2, %c0_3] : memref<32x128xbf16, #tpu.memory_space<vmem>>, vector<32x128xbf16>
    %c0_4 = arith.constant 0 : index
    %c0_5 = arith.constant 0 : index
    %5 = vector.load %arg4[%c0_4, %c0_5] : memref<128x128xbf16, #tpu.memory_space<vmem>>, vector<128x128xbf16>
    %cst = arith.constant dense<0.000000e+00> : vector<32x128xf32>
    %6 = tpu.matmul %4, %5, %cst {dimension_numbers = #tpu.dot_dimension_numbers<[1], [0], [0], [1], [0, 0, 1, 1], [], []>} : vector<32x128xbf16>, vector<128x128xbf16>, vector<32x128xf32> -> vector<32x128xf32>
    %7 = arith.addf %3, %6 : vector<32x128xf32>
    %c0_6 = arith.constant 0 : index
    %c0_7 = arith.constant 0 : index
    %8 = vector.load %arg8[%c0_6, %c0_7] : memref<32x128xf32, #tpu.memory_space<vmem>>, vector<32x128xf32>
    tpu.vector_store %arg8[%c0_6, %c0_7], %7 {strides = array<i32>} : memref<32x128xf32, #tpu.memory_space<vmem>>, vector<32x128xf32>,
    %c8_i32 = arith.constant 8 : i32
    %9 = arith.cmpi eq, %arg2, %c8_i32 : i32
    %10 = arith.extui %9 : i1 to i32
    %c0_i32_8 = arith.constant 0 : i32
    %11 = arith.cmpi ne, %10, %c0_i32_8 : i32
    scf.if %11 {
      %c0_9 = arith.constant 0 : index
      %c0_10 = arith.constant 0 : index
      %12 = vector.load %arg8[%c0_9, %c0_10] : memref<32x128xf32, #tpu.memory_space<vmem>>, vector<32x128xf32>
      %13 = arith.truncf %12 : vector<32x128xf32> to vector<32x128xbf16>
      %c0_11 = arith.constant 0 : index
      %c0_12 = arith.constant 0 : index
      %14 = vector.load %arg5[%c0_11, %c0_12] : memref<32x128xbf16, #tpu.memory_space<vmem>>, vector<32x128xbf16>
      tpu.vector_store %arg5[%c0_11, %c0_12], %13 {strides = array<i32>} : memref<32x128xbf16, #tpu.memory_space<vmem>>, vector<32x128xbf16>,
      %cst_13 = arith.constant dense<0.000000e+00> : vector<128xf32>
      %15 = vector.multi_reduction <add>, %12, %cst_13 [0] : vector<32x128xf32> to vector<128xf32>
      %16 = vector.shape_cast %15 : vector<128xf32> to vector<1x128xf32>
      %17 = arith.mulf %12, %12 : vector<32x128xf32>
      %cst_14 = arith.constant dense<0.000000e+00> : vector<128xf32>
      %18 = vector.multi_reduction <add>, %17, %cst_14 [0] : vector<32x128xf32> to vector<128xf32>
      %19 = vector.shape_cast %18 : vector<128xf32> to vector<1x128xf32>
      %20 = vector.shape_cast %16 : vector<1x128xf32> to vector<1x128xf32>
      %21 = vector.broadcast %20 : vector<1x128xf32> to vector<8x128xf32>
      %c0_15 = arith.constant 0 : index
      %c0_16 = arith.constant 0 : index
      %22 = vector.load %arg6[%c0_15, %c0_16] : memref<8x128xf32, #tpu.memory_space<vmem>>, vector<8x128xf32>
      tpu.vector_store %arg6[%c0_15, %c0_16], %21 {strides = array<i32>} : memref<8x128xf32, #tpu.memory_space<vmem>>, vector<8x128xf32>,
      %23 = vector.shape_cast %19 : vector<1x128xf32> to vector<1x128xf32>
      %24 = vector.broadcast %23 : vector<1x128xf32> to vector<8x128xf32>
      %c0_17 = arith.constant 0 : index
      %c0_18 = arith.constant 0 : index
      %25 = vector.load %arg7[%c0_17, %c0_18] : memref<8x128xf32, #tpu.memory_space<vmem>>, vector<8x128xf32>
      tpu.vector_store %arg7[%c0_17, %c0_18], %24 {strides = array<i32>} : memref<8x128xf32, #tpu.memory_space<vmem>>, vector<8x128xf32>,
    } else {
    }
    return
  }
  func.func @transform_0(%arg0: i32, %arg1: i32, %arg2: i32) -> (i32, i32) {
    %c0_i32 = arith.constant 0 : i32
    return %arg0, %arg2 : i32, i32
  }
  func.func @transform_1(%arg0: i32, %arg1: i32, %arg2: i32) -> (i32, i32) {
    %c0_i32 = arith.constant 0 : i32
    return %arg2, %arg1 : i32, i32
  }
  func.func @transform_2(%arg0: i32, %arg1: i32, %arg2: i32) -> (i32, i32) {
    %c0_i32 = arith.constant 0 : i32
    return %arg0, %arg1 : i32, i32
  }
  func.func @transform_3(%arg0: i32, %arg1: i32, %arg2: i32) -> (i32, i32) {
    %c0_i32 = arith.constant 0 : i32
    return %arg0, %arg1 : i32, i32
  }
  func.func @transform_4(%arg0: i32, %arg1: i32, %arg2: i32) -> (i32, i32) {
    %c0_i32 = arith.constant 0 : i32
    return %arg0, %arg1 : i32, i32
  }
}

module attributes {stable_mosaic.version = 11 : i64} {
  func.func @_mm_kernel(%arg0: i32, %arg1: i32, %arg2: i32, %arg3: memref<32x256xbf16, #tpu.memory_space<vmem>>, %arg4: memref<256x128xbf16, #tpu.memory_space<vmem>>, %arg5: memref<32x128xbf16, #tpu.memory_space<vmem>>, %arg6: memref<8x128xf32, #tpu.memory_space<vmem>>, %arg7: memref<8x128xf32, #tpu.memory_space<vmem>>, %arg8: memref<32x128xf32, #tpu.memory_space<vmem>>) attributes {dimension_semantics = [#tpu.dimension_semantics<parallel>, #tpu.dimension_semantics<parallel>, #tpu.dimension_semantics<arbitrary>], iteration_bounds = array<i64: 1, 2, 9>, scalar_prefetch = 0 : i64, scratch_operands = 1 : i64, tpu.core_type = #tpu.core_type<tc>, window_params = [{transform_indices = @transform_0, window_bounds = array<i64: 32, 256>}, {transform_indices = @transform_1, window_bounds = array<i64: 256, 128>}, {transform_indices = @transform_2, window_bounds = array<i64: 32, 128>}, {transform_indices = @transform_3, window_bounds = array<i64: 8, 128>}, {transform_indices = @transform_4, window_bounds = array<i64: 8, 128>}]} {
    %c0_i32 = arith.constant 0 : i32
    %0 = arith.cmpi eq, %arg2, %c0_i32 : i32
    %1 = arith.extui %0 : i1 to i32
    %c0_i32_0 = arith.constant 0 : i32
    %2 = arith.cmpi ne, %1, %c0_i32_0 : i32
    scf.if %2 {
      %cst_9 = arith.constant 0.000000e+00 : f32
      %12 = vector.broadcast %cst_9 : f32 to vector<32x128xf32>
      %c0_10 = arith.constant 0 : index
      %c0_11 = arith.constant 0 : index
      %13 = vector.load %arg8[%c0_10, %c0_11] : memref<32x128xf32, #tpu.memory_space<vmem>>, vector<32x128xf32>
      tpu.vector_store %arg8[%c0_10, %c0_11], %12 {strides = array<i32>} : memref<32x128xf32, #tpu.memory_space<vmem>>, vector<32x128xf32>,
    } else {
    }
    %c0 = arith.constant 0 : index
    %c0_1 = arith.constant 0 : index
    %3 = vector.load %arg8[%c0, %c0_1] : memref<32x128xf32, #tpu.memory_space<vmem>>, vector<32x128xf32>
    %c0_2 = arith.constant 0 : index
    %c0_3 = arith.constant 0 : index
    %4 = vector.load %arg3[%c0_2, %c0_3] : memref<32x256xbf16, #tpu.memory_space<vmem>>, vector<32x256xbf16>
    %c0_4 = arith.constant 0 : index
    %c0_5 = arith.constant 0 : index
    %5 = vector.load %arg4[%c0_4, %c0_5] : memref<256x128xbf16, #tpu.memory_space<vmem>>, vector<256x128xbf16>
    %cst = arith.constant dense<0.000000e+00> : vector<32x128xf32>
    %6 = tpu.matmul %4, %5, %cst {dimension_numbers = #tpu.dot_dimension_numbers<[1], [0], [0], [1], [0, 0, 1, 1], [], []>} : vector<32x256xbf16>, vector<256x128xbf16>, vector<32x128xf32> -> vector<32x128xf32>
    %7 = arith.addf %3, %6 : vector<32x128xf32>
    %c0_6 = arith.constant 0 : index
    %c0_7 = arith.constant 0 : index
    %8 = vector.load %arg8[%c0_6, %c0_7] : memref<32x128xf32, #tpu.memory_space<vmem>>, vector<32x128xf32>
    tpu.vector_store %arg8[%c0_6, %c0_7], %7 {strides = array<i32>} : memref<32x128xf32, #tpu.memory_space<vmem>>, vector<32x128xf32>,
    %c8_i32 = arith.constant 8 : i32
    %9 = arith.cmpi eq, %arg2, %c8_i32 : i32
    %10 = arith.extui %9 : i1 to i32
    %c0_i32_8 = arith.constant 0 : i32
    %11 = arith.cmpi ne, %10, %c0_i32_8 : i32
    scf.if %11 {
      %c0_9 = arith.constant 0 : index
      %c0_10 = arith.constant 0 : index
      %12 = vector.load %arg8[%c0_9, %c0_10] : memref<32x128xf32, #tpu.memory_space<vmem>>, vector<32x128xf32>
      %13 = arith.truncf %12 : vector<32x128xf32> to vector<32x128xbf16>
      %c0_11 = arith.constant 0 : index
      %c0_12 = arith.constant 0 : index
      %14 = vector.load %arg5[%c0_11, %c0_12] : memref<32x128xbf16, #tpu.memory_space<vmem>>, vector<32x128xbf16>
      tpu.vector_store %arg5[%c0_11, %c0_12], %13 {strides = array<i32>} : memref<32x128xbf16, #tpu.memory_space<vmem>>, vector<32x128xbf16>,
      %cst_13 = arith.constant dense<0.000000e+00> : vector<128xf32>
      %15 = vector.multi_reduction <add>, %12, %cst_13 [0] : vector<32x128xf32> to vector<128xf32>
      %16 = vector.shape_cast %15 : vector<128xf32> to vector<1x128xf32>
      %17 = arith.mulf %12, %12 : vector<32x128xf32>
      %cst_14 = arith.constant dense<0.000000e+00> : vector<128xf32>
      %18 = vector.multi_reduction <add>, %17, %cst_14 [0] : vector<32x128xf32> to vector<128xf32>
      %19 = vector.shape_cast %18 : vector<128xf32> to vector<1x128xf32>
      %20 = vector.shape_cast %16 : vector<1x128xf32> to vector<1x128xf32>
      %21 = vector.broadcast %20 : vector<1x128xf32> to vector<8x128xf32>
      %c0_15 = arith.constant 0 : index
      %c0_16 = arith.constant 0 : index
      %22 = vector.load %arg6[%c0_15, %c0_16] : memref<8x128xf32, #tpu.memory_space<vmem>>, vector<8x128xf32>
      tpu.vector_store %arg6[%c0_15, %c0_16], %21 {strides = array<i32>} : memref<8x128xf32, #tpu.memory_space<vmem>>, vector<8x128xf32>,
      %23 = vector.shape_cast %19 : vector<1x128xf32> to vector<1x128xf32>
      %24 = vector.broadcast %23 : vector<1x128xf32> to vector<8x128xf32>
      %c0_17 = arith.constant 0 : index
      %c0_18 = arith.constant 0 : index
      %25 = vector.load %arg7[%c0_17, %c0_18] : memref<8x128xf32, #tpu.memory_space<vmem>>, vector<8x128xf32>
      tpu.vector_store %arg7[%c0_17, %c0_18], %24 {strides = array<i32>} : memref<8x128xf32, #tpu.memory_space<vmem>>, vector<8x128xf32>,
    } else {
    }
    return
  }
  func.func @transform_0(%arg0: i32, %arg1: i32, %arg2: i32) -> (i32, i32) {
    %c0_i32 = arith.constant 0 : i32
    return %arg0, %arg2 : i32, i32
  }
  func.func @transform_1(%arg0: i32, %arg1: i32, %arg2: i32) -> (i32, i32) {
    %c0_i32 = arith.constant 0 : i32
    return %arg2, %arg1 : i32, i32
  }
  func.func @transform_2(%arg0: i32, %arg1: i32, %arg2: i32) -> (i32, i32) {
    %c0_i32 = arith.constant 0 : i32
    return %arg0, %arg1 : i32, i32
  }
  func.func @transform_3(%arg0: i32, %arg1: i32, %arg2: i32) -> (i32, i32) {
    %c0_i32 = arith.constant 0 : i32
    return %arg0, %arg1 : i32, i32
  }
  func.func @transform_4(%arg0: i32, %arg1: i32, %arg2: i32) -> (i32, i32) {
    %c0_i32 = arith.constant 0 : i32
    return %arg0, %arg1 : i32, i32
  }
}

module attributes {stable_mosaic.version = 11 : i64} {
  func.func @_mm_kernel(%arg0: i32, %arg1: i32, %arg2: i32, %arg3: memref<32x128xbf16, #tpu.memory_space<vmem>>, %arg4: memref<128x128xbf16, #tpu.memory_space<vmem>>, %arg5: memref<32x128xbf16, #tpu.memory_space<vmem>>, %arg6: memref<8x128xf32, #tpu.memory_space<vmem>>, %arg7: memref<8x128xf32, #tpu.memory_space<vmem>>, %arg8: memref<32x128xf32, #tpu.memory_space<vmem>>) attributes {dimension_semantics = [#tpu.dimension_semantics<parallel>, #tpu.dimension_semantics<parallel>, #tpu.dimension_semantics<arbitrary>], iteration_bounds = array<i64: 1, 2, 1>, scalar_prefetch = 0 : i64, scratch_operands = 1 : i64, tpu.core_type = #tpu.core_type<tc>, window_params = [{transform_indices = @transform_0, window_bounds = array<i64: 32, 128>}, {transform_indices = @transform_1, window_bounds = array<i64: 128, 128>}, {transform_indices = @transform_2, window_bounds = array<i64: 32, 128>}, {transform_indices = @transform_3, window_bounds = array<i64: 8, 128>}, {transform_indices = @transform_4, window_bounds = array<i64: 8, 128>}]} {
    %c0_i32 = arith.constant 0 : i32
    %0 = arith.cmpi eq, %arg2, %c0_i32 : i32
    %1 = arith.extui %0 : i1 to i32
    %c0_i32_0 = arith.constant 0 : i32
    %2 = arith.cmpi ne, %1, %c0_i32_0 : i32
    scf.if %2 {
      %cst_10 = arith.constant 0.000000e+00 : f32
      %12 = vector.broadcast %cst_10 : f32 to vector<32x128xf32>
      %c0_11 = arith.constant 0 : index
      %c0_12 = arith.constant 0 : index
      %13 = vector.load %arg8[%c0_11, %c0_12] : memref<32x128xf32, #tpu.memory_space<vmem>>, vector<32x128xf32>
      tpu.vector_store %arg8[%c0_11, %c0_12], %12 {strides = array<i32>} : memref<32x128xf32, #tpu.memory_space<vmem>>, vector<32x128xf32>,
    } else {
    }
    %c0 = arith.constant 0 : index
    %c0_1 = arith.constant 0 : index
    %3 = vector.load %arg8[%c0, %c0_1] : memref<32x128xf32, #tpu.memory_space<vmem>>, vector<32x128xf32>
    %c0_2 = arith.constant 0 : index
    %c0_3 = arith.constant 0 : index
    %4 = vector.load %arg3[%c0_2, %c0_3] : memref<32x128xbf16, #tpu.memory_space<vmem>>, vector<32x128xbf16>
    %c0_4 = arith.constant 0 : index
    %c0_5 = arith.constant 0 : index
    %5 = vector.load %arg4[%c0_4, %c0_5] : memref<128x128xbf16, #tpu.memory_space<vmem>>, vector<128x128xbf16>
    %cst = arith.constant dense<0.000000e+00> : vector<32x128xf32>
    %6 = tpu.matmul %4, %5, %cst {dimension_numbers = #tpu.dot_dimension_numbers<[1], [0], [0], [1], [0, 0, 1, 1], [], []>} : vector<32x128xbf16>, vector<128x128xbf16>, vector<32x128xf32> -> vector<32x128xf32>
    %7 = arith.addf %3, %6 : vector<32x128xf32>
    %c0_6 = arith.constant 0 : index
    %c0_7 = arith.constant 0 : index
    %8 = vector.load %arg8[%c0_6, %c0_7] : memref<32x128xf32, #tpu.memory_space<vmem>>, vector<32x128xf32>
    tpu.vector_store %arg8[%c0_6, %c0_7], %7 {strides = array<i32>} : memref<32x128xf32, #tpu.memory_space<vmem>>, vector<32x128xf32>,
    %c0_i32_8 = arith.constant 0 : i32
    %9 = arith.cmpi eq, %arg2, %c0_i32_8 : i32
    %10 = arith.extui %9 : i1 to i32
    %c0_i32_9 = arith.constant 0 : i32
    %11 = arith.cmpi ne, %10, %c0_i32_9 : i32
    scf.if %11 {
      %c0_10 = arith.constant 0 : index
      %c0_11 = arith.constant 0 : index
      %12 = vector.load %arg8[%c0_10, %c0_11] : memref<32x128xf32, #tpu.memory_space<vmem>>, vector<32x128xf32>
      %13 = arith.truncf %12 : vector<32x128xf32> to vector<32x128xbf16>
      %c0_12 = arith.constant 0 : index
      %c0_13 = arith.constant 0 : index
      %14 = vector.load %arg5[%c0_12, %c0_13] : memref<32x128xbf16, #tpu.memory_space<vmem>>, vector<32x128xbf16>
      tpu.vector_store %arg5[%c0_12, %c0_13], %13 {strides = array<i32>} : memref<32x128xbf16, #tpu.memory_space<vmem>>, vector<32x128xbf16>,
      %cst_14 = arith.constant dense<0.000000e+00> : vector<128xf32>
      %15 = vector.multi_reduction <add>, %12, %cst_14 [0] : vector<32x128xf32> to vector<128xf32>
      %16 = vector.shape_cast %15 : vector<128xf32> to vector<1x128xf32>
      %17 = arith.mulf %12, %12 : vector<32x128xf32>
      %cst_15 = arith.constant dense<0.000000e+00> : vector<128xf32>
      %18 = vector.multi_reduction <add>, %17, %cst_15 [0] : vector<32x128xf32> to vector<128xf32>
      %19 = vector.shape_cast %18 : vector<128xf32> to vector<1x128xf32>
      %20 = vector.shape_cast %16 : vector<1x128xf32> to vector<1x128xf32>
      %21 = vector.broadcast %20 : vector<1x128xf32> to vector<8x128xf32>
      %c0_16 = arith.constant 0 : index
      %c0_17 = arith.constant 0 : index
      %22 = vector.load %arg6[%c0_16, %c0_17] : memref<8x128xf32, #tpu.memory_space<vmem>>, vector<8x128xf32>
      tpu.vector_store %arg6[%c0_16, %c0_17], %21 {strides = array<i32>} : memref<8x128xf32, #tpu.memory_space<vmem>>, vector<8x128xf32>,
      %23 = vector.shape_cast %19 : vector<1x128xf32> to vector<1x128xf32>
      %24 = vector.broadcast %23 : vector<1x128xf32> to vector<8x128xf32>
      %c0_18 = arith.constant 0 : index
      %c0_19 = arith.constant 0 : index
      %25 = vector.load %arg7[%c0_18, %c0_19] : memref<8x128xf32, #tpu.memory_space<vmem>>, vector<8x128xf32>
      tpu.vector_store %arg7[%c0_18, %c0_19], %24 {strides = array<i32>} : memref<8x128xf32, #tpu.memory_space<vmem>>, vector<8x128xf32>,
    } else {
    }
    return
  }
  func.func @transform_0(%arg0: i32, %arg1: i32, %arg2: i32) -> (i32, i32) {
    %c0_i32 = arith.constant 0 : i32
    return %arg0, %arg2 : i32, i32
  }
  func.func @transform_1(%arg0: i32, %arg1: i32, %arg2: i32) -> (i32, i32) {
    %c0_i32 = arith.constant 0 : i32
    return %arg2, %arg1 : i32, i32
  }
  func.func @transform_2(%arg0: i32, %arg1: i32, %arg2: i32) -> (i32, i32) {
    %c0_i32 = arith.constant 0 : i32
    return %arg0, %arg1 : i32, i32
  }
  func.func @transform_3(%arg0: i32, %arg1: i32, %arg2: i32) -> (i32, i32) {
    %c0_i32 = arith.constant 0 : i32
    return %arg0, %arg1 : i32, i32
  }
  func.func @transform_4(%arg0: i32, %arg1: i32, %arg2: i32) -> (i32, i32) {
    %c0_i32 = arith.constant 0 : i32
    return %arg0, %arg1 : i32, i32
  }
}

module attributes {stable_mosaic.version = 11 : i64} {
  func.func @_mm_kernel(%arg0: i32, %arg1: i32, %arg2: i32, %arg3: memref<16x256xbf16, #tpu.memory_space<vmem>>, %arg4: memref<256x128xbf16, #tpu.memory_space<vmem>>, %arg5: memref<16x128xbf16, #tpu.memory_space<vmem>>, %arg6: memref<8x128xf32, #tpu.memory_space<vmem>>, %arg7: memref<8x128xf32, #tpu.memory_space<vmem>>, %arg8: memref<16x128xf32, #tpu.memory_space<vmem>>) attributes {dimension_semantics = [#tpu.dimension_semantics<parallel>, #tpu.dimension_semantics<parallel>, #tpu.dimension_semantics<arbitrary>], iteration_bounds = array<i64: 2, 1, 9>, scalar_prefetch = 0 : i64, scratch_operands = 1 : i64, tpu.core_type = #tpu.core_type<tc>, window_params = [{transform_indices = @transform_0, window_bounds = array<i64: 16, 256>}, {transform_indices = @transform_1, window_bounds = array<i64: 256, 128>}, {transform_indices = @transform_2, window_bounds = array<i64: 16, 128>}, {transform_indices = @transform_3, window_bounds = array<i64: 8, 128>}, {transform_indices = @transform_4, window_bounds = array<i64: 8, 128>}]} {
    %c0_i32 = arith.constant 0 : i32
    %0 = arith.cmpi eq, %arg2, %c0_i32 : i32
    %1 = arith.extui %0 : i1 to i32
    %c0_i32_0 = arith.constant 0 : i32
    %2 = arith.cmpi ne, %1, %c0_i32_0 : i32
    scf.if %2 {
      %cst_9 = arith.constant 0.000000e+00 : f32
      %12 = vector.broadcast %cst_9 : f32 to vector<16x128xf32>
      %c0_10 = arith.constant 0 : index
      %c0_11 = arith.constant 0 : index
      %13 = vector.load %arg8[%c0_10, %c0_11] : memref<16x128xf32, #tpu.memory_space<vmem>>, vector<16x128xf32>
      tpu.vector_store %arg8[%c0_10, %c0_11], %12 {strides = array<i32>} : memref<16x128xf32, #tpu.memory_space<vmem>>, vector<16x128xf32>,
    } else {
    }
    %c0 = arith.constant 0 : index
    %c0_1 = arith.constant 0 : index
    %3 = vector.load %arg8[%c0, %c0_1] : memref<16x128xf32, #tpu.memory_space<vmem>>, vector<16x128xf32>
    %c0_2 = arith.constant 0 : index
    %c0_3 = arith.constant 0 : index
    %4 = vector.load %arg3[%c0_2, %c0_3] : memref<16x256xbf16, #tpu.memory_space<vmem>>, vector<16x256xbf16>
    %c0_4 = arith.constant 0 : index
    %c0_5 = arith.constant 0 : index
    %5 = vector.load %arg4[%c0_4, %c0_5] : memref<256x128xbf16, #tpu.memory_space<vmem>>, vector<256x128xbf16>
    %cst = arith.constant dense<0.000000e+00> : vector<16x128xf32>
    %6 = tpu.matmul %4, %5, %cst {dimension_numbers = #tpu.dot_dimension_numbers<[1], [0], [0], [1], [0, 0, 1, 1], [], []>} : vector<16x256xbf16>, vector<256x128xbf16>, vector<16x128xf32> -> vector<16x128xf32>
    %7 = arith.addf %3, %6 : vector<16x128xf32>
    %c0_6 = arith.constant 0 : index
    %c0_7 = arith.constant 0 : index
    %8 = vector.load %arg8[%c0_6, %c0_7] : memref<16x128xf32, #tpu.memory_space<vmem>>, vector<16x128xf32>
    tpu.vector_store %arg8[%c0_6, %c0_7], %7 {strides = array<i32>} : memref<16x128xf32, #tpu.memory_space<vmem>>, vector<16x128xf32>,
    %c8_i32 = arith.constant 8 : i32
    %9 = arith.cmpi eq, %arg2, %c8_i32 : i32
    %10 = arith.extui %9 : i1 to i32
    %c0_i32_8 = arith.constant 0 : i32
    %11 = arith.cmpi ne, %10, %c0_i32_8 : i32
    scf.if %11 {
      %c0_9 = arith.constant 0 : index
      %c0_10 = arith.constant 0 : index
      %12 = vector.load %arg8[%c0_9, %c0_10] : memref<16x128xf32, #tpu.memory_space<vmem>>, vector<16x128xf32>
      %13 = arith.truncf %12 : vector<16x128xf32> to vector<16x128xbf16>
      %c0_11 = arith.constant 0 : index
      %c0_12 = arith.constant 0 : index
      %14 = vector.load %arg5[%c0_11, %c0_12] : memref<16x128xbf16, #tpu.memory_space<vmem>>, vector<16x128xbf16>
      tpu.vector_store %arg5[%c0_11, %c0_12], %13 {strides = array<i32>} : memref<16x128xbf16, #tpu.memory_space<vmem>>, vector<16x128xbf16>,
      %cst_13 = arith.constant dense<0.000000e+00> : vector<128xf32>
      %15 = vector.multi_reduction <add>, %12, %cst_13 [0] : vector<16x128xf32> to vector<128xf32>
      %16 = vector.shape_cast %15 : vector<128xf32> to vector<1x128xf32>
      %17 = arith.mulf %12, %12 : vector<16x128xf32>
      %cst_14 = arith.constant dense<0.000000e+00> : vector<128xf32>
      %18 = vector.multi_reduction <add>, %17, %cst_14 [0] : vector<16x128xf32> to vector<128xf32>
      %19 = vector.shape_cast %18 : vector<128xf32> to vector<1x128xf32>
      %20 = vector.shape_cast %16 : vector<1x128xf32> to vector<1x128xf32>
      %21 = vector.broadcast %20 : vector<1x128xf32> to vector<8x128xf32>
      %c0_15 = arith.constant 0 : index
      %c0_16 = arith.constant 0 : index
      %22 = vector.load %arg6[%c0_15, %c0_16] : memref<8x128xf32, #tpu.memory_space<vmem>>, vector<8x128xf32>
      tpu.vector_store %arg6[%c0_15, %c0_16], %21 {strides = array<i32>} : memref<8x128xf32, #tpu.memory_space<vmem>>, vector<8x128xf32>,
      %23 = vector.shape_cast %19 : vector<1x128xf32> to vector<1x128xf32>
      %24 = vector.broadcast %23 : vector<1x128xf32> to vector<8x128xf32>
      %c0_17 = arith.constant 0 : index
      %c0_18 = arith.constant 0 : index
      %25 = vector.load %arg7[%c0_17, %c0_18] : memref<8x128xf32, #tpu.memory_space<vmem>>, vector<8x128xf32>
      tpu.vector_store %arg7[%c0_17, %c0_18], %24 {strides = array<i32>} : memref<8x128xf32, #tpu.memory_space<vmem>>, vector<8x128xf32>,
    } else {
    }
    return
  }
  func.func @transform_0(%arg0: i32, %arg1: i32, %arg2: i32) -> (i32, i32) {
    %c0_i32 = arith.constant 0 : i32
    return %arg0, %arg2 : i32, i32
  }
  func.func @transform_1(%arg0: i32, %arg1: i32, %arg2: i32) -> (i32, i32) {
    %c0_i32 = arith.constant 0 : i32
    return %arg2, %arg1 : i32, i32
  }
  func.func @transform_2(%arg0: i32, %arg1: i32, %arg2: i32) -> (i32, i32) {
    %c0_i32 = arith.constant 0 : i32
    return %arg0, %arg1 : i32, i32
  }
  func.func @transform_3(%arg0: i32, %arg1: i32, %arg2: i32) -> (i32, i32) {
    %c0_i32 = arith.constant 0 : i32
    return %arg0, %arg1 : i32, i32
  }
  func.func @transform_4(%arg0: i32, %arg1: i32, %arg2: i32) -> (i32, i32) {
    %c0_i32 = arith.constant 0 : i32
    return %arg0, %arg1 : i32, i32
  }
}

module attributes {stable_mosaic.version = 11 : i64} {
  func.func @_mm_kernel(%arg0: i32, %arg1: i32, %arg2: i32, %arg3: memref<16x256xbf16, #tpu.memory_space<vmem>>, %arg4: memref<256x128xbf16, #tpu.memory_space<vmem>>, %arg5: memref<16x128xbf16, #tpu.memory_space<vmem>>, %arg6: memref<8x128xf32, #tpu.memory_space<vmem>>, %arg7: memref<8x128xf32, #tpu.memory_space<vmem>>, %arg8: memref<16x128xf32, #tpu.memory_space<vmem>>) attributes {dimension_semantics = [#tpu.dimension_semantics<parallel>, #tpu.dimension_semantics<parallel>, #tpu.dimension_semantics<arbitrary>], iteration_bounds = array<i64: 2, 1, 1>, scalar_prefetch = 0 : i64, scratch_operands = 1 : i64, tpu.core_type = #tpu.core_type<tc>, window_params = [{transform_indices = @transform_0, window_bounds = array<i64: 16, 256>}, {transform_indices = @transform_1, window_bounds = array<i64: 256, 128>}, {transform_indices = @transform_2, window_bounds = array<i64: 16, 128>}, {transform_indices = @transform_3, window_bounds = array<i64: 8, 128>}, {transform_indices = @transform_4, window_bounds = array<i64: 8, 128>}]} {
    %c0_i32 = arith.constant 0 : i32
    %0 = arith.cmpi eq, %arg2, %c0_i32 : i32
    %1 = arith.extui %0 : i1 to i32
    %c0_i32_0 = arith.constant 0 : i32
    %2 = arith.cmpi ne, %1, %c0_i32_0 : i32
    scf.if %2 {
      %cst_10 = arith.constant 0.000000e+00 : f32
      %12 = vector.broadcast %cst_10 : f32 to vector<16x128xf32>
      %c0_11 = arith.constant 0 : index
      %c0_12 = arith.constant 0 : index
      %13 = vector.load %arg8[%c0_11, %c0_12] : memref<16x128xf32, #tpu.memory_space<vmem>>, vector<16x128xf32>
      tpu.vector_store %arg8[%c0_11, %c0_12], %12 {strides = array<i32>} : memref<16x128xf32, #tpu.memory_space<vmem>>, vector<16x128xf32>,
    } else {
    }
    %c0 = arith.constant 0 : index
    %c0_1 = arith.constant 0 : index
    %3 = vector.load %arg8[%c0, %c0_1] : memref<16x128xf32, #tpu.memory_space<vmem>>, vector<16x128xf32>
    %c0_2 = arith.constant 0 : index
    %c0_3 = arith.constant 0 : index
    %4 = vector.load %arg3[%c0_2, %c0_3] : memref<16x256xbf16, #tpu.memory_space<vmem>>, vector<16x256xbf16>
    %c0_4 = arith.constant 0 : index
    %c0_5 = arith.constant 0 : index
    %5 = vector.load %arg4[%c0_4, %c0_5] : memref<256x128xbf16, #tpu.memory_space<vmem>>, vector<256x128xbf16>
    %cst = arith.constant dense<0.000000e+00> : vector<16x128xf32>
    %6 = tpu.matmul %4, %5, %cst {dimension_numbers = #tpu.dot_dimension_numbers<[1], [0], [0], [1], [0, 0, 1, 1], [], []>} : vector<16x256xbf16>, vector<256x128xbf16>, vector<16x128xf32> -> vector<16x128xf32>
    %7 = arith.addf %3, %6 : vector<16x128xf32>
    %c0_6 = arith.constant 0 : index
    %c0_7 = arith.constant 0 : index
    %8 = vector.load %arg8[%c0_6, %c0_7] : memref<16x128xf32, #tpu.memory_space<vmem>>, vector<16x128xf32>
    tpu.vector_store %arg8[%c0_6, %c0_7], %7 {strides = array<i32>} : memref<16x128xf32, #tpu.memory_space<vmem>>, vector<16x128xf32>,
    %c0_i32_8 = arith.constant 0 : i32
    %9 = arith.cmpi eq, %arg2, %c0_i32_8 : i32
    %10 = arith.extui %9 : i1 to i32
    %c0_i32_9 = arith.constant 0 : i32
    %11 = arith.cmpi ne, %10, %c0_i32_9 : i32
    scf.if %11 {
      %c0_10 = arith.constant 0 : index
      %c0_11 = arith.constant 0 : index
      %12 = vector.load %arg8[%c0_10, %c0_11] : memref<16x128xf32, #tpu.memory_space<vmem>>, vector<16x128xf32>
      %13 = arith.truncf %12 : vector<16x128xf32> to vector<16x128xbf16>
      %c0_12 = arith.constant 0 : index
      %c0_13 = arith.constant 0 : index
      %14 = vector.load %arg5[%c0_12, %c0_13] : memref<16x128xbf16, #tpu.memory_space<vmem>>, vector<16x128xbf16>
      tpu.vector_store %arg5[%c0_12, %c0_13], %13 {strides = array<i32>} : memref<16x128xbf16, #tpu.memory_space<vmem>>, vector<16x128xbf16>,
      %cst_14 = arith.constant dense<0.000000e+00> : vector<128xf32>
      %15 = vector.multi_reduction <add>, %12, %cst_14 [0] : vector<16x128xf32> to vector<128xf32>
      %16 = vector.shape_cast %15 : vector<128xf32> to vector<1x128xf32>
      %17 = arith.mulf %12, %12 : vector<16x128xf32>
      %cst_15 = arith.constant dense<0.000000e+00> : vector<128xf32>
      %18 = vector.multi_reduction <add>, %17, %cst_15 [0] : vector<16x128xf32> to vector<128xf32>
      %19 = vector.shape_cast %18 : vector<128xf32> to vector<1x128xf32>
      %20 = vector.shape_cast %16 : vector<1x128xf32> to vector<1x128xf32>
      %21 = vector.broadcast %20 : vector<1x128xf32> to vector<8x128xf32>
      %c0_16 = arith.constant 0 : index
      %c0_17 = arith.constant 0 : index
      %22 = vector.load %arg6[%c0_16, %c0_17] : memref<8x128xf32, #tpu.memory_space<vmem>>, vector<8x128xf32>
      tpu.vector_store %arg6[%c0_16, %c0_17], %21 {strides = array<i32>} : memref<8x128xf32, #tpu.memory_space<vmem>>, vector<8x128xf32>,
      %23 = vector.shape_cast %19 : vector<1x128xf32> to vector<1x128xf32>
      %24 = vector.broadcast %23 : vector<1x128xf32> to vector<8x128xf32>
      %c0_18 = arith.constant 0 : index
      %c0_19 = arith.constant 0 : index
      %25 = vector.load %arg7[%c0_18, %c0_19] : memref<8x128xf32, #tpu.memory_space<vmem>>, vector<8x128xf32>
      tpu.vector_store %arg7[%c0_18, %c0_19], %24 {strides = array<i32>} : memref<8x128xf32, #tpu.memory_space<vmem>>, vector<8x128xf32>,
    } else {
    }
    return
  }
  func.func @transform_0(%arg0: i32, %arg1: i32, %arg2: i32) -> (i32, i32) {
    %c0_i32 = arith.constant 0 : i32
    return %arg0, %arg2 : i32, i32
  }
  func.func @transform_1(%arg0: i32, %arg1: i32, %arg2: i32) -> (i32, i32) {
    %c0_i32 = arith.constant 0 : i32
    return %arg2, %arg1 : i32, i32
  }
  func.func @transform_2(%arg0: i32, %arg1: i32, %arg2: i32) -> (i32, i32) {
    %c0_i32 = arith.constant 0 : i32
    return %arg0, %arg1 : i32, i32
  }
  func.func @transform_3(%arg0: i32, %arg1: i32, %arg2: i32) -> (i32, i32) {
    %c0_i32 = arith.constant 0 : i32
    return %arg0, %arg1 : i32, i32
  }
  func.func @transform_4(%arg0: i32, %arg1: i32, %arg2: i32) -> (i32, i32) {
    %c0_i32 = arith.constant 0 : i32
    return %arg0, %arg1 : i32, i32
  }
}

module attributes {stable_mosaic.version = 11 : i64} {
  func.func @_mm_kernel(%arg0: i32, %arg1: i32, %arg2: i32, %arg3: memref<32x640xbf16, #tpu.memory_space<vmem>>, %arg4: memref<640x128xbf16, #tpu.memory_space<vmem>>, %arg5: memref<32x128xbf16, #tpu.memory_space<vmem>>, %arg6: memref<8x128xf32, #tpu.memory_space<vmem>>, %arg7: memref<8x128xf32, #tpu.memory_space<vmem>>, %arg8: memref<32x128xf32, #tpu.memory_space<vmem>>) attributes {dimension_semantics = [#tpu.dimension_semantics<parallel>, #tpu.dimension_semantics<parallel>, #tpu.dimension_semantics<arbitrary>], iteration_bounds = array<i64: 1, 2, 1>, scalar_prefetch = 0 : i64, scratch_operands = 1 : i64, tpu.core_type = #tpu.core_type<tc>, window_params = [{transform_indices = @transform_0, window_bounds = array<i64: 32, 640>}, {transform_indices = @transform_1, window_bounds = array<i64: 640, 128>}, {transform_indices = @transform_2, window_bounds = array<i64: 32, 128>}, {transform_indices = @transform_3, window_bounds = array<i64: 8, 128>}, {transform_indices = @transform_4, window_bounds = array<i64: 8, 128>}]} {
    %c0_i32 = arith.constant 0 : i32
    %0 = arith.cmpi eq, %arg2, %c0_i32 : i32
    %1 = arith.extui %0 : i1 to i32
    %c0_i32_0 = arith.constant 0 : i32
    %2 = arith.cmpi ne, %1, %c0_i32_0 : i32
    scf.if %2 {
      %cst_10 = arith.constant 0.000000e+00 : f32
      %12 = vector.broadcast %cst_10 : f32 to vector<32x128xf32>
      %c0_11 = arith.constant 0 : index
      %c0_12 = arith.constant 0 : index
      %13 = vector.load %arg8[%c0_11, %c0_12] : memref<32x128xf32, #tpu.memory_space<vmem>>, vector<32x128xf32>
      tpu.vector_store %arg8[%c0_11, %c0_12], %12 {strides = array<i32>} : memref<32x128xf32, #tpu.memory_space<vmem>>, vector<32x128xf32>,
    } else {
    }
    %c0 = arith.constant 0 : index
    %c0_1 = arith.constant 0 : index
    %3 = vector.load %arg8[%c0, %c0_1] : memref<32x128xf32, #tpu.memory_space<vmem>>, vector<32x128xf32>
    %c0_2 = arith.constant 0 : index
    %c0_3 = arith.constant 0 : index
    %4 = vector.load %arg3[%c0_2, %c0_3] : memref<32x640xbf16, #tpu.memory_space<vmem>>, vector<32x640xbf16>
    %c0_4 = arith.constant 0 : index
    %c0_5 = arith.constant 0 : index
    %5 = vector.load %arg4[%c0_4, %c0_5] : memref<640x128xbf16, #tpu.memory_space<vmem>>, vector<640x128xbf16>
    %cst = arith.constant dense<0.000000e+00> : vector<32x128xf32>
    %6 = tpu.matmul %4, %5, %cst {dimension_numbers = #tpu.dot_dimension_numbers<[1], [0], [0], [1], [0, 0, 1, 1], [], []>} : vector<32x640xbf16>, vector<640x128xbf16>, vector<32x128xf32> -> vector<32x128xf32>
    %7 = arith.addf %3, %6 : vector<32x128xf32>
    %c0_6 = arith.constant 0 : index
    %c0_7 = arith.constant 0 : index
    %8 = vector.load %arg8[%c0_6, %c0_7] : memref<32x128xf32, #tpu.memory_space<vmem>>, vector<32x128xf32>
    tpu.vector_store %arg8[%c0_6, %c0_7], %7 {strides = array<i32>} : memref<32x128xf32, #tpu.memory_space<vmem>>, vector<32x128xf32>,
    %c0_i32_8 = arith.constant 0 : i32
    %9 = arith.cmpi eq, %arg2, %c0_i32_8 : i32
    %10 = arith.extui %9 : i1 to i32
    %c0_i32_9 = arith.constant 0 : i32
    %11 = arith.cmpi ne, %10, %c0_i32_9 : i32
    scf.if %11 {
      %c0_10 = arith.constant 0 : index
      %c0_11 = arith.constant 0 : index
      %12 = vector.load %arg8[%c0_10, %c0_11] : memref<32x128xf32, #tpu.memory_space<vmem>>, vector<32x128xf32>
      %13 = arith.truncf %12 : vector<32x128xf32> to vector<32x128xbf16>
      %c0_12 = arith.constant 0 : index
      %c0_13 = arith.constant 0 : index
      %14 = vector.load %arg5[%c0_12, %c0_13] : memref<32x128xbf16, #tpu.memory_space<vmem>>, vector<32x128xbf16>
      tpu.vector_store %arg5[%c0_12, %c0_13], %13 {strides = array<i32>} : memref<32x128xbf16, #tpu.memory_space<vmem>>, vector<32x128xbf16>,
      %cst_14 = arith.constant dense<0.000000e+00> : vector<128xf32>
      %15 = vector.multi_reduction <add>, %12, %cst_14 [0] : vector<32x128xf32> to vector<128xf32>
      %16 = vector.shape_cast %15 : vector<128xf32> to vector<1x128xf32>
      %17 = arith.mulf %12, %12 : vector<32x128xf32>
      %cst_15 = arith.constant dense<0.000000e+00> : vector<128xf32>
      %18 = vector.multi_reduction <add>, %17, %cst_15 [0] : vector<32x128xf32> to vector<128xf32>
      %19 = vector.shape_cast %18 : vector<128xf32> to vector<1x128xf32>
      %20 = vector.shape_cast %16 : vector<1x128xf32> to vector<1x128xf32>
      %21 = vector.broadcast %20 : vector<1x128xf32> to vector<8x128xf32>
      %c0_16 = arith.constant 0 : index
      %c0_17 = arith.constant 0 : index
      %22 = vector.load %arg6[%c0_16, %c0_17] : memref<8x128xf32, #tpu.memory_space<vmem>>, vector<8x128xf32>
      tpu.vector_store %arg6[%c0_16, %c0_17], %21 {strides = array<i32>} : memref<8x128xf32, #tpu.memory_space<vmem>>, vector<8x128xf32>,
      %23 = vector.shape_cast %19 : vector<1x128xf32> to vector<1x128xf32>
      %24 = vector.broadcast %23 : vector<1x128xf32> to vector<8x128xf32>
      %c0_18 = arith.constant 0 : index
      %c0_19 = arith.constant 0 : index
      %25 = vector.load %arg7[%c0_18, %c0_19] : memref<8x128xf32, #tpu.memory_space<vmem>>, vector<8x128xf32>
      tpu.vector_store %arg7[%c0_18, %c0_19], %24 {strides = array<i32>} : memref<8x128xf32, #tpu.memory_space<vmem>>, vector<8x128xf32>,
    } else {
    }
    return
  }
  func.func @transform_0(%arg0: i32, %arg1: i32, %arg2: i32) -> (i32, i32) {
    %c0_i32 = arith.constant 0 : i32
    return %arg0, %arg2 : i32, i32
  }
  func.func @transform_1(%arg0: i32, %arg1: i32, %arg2: i32) -> (i32, i32) {
    %c0_i32 = arith.constant 0 : i32
    return %arg2, %arg1 : i32, i32
  }
  func.func @transform_2(%arg0: i32, %arg1: i32, %arg2: i32) -> (i32, i32) {
    %c0_i32 = arith.constant 0 : i32
    return %arg0, %arg1 : i32, i32
  }
  func.func @transform_3(%arg0: i32, %arg1: i32, %arg2: i32) -> (i32, i32) {
    %c0_i32 = arith.constant 0 : i32
    return %arg0, %arg1 : i32, i32
  }
  func.func @transform_4(%arg0: i32, %arg1: i32, %arg2: i32) -> (i32, i32) {
    %c0_i32 = arith.constant 0 : i32
    return %arg0, %arg1 : i32, i32
  }
}

module attributes {stable_mosaic.version = 11 : i64} {
  func.func @_mm_kernel(%arg0: i32, %arg1: i32, %arg2: i32, %arg3: memref<16x256xbf16, #tpu.memory_space<vmem>>, %arg4: memref<256x128xbf16, #tpu.memory_space<vmem>>, %arg5: memref<1x128xf32, #tpu.memory_space<vmem>>, %arg6: memref<16x128xbf16, #tpu.memory_space<vmem>>, %arg7: memref<16x128xf32, #tpu.memory_space<vmem>>) attributes {dimension_semantics = [#tpu.dimension_semantics<parallel>, #tpu.dimension_semantics<parallel>, #tpu.dimension_semantics<arbitrary>], iteration_bounds = array<i64: 2, 1, 9>, scalar_prefetch = 0 : i64, scratch_operands = 1 : i64, tpu.core_type = #tpu.core_type<tc>, window_params = [{transform_indices = @transform_0, window_bounds = array<i64: 16, 256>}, {transform_indices = @transform_1, window_bounds = array<i64: 256, 128>}, {transform_indices = @transform_2, window_bounds = array<i64: 1, 128>}, {transform_indices = @transform_3, window_bounds = array<i64: 16, 128>}]} {
    %c0_i32 = arith.constant 0 : i32
    %0 = arith.cmpi eq, %arg2, %c0_i32 : i32
    %1 = arith.extui %0 : i1 to i32
    %c0_i32_0 = arith.constant 0 : i32
    %2 = arith.cmpi ne, %1, %c0_i32_0 : i32
    scf.if %2 {
      %cst_9 = arith.constant 0.000000e+00 : f32
      %12 = vector.broadcast %cst_9 : f32 to vector<16x128xf32>
      %c0_10 = arith.constant 0 : index
      %c0_11 = arith.constant 0 : index
      %13 = vector.load %arg7[%c0_10, %c0_11] : memref<16x128xf32, #tpu.memory_space<vmem>>, vector<16x128xf32>
      tpu.vector_store %arg7[%c0_10, %c0_11], %12 {strides = array<i32>} : memref<16x128xf32, #tpu.memory_space<vmem>>, vector<16x128xf32>,
    } else {
    }
    %c0 = arith.constant 0 : index
    %c0_1 = arith.constant 0 : index
    %3 = vector.load %arg7[%c0, %c0_1] : memref<16x128xf32, #tpu.memory_space<vmem>>, vector<16x128xf32>
    %c0_2 = arith.constant 0 : index
    %c0_3 = arith.constant 0 : index
    %4 = vector.load %arg3[%c0_2, %c0_3] : memref<16x256xbf16, #tpu.memory_space<vmem>>, vector<16x256xbf16>
    %c0_4 = arith.constant 0 : index
    %c0_5 = arith.constant 0 : index
    %5 = vector.load %arg4[%c0_4, %c0_5] : memref<256x128xbf16, #tpu.memory_space<vmem>>, vector<256x128xbf16>
    %cst = arith.constant dense<0.000000e+00> : vector<16x128xf32>
    %6 = tpu.matmul %4, %5, %cst {dimension_numbers = #tpu.dot_dimension_numbers<[1], [0], [0], [1], [0, 0, 1, 1], [], []>} : vector<16x256xbf16>, vector<256x128xbf16>, vector<16x128xf32> -> vector<16x128xf32>
    %7 = arith.addf %3, %6 : vector<16x128xf32>
    %c0_6 = arith.constant 0 : index
    %c0_7 = arith.constant 0 : index
    %8 = vector.load %arg7[%c0_6, %c0_7] : memref<16x128xf32, #tpu.memory_space<vmem>>, vector<16x128xf32>
    tpu.vector_store %arg7[%c0_6, %c0_7], %7 {strides = array<i32>} : memref<16x128xf32, #tpu.memory_space<vmem>>, vector<16x128xf32>,
    %c8_i32 = arith.constant 8 : i32
    %9 = arith.cmpi eq, %arg2, %c8_i32 : i32
    %10 = arith.extui %9 : i1 to i32
    %c0_i32_8 = arith.constant 0 : i32
    %11 = arith.cmpi ne, %10, %c0_i32_8 : i32
    scf.if %11 {
      %c0_9 = arith.constant 0 : index
      %c0_10 = arith.constant 0 : index
      %12 = vector.load %arg7[%c0_9, %c0_10] : memref<16x128xf32, #tpu.memory_space<vmem>>, vector<16x128xf32>
      %c0_11 = arith.constant 0 : index
      %c0_12 = arith.constant 0 : index
      %13 = vector.load %arg5[%c0_11, %c0_12] : memref<1x128xf32, #tpu.memory_space<vmem>>, vector<1x128xf32>
      %14 = vector.broadcast %13 : vector<1x128xf32> to vector<16x128xf32>
      %15 = arith.addf %12, %14 : vector<16x128xf32>
      %16 = arith.truncf %15 : vector<16x128xf32> to vector<16x128xbf16>
      %c0_13 = arith.constant 0 : index
      %c0_14 = arith.constant 0 : index
      %17 = vector.load %arg6[%c0_13, %c0_14] : memref<16x128xbf16, #tpu.memory_space<vmem>>, vector<16x128xbf16>
      tpu.vector_store %arg6[%c0_13, %c0_14], %16 {strides = array<i32>} : memref<16x128xbf16, #tpu.memory_space<vmem>>, vector<16x128xbf16>,
    } else {
    }
    return
  }
  func.func @transform_0(%arg0: i32, %arg1: i32, %arg2: i32) -> (i32, i32) {
    %c0_i32 = arith.constant 0 : i32
    return %arg0, %arg2 : i32, i32
  }
  func.func @transform_1(%arg0: i32, %arg1: i32, %arg2: i32) -> (i32, i32) {
    %c0_i32 = arith.constant 0 : i32
    return %arg2, %arg1 : i32, i32
  }
  func.func @transform_2(%arg0: i32, %arg1: i32, %arg2: i32) -> (i32, i32) {
    %c0_i32 = arith.constant 0 : i32
    %c0_i32_0 = arith.constant 0 : i32
    return %c0_i32, %arg1 : i32, i32
  }
  func.func @transform_3(%arg0: i32, %arg1: i32, %arg2: i32) -> (i32, i32) {
    %c0_i32 = arith.constant 0 : i32
    return %arg0, %arg1 : i32, i32
  }
}

module attributes {stable_mosaic.version = 11 : i64} {
  func.func @_mm_kernel(%arg0: i32, %arg1: i32, %arg2: i32, %arg3: memref<64x256xbf16, #tpu.memory_space<vmem>>, %arg4: memref<256x128xbf16, #tpu.memory_space<vmem>>, %arg5: memref<1x128xf32, #tpu.memory_space<vmem>>, %arg6: memref<64x128xbf16, #tpu.memory_space<vmem>>, %arg7: memref<64x128xf32, #tpu.memory_space<vmem>>) attributes {dimension_semantics = [#tpu.dimension_semantics<parallel>, #tpu.dimension_semantics<parallel>, #tpu.dimension_semantics<arbitrary>], iteration_bounds = array<i64: 2, 1, 9>, scalar_prefetch = 0 : i64, scratch_operands = 1 : i64, tpu.core_type = #tpu.core_type<tc>, window_params = [{transform_indices = @transform_0, window_bounds = array<i64: 64, 256>}, {transform_indices = @transform_1, window_bounds = array<i64: 256, 128>}, {transform_indices = @transform_2, window_bounds = array<i64: 1, 128>}, {transform_indices = @transform_3, window_bounds = array<i64: 64, 128>}]} {
    %c0_i32 = arith.constant 0 : i32
    %0 = arith.cmpi eq, %arg2, %c0_i32 : i32
    %1 = arith.extui %0 : i1 to i32
    %c0_i32_0 = arith.constant 0 : i32
    %2 = arith.cmpi ne, %1, %c0_i32_0 : i32
    scf.if %2 {
      %cst_9 = arith.constant 0.000000e+00 : f32
      %12 = vector.broadcast %cst_9 : f32 to vector<64x128xf32>
      %c0_10 = arith.constant 0 : index
      %c0_11 = arith.constant 0 : index
      %13 = vector.load %arg7[%c0_10, %c0_11] : memref<64x128xf32, #tpu.memory_space<vmem>>, vector<64x128xf32>
      tpu.vector_store %arg7[%c0_10, %c0_11], %12 {strides = array<i32>} : memref<64x128xf32, #tpu.memory_space<vmem>>, vector<64x128xf32>,
    } else {
    }
    %c0 = arith.constant 0 : index
    %c0_1 = arith.constant 0 : index
    %3 = vector.load %arg7[%c0, %c0_1] : memref<64x128xf32, #tpu.memory_space<vmem>>, vector<64x128xf32>
    %c0_2 = arith.constant 0 : index
    %c0_3 = arith.constant 0 : index
    %4 = vector.load %arg3[%c0_2, %c0_3] : memref<64x256xbf16, #tpu.memory_space<vmem>>, vector<64x256xbf16>
    %c0_4 = arith.constant 0 : index
    %c0_5 = arith.constant 0 : index
    %5 = vector.load %arg4[%c0_4, %c0_5] : memref<256x128xbf16, #tpu.memory_space<vmem>>, vector<256x128xbf16>
    %cst = arith.constant dense<0.000000e+00> : vector<64x128xf32>
    %6 = tpu.matmul %4, %5, %cst {dimension_numbers = #tpu.dot_dimension_numbers<[1], [0], [0], [1], [0, 0, 1, 1], [], []>} : vector<64x256xbf16>, vector<256x128xbf16>, vector<64x128xf32> -> vector<64x128xf32>
    %7 = arith.addf %3, %6 : vector<64x128xf32>
    %c0_6 = arith.constant 0 : index
    %c0_7 = arith.constant 0 : index
    %8 = vector.load %arg7[%c0_6, %c0_7] : memref<64x128xf32, #tpu.memory_space<vmem>>, vector<64x128xf32>
    tpu.vector_store %arg7[%c0_6, %c0_7], %7 {strides = array<i32>} : memref<64x128xf32, #tpu.memory_space<vmem>>, vector<64x128xf32>,
    %c8_i32 = arith.constant 8 : i32
    %9 = arith.cmpi eq, %arg2, %c8_i32 : i32
    %10 = arith.extui %9 : i1 to i32
    %c0_i32_8 = arith.constant 0 : i32
    %11 = arith.cmpi ne, %10, %c0_i32_8 : i32
    scf.if %11 {
      %c0_9 = arith.constant 0 : index
      %c0_10 = arith.constant 0 : index
      %12 = vector.load %arg7[%c0_9, %c0_10] : memref<64x128xf32, #tpu.memory_space<vmem>>, vector<64x128xf32>
      %c0_11 = arith.constant 0 : index
      %c0_12 = arith.constant 0 : index
      %13 = vector.load %arg5[%c0_11, %c0_12] : memref<1x128xf32, #tpu.memory_space<vmem>>, vector<1x128xf32>
      %14 = vector.broadcast %13 : vector<1x128xf32> to vector<64x128xf32>
      %15 = arith.addf %12, %14 : vector<64x128xf32>
      %16 = arith.truncf %15 : vector<64x128xf32> to vector<64x128xbf16>
      %c0_13 = arith.constant 0 : index
      %c0_14 = arith.constant 0 : index
      %17 = vector.load %arg6[%c0_13, %c0_14] : memref<64x128xbf16, #tpu.memory_space<vmem>>, vector<64x128xbf16>
      tpu.vector_store %arg6[%c0_13, %c0_14], %16 {strides = array<i32>} : memref<64x128xbf16, #tpu.memory_space<vmem>>, vector<64x128xbf16>,
    } else {
    }
    return
  }
  func.func @transform_0(%arg0: i32, %arg1: i32, %arg2: i32) -> (i32, i32) {
    %c0_i32 = arith.constant 0 : i32
    return %arg0, %arg2 : i32, i32
  }
  func.func @transform_1(%arg0: i32, %arg1: i32, %arg2: i32) -> (i32, i32) {
    %c0_i32 = arith.constant 0 : i32
    return %arg2, %arg1 : i32, i32
  }
  func.func @transform_2(%arg0: i32, %arg1: i32, %arg2: i32) -> (i32, i32) {
    %c0_i32 = arith.constant 0 : i32
    %c0_i32_0 = arith.constant 0 : i32
    return %c0_i32, %arg1 : i32, i32
  }
  func.func @transform_3(%arg0: i32, %arg1: i32, %arg2: i32) -> (i32, i32) {
    %c0_i32 = arith.constant 0 : i32
    return %arg0, %arg1 : i32, i32
  }
}

module attributes {stable_mosaic.version = 11 : i64} {
  func.func @_mm_kernel(%arg0: i32, %arg1: i32, %arg2: i32, %arg3: memref<64x128xbf16, #tpu.memory_space<vmem>>, %arg4: memref<128x64xbf16, #tpu.memory_space<vmem>>, %arg5: memref<1x64xf32, #tpu.memory_space<vmem>>, %arg6: memref<64x64xbf16, #tpu.memory_space<vmem>>, %arg7: memref<64x64xf32, #tpu.memory_space<vmem>>) attributes {dimension_semantics = [#tpu.dimension_semantics<parallel>, #tpu.dimension_semantics<parallel>, #tpu.dimension_semantics<arbitrary>], iteration_bounds = array<i64: 2, 1, 9>, scalar_prefetch = 0 : i64, scratch_operands = 1 : i64, tpu.core_type = #tpu.core_type<tc>, window_params = [{transform_indices = @transform_0, window_bounds = array<i64: 64, 128>}, {transform_indices = @transform_1, window_bounds = array<i64: 128, 64>}, {transform_indices = @transform_2, window_bounds = array<i64: 1, 64>}, {transform_indices = @transform_3, window_bounds = array<i64: 64, 64>}]} {
    %c0_i32 = arith.constant 0 : i32
    %0 = arith.cmpi eq, %arg2, %c0_i32 : i32
    %1 = arith.extui %0 : i1 to i32
    %c0_i32_0 = arith.constant 0 : i32
    %2 = arith.cmpi ne, %1, %c0_i32_0 : i32
    scf.if %2 {
      %cst_9 = arith.constant 0.000000e+00 : f32
      %12 = vector.broadcast %cst_9 : f32 to vector<64x64xf32>
      %c0_10 = arith.constant 0 : index
      %c0_11 = arith.constant 0 : index
      %13 = vector.load %arg7[%c0_10, %c0_11] : memref<64x64xf32, #tpu.memory_space<vmem>>, vector<64x64xf32>
      tpu.vector_store %arg7[%c0_10, %c0_11], %12 {strides = array<i32>} : memref<64x64xf32, #tpu.memory_space<vmem>>, vector<64x64xf32>,
    } else {
    }
    %c0 = arith.constant 0 : index
    %c0_1 = arith.constant 0 : index
    %3 = vector.load %arg7[%c0, %c0_1] : memref<64x64xf32, #tpu.memory_space<vmem>>, vector<64x64xf32>
    %c0_2 = arith.constant 0 : index
    %c0_3 = arith.constant 0 : index
    %4 = vector.load %arg3[%c0_2, %c0_3] : memref<64x128xbf16, #tpu.memory_space<vmem>>, vector<64x128xbf16>
    %c0_4 = arith.constant 0 : index
    %c0_5 = arith.constant 0 : index
    %5 = vector.load %arg4[%c0_4, %c0_5] : memref<128x64xbf16, #tpu.memory_space<vmem>>, vector<128x64xbf16>
    %cst = arith.constant dense<0.000000e+00> : vector<64x64xf32>
    %6 = tpu.matmul %4, %5, %cst {dimension_numbers = #tpu.dot_dimension_numbers<[1], [0], [0], [1], [0, 0, 1, 1], [], []>} : vector<64x128xbf16>, vector<128x64xbf16>, vector<64x64xf32> -> vector<64x64xf32>
    %7 = arith.addf %3, %6 : vector<64x64xf32>
    %c0_6 = arith.constant 0 : index
    %c0_7 = arith.constant 0 : index
    %8 = vector.load %arg7[%c0_6, %c0_7] : memref<64x64xf32, #tpu.memory_space<vmem>>, vector<64x64xf32>
    tpu.vector_store %arg7[%c0_6, %c0_7], %7 {strides = array<i32>} : memref<64x64xf32, #tpu.memory_space<vmem>>, vector<64x64xf32>,
    %c8_i32 = arith.constant 8 : i32
    %9 = arith.cmpi eq, %arg2, %c8_i32 : i32
    %10 = arith.extui %9 : i1 to i32
    %c0_i32_8 = arith.constant 0 : i32
    %11 = arith.cmpi ne, %10, %c0_i32_8 : i32
    scf.if %11 {
      %c0_9 = arith.constant 0 : index
      %c0_10 = arith.constant 0 : index
      %12 = vector.load %arg7[%c0_9, %c0_10] : memref<64x64xf32, #tpu.memory_space<vmem>>, vector<64x64xf32>
      %c0_11 = arith.constant 0 : index
      %c0_12 = arith.constant 0 : index
      %13 = vector.load %arg5[%c0_11, %c0_12] : memref<1x64xf32, #tpu.memory_space<vmem>>, vector<1x64xf32>
      %14 = vector.broadcast %13 : vector<1x64xf32> to vector<64x64xf32>
      %15 = arith.addf %12, %14 : vector<64x64xf32>
      %16 = arith.truncf %15 : vector<64x64xf32> to vector<64x64xbf16>
      %c0_13 = arith.constant 0 : index
      %c0_14 = arith.constant 0 : index
      %17 = vector.load %arg6[%c0_13, %c0_14] : memref<64x64xbf16, #tpu.memory_space<vmem>>, vector<64x64xbf16>
      tpu.vector_store %arg6[%c0_13, %c0_14], %16 {strides = array<i32>} : memref<64x64xbf16, #tpu.memory_space<vmem>>, vector<64x64xbf16>,
    } else {
    }
    return
  }
  func.func @transform_0(%arg0: i32, %arg1: i32, %arg2: i32) -> (i32, i32) {
    %c0_i32 = arith.constant 0 : i32
    return %arg0, %arg2 : i32, i32
  }
  func.func @transform_1(%arg0: i32, %arg1: i32, %arg2: i32) -> (i32, i32) {
    %c0_i32 = arith.constant 0 : i32
    return %arg2, %arg1 : i32, i32
  }
  func.func @transform_2(%arg0: i32, %arg1: i32, %arg2: i32) -> (i32, i32) {
    %c0_i32 = arith.constant 0 : i32
    %c0_i32_0 = arith.constant 0 : i32
    return %c0_i32, %arg1 : i32, i32
  }
  func.func @transform_3(%arg0: i32, %arg1: i32, %arg2: i32) -> (i32, i32) {
    %c0_i32 = arith.constant 0 : i32
    return %arg0, %arg1 : i32, i32
  }
}

module attributes {stable_mosaic.version = 11 : i64} {
  func.func @_mm_kernel(%arg0: i32, %arg1: i32, %arg2: i32, %arg3: memref<256x128xbf16, #tpu.memory_space<vmem>>, %arg4: memref<128x64xbf16, #tpu.memory_space<vmem>>, %arg5: memref<1x64xf32, #tpu.memory_space<vmem>>, %arg6: memref<256x64xbf16, #tpu.memory_space<vmem>>, %arg7: memref<256x64xf32, #tpu.memory_space<vmem>>) attributes {dimension_semantics = [#tpu.dimension_semantics<parallel>, #tpu.dimension_semantics<parallel>, #tpu.dimension_semantics<arbitrary>], iteration_bounds = array<i64: 2, 1, 9>, scalar_prefetch = 0 : i64, scratch_operands = 1 : i64, tpu.core_type = #tpu.core_type<tc>, window_params = [{transform_indices = @transform_0, window_bounds = array<i64: 256, 128>}, {transform_indices = @transform_1, window_bounds = array<i64: 128, 64>}, {transform_indices = @transform_2, window_bounds = array<i64: 1, 64>}, {transform_indices = @transform_3, window_bounds = array<i64: 256, 64>}]} {
    %c0_i32 = arith.constant 0 : i32
    %0 = arith.cmpi eq, %arg2, %c0_i32 : i32
    %1 = arith.extui %0 : i1 to i32
    %c0_i32_0 = arith.constant 0 : i32
    %2 = arith.cmpi ne, %1, %c0_i32_0 : i32
    scf.if %2 {
      %cst_9 = arith.constant 0.000000e+00 : f32
      %12 = vector.broadcast %cst_9 : f32 to vector<256x64xf32>
      %c0_10 = arith.constant 0 : index
      %c0_11 = arith.constant 0 : index
      %13 = vector.load %arg7[%c0_10, %c0_11] : memref<256x64xf32, #tpu.memory_space<vmem>>, vector<256x64xf32>
      tpu.vector_store %arg7[%c0_10, %c0_11], %12 {strides = array<i32>} : memref<256x64xf32, #tpu.memory_space<vmem>>, vector<256x64xf32>,
    } else {
    }
    %c0 = arith.constant 0 : index
    %c0_1 = arith.constant 0 : index
    %3 = vector.load %arg7[%c0, %c0_1] : memref<256x64xf32, #tpu.memory_space<vmem>>, vector<256x64xf32>
    %c0_2 = arith.constant 0 : index
    %c0_3 = arith.constant 0 : index
    %4 = vector.load %arg3[%c0_2, %c0_3] : memref<256x128xbf16, #tpu.memory_space<vmem>>, vector<256x128xbf16>
    %c0_4 = arith.constant 0 : index
    %c0_5 = arith.constant 0 : index
    %5 = vector.load %arg4[%c0_4, %c0_5] : memref<128x64xbf16, #tpu.memory_space<vmem>>, vector<128x64xbf16>
    %cst = arith.constant dense<0.000000e+00> : vector<256x64xf32>
    %6 = tpu.matmul %4, %5, %cst {dimension_numbers = #tpu.dot_dimension_numbers<[1], [0], [0], [1], [0, 0, 1, 1], [], []>} : vector<256x128xbf16>, vector<128x64xbf16>, vector<256x64xf32> -> vector<256x64xf32>
    %7 = arith.addf %3, %6 : vector<256x64xf32>
    %c0_6 = arith.constant 0 : index
    %c0_7 = arith.constant 0 : index
    %8 = vector.load %arg7[%c0_6, %c0_7] : memref<256x64xf32, #tpu.memory_space<vmem>>, vector<256x64xf32>
    tpu.vector_store %arg7[%c0_6, %c0_7], %7 {strides = array<i32>} : memref<256x64xf32, #tpu.memory_space<vmem>>, vector<256x64xf32>,
    %c8_i32 = arith.constant 8 : i32
    %9 = arith.cmpi eq, %arg2, %c8_i32 : i32
    %10 = arith.extui %9 : i1 to i32
    %c0_i32_8 = arith.constant 0 : i32
    %11 = arith.cmpi ne, %10, %c0_i32_8 : i32
    scf.if %11 {
      %c0_9 = arith.constant 0 : index
      %c0_10 = arith.constant 0 : index
      %12 = vector.load %arg7[%c0_9, %c0_10] : memref<256x64xf32, #tpu.memory_space<vmem>>, vector<256x64xf32>
      %c0_11 = arith.constant 0 : index
      %c0_12 = arith.constant 0 : index
      %13 = vector.load %arg5[%c0_11, %c0_12] : memref<1x64xf32, #tpu.memory_space<vmem>>, vector<1x64xf32>
      %14 = vector.broadcast %13 : vector<1x64xf32> to vector<256x64xf32>
      %15 = arith.addf %12, %14 : vector<256x64xf32>
      %16 = arith.truncf %15 : vector<256x64xf32> to vector<256x64xbf16>
      %c0_13 = arith.constant 0 : index
      %c0_14 = arith.constant 0 : index
      %17 = vector.load %arg6[%c0_13, %c0_14] : memref<256x64xbf16, #tpu.memory_space<vmem>>, vector<256x64xbf16>
      tpu.vector_store %arg6[%c0_13, %c0_14], %16 {strides = array<i32>} : memref<256x64xbf16, #tpu.memory_space<vmem>>, vector<256x64xbf16>,
    } else {
    }
    return
  }
  func.func @transform_0(%arg0: i32, %arg1: i32, %arg2: i32) -> (i32, i32) {
    %c0_i32 = arith.constant 0 : i32
    return %arg0, %arg2 : i32, i32
  }
  func.func @transform_1(%arg0: i32, %arg1: i32, %arg2: i32) -> (i32, i32) {
    %c0_i32 = arith.constant 0 : i32
    return %arg2, %arg1 : i32, i32
  }
  func.func @transform_2(%arg0: i32, %arg1: i32, %arg2: i32) -> (i32, i32) {
    %c0_i32 = arith.constant 0 : i32
    %c0_i32_0 = arith.constant 0 : i32
    return %c0_i32, %arg1 : i32, i32
  }
  func.func @transform_3(%arg0: i32, %arg1: i32, %arg2: i32) -> (i32, i32) {
    %c0_i32 = arith.constant 0 : i32
    return %arg0, %arg1 : i32, i32
  }
}

</mosaic_0001>

<bundles_post_ra>
// kernel: net_forward.23
= control target key start
LH: loop header
LB: loop body
LE: loop exit
PB: predicated region body
PF: predicated region fallthrough
CT: control target
= control target key end

     0   :  { %s3053_s15 = smov 0   ;;  %s3055_s16 = smov 0   ;;  %s3651_s0 = inlined_call_operand.vmem [shape: bf16[512,576], index: 0, kind: input, shape index: {}]   ;;  %s3652_s1 = inlined_call_operand.vmem [shape: bf16[576,64], index: 1, kind: input, shape index: {}]   ;;  %s3653_s2 = inlined_call_operand.vmem [shape: bf16[512,64], index: 2, kind: output, shape index: {0}]   ;;  %s3654_s3 = inlined_call_operand.vmem [shape: f32[16,64], index: 3, kind: output, shape index: {1}]   ;;  %s3655_s4 = inlined_call_operand.vmem [shape: f32[16,64], index: 4, kind: output, shape index: {2}]  }
   0x1   :  { %s3057_s17 = smov 0  }
   0x2 LB: > { %s34_s18 = sadd.s32 1, %s3021_s16  ;;  %p2324_p0 = scmp.ge.s32.totalorder %s3025_s17, 1  ;;  %s3025_s17 = sphi %s3057_s17, %s15_s17   ;;  %s3021_s16 = sphi %s3055_s16, %s3657_s16   ;;  %s3017_s15 = sphi %s3053_s15, %s3656_s15  }
   0x3   : > { %p36_p1 = scmp.ge.s32.totalorder %s34_s18, 2  ;;  %p217_p2 = scmp.lt.s32.totalorder %s3025_s17, 3 }
   0x5   : > { %s3659_s18 = smov (%p36_p1, %s34_s18), 0  ;;  %p218_p3 = pnand %p2324_p0, %p217_p2 }
   0x6   : > { %v2855_v0 = vld [vmem:[%s3652_s1 + $0x40] sm:$0xff] (!%p218_p3)   ;;  %s2325_s21 = sshll.u32 (!%p218_p3), %s3017_s15, 5  ;;  %v2857_v2 = vld [vmem:[%s3652_s1 + $0x48] sm:$0xff] (!%p218_p3)   ;;  %v2859_v4 = vld [vmem:[%s3652_s1 + $0x50] sm:$0xff] (!%p218_p3)   ;;  %vm322_vm0 = vcmask (!%p218_p3), 523264   ;;  %vm1930_vm1 = vcmask (!%p218_p3), 519168  }
   0x7   : > { %221 = sbr.rel (%p218_p3) target bundleno = 448 (0x1c0), region = 28  ;;  %v2856_v1 = vld [vmem:[%s3652_s1] sm:$0xff] (!%p218_p3)   ;;  %2529 = vmatprep.subr.bf16.mxu0 (!%p218_p3), %v2855_v0  ;;  %2813 = vmatprep.subr.bf16.mxu1 (!%p218_p3), %v2855_v0  ;;  %p275_p4 = scmp.lt.s32.totalorder (!%p218_p3), %s2325_s21, 63  ;;  %v2858_v3 = vld [vmem:[%s3652_s1 + $0x8] sm:$0xff] (!%p218_p3)   ;;  %v2860_v5 = vld [vmem:[%s3652_s1 + $0x10] sm:$0xff] (!%p218_p3)  }
   0x8   : > { %2530 = vmatpush3.bf16.msra.mxu0 (!%p218_p3), %v2856_v1  ;;  %2821 = vmatpush3.bf16.msra.mxu1 (!%p218_p3), %v2856_v1  ;;  %v2861_v6 = vld [vmem:[%s3652_s1 + $0x58] sm:$0xff] (!%p218_p3)   ;;  %v2863_v8 = vld [vmem:[%s3652_s1 + $0x60] sm:$0xff] (!%p218_p3)   ;;  %v2865_v10 = vld [vmem:[%s3652_s1 + $0x68] sm:$0xff] (!%p218_p3)   ;;  %p303_p5 = scmp.lt.s32.totalorder (!%p218_p3), %s3017_s15, 1 }
   0x9   : > { %2531 = vmatprep.subr.bf16.mxu0 (!%p218_p3), %v2857_v2  ;;  %2814 = vmatprep.subr.bf16.mxu1 (!%p218_p3), %v2857_v2  ;;  %v2862_v7 = vld [vmem:[%s3652_s1 + $0x18] sm:$0xff] (!%p218_p3)   ;;  %v2864_v9 = vld [vmem:[%s3652_s1 + $0x20] sm:$0xff] (!%p218_p3)   ;;  %v2866_v13 = vld [vmem:[%s3652_s1 + $0x28] sm:$0xff] (!%p218_p3)  }
   0xa   : > { %v2867_v14 = vld [vmem:[%s3652_s1 + $0x70] sm:$0xff] (!%p218_p3)   ;;  %v2869_v16 = vld [vmem:[%s3652_s1 + $0x78] sm:$0xff] (!%p218_p3)   ;;  %v2877_v18 = vld [vmem:[%s3652_s1 + $0xc0] sm:$0xff] (!%p218_p3)  }
   0xb   : > { %v2868_v15 = vld [vmem:[%s3652_s1 + $0x30] sm:$0xff] (!%p218_p3)   ;;  %v2870_v17 = vld [vmem:[%s3652_s1 + $0x38] sm:$0xff] (!%p218_p3)   ;;  %v2878_v19 = vld [vmem:[%s3652_s1 + $0x100] sm:$0xff] (!%p218_p3)  }
   0xc   : > { %2532 = vmatpush3.bf16.msra.mxu0 (!%p218_p3), %v2858_v3  ;;  %2822 = vmatpush3.bf16.msra.mxu1 (!%p218_p3), %v2858_v3  ;;  %v2879_v22 = vld [vmem:[%s3652_s1 + $0x80] sm:$0xff] (!%p218_p3)   ;;  %v2880_v23 = vld [vmem:[%s3652_s1 + $0xc8] sm:$0xff] (!%p218_p3)   ;;  %v2888_v28 = vld [vmem:[%s3652_s1 + $0xd0] sm:$0xff] (!%p218_p3)  }
   0xd   : > { %2533 = vmatprep.subr.bf16.mxu0 (!%p218_p3), %v2859_v4  ;;  %2815 = vmatprep.subr.bf16.mxu1 (!%p218_p3), %v2859_v4  ;;  %v2881_v26 = vld [vmem:[%s3652_s1 + $0x88] sm:$0xff] (!%p218_p3)   ;;  %v2889_v30 = vld [vmem:[%s3652_s1 + $0x90] sm:$0xff] (!%p218_p3)   ;;  %v2890_v31 = vld [vmem:[%s3652_s1 + $0xd8] sm:$0xff] (!%p218_p3)  }
   0xe   : > { %s3661_s21 = smov (!%p275_p4, %s2325_s21), 63  ;;  %v2909_v34 = vld [vmem:[%s3652_s1 + $0x108] sm:$0xff]   ;;  %v2891_v35 = vld [vmem:[%s3652_s1 + $0x98] sm:$0xff]   ;;  %v2898_v37 = vld [vmem:[%s3652_s1 + $0xe0] sm:$0xff]   ;;  %s3663_s15 = smov (!%p303_p5, %s3017_s15), 1 }
   0xf   : > { %s2829_s8 = smul.u32 20, %s3661_s21  ;;  %v2899_v39 = vld [vmem:[%s3652_s1 + $0xa0] sm:$0xff]   ;;  %v2900_v40 = vld [vmem:[%s3652_s1 + $0xe8] sm:$0xff]   ;;  %v2908_v46 = vld [vmem:[%s3652_s1 + $0xf0] sm:$0xff]   ;;  %s2329_s11 = sshll.u32 %s3663_s15, 3 }
  0x10   : > { %2534 = vmatpush3.bf16.msra.mxu0 %v2860_v5  ;;  %2823 = vmatpush3.bf16.msra.mxu1 %v2860_v5  ;;  %v2901_v43 = vld [vmem:[%s3652_s1 + $0xa8] sm:$0xff]   ;;  %v2931_v47 = vld [vmem:[%s3652_s1 + $0x110] sm:$0xff]   ;;  %v2911_v49 = vld [vmem:[%s3652_s1 + $0xf8] sm:$0xff]   ;;  %s309_s14 = scalar_lea.vmem %s3654_s3, %s2329_s11  ;;  %s316_s23 = scalar_lea.vmem %s3655_s4, %s2329_s11 }
  0x11   : > { %2535 = vmatprep.subr.bf16.mxu0 %v2861_v6  ;;  %2816 = vmatprep.subr.bf16.mxu1 %v2861_v6  ;;  %s3107_s19 = scalar_lea.vmem %s3651_s0, %s2829_s8  ;;  %v2910_v48 = vld [vmem:[%s3652_s1 + $0xb0] sm:$0xff]   ;;  %v2912_v52 = vld [vmem:[%s3652_s1 + $0xb8] sm:$0xff]  }
  0x12   : > { %v2873_v11 = vld [vmem:[%s3107_s19 + $0x4] ss:$20 sps:$4 sm:$0xff]   ;;  %v2871_v20 = vld [vmem:[%s3107_s19] ss:$20 sps:$4 sm:$0xff]   ;;  %v2886_v27 = vld [vmem:[%s3107_s19 + $0x28] ss:$20 sps:$4 sm:$0xff]  }
  0x13   : > { %v2876_v12 = vld [vmem:[%s3107_s19 + $0x1e4] ss:$20 sps:$4 sm:$0xff]   ;;  %1252 = vmatprep.mubr.bf16.mxu0 %v2873_v11  ;;  %v2874_v21 = vld [vmem:[%s3107_s19 + $0x1e0] ss:$20 sps:$4 sm:$0xff]   ;;  %v2887_v29 = vld [vmem:[%s3107_s19 + $0x208] ss:$20 sps:$4 sm:$0xff]  }
  0x14   : > { %2536 = vmatpush3.bf16.msra.mxu0 %v2862_v7  ;;  %2824 = vmatpush3.bf16.msra.mxu1 %v2862_v7  ;;  %v2882_v24 = vld [vmem:[%s3107_s19 + $0x2c] ss:$20 sps:$4 sm:$0xff]   ;;  %v2892_v32 = vld [vmem:[%s3107_s19 + $0x54] ss:$20 sps:$4 sm:$0xff]   ;;  %v2896_v36 = vld [vmem:[%s3107_s19 + $0x50] ss:$20 sps:$4 sm:$0xff]  }
  0x15   : > { %2537 = vmatprep.subr.bf16.mxu0 %v2863_v8  ;;  %2817 = vmatprep.subr.bf16.mxu1 %v2863_v8  ;;  %v2884_v25 = vld [vmem:[%s3107_s19 + $0x20c] ss:$20 sps:$4 sm:$0xff]   ;;  %v2894_v33 = vld [vmem:[%s3107_s19 + $0x234] ss:$20 sps:$4 sm:$0xff]   ;;  %v2897_v38 = vld [vmem:[%s3107_s19 + $0x230] ss:$20 sps:$4 sm:$0xff]  }
  0x16   : > { %1348 = vmatprep.mubr.bf16.mxu1 %v2876_v12  ;;  %v2902_v41 = vld [vmem:[%s3107_s19 + $0x7c] ss:$20 sps:$4 sm:$0xff]   ;;  %v2906_v44 = vld [vmem:[%s3107_s19 + $0x78] ss:$20 sps:$4 sm:$0xff]   ;;  %v2918_v54 = vld [vmem:[%s3107_s19 + $0xa0] ss:$20 sps:$4 sm:$0xff]  }
  0x17   : > { %v2904_v42 = vld [vmem:[%s3107_s19 + $0x25c] ss:$20 sps:$4 sm:$0xff]   ;;  %v2907_v45 = vld [vmem:[%s3107_s19 + $0x258] ss:$20 sps:$4 sm:$0xff]   ;;  %v2921_v57 = vld [vmem:[%s3107_s19 + $0x34] ss:$20 sps:$4 sm:$0xff]  }
  0x18   : > { %2538 = vmatpush3.bf16.msra.mxu0 %v2864_v9  ;;  %2825 = vmatpush3.bf16.msra.mxu1 %v2864_v9  ;;  %v2913_v50 = vld [vmem:[%s3107_s19 + $0xa4] ss:$20 sps:$4 sm:$0xff]   ;;  %v2917_v51 = vld [vmem:[%s3107_s19 + $0xc] ss:$20 sps:$4 sm:$0xff]   ;;  %v2915_v53 = vld [vmem:[%s3107_s19 + $0x8] ss:$20 sps:$4 sm:$0xff]  }
  0x19   : > { %2539 = vmatprep.subr.bf16.mxu0 %v2865_v10  ;;  %2818 = vmatprep.subr.bf16.mxu1 %v2865_v10  ;;  %v2919_v55 = vld [vmem:[%s3107_s19 + $0xcc] ss:$20 sps:$4 sm:$0xff]   ;;  %v2950_v56 = vld [vmem:[%s3652_s1 + $0x118] sm:$0xff]   ;;  %v2924_v59 = vld [vmem:[%s3107_s19 + $0x30] ss:$20 sps:$4 sm:$0xff]  }
  0x1a   : > { %v2923_v58 = vld [vmem:[%s3107_s19 + $0xc8] ss:$20 sps:$4 sm:$0xff]   ;;  %v2929_v62 = vld [vmem:[%s3107_s19 + $0xf0] ss:$20 sps:$4 sm:$0xff]   ;;  %v2930_v63 = vld [vmem:[%s3107_s19 + $0x58] ss:$20 sps:$4 sm:$0xff]  }
  0x1b   : > { %v2925_v60 = vld [vmem:[%s3107_s19 + $0xf4] ss:$20 sps:$4 sm:$0xff]   ;;  %v2927_v61 = vld [vmem:[%s3107_s19 + $0x5c] ss:$20 sps:$4 sm:$0xff]   ;;  %v2934_v1 = vld [vmem:[%s3107_s19 + $0x84] ss:$20 sps:$4 sm:$0xff]  }
  0x1c   : > { %2540 = vmatpush3.bf16.msra.mxu0 %v2866_v13  ;;  %2826 = vmatpush3.bf16.msra.mxu1 %v2866_v13  ;;  %v2932_v0 = vld [vmem:[%s3107_s19 + $0x11c] ss:$20 sps:$4 sm:$0xff]   ;;  %v2936_v2 = vld [vmem:[%s3107_s19 + $0x118] ss:$20 sps:$4 sm:$0xff]   ;;  %v2937_v3 = vld [vmem:[%s3107_s19 + $0x80] ss:$20 sps:$4 sm:$0xff]  }
  0x1d   : > { %2541 = vmatprep.subr.bf16.mxu0 %v2867_v14  ;;  %2819 = vmatprep.subr.bf16.mxu1 %v2867_v14  ;;  %v2938_v4 = vld [vmem:[%s3107_s19 + $0x144] ss:$20 sps:$4 sm:$0xff]   ;;  %v2940_v5 = vld [vmem:[%s3107_s19 + $0xac] ss:$20 sps:$4 sm:$0xff]   ;;  %v2943_v7 = vld [vmem:[%s3107_s19 + $0xa8] ss:$20 sps:$4 sm:$0xff]  }
  0x1e   : > { %v2942_v6 = vld [vmem:[%s3107_s19 + $0x140] ss:$20 sps:$4 sm:$0xff]   ;;  %v2948_v10 = vld [vmem:[%s3107_s19 + $0x168] ss:$20 sps:$4 sm:$0xff]   ;;  %v2949_v11 = vld [vmem:[%s3107_s19 + $0xd0] ss:$20 sps:$4 sm:$0xff]  }
  0x1f   : > { %v2944_v8 = vld [vmem:[%s3107_s19 + $0x16c] ss:$20 sps:$4 sm:$0xff]   ;;  %v2946_v9 = vld [vmem:[%s3107_s19 + $0xd4] ss:$20 sps:$4 sm:$0xff]   ;;  %v2953_v13 = vld [vmem:[%s3107_s19 + $0xfc] ss:$20 sps:$4 sm:$0xff]  }
  0x20   : > { %2542 = vmatpush3.bf16.msra.mxu0 %v2868_v15  ;;  %2827 = vmatpush3.bf16.msra.mxu1 %v2868_v15  ;;  %v2951_v12 = vld [vmem:[%s3107_s19 + $0x194] ss:$20 sps:$4 sm:$0xff]   ;;  %v2955_v14 = vld [vmem:[%s3107_s19 + $0x190] ss:$20 sps:$4 sm:$0xff]   ;;  %v2956_v15 = vld [vmem:[%s3107_s19 + $0xf8] ss:$20 sps:$4 sm:$0xff]  }
  0x21   : > { %2543 = vmatprep.subr.bf16.mxu0 %v2869_v16  ;;  %2820 = vmatprep.subr.bf16.mxu1 %v2869_v16  ;;  %v2957_v16 = vld [vmem:[%s3107_s19 + $0x1bc] ss:$20 sps:$4 sm:$0xff]  }
  0x24   : > { %2544 = vmatpush3.bf16.msra.mxu0 %v2870_v17  ;;  %2828 = vmatpush3.bf16.msra.mxu1 %v2870_v17  ;;  %v2959_v17 = vld [vmem:[%s3107_s19 + $0x124] ss:$20 sps:$4 sm:$0xff]  }
  0x25   : > { %2641 = vmatprep.subr.bf16.mxu1 %v2877_v18  ;;  %2773 = vmatprep.subr.bf16.mxu0 %v2878_v19  ;;  %v2961_v18 = vld [vmem:[%s3107_s19 + $0x1b8] ss:$20 sps:$4 sm:$0xff]  }
  0x27   : > { %1253 = vmatmul.mubr.bf16.vlgmr.msra.gmra.mrb[0].mxu0 %v2871_v20  ;;  %1349 = vmatmul.mubr.bf16.vlgmr.msra.gmra.mrb[0].mxu1 %v2874_v21  ;;  %v2963_v20 = vld [vmem:[%s3107_s19 + $0x14c] ss:$20 sps:$4 sm:$0xff]   ;;  %v2965_v21 = vld [vmem:[%s3107_s19 + $0x10] ss:$20 sps:$4 sm:$0xff]  }
  0x28   : > { %2642 = vmatpush3.bf16.msra.mxu1 %v2879_v22  ;;  %2774 = vmatpush3.bf16.msra.mxu0 %v2878_v19  ;;  %v2962_v19 = vld [vmem:[%s3107_s19 + $0x120] ss:$20 sps:$4 sm:$0xff]   ;;  %v2966_v22 = vld [vmem:[%s3107_s19 + $0x148] ss:$20 sps:$4 sm:$0xff]  }
  0x29   : > { %2643 = vmatprep.subr.bf16.mxu1 %v2880_v23  ;;  %1260 = vmatprep.mubr.bf16.mxu0 %v2882_v24  ;;  %v2967_v23 = vld [vmem:[%s3107_s19 + $0x38] ss:$20 sps:$4 sm:$0xff]   ;;  %v2968_v24 = vld [vmem:[%s3107_s19 + $0x174] ss:$20 sps:$4 sm:$0xff]  }
  0x2a   : > { %1356 = vmatprep.mubr.bf16.mxu1 %v2884_v25  ;;  %2775 = vmatprep.subr.bf16.mxu0 %v2909_v34  ;;  %v2970_v25 = vld [vmem:[%s3107_s19 + $0x60] ss:$20 sps:$4 sm:$0xff]  }
  0x2c   : > { %2644 = vmatpush3.bf16.msra.mxu1 %v2881_v26  ;;  %2776 = vmatpush3.bf16.msra.mxu0 %v2909_v34  ;;  %v2971_v26 = vld [vmem:[%s3107_s19 + $0x170] ss:$20 sps:$4 sm:$0xff]   ;;  %v2981_v34 = vld [vmem:[%s3107_s19 + $0x1c0] ss:$20 sps:$4 sm:$0xff]  }
  0x2d   : > { %2645 = vmatprep.subr.bf16.mxu1 %v2888_v28  ;;  %2777 = vmatprep.subr.bf16.mxu0 %v2931_v47  ;;  %v2973_v28 = vld [vmem:[%s3107_s19 + $0x19c] ss:$20 sps:$4 sm:$0xff]  }
  0x2f   : > { %1261 = vmatmul.mubr.bf16.gmra.mrb[4].mxu0 %v2886_v27  ;;  %1357 = vmatmul.mubr.bf16.gmra.mrb[4].mxu1 %v2887_v29  ;;  %v2972_v27 = vld [vmem:[%s3107_s19 + $0x88] ss:$20 sps:$4 sm:$0xff]   ;;  %v2975_v29 = vld [vmem:[%s3107_s19 + $0xb0] ss:$20 sps:$4 sm:$0xff]  }
  0x30   : > { %2646 = vmatpush3.bf16.msra.mxu1 %v2889_v30  ;;  %1268 = vmatprep.mubr.bf16.mxu0 %v2892_v32  ;;  %v2976_v30 = vld [vmem:[%s3107_s19 + $0x198] ss:$20 sps:$4 sm:$0xff]  }
  0x31   : > { %2647 = vmatprep.subr.bf16.mxu1 %v2890_v31  ;;  %1364 = vmatprep.mubr.bf16.mxu1 %v2894_v33  ;;  %v2977_v31 = vld [vmem:[%s3107_s19 + $0xd8] ss:$20 sps:$4 sm:$0xff]   ;;  %v2980_v33 = vld [vmem:[%s3107_s19 + $0x100] ss:$20 sps:$4 sm:$0xff]  }
  0x32   : > { %2778 = vmatpush3.bf16.msra.mxu0 %v2931_v47  ;;  %v2978_v32 = vld [vmem:[%s3107_s19 + $0x1c4] ss:$20 sps:$4 sm:$0xff]  }
  0x33   : > { %2779 = vmatprep.subr.bf16.mxu0 %v2950_v56  ;;  %v2997_v47 = vld [vmem:[%s3107_s19 + $0x218] ss:$20 sps:$4 sm:$0xff]  }
  0x34   : > { %2648 = vmatpush3.bf16.msra.mxu1 %v2891_v35  ;;  %v2982_v35 = vld [vmem:[%s3107_s19 + $0x128] ss:$20 sps:$4 sm:$0xff]  }
  0x35   : > { %2649 = vmatprep.subr.bf16.mxu1 %v2898_v37  ;;  %v2985_v37 = vld [vmem:[%s3107_s19 + $0x150] ss:$20 sps:$4 sm:$0xff]  }
  0x36   : > { %2780 = vmatpush3.bf16.msra.mxu0 %v2950_v56 }
  0x37   : > { %1269 = vmatmul.mubr.bf16.gmra.mrb[8].mxu0 %v2896_v36  ;;  %1365 = vmatmul.mubr.bf16.gmra.mrb[8].mxu1 %v2897_v38  ;;  %v2983_v36 = vld [vmem:[%s3107_s19 + $0x1ec] ss:$20 sps:$4 sm:$0xff]   ;;  %v2986_v38 = vld [vmem:[%s3107_s19 + $0x1e8] ss:$20 sps:$4 sm:$0xff]  }
  0x38   : > { %2650 = vmatpush3.bf16.msra.mxu1 %v2899_v39  ;;  %1276 = vmatprep.mubr.bf16.mxu0 %v2902_v41  ;;  %v2987_v39 = vld [vmem:[%s3107_s19 + $0x178] ss:$20 sps:$4 sm:$0xff]   ;;  %v2990_v41 = vld [vmem:[%s3107_s19 + $0x1a0] ss:$20 sps:$4 sm:$0xff]  }
  0x39   : > { %2651 = vmatprep.subr.bf16.mxu1 %v2900_v40  ;;  %1372 = vmatprep.mubr.bf16.mxu1 %v2904_v42  ;;  %v2988_v40 = vld [vmem:[%s3107_s19 + $0x214] ss:$20 sps:$4 sm:$0xff]   ;;  %v2991_v42 = vld [vmem:[%s3107_s19 + $0x210] ss:$20 sps:$4 sm:$0xff]  }
  0x3c   : > { %2652 = vmatpush3.bf16.msra.mxu1 %v2901_v43  ;;  %v2992_v43 = vld [vmem:[%s3107_s19 + $0x1c8] ss:$20 sps:$4 sm:$0xff]  }
  0x3d   : > { %2653 = vmatprep.subr.bf16.mxu1 %v2908_v46  ;;  %v2996_v46 = vld [vmem:[%s3107_s19 + $0x238] ss:$20 sps:$4 sm:$0xff]  }
  0x3f   : > { %1277 = vmatmul.mubr.bf16.gmra.mrb[12].mxu0 %v2906_v44  ;;  %1373 = vmatmul.mubr.bf16.gmra.mrb[12].mxu1 %v2907_v45  ;;  %v2993_v44 = vld [vmem:[%s3107_s19 + $0x23c] ss:$20 sps:$4 sm:$0xff]  }
  0x40   : > { %2654 = vmatpush3.bf16.msra.mxu1 %v2910_v48  ;;  %1284 = vmatprep.mubr.bf16.mxu0 %v2913_v50  ;;  %v2995_v45 = vld [vmem:[%s3107_s19 + $0x1f0] ss:$20 sps:$4 sm:$0xff]   ;;  %v3001_v50 = vld [vmem:[%s3107_s19 + $0x260] ss:$20 sps:$4 sm:$0xff]  }
  0x41   : > { %2655 = vmatprep.subr.bf16.mxu1 %v2911_v49  ;;  %1413 = vmatprep.mubr.bf16.mxu1 %v2917_v51  ;;  %v2998_v48 = vld [vmem:[%s3107_s19 + $0x264] ss:$20 sps:$4 sm:$0xff]   ;;  %v3000_v49 = vld [vmem:[%s3107_s19 + $0x240] ss:$20 sps:$4 sm:$0xff]   ;;  %v3002_v51 = vld [vmem:[%s3107_s19 + $0x268] ss:$20 sps:$4 sm:$0xff]  }
  0x42   : > { %s2328_s19 = sshll.u32 %s3661_s21, 2 }
  0x43   : > { %s3415_s10 = scalar_lea.vmem %s3653_s2, %s2328_s19 }
  0x44   : > { %2656 = vmatpush3.bf16.msra.mxu1 %v2912_v52  ;;  %v3027_v52 = vmov 0.0  }
  0x45   : > { %325 = vst.msk [vmem:[#allocation2 + $0x10] sm:$0xff] %vm322_vm0, %v3027_v52  ;;  %323 = vst.msk [vmem:[#allocation2] sm:$0xff] %vm322_vm0, %v3027_v52 }
  0x46   : > { %324 = vst.msk [vmem:[#allocation2 + $0x8] sm:$0xff] %vm322_vm0, %v3027_v52  ;;  %326 = vst.msk [vmem:[#allocation2 + $0x18] sm:$0xff] %vm322_vm0, %v3027_v52 }
  0x47   : > { %1285 = vmatmul.mubr.bf16.gmra.mrb[16].mxu0 %v2918_v54  ;;  %1414 = vmatmul.mubr.bf16.vlgmr.msra.gmra.mrb[16].mxu1 %v2915_v53  ;;  %327 = vst.msk [vmem:[#allocation2 + $0x20] sm:$0xff] %vm322_vm0, %v3027_v52  ;;  %328 = vst.msk [vmem:[#allocation2 + $0x28] sm:$0xff] %vm322_vm0, %v3027_v52 }
  0x48   : > { %1292 = vmatprep.mubr.bf16.mxu0 %v2919_v55  ;;  %1421 = vmatprep.mubr.bf16.mxu1 %v2921_v57  ;;  %329 = vst.msk [vmem:[#allocation2 + $0x30] sm:$0xff] %vm322_vm0, %v3027_v52  ;;  %330 = vst.msk [vmem:[#allocation2 + $0x38] sm:$0xff] %vm322_vm0, %v3027_v52 }
  0x49   : > { %331 = vst.msk [vmem:[#allocation2 + $0x40] sm:$0xff] %vm322_vm0, %v3027_v52  ;;  %332 = vst.msk [vmem:[#allocation2 + $0x48] sm:$0xff] %vm322_vm0, %v3027_v52 }
  0x4a   : > { %333 = vst.msk [vmem:[#allocation2 + $0x50] sm:$0xff] %vm322_vm0, %v3027_v52  ;;  %334 = vst.msk [vmem:[#allocation2 + $0x58] sm:$0xff] %vm322_vm0, %v3027_v52 }
  0x4b   : > { %335 = vst.msk [vmem:[#allocation2 + $0x60] sm:$0xff] %vm322_vm0, %v3027_v52  ;;  %336 = vst.msk [vmem:[#allocation2 + $0x68] sm:$0xff] %vm322_vm0, %v3027_v52 }
  0x4c   : > { %337 = vst.msk [vmem:[#allocation2 + $0x70] sm:$0xff] %vm322_vm0, %v3027_v52  ;;  %338 = vst.msk [vmem:[#allocation2 + $0x78] sm:$0xff] %vm322_vm0, %v3027_v52 }
  0x4d   : > { %339 = vst.msk [vmem:[#allocation2 + $0x80] sm:$0xff] %vm322_vm0, %v3027_v52  ;;  %340 = vst.msk [vmem:[#allocation2 + $0x88] sm:$0xff] %vm322_vm0, %v3027_v52 }
  0x4e   : > { %341 = vst.msk [vmem:[#allocation2 + $0x90] sm:$0xff] %vm322_vm0, %v3027_v52  ;;  %342 = vst.msk [vmem:[#allocation2 + $0x98] sm:$0xff] %vm322_vm0, %v3027_v52 }
  0x4f   : > { %1293 = vmatmul.mubr.bf16.gmra.mrb[20].mxu0 %v2923_v58  ;;  %1422 = vmatmul.mubr.bf16.gmra.mrb[20].mxu1 %v2924_v59  ;;  %343 = vst.msk [vmem:[#allocation2 + $0xa0] sm:$0xff] %vm322_vm0, %v3027_v52  ;;  %344 = vst.msk [vmem:[#allocation2 + $0xa8] sm:$0xff] %vm322_vm0, %v3027_v52 }
  0x50   : > { %1300 = vmatprep.mubr.bf16.mxu0 %v2925_v60  ;;  %1429 = vmatprep.mubr.bf16.mxu1 %v2927_v61  ;;  %345 = vst.msk [vmem:[#allocation2 + $0xb0] sm:$0xff] %vm322_vm0, %v3027_v52  ;;  %346 = vst.msk [vmem:[#allocation2 + $0xb8] sm:$0xff] %vm322_vm0, %v3027_v52 }
  0x51   : > { %347 = vst.msk [vmem:[#allocation2 + $0xc0] sm:$0xff] %vm322_vm0, %v3027_v52  ;;  %348 = vst.msk [vmem:[#allocation2 + $0xc8] sm:$0xff] %vm322_vm0, %v3027_v52 }
  0x52   : > { %349 = vst.msk [vmem:[#allocation2 + $0xd0] sm:$0xff] %vm322_vm0, %v3027_v52  ;;  %350 = vst.msk [vmem:[#allocation2 + $0xd8] sm:$0xff] %vm322_vm0, %v3027_v52 }
  0x53   : > { %351 = vst.msk [vmem:[#allocation2 + $0xe0] sm:$0xff] %vm322_vm0, %v3027_v52  ;;  %352 = vst.msk [vmem:[#allocation2 + $0xe8] sm:$0xff] %vm322_vm0, %v3027_v52 }
  0x54   : > { %353 = vst.msk [vmem:[#allocation2 + $0xf0] sm:$0xff] %vm322_vm0, %v3027_v52  ;;  %354 = vst.msk [vmem:[#allocation2 + $0xf8] sm:$0xff] %vm322_vm0, %v3027_v52 }
  0x57   : > { %1301 = vmatmul.mubr.bf16.gmra.mrb[24].mxu0 %v2929_v62  ;;  %1430 = vmatmul.mubr.bf16.gmra.mrb[24].mxu1 %v2930_v63 }
  0x58   : > { %1308 = vmatprep.mubr.bf16.mxu0 %v2932_v0  ;;  %1437 = vmatprep.mubr.bf16.mxu1 %v2934_v1 }
  0x5f   : > { %1309 = vmatmul.mubr.bf16.gmra.mrb[28].mxu0 %v2936_v2  ;;  %1438 = vmatmul.mubr.bf16.gmra.mrb[28].mxu1 %v2937_v3 }
  0x60   : > { %1316 = vmatprep.mubr.bf16.mxu0 %v2938_v4  ;;  %1445 = vmatprep.mubr.bf16.mxu1 %v2940_v5 }
  0x67   : > { %1317 = vmatmul.mubr.bf16.gmra.mrb[32].mxu0 %v2942_v6  ;;  %1446 = vmatmul.mubr.bf16.gmra.mrb[32].mxu1 %v2943_v7 }
  0x68   : > { %1324 = vmatprep.mubr.bf16.mxu0 %v2944_v8  ;;  %1453 = vmatprep.mubr.bf16.mxu1 %v2946_v9 }
  0x6f   : > { %1325 = vmatmul.mubr.bf16.gmra.mrb[36].mxu0 %v2948_v10  ;;  %1454 = vmatmul.mubr.bf16.gmra.mrb[36].mxu1 %v2949_v11 }
  0x70   : > { %1332 = vmatprep.mubr.bf16.mxu0 %v2951_v12  ;;  %1461 = vmatprep.mubr.bf16.mxu1 %v2953_v13 }
  0x77   : > { %1333 = vmatmul.mubr.bf16.gmra.mrb[40].mxu0 %v2955_v14  ;;  %1462 = vmatmul.mubr.bf16.gmra.mrb[40].mxu1 %v2956_v15 }
  0x78   : > { %1340 = vmatprep.mubr.bf16.mxu0 %v2957_v16  ;;  %1469 = vmatprep.mubr.bf16.mxu1 %v2959_v17 }
  0x7f   : > { %1341 = vmatmul.mubr.bf16.gmra.mrb[44].mxu0 %v2961_v18  ;;  %1470 = vmatmul.mubr.bf16.gmra.mrb[44].mxu1 %v2962_v19 }
  0x80   : > { %1477 = vmatprep.mubr.bf16.mxu1 %v2963_v20  ;;  %2781 = vmatprep.mubr.msk.bf16.mxu0 %vm322_vm0, %v2965_v21 }
  0x87   : > { %1478 = vmatmul.mubr.bf16.gmra.mrb[48].mxu1 %v2966_v22  ;;  %2782 = vmatmul.mubr.msk.bf16.vlgmr.msra.gmra.mrb[48].mxu0 %vm322_vm0, %v2967_v23 }
  0x88   : > { %1485 = vmatprep.mubr.bf16.mxu1 %v2968_v24  ;;  %2785 = vmatprep.mubr.msk.bf16.mxu0 %vm322_vm0, %v2970_v25 }
  0x8f   : > { %1486 = vmatmul.mubr.bf16.gmra.mrb[52].mxu1 %v2971_v26  ;;  %2786 = vmatmul.mubr.msk.bf16.gmra.mrb[52].mxu0 %vm322_vm0, %v2972_v27 }
  0x90   : > { %1493 = vmatprep.mubr.bf16.mxu1 %v2973_v28  ;;  %2789 = vmatprep.mubr.msk.bf16.mxu0 %vm322_vm0, %v2975_v29 }
  0x97   : > { %1494 = vmatmul.mubr.bf16.gmra.mrb[56].mxu1 %v2976_v30  ;;  %2790 = vmatmul.mubr.msk.bf16.gmra.mrb[56].mxu0 %vm322_vm0, %v2977_v31 }
  0x98   : > { %1501 = vmatprep.mubr.bf16.mxu1 %v2978_v32  ;;  %2793 = vmatprep.mubr.msk.bf16.mxu0 %vm322_vm0, %v2980_v33 }
  0x9f   : > { %1502 = vmatmul.mubr.bf16.gmra.mrb[60].mxu1 %v2981_v34  ;;  %2794 = vmatmul.mubr.msk.bf16.gmra.mrb[60].mxu0 %vm322_vm0, %v2982_v35 }
  0xa0   : > { %1509 = vmatprep.mubr.bf16.mxu1 %v2983_v36  ;;  %2797 = vmatprep.mubr.msk.bf16.mxu0 %vm322_vm0, %v2985_v37 }
  0xa7   : > { %1510 = vmatmul.mubr.bf16.gmra.mrb[64].mxu1 %v2986_v38  ;;  %2798 = vmatmul.mubr.msk.bf16.gmra.mrb[64].mxu0 %vm322_vm0, %v2987_v39 }
  0xa8   : > { %1517 = vmatprep.mubr.bf16.mxu1 %v2988_v40  ;;  %2801 = vmatprep.mubr.msk.bf16.mxu0 %vm322_vm0, %v2990_v41 }
  0xaf   : > { %1518 = vmatmul.mubr.bf16.gmra.mrb[68].mxu1 %v2991_v42  ;;  %2802 = vmatmul.mubr.msk.bf16.gmra.mrb[68].mxu0 %vm322_vm0, %v2992_v43 }
  0xb0   : > { %1525 = vmatprep.mubr.bf16.mxu1 %v2993_v44  ;;  %2805 = vmatprep.mubr.msk.bf16.mxu0 %vm322_vm0, %v2995_v45 }
  0xb7   : > { %1526 = vmatmul.mubr.bf16.gmra.mrb[72].mxu1 %v2996_v46  ;;  %2806 = vmatmul.mubr.msk.bf16.gmra.mrb[72].mxu0 %vm322_vm0, %v2997_v47 }
  0xb8   : > { %1533 = vmatprep.mubr.bf16.mxu1 %v2998_v48  ;;  %2809 = vmatprep.mubr.msk.bf16.mxu0 %vm322_vm0, %v3000_v49 }
  0xbf   : > { %1534 = vmatmul.mubr.bf16.gmra.mrb[76].mxu1 %v3001_v50  ;;  %2810 = vmatmul.mubr.msk.bf16.gmra.mrb[76].mxu0 %vm322_vm0, %v3002_v51 }
  0xfa   : > { %v2545_v53 = vpop.f32.mrb[0].mxu0  ;;  %v2617_v54 = vpop.f32.mrb[0].mxu1 }
  0xfb   : > { %v2546_v55 = vpop.f32.mrb[1].mxu0  ;;  %v2618_v56 = vpop.f32.mrb[1].mxu1 }
  0xfc   : > { %v2547_v57 = vadd.f32 %v2546_v55, %v2545_v53  ;;  %v3318_v58 = vadd.f32 %v2618_v56, %v2617_v54  ;;  %v2548_v59 = vpop.f32.mrb[2].mxu0  ;;  %v2620_v60 = vpop.f32.mrb[2].mxu1 }
  0xfd   : > { %v2549_v61 = vpop.f32.mrb[3].mxu0  ;;  %v2621_v62 = vpop.f32.mrb[3].mxu1 }
  0xfe   : > { %v2550_v63 = vadd.f32 %v2549_v61, %v2548_v59  ;;  %v3320_v0 = vadd.f32 %v2621_v62, %v2620_v60 }
 0x102   : > { %v2551_v1 = vpop.f32.mrb[4].mxu0  ;;  %v2623_v2 = vpop.f32.mrb[4].mxu1 }
 0x103   : > { %v2552_v3 = vpop.f32.mrb[5].mxu0  ;;  %v2624_v4 = vpop.f32.mrb[5].mxu1 }
 0x104   : > { %v2553_v5 = vadd.f32 %v2552_v3, %v2551_v1  ;;  %v3322_v6 = vadd.f32 %v2624_v4, %v2623_v2  ;;  %v2554_v7 = vpop.f32.mrb[6].mxu0  ;;  %v2626_v8 = vpop.f32.mrb[6].mxu1 }
 0x105   : > { %v2555_v9 = vpop.f32.mrb[7].mxu0  ;;  %v2627_v10 = vpop.f32.mrb[7].mxu1 }
 0x106   : > { %v2556_v11 = vadd.f32 %v2555_v9, %v2554_v7  ;;  %v3324_v12 = vadd.f32 %v2627_v10, %v2626_v8 }
 0x10a   : > { %v2557_v13 = vpop.f32.mrb[8].mxu0  ;;  %v2629_v14 = vpop.f32.mrb[8].mxu1 }
 0x10b   : > { %v2558_v15 = vpop.f32.mrb[9].mxu0  ;;  %v2630_v16 = vpop.f32.mrb[9].mxu1 }
 0x10c   : > { %v2559_v17 = vadd.f32 %v2558_v15, %v2557_v13  ;;  %v3326_v18 = vadd.f32 %v2630_v16, %v2629_v14  ;;  %v2560_v19 = vpop.f32.mrb[10].mxu0  ;;  %v2632_v20 = vpop.f32.mrb[10].mxu1 }
 0x10d   : > { %v2561_v21 = vpop.f32.mrb[11].mxu0  ;;  %v2633_v22 = vpop.f32.mrb[11].mxu1 }
 0x10e   : > { %v2562_v23 = vadd.f32 %v2561_v21, %v2560_v19  ;;  %v3328_v24 = vadd.f32 %v2633_v22, %v2632_v20 }
 0x112   : > { %v2563_v25 = vpop.f32.mrb[12].mxu0  ;;  %v2635_v26 = vpop.f32.mrb[12].mxu1 }
 0x113   : > { %v2564_v27 = vpop.f32.mrb[13].mxu0  ;;  %v2636_v28 = vpop.f32.mrb[13].mxu1 }
 0x114   : > { %v2565_v29 = vadd.f32 %v2564_v27, %v2563_v25  ;;  %v3330_v30 = vadd.f32 %v2636_v28, %v2635_v26  ;;  %v2566_v31 = vpop.f32.mrb[14].mxu0  ;;  %v2638_v32 = vpop.f32.mrb[14].mxu1 }
 0x115   : > { %v2567_v33 = vpop.f32.mrb[15].mxu0  ;;  %v2639_v34 = vpop.f32.mrb[15].mxu1 }
 0x116   : > { %v2568_v35 = vadd.f32 %v2567_v33, %v2566_v31  ;;  %v3332_v36 = vadd.f32 %v2639_v34, %v2638_v32 }
 0x11a   : > { %v2569_v37 = vpop.f32.mrb[16].mxu0  ;;  %v2657_v38 = vpop.f32.mrb[16].mxu1 }
 0x11b   : > { %v2570_v39 = vpop.f32.mrb[17].mxu0  ;;  %v2658_v40 = vpop.f32.mrb[17].mxu1 }
 0x11c   : > { %v3334_v41 = vadd.f32 %v2570_v39, %v2569_v37  ;;  %v2659_v42 = vadd.f32 %v2658_v40, %v2657_v38  ;;  %v2572_v43 = vpop.f32.mrb[18].mxu0  ;;  %v2660_v44 = vpop.f32.mrb[18].mxu1 }
 0x11d   : > { %v2573_v45 = vpop.f32.mrb[19].mxu0  ;;  %v2661_v46 = vpop.f32.mrb[19].mxu1 }
 0x11e   : > { %v2574_v47 = vadd.f32 %v2573_v45, %v2572_v43  ;;  %v2662_v48 = vadd.f32 %v2661_v46, %v2660_v44  ;;  %v3336_v49 = vadd.f32 %v2659_v42, %v2547_v57 }
 0x120   : > { %v3338_v50 = vadd.f32 %v2662_v48, %v2550_v63 }
 0x122   : > { %v2575_v51 = vpop.f32.mrb[20].mxu0  ;;  %v2663_v52 = vpop.f32.mrb[20].mxu1 }
 0x123   : > { %v2576_v53 = vpop.f32.mrb[21].mxu0  ;;  %v2664_v54 = vpop.f32.mrb[21].mxu1 }
 0x124   : > { %v3340_v55 = vadd.f32 %v2576_v53, %v2575_v51  ;;  %v2665_v56 = vadd.f32 %v2664_v54, %v2663_v52  ;;  %v2578_v59 = vpop.f32.mrb[22].mxu0  ;;  %v2666_v60 = vpop.f32.mrb[22].mxu1 }
 0x125   : > { %v2579_v61 = vpop.f32.mrb[23].mxu0  ;;  %v2667_v62 = vpop.f32.mrb[23].mxu1 }
 0x126   : > { %v2580_v1 = vadd.f32 %v2579_v61, %v2578_v59  ;;  %v2668_v2 = vadd.f32 %v2667_v62, %v2666_v60  ;;  %v3342_v3 = vadd.f32 %v2665_v56, %v2553_v5 }
 0x128   : > { %v3344_v4 = vadd.f32 %v2668_v2, %v2556_v11 }
 0x12a   : > { %v2581_v57 = vpop.f32.mrb[24].mxu0  ;;  %v2669_v63 = vpop.f32.mrb[24].mxu1 }
 0x12b   : > { %v2582_v7 = vpop.f32.mrb[25].mxu0  ;;  %v2670_v8 = vpop.f32.mrb[25].mxu1 }
 0x12c   : > { %v3346_v9 = vadd.f32 %v2582_v7, %v2581_v57  ;;  %v2671_v10 = vadd.f32 %v2670_v8, %v2669_v63  ;;  %v2584_v13 = vpop.f32.mrb[26].mxu0  ;;  %v2672_v14 = vpop.f32.mrb[26].mxu1 }
 0x12d   : > { %v2585_v15 = vpop.f32.mrb[27].mxu0  ;;  %v2673_v16 = vpop.f32.mrb[27].mxu1 }
 0x12e   : > { %v2586_v19 = vadd.f32 %v2585_v15, %v2584_v13  ;;  %v2674_v20 = vadd.f32 %v2673_v16, %v2672_v14  ;;  %v3348_v21 = vadd.f32 %v2671_v10, %v2559_v17 }
 0x130   : > { %v3350_v22 = vadd.f32 %v2674_v20, %v2562_v23 }
 0x132   : > { %v2587_v5 = vpop.f32.mrb[28].mxu0  ;;  %v2675_v11 = vpop.f32.mrb[28].mxu1 }
 0x133   : > { %v2588_v25 = vpop.f32.mrb[29].mxu0  ;;  %v2676_v26 = vpop.f32.mrb[29].mxu1 }
 0x134   : > { %v3352_v27 = vadd.f32 %v2588_v25, %v2587_v5  ;;  %v2677_v28 = vadd.f32 %v2676_v26, %v2675_v11  ;;  %v2590_v31 = vpop.f32.mrb[30].mxu0  ;;  %v2678_v32 = vpop.f32.mrb[30].mxu1 }
 0x135   : > { %v2591_v33 = vpop.f32.mrb[31].mxu0  ;;  %v2679_v34 = vpop.f32.mrb[31].mxu1 }
 0x136   : > { %v2592_v37 = vadd.f32 %v2591_v33, %v2590_v31  ;;  %v2680_v38 = vadd.f32 %v2679_v34, %v2678_v32  ;;  %v3354_v39 = vadd.f32 %v2677_v28, %v2565_v29 }
 0x138   : > { %v3356_v40 = vadd.f32 %v2680_v38, %v2568_v35 }
 0x13a   : > { %v2593_v17 = vpop.f32.mrb[32].mxu0  ;;  %v2681_v23 = vpop.f32.mrb[32].mxu1 }
 0x13b   : > { %v2594_v42 = vpop.f32.mrb[33].mxu0  ;;  %v2682_v43 = vpop.f32.mrb[33].mxu1 }
 0x13c   : > { %v3358_v44 = vadd.f32 %v2594_v42, %v2593_v17  ;;  %v2683_v45 = vadd.f32 %v2682_v43, %v2681_v23  ;;  %v2596_v46 = vpop.f32.mrb[34].mxu0  ;;  %v2684_v48 = vpop.f32.mrb[34].mxu1 }
 0x13d   : > { %v2597_v51 = vpop.f32.mrb[35].mxu0  ;;  %v2685_v52 = vpop.f32.mrb[35].mxu1 }
 0x13e   : > { %v3360_v53 = vadd.f32 %v2597_v51, %v2596_v46  ;;  %v2686_v54 = vadd.f32 %v2685_v52, %v2684_v48  ;;  %v3363_v56 = vadd.f32 %v2683_v45, %v3334_v41 }
 0x140   : > { %v3365_v29 = vadd.f32 %v2686_v54, %v2574_v47 }
 0x142   : > { %v2599_v35 = vpop.f32.mrb[36].mxu0  ;;  %v2687_v59 = vpop.f32.mrb[36].mxu1 }
 0x143   : > { %v2600_v60 = vpop.f32.mrb[37].mxu0  ;;  %v2688_v61 = vpop.f32.mrb[37].mxu1 }
 0x144   : > { %v3367_v62 = vadd.f32 %v2600_v60, %v2599_v35  ;;  %v2689_v2 = vadd.f32 %v2688_v61, %v2687_v59  ;;  %v2602_v57 = vpop.f32.mrb[38].mxu0  ;;  %v2690_v63 = vpop.f32.mrb[38].mxu1  ;;  %v357_v59 = vld [vmem:[#allocation2 + $0x10] sm:$0xff] }
 0x145   : > { %v2603_v7 = vpop.f32.mrb[39].mxu0  ;;  %v2691_v8 = vpop.f32.mrb[39].mxu1 }
 0x146   : > { %v3369_v10 = vadd.f32 %v2603_v7, %v2602_v57  ;;  %v2692_v13 = vadd.f32 %v2691_v8, %v2690_v63  ;;  %v3372_v14 = vadd.f32 %v2689_v2, %v3340_v55  ;;  %v355_v57 = vld [vmem:[#allocation2] sm:$0xff] }
 0x148   : > { %v3374_v41 = vadd.f32 %v2692_v13, %v2580_v1 }
 0x14a   : > { %v2605_v47 = vpop.f32.mrb[40].mxu0  ;;  %v2693_v15 = vpop.f32.mrb[40].mxu1 }
 0x14b   : > { %v2606_v16 = vpop.f32.mrb[41].mxu0  ;;  %v2694_v20 = vpop.f32.mrb[41].mxu1 }
 0x14c   : > { %v3376_v5 = vadd.f32 %v2606_v16, %v2605_v47  ;;  %v2695_v11 = vadd.f32 %v2694_v20, %v2693_v15  ;;  %v2608_v25 = vpop.f32.mrb[42].mxu0  ;;  %v2696_v26 = vpop.f32.mrb[42].mxu1  ;;  %v358_v47 = vld [vmem:[#allocation2 + $0x18] sm:$0xff] }
 0x14d   : > { %v2609_v28 = vpop.f32.mrb[43].mxu0  ;;  %v2697_v31 = vpop.f32.mrb[43].mxu1 }
 0x14e   : > { %v3378_v32 = vadd.f32 %v2609_v28, %v2608_v25  ;;  %v2698_v33 = vadd.f32 %v2697_v31, %v2696_v26  ;;  %v3381_v34 = vadd.f32 %v2695_v11, %v3346_v9 }
 0x150   : > { %v3383_v55 = vadd.f32 %v2698_v33, %v2586_v19 }
 0x152   : > { %v2611_v1 = vpop.f32.mrb[44].mxu0  ;;  %v2699_v38 = vpop.f32.mrb[44].mxu1 }
 0x153   : > { %v2612_v17 = vpop.f32.mrb[45].mxu0  ;;  %v2700_v23 = vpop.f32.mrb[45].mxu1 }
 0x154   : > { %v3385_v42 = vadd.f32 %v2612_v17, %v2611_v1  ;;  %v2701_v43 = vadd.f32 %v2700_v23, %v2699_v38  ;;  %v2614_v45 = vpop.f32.mrb[46].mxu0  ;;  %v2702_v46 = vpop.f32.mrb[46].mxu1  ;;  %v361_v1 = vld [vmem:[#allocation2 + $0x30] sm:$0xff]  ;;  %v359_v17 = vld [vmem:[#allocation2 + $0x20] sm:$0xff] }
 0x155   : > { %v2615_v48 = vpop.f32.mrb[47].mxu0  ;;  %v2703_v51 = vpop.f32.mrb[47].mxu1 }
 0x156   : > { %v3387_v52 = vadd.f32 %v2615_v48, %v2614_v45  ;;  %v2704_v54 = vadd.f32 %v2703_v51, %v2702_v46  ;;  %v3390_v35 = vadd.f32 %v2701_v43, %v3352_v27  ;;  %v362_v48 = vld [vmem:[#allocation2 + $0x38] sm:$0xff] }
 0x158   : > { %v3392_v9 = vadd.f32 %v2704_v54, %v2592_v37  ;;  %v356_v37 = vld [vmem:[#allocation2 + $0x8] sm:$0xff] }
 0x15a   : > { %v2705_v19 = vpop.f32.mrb[48].mxu1  ;;  %v2783_v60 = vpop.f32.mrb[48].mxu0 }
 0x15b   : > { %v1585_v61 = vadd.f32 %v2783_v60, %v3342_v3  ;;  %v2706_v2 = vpop.f32.mrb[49].mxu1  ;;  %v1576_v63 = vpop.f32.mrb[49].mxu0 }
 0x15c   : > { %v2707_v7 = vadd.f32 %v2706_v2, %v2705_v19  ;;  %v1577_v8 = vadd.f32 %v1576_v63, %v3336_v49  ;;  %v2708_v13 = vpop.f32.mrb[50].mxu1  ;;  %v2784_v15 = vpop.f32.mrb[50].mxu0 }
 0x15d   : > { %v1705_v16 = vadd.f32 %v1585_v61, %v357_v59  ;;  %v1588_v27 = vadd.f32 %v2784_v15, %v3344_v4  ;;  %v2709_v20 = vpop.f32.mrb[51].mxu1  ;;  %v1579_v11 = vpop.f32.mrb[51].mxu0  ;;  %v360_v59 = vld [vmem:[#allocation2 + $0x28] sm:$0xff] }
 0x15e   : > { %v1703_v25 = vadd.f32 %v1577_v8, %v355_v57  ;;  %v2710_v26 = vadd.f32 %v2709_v20, %v2708_v13  ;;  %v1580_v3 = vadd.f32 %v1579_v11, %v3338_v50  ;;  %v3399_v28 = vadd.f32 %v2707_v7, %v3358_v44 }
 0x15f   : > { %1737 = vst.msk [vmem:[#allocation2 + $0x10] sm:$0xff] %vm322_vm0, %v1705_v16  ;;  %v1706_v49 = vadd.f32 %v1588_v27, %v358_v47 }
 0x160   : > { %1735 = vst.msk [vmem:[#allocation2] sm:$0xff] %vm322_vm0, %v1703_v25  ;;  %v1704_v31 = vadd.f32 %v1580_v3, %v356_v37  ;;  %v3404_v33 = vadd.f32 %v2710_v26, %v3360_v53 }
 0x161   : > { %1738 = vst.msk [vmem:[#allocation2 + $0x18] sm:$0xff] %vm322_vm0, %v1706_v49  ;;  %v365_v49 = vld [vmem:[#allocation2 + $0x50] sm:$0xff] }
 0x162   : > { %1736 = vst.msk [vmem:[#allocation2 + $0x8] sm:$0xff] %vm322_vm0, %v1704_v31  ;;  %v2711_v4 = vpop.f32.mrb[52].mxu1  ;;  %v2787_v38 = vpop.f32.mrb[52].mxu0 }
 0x163   : > { %v1601_v50 = vadd.f32 %v2787_v38, %v3354_v39  ;;  %v2712_v44 = vpop.f32.mrb[53].mxu1  ;;  %v1592_v23 = vpop.f32.mrb[53].mxu0 }
 0x164   : > { %v2713_v43 = vadd.f32 %v2712_v44, %v2711_v4  ;;  %v1593_v45 = vadd.f32 %v1592_v23, %v3348_v21  ;;  %v2714_v46 = vpop.f32.mrb[54].mxu1  ;;  %v2788_v53 = vpop.f32.mrb[54].mxu0  ;;  %v363_v44 = vld [vmem:[#allocation2 + $0x40] sm:$0xff] }
 0x165   : > { %v1709_v51 = vadd.f32 %v1601_v50, %v361_v1  ;;  %v1604_v54 = vadd.f32 %v2788_v53, %v3356_v40  ;;  %v2715_v19 = vpop.f32.mrb[55].mxu1  ;;  %v1595_v60 = vpop.f32.mrb[55].mxu0 }
 0x166   : > { %v1772_v39 = vld [vmem:[#allocation2 + $0x10] sm:$0xff]  ;;  %v1707_v61 = vadd.f32 %v1593_v45, %v359_v17  ;;  %v2716_v2 = vadd.f32 %v2715_v19, %v2714_v46  ;;  %v1596_v21 = vadd.f32 %v1595_v60, %v3350_v22  ;;  %v3419_v57 = vadd.f32 %v2713_v43, %v3367_v62 }
 0x167   : > { %v2499_v63 = vpack.c.bf16 %v1772_v39, %v1772_v39  ;;  %v2034_v7 = vmul.f32 %v1772_v39, %v1772_v39  ;;  %v1770_v40 = vld [vmem:[#allocation2] sm:$0xff]  ;;  %1741 = vst.msk [vmem:[#allocation2 + $0x30] sm:$0xff] %vm322_vm0, %v1709_v51  ;;  %v1710_v8 = vadd.f32 %v1604_v54, %v362_v48  ;;  %v1966_v22 = vsel %vm322_vm0, %v1772_v39, 0.0 }
 0x168   : > { %v2497_v13 = vpack.c.bf16 %v1770_v40, %v1770_v40  ;;  %v2032_v47 = vmul.f32 %v1770_v40, %v1770_v40  ;;  %v1773_v15 = vld [vmem:[#allocation2 + $0x18] sm:$0xff]  ;;  %1739 = vst.msk [vmem:[#allocation2 + $0x20] sm:$0xff] %vm322_vm0, %v1707_v61  ;;  %v1708_v16 = vadd.f32 %v1596_v21, %v360_v59  ;;  %v1963_v62 = vsel %vm322_vm0, %v1770_v40, 0.0 }
 0x169   : > { %1933 = vst.msk [vmem:[%s3415_s10 + $0x8] sm:$0xf] %vm1930_vm1, %v2499_v63  ;;  %v2500_v27 = vpack.c.bf16 %v1773_v15, %v1773_v15  ;;  %v1771_v20 = vld [vmem:[#allocation2 + $0x8] sm:$0xff]  ;;  %v2067_v37 = vsel %vm322_vm0, %v2034_v7, 0.0  ;;  %v2035_v4 = vmul.f32 %v1773_v15, %v1773_v15  ;;  %v3437_v23 = vadd.f32 %v2716_v2, %v3369_v10 }
 0x16a   : > { %1742 = vst.msk [vmem:[#allocation2 + $0x38] sm:$0xff] %vm322_vm0, %v1710_v8  ;;  %v2498_v11 = vpack.c.bf16 %v1771_v20, %v1771_v20  ;;  %v1964_v25 = vsel %vm322_vm0, %v1771_v20, 0.0  ;;  %v2033_v26 = vmul.f32 %v1771_v20, %v1771_v20  ;;  %1740 = vst.msk [vmem:[#allocation2 + $0x28] sm:$0xff] %vm322_vm0, %v1708_v16  ;;  %v2717_v3 = vpop.f32.mrb[56].mxu1  ;;  %v2791_v31 = vpop.f32.mrb[56].mxu0  ;;  %v2064_v43 = vsel %vm322_vm0, %v2032_v47, 0.0 }
 0x16b   : > { %1931 = vst.msk [vmem:[%s3415_s10] sm:$0xf] %vm1930_vm1, %v2497_v13  ;;  %1934 = vst.msk [vmem:[%s3415_s10 + $0xc] sm:$0xf] %vm1930_vm1, %v2500_v27  ;;  %v1965_v1 = vadd.f32 %v1964_v25, %v1963_v62  ;;  %v1617_v38 = vadd.f32 %v2791_v31, %v3372_v14  ;;  %v2718_v50 = vpop.f32.mrb[57].mxu1  ;;  %v1608_v17 = vpop.f32.mrb[57].mxu0 }
 0x16c   : > { %1932 = vst.msk [vmem:[%s3415_s10 + $0x4] sm:$0xf] %vm1930_vm1, %v2498_v11  ;;  %v2065_v45 = vsel %vm322_vm0, %v2033_v26, 0.0  ;;  %v2719_v46 = vadd.f32 %v2718_v50, %v2717_v3  ;;  %v1609_v48 = vadd.f32 %v1608_v17, %v3363_v56  ;;  %v2720_v53 = vpop.f32.mrb[58].mxu1  ;;  %v2792_v51 = vpop.f32.mrb[58].mxu0  ;;  %v1968_v56 = vsel %vm322_vm0, %v1773_v15, 0.0 }
 0x16d   : > { %v1967_v54 = vadd.f32 %v1966_v22, %v1965_v1  ;;  %v2066_v19 = vadd.f32 %v2065_v45, %v2064_v43  ;;  %v1713_v14 = vadd.f32 %v1617_v38, %v365_v49  ;;  %v1620_v59 = vadd.f32 %v2792_v51, %v3374_v41  ;;  %v2721_v60 = vpop.f32.mrb[59].mxu1  ;;  %v1611_v39 = vpop.f32.mrb[59].mxu0  ;;  %v367_v51 = vld [vmem:[#allocation2 + $0x60] sm:$0xff] }
 0x16e   : > { %v1776_v10 = vld [vmem:[#allocation2 + $0x30] sm:$0xff]  ;;  %v1711_v61 = vadd.f32 %v1609_v48, %v363_v44  ;;  %v3445_v2 = vadd.f32 %v2721_v60, %v2720_v53  ;;  %v1612_v21 = vadd.f32 %v1611_v39, %v3365_v29  ;;  %v3449_v63 = vadd.f32 %v2719_v46, %v3376_v5  ;;  %v366_v29 = vld [vmem:[#allocation2 + $0x58] sm:$0xff] }
 0x16f   : > { %v2069_v7 = vsel %vm322_vm0, %v2035_v4, 0.0  ;;  %v2068_v40 = vadd.f32 %v2067_v37, %v2066_v19  ;;  %v2503_v8 = vpack.c.bf16 %v1776_v10, %v1776_v10  ;;  %v1774_v13 = vld [vmem:[#allocation2 + $0x20] sm:$0xff]  ;;  %1745 = vst.msk [vmem:[#allocation2 + $0x50] sm:$0xff] %vm322_vm0, %v1713_v14  ;;  %v1969_v47 = vadd.f32 %v1968_v56, %v1967_v54  ;;  %v364_v37 = vld [vmem:[#allocation2 + $0x48] sm:$0xff]  ;;  %v369_v44 = vld [vmem:[#allocation2 + $0x70] sm:$0xff] }
 0x170   : > { %v2501_v41 = vpack.c.bf16 %v1774_v13, %v1774_v13  ;;  %v1970_v16 = vsel %vm322_vm0, %v1774_v13, 0.0  ;;  %v2036_v22 = vmul.f32 %v1774_v13, %v1774_v13  ;;  %1743 = vst.msk [vmem:[#allocation2 + $0x40] sm:$0xff] %vm322_vm0, %v1711_v61  ;;  %v1974_v5 = vsel %vm322_vm0, %v1776_v10, 0.0 }
 0x171   : > { %v1777_v62 = vld [vmem:[#allocation2 + $0x38] sm:$0xff]  ;;  %1937 = vst.msk [vmem:[%s3415_s10 + $0x18] sm:$0xf] %vm1930_vm1, %v2503_v8  ;;  %v2070_v15 = vadd.f32 %v2069_v7, %v2068_v40  ;;  %v1775_v20 = vld [vmem:[#allocation2 + $0x28] sm:$0xff]  ;;  %v2038_v11 = vmul.f32 %v1776_v10, %v1776_v10  ;;  %v1971_v25 = vadd.f32 %v1970_v16, %v1969_v47  ;;  %v1714_v50 = vadd.f32 %v1620_v59, %v366_v29 }
 0x172   : > { %v2504_v27 = vpack.c.bf16 %v1777_v62, %v1777_v62  ;;  %1935 = vst.msk [vmem:[%s3415_s10 + $0x10] sm:$0xf] %vm1930_vm1, %v2501_v41  ;;  %v2071_v26 = vsel %vm322_vm0, %v2036_v22, 0.0  ;;  %v2502_v3 = vpack.c.bf16 %v1775_v20, %v1775_v20  ;;  %v2723_v49 = vpop.f32.mrb[60].mxu1  ;;  %v2795_v31 = vpop.f32.mrb[60].mxu0  ;;  %v1972_v1 = vsel %vm322_vm0, %v1775_v20, 0.0 }
 0x173   : > { %v2072_v4 = vadd.f32 %v2071_v26, %v2070_v15  ;;  %v2037_v38 = vmul.f32 %v1775_v20, %v1775_v20  ;;  %v2724_v17 = vpop.f32.mrb[61].mxu1  ;;  %v1624_v43 = vpop.f32.mrb[61].mxu0  ;;  %v2039_v45 = vmul.f32 %v1777_v62, %v1777_v62  ;;  %v1973_v46 = vadd.f32 %v1972_v1, %v1971_v25  ;;  %1746 = vst.msk [vmem:[#allocation2 + $0x58] sm:$0xff] %vm322_vm0, %v1714_v50  ;;  %v368_v15 = vld [vmem:[#allocation2 + $0x68] sm:$0xff] }
 0x174   : > { %1938 = vst.msk [vmem:[%s3415_s10 + $0x1c] sm:$0xf] %vm1930_vm1, %v2504_v27  ;;  %1936 = vst.msk [vmem:[%s3415_s10 + $0x14] sm:$0xf] %vm1930_vm1, %v2502_v3  ;;  %v1712_v48 = vadd.f32 %v1612_v21, %v364_v37  ;;  %v1633_v53 = vadd.f32 %v2795_v31, %v3390_v35  ;;  %v2726_v54 = vpop.f32.mrb[62].mxu1  ;;  %v2796_v19 = vpop.f32.mrb[62].mxu0  ;;  %v2725_v60 = vadd.f32 %v2724_v17, %v2723_v49 }
 0x175   : > { %v2073_v14 = vsel %vm322_vm0, %v2037_v38, 0.0  ;;  %v1625_v59 = vadd.f32 %v1624_v43, %v3381_v34  ;;  %v1636_v39 = vadd.f32 %v2796_v19, %v3392_v9  ;;  %v2727_v10 = vpop.f32.mrb[63].mxu1  ;;  %v1627_v61 = vpop.f32.mrb[63].mxu0  ;;  %v1975_v56 = vadd.f32 %v1974_v5, %v1973_v46  ;;  %v370_v21 = vld [vmem:[#allocation2 + $0x78] sm:$0xff]  ;;  %v373_v3 = vld [vmem:[#allocation2 + $0x90] sm:$0xff] }
 0x176   : > { %v2074_v7 = vadd.f32 %v2073_v14, %v2072_v4  ;;  %v1780_v40 = vld [vmem:[#allocation2 + $0x50] sm:$0xff]  ;;  %1744 = vst.msk [vmem:[#allocation2 + $0x48] sm:$0xff] %vm322_vm0, %v1712_v48  ;;  %v1717_v35 = vadd.f32 %v1633_v53, %v369_v44  ;;  %v2728_v8 = vadd.f32 %v2727_v10, %v2726_v54  ;;  %v2075_v13 = vsel %vm322_vm0, %v2038_v11, 0.0  ;;  %v371_v44 = vld [vmem:[#allocation2 + $0x80] sm:$0xff] }
 0x177   : > { %v1976_v41 = vsel %vm322_vm0, %v1777_v62, 0.0  ;;  %v2507_v47 = vpack.c.bf16 %v1780_v40, %v1780_v40  ;;  %v1778_v34 = vld [vmem:[#allocation2 + $0x40] sm:$0xff]  ;;  %v1715_v16 = vadd.f32 %v1625_v59, %v367_v51  ;;  %v2077_v27 = vsel %vm322_vm0, %v2039_v45, 0.0 }
 0x178   : > { %v2076_v9 = vadd.f32 %v2075_v13, %v2074_v7  ;;  %v2505_v22 = vpack.c.bf16 %v1778_v34, %v1778_v34  ;;  %v1977_v29 = vadd.f32 %v1976_v41, %v1975_v56  ;;  %v1978_v5 = vsel %vm322_vm0, %v1778_v34, 0.0  ;;  %1749 = vst.msk [vmem:[#allocation2 + $0x70] sm:$0xff] %vm322_vm0, %v1717_v35  ;;  %v374_v7 = vld [vmem:[#allocation2 + $0x98] sm:$0xff] }
 0x179   : > { %1941 = vst.msk [vmem:[%s3415_s10 + $0x28] sm:$0xf] %vm1930_vm1, %v2507_v47  ;;  %v2040_v20 = vmul.f32 %v1778_v34, %v1778_v34  ;;  %v1718_v62 = vadd.f32 %v1636_v39, %v370_v21  ;;  %v1628_v37 = vadd.f32 %v1627_v61, %v3383_v55  ;;  %v3485_v31 = vadd.f32 %v2725_v60, %v3385_v42 }
 0x17a   : > { %1747 = vst.msk [vmem:[#allocation2 + $0x60] sm:$0xff] %vm322_vm0, %v1715_v16  ;;  %v1979_v11 = vadd.f32 %v1978_v5, %v1977_v29  ;;  %v2078_v25 = vadd.f32 %v2077_v27, %v2076_v9  ;;  %v2729_v26 = vpop.f32.mrb[64].mxu1  ;;  %v2799_v49 = vpop.f32.mrb[64].mxu0  ;;  %v3488_v4 = vadd.f32 %v2728_v8, %v3387_v52  ;;  %v3495_v43 = vadd.f32 %v3445_v2, %v3378_v32  ;;  %v1781_v42 = vld [vmem:[#allocation2 + $0x58] sm:$0xff] }
 0x17b   : > { %1939 = vst.msk [vmem:[%s3415_s10 + $0x20] sm:$0xf] %vm1930_vm1, %v2505_v22  ;;  %v2079_v1 = vsel %vm322_vm0, %v2040_v20, 0.0  ;;  %v1716_v38 = vadd.f32 %v1628_v37, %v368_v15  ;;  %v1649_v55 = vadd.f32 %v2799_v49, %v3419_v57  ;;  %v2730_v50 = vpop.f32.mrb[65].mxu1  ;;  %v1640_v17 = vpop.f32.mrb[65].mxu0  ;;  %v2042_v45 = vmul.f32 %v1780_v40, %v1780_v40  ;;  %v372_v22 = vld [vmem:[#allocation2 + $0x88] sm:$0xff] }
 0x17c   : > { %1750 = vst.msk [vmem:[#allocation2 + $0x78] sm:$0xff] %vm322_vm0, %v1718_v62  ;;  %v3497_v46 = vadd.f32 %v2730_v50, %v2729_v26  ;;  %v1641_v52 = vadd.f32 %v1640_v17, %v3399_v28  ;;  %v2732_v48 = vpop.f32.mrb[66].mxu1  ;;  %v2800_v53 = vpop.f32.mrb[66].mxu0  ;;  %v2080_v51 = vadd.f32 %v2079_v1, %v2078_v25  ;;  %v2508_v54 = vpack.c.bf16 %v1781_v42, %v1781_v42  ;;  %v377_v49 = vld [vmem:[#allocation2 + $0xb0] sm:$0xff] }
 0x17d   : > { %v2043_v19 = vmul.f32 %v1781_v42, %v1781_v42  ;;  %v1779_v57 = vld [vmem:[#allocation2 + $0x48] sm:$0xff]  ;;  %1748 = vst.msk [vmem:[#allocation2 + $0x68] sm:$0xff] %vm322_vm0, %v1716_v38  ;;  %v1721_v14 = vadd.f32 %v1649_v55, %v373_v3  ;;  %v2733_v60 = vpop.f32.mrb[67].mxu1  ;;  %v1643_v32 = vpop.f32.mrb[67].mxu0  ;;  %v1982_v28 = vsel %vm322_vm0, %v1780_v40, 0.0  ;;  %v1652_v35 = vadd.f32 %v2800_v53, %v3437_v23 }
 0x17e   : > { %v2506_v2 = vpack.c.bf16 %v1779_v57, %v1779_v57  ;;  %v1980_v59 = vsel %vm322_vm0, %v1779_v57, 0.0  ;;  %v2041_v39 = vmul.f32 %v1779_v57, %v1779_v57  ;;  %v1719_v10 = vadd.f32 %v1641_v52, %v371_v44  ;;  %1942 = vst.msk [vmem:[%s3415_s10 + $0x2c] sm:$0xf] %vm1930_vm1, %v2508_v54 }
 0x17f   : > { %v1981_v61 = vadd.f32 %v1980_v59, %v1979_v11  ;;  %v1784_v56 = vld [vmem:[#allocation2 + $0x70] sm:$0xff]  ;;  %1753 = vst.msk [vmem:[#allocation2 + $0x90] sm:$0xff] %vm322_vm0, %v1721_v14  ;;  %v3507_v21 = vadd.f32 %v2733_v60, %v2732_v48  ;;  %v2083_v8 = vsel %vm322_vm0, %v2042_v45, 0.0  ;;  %v1984_v13 = vsel %vm322_vm0, %v1781_v42, 0.0 }
 0x180   : > { %1940 = vst.msk [vmem:[%s3415_s10 + $0x24] sm:$0xf] %vm1930_vm1, %v2506_v2  ;;  %v2081_v40 = vsel %vm322_vm0, %v2041_v39, 0.0  ;;  %v2511_v41 = vpack.c.bf16 %v1784_v56, %v1784_v56  ;;  %v2085_v34 = vsel %vm322_vm0, %v2043_v19, 0.0  ;;  %v1722_v27 = vadd.f32 %v1652_v35, %v374_v7 }
 0x181   : > { %v1782_v47 = vld [vmem:[#allocation2 + $0x60] sm:$0xff]  ;;  %1751 = vst.msk [vmem:[#allocation2 + $0x80] sm:$0xff] %vm322_vm0, %v1719_v10  ;;  %v1983_v16 = vadd.f32 %v1982_v28, %v1981_v61  ;;  %v2082_v9 = vadd.f32 %v2081_v40, %v2080_v51  ;;  %v1644_v20 = vadd.f32 %v1643_v32, %v3404_v33  ;;  %v2046_v25 = vmul.f32 %v1784_v56, %v1784_v56 }
 0x182   : > { %v2509_v23 = vpack.c.bf16 %v1782_v47, %v1782_v47  ;;  %1945 = vst.msk [vmem:[%s3415_s10 + $0x38] sm:$0xf] %vm1930_vm1, %v2511_v41  ;;  %v1986_v29 = vsel %vm322_vm0, %v1782_v47, 0.0  ;;  %v2044_v5 = vmul.f32 %v1782_v47, %v1782_v47  ;;  %v2735_v62 = vpop.f32.mrb[68].mxu1  ;;  %v2803_v37 = vpop.f32.mrb[68].mxu0  ;;  %v1990_v57 = vsel %vm322_vm0, %v1784_v56, 0.0 }
 0x183   : > { %v1785_v15 = vld [vmem:[#allocation2 + $0x78] sm:$0xff]  ;;  %v2084_v11 = vadd.f32 %v2083_v8, %v2082_v9  ;;  %v1985_v26 = vadd.f32 %v1984_v13, %v1983_v16  ;;  %v2736_v1 = vpop.f32.mrb[69].mxu1  ;;  %v1656_v38 = vpop.f32.mrb[69].mxu0  ;;  %1754 = vst.msk [vmem:[#allocation2 + $0x98] sm:$0xff] %vm322_vm0, %v1722_v27  ;;  %v1720_v17 = vadd.f32 %v1644_v20, %v372_v22  ;;  %v1665_v33 = vadd.f32 %v2803_v37, %v3485_v31  ;;  %v375_v8 = vld [vmem:[#allocation2 + $0xa0] sm:$0xff]  ;;  %v376_v22 = vld [vmem:[#allocation2 + $0xa8] sm:$0xff] }
 0x184   : > { %1943 = vst.msk [vmem:[%s3415_s10 + $0x30] sm:$0xf] %vm1930_vm1, %v2509_v23  ;;  %v2512_v3 = vpack.c.bf16 %v1785_v15, %v1785_v15  ;;  %v2087_v55 = vsel %vm322_vm0, %v2044_v5, 0.0  ;;  %v2047_v50 = vmul.f32 %v1785_v15, %v1785_v15  ;;  %v1783_v44 = vld [vmem:[#allocation2 + $0x68] sm:$0xff]  ;;  %v2738_v45 = vpop.f32.mrb[70].mxu1  ;;  %v2804_v42 = vpop.f32.mrb[70].mxu0  ;;  %v2737_v31 = vadd.f32 %v2736_v1, %v2735_v62 }
 0x185   : > { %v1987_v52 = vadd.f32 %v1986_v29, %v1985_v26  ;;  %v2086_v48 = vadd.f32 %v2085_v34, %v2084_v11  ;;  %v2510_v53 = vpack.c.bf16 %v1783_v44, %v1783_v44  ;;  %v1988_v51 = vsel %vm322_vm0, %v1783_v44, 0.0  ;;  %v2739_v54 = vpop.f32.mrb[71].mxu1  ;;  %v1659_v19 = vpop.f32.mrb[71].mxu0  ;;  %1752 = vst.msk [vmem:[#allocation2 + $0x88] sm:$0xff] %vm322_vm0, %v1720_v17  ;;  %v378_v34 = vld [vmem:[#allocation2 + $0xb8] sm:$0xff] }
 0x186   : > { %1946 = vst.msk [vmem:[%s3415_s10 + $0x3c] sm:$0xf] %vm1930_vm1, %v2512_v3  ;;  %v2045_v14 = vmul.f32 %v1783_v44, %v1783_v44  ;;  %v1788_v60 = vld [vmem:[#allocation2 + $0x90] sm:$0xff]  ;;  %v1725_v32 = vadd.f32 %v1665_v33, %v377_v49  ;;  %v2091_v2 = vsel %vm322_vm0, %v2046_v25, 0.0  ;;  %v1992_v61 = vsel %vm322_vm0, %v1785_v15, 0.0 }
 0x187   : > { %v2088_v59 = vadd.f32 %v2087_v55, %v2086_v48  ;;  %1944 = vst.msk [vmem:[%s3415_s10 + $0x34] sm:$0xf] %vm1930_vm1, %v2510_v53  ;;  %v1989_v39 = vadd.f32 %v1988_v51, %v1987_v52  ;;  %v2515_v10 = vpack.c.bf16 %v1788_v60, %v1788_v60  ;;  %v2093_v56 = vsel %vm322_vm0, %v2047_v50, 0.0  ;;  %v381_v51 = vld [vmem:[#allocation2 + $0xd0] sm:$0xff] }
 0x188   : > { %v1786_v28 = vld [vmem:[#allocation2 + $0x80] sm:$0xff]  ;;  %v2089_v7 = vsel %vm322_vm0, %v2045_v14, 0.0  ;;  %1757 = vst.msk [vmem:[#allocation2 + $0xb0] sm:$0xff] %vm322_vm0, %v1725_v32  ;;  %v1657_v47 = vadd.f32 %v1656_v38, %v3449_v63  ;;  %v1668_v9 = vadd.f32 %v2804_v42, %v3488_v4  ;;  %v2740_v23 = vadd.f32 %v2739_v54, %v2738_v45 }
 0x189   : > { %v2513_v35 = vpack.c.bf16 %v1786_v28, %v1786_v28  ;;  %v1991_v13 = vadd.f32 %v1990_v57, %v1989_v39  ;;  %v2090_v40 = vadd.f32 %v2089_v7, %v2088_v59  ;;  %1949 = vst.msk [vmem:[%s3415_s10 + $0x48] sm:$0xf] %vm1930_vm1, %v2515_v10  ;;  %v2048_v41 = vmul.f32 %v1786_v28, %v1786_v28 }
 0x18a   : > { %v1994_v16 = vsel %vm322_vm0, %v1786_v28, 0.0  ;;  %v1660_v29 = vadd.f32 %v1659_v19, %v3495_v43  ;;  %v2741_v5 = vpop.f32.mrb[72].mxu1  ;;  %v2807_v15 = vpop.f32.mrb[72].mxu0  ;;  %v1998_v20 = vsel %vm322_vm0, %v1788_v60, 0.0  ;;  %v1789_v37 = vld [vmem:[#allocation2 + $0x98] sm:$0xff]  ;;  %v1723_v11 = vadd.f32 %v1657_v47, %v375_v8 }
 0x18b   : > { %1947 = vst.msk [vmem:[%s3415_s10 + $0x40] sm:$0xf] %vm1930_vm1, %v2513_v35  ;;  %v2092_v27 = vadd.f32 %v2091_v2, %v2090_v40  ;;  %v1993_v62 = vadd.f32 %v1992_v61, %v1991_v13  ;;  %v2742_v63 = vpop.f32.mrb[73].mxu1  ;;  %v1672_v25 = vpop.f32.mrb[73].mxu0  ;;  %v2050_v26 = vmul.f32 %v1788_v60, %v1788_v60  ;;  %v2095_v3 = vsel %vm322_vm0, %v2048_v41, 0.0 }
 0x18c   : > { %v2516_v49 = vpack.c.bf16 %v1789_v37, %v1789_v37  ;;  %v1726_v4 = vadd.f32 %v1668_v9, %v378_v34  ;;  %v2744_v1 = vpop.f32.mrb[74].mxu1  ;;  %v2808_v38 = vpop.f32.mrb[74].mxu0  ;;  %v1787_v50 = vld [vmem:[#allocation2 + $0x88] sm:$0xff]  ;;  %1755 = vst.msk [vmem:[#allocation2 + $0xa0] sm:$0xff] %vm322_vm0, %v1723_v11  ;;  %v1724_v44 = vadd.f32 %v1660_v29, %v376_v22  ;;  %v1520_v17 = vadd.f32 %v2737_v31, %v3322_v6 }
 0x18d   : > { %v1995_v55 = vadd.f32 %v1994_v16, %v1993_v62  ;;  %v2094_v43 = vadd.f32 %v2093_v56, %v2092_v27  ;;  %v2745_v33 = vpop.f32.mrb[75].mxu1  ;;  %v1675_v45 = vpop.f32.mrb[75].mxu0  ;;  %v2051_v42 = vmul.f32 %v1789_v37, %v1789_v37  ;;  %v2514_v52 = vpack.c.bf16 %v1787_v50, %v1787_v50  ;;  %v379_v62 = vld [vmem:[#allocation2 + $0xc0] sm:$0xff] }
 0x18e   : > { %1950 = vst.msk [vmem:[%s3415_s10 + $0x4c] sm:$0xf] %vm1930_vm1, %v2516_v49  ;;  %v1996_v48 = vsel %vm322_vm0, %v1787_v50, 0.0  ;;  %v2049_v53 = vmul.f32 %v1787_v50, %v1787_v50  ;;  %v1681_v6 = vadd.f32 %v2807_v15, %v1520_v17  ;;  %v2743_v14 = vadd.f32 %v2742_v63, %v2741_v5 }
 0x18f   : > { %1758 = vst.msk [vmem:[#allocation2 + $0xb8] sm:$0xff] %vm322_vm0, %v1726_v4  ;;  %v2096_v54 = vadd.f32 %v2095_v3, %v2094_v43  ;;  %v1997_v19 = vadd.f32 %v1996_v48, %v1995_v55  ;;  %v3553_v57 = vld [vmem:[#allocation2 + $0xb0] sm:$0xff]  ;;  %1756 = vst.msk [vmem:[#allocation2 + $0xa8] sm:$0xff] %vm322_vm0, %v1724_v44  ;;  %v2099_v60 = vsel %vm322_vm0, %v2050_v26, 0.0  ;;  %v2000_v32 = vsel %vm322_vm0, %v1789_v37, 0.0  ;;  %v382_v26 = vld [vmem:[#allocation2 + $0xd8] sm:$0xff] }
 0x190   : > { %1948 = vst.msk [vmem:[%s3415_s10 + $0x44] sm:$0xf] %vm1930_vm1, %v2514_v52  ;;  %v2097_v31 = vsel %vm322_vm0, %v2049_v53, 0.0  ;;  %v2519_v2 = vpack.c.bf16 %v3553_v57, %v3553_v57  ;;  %v1729_v10 = vadd.f32 %v1681_v6, %v381_v51  ;;  %v1512_v28 = vadd.f32 %v3497_v46, %v3318_v58  ;;  %v380_v3 = vld [vmem:[#allocation2 + $0xc8] sm:$0xff]  ;;  %v385_v51 = vld [vmem:[#allocation2 + $0xf0] sm:$0xff] }
 0x191   : > { %v1999_v59 = vadd.f32 %v1998_v20, %v1997_v19  ;;  %v2098_v39 = vadd.f32 %v2097_v31, %v2096_v54  ;;  %v2101_v61 = vsel %vm322_vm0, %v2051_v42, 0.0  ;;  %v1523_v56 = vadd.f32 %v2740_v23, %v3324_v12  ;;  %v383_v42 = vld [vmem:[#allocation2 + $0xe0] sm:$0xff] }
 0x192   : > { %1953 = vst.msk [vmem:[%s3415_s10 + $0x58] sm:$0xf] %vm1930_vm1, %v2519_v2  ;;  %v2746_v7 = vadd.f32 %v2745_v33, %v2744_v1  ;;  %v1515_v35 = vadd.f32 %v3507_v21, %v3320_v0  ;;  %v2747_v8 = vpop.f32.mrb[76].mxu1  ;;  %v2811_v13 = vpop.f32.mrb[76].mxu0  ;;  %v1673_v47 = vadd.f32 %v1672_v25, %v1512_v28  ;;  %v1528_v58 = vadd.f32 %v2743_v14, %v3326_v18  ;;  %v384_v2 = vld [vmem:[#allocation2 + $0xe8] sm:$0xff] }
 0x193   : > { %v2100_v40 = vadd.f32 %v2099_v60, %v2098_v39  ;;  %v2001_v41 = vadd.f32 %v2000_v32, %v1999_v59  ;;  %1761 = vst.msk [vmem:[#allocation2 + $0xd0] sm:$0xff] %vm322_vm0, %v1729_v10  ;;  %v2748_v34 = vpop.f32.mrb[77].mxu1  ;;  %v1688_v46 = vpop.f32.mrb[77].mxu0  ;;  %v1790_v16 = vld [vmem:[#allocation2 + $0xa0] sm:$0xff]  ;;  %v1684_v9 = vadd.f32 %v2808_v38, %v1523_v56  ;;  %v2054_v38 = vmul.f32 %v3553_v57, %v3553_v57  ;;  %v386_v10 = vld [vmem:[#allocation2 + $0xf8] sm:$0xff] }
 0x194   : > { %v1676_v22 = vadd.f32 %v1675_v45, %v1515_v35  ;;  %v2749_v29 = vadd.f32 %v2748_v34, %v2747_v8  ;;  %v2750_v12 = vpop.f32.mrb[78].mxu1  ;;  %v2812_v23 = vpop.f32.mrb[78].mxu0  ;;  %v1531_v0 = vadd.f32 %v2746_v7, %v3328_v24  ;;  %v2517_v21 = vpack.c.bf16 %v1790_v16, %v1790_v16 }
 0x195   : > { %v2002_v5 = vsel %vm322_vm0, %v1790_v16, 0.0  ;;  %v2052_v15 = vmul.f32 %v1790_v16, %v1790_v16  ;;  %v2102_v27 = vadd.f32 %v2101_v61, %v2100_v40  ;;  %v2751_v37 = vpop.f32.mrb[79].mxu1  ;;  %v1691_v18 = vpop.f32.mrb[79].mxu0  ;;  %v1727_v50 = vadd.f32 %v1673_v47, %v379_v62 }
 0x196   : > { %v1793_v20 = vld [vmem:[#allocation2 + $0xb8] sm:$0xff]  ;;  %v2003_v11 = vadd.f32 %v2002_v5, %v2001_v41  ;;  %v1791_v25 = vld [vmem:[#allocation2 + $0xa8] sm:$0xff]  ;;  %1951 = vst.msk [vmem:[%s3415_s10 + $0x50] sm:$0xf] %vm1930_vm1, %v2517_v21  ;;  %v1730_v17 = vadd.f32 %v1684_v9, %v382_v26  ;;  %v1728_v33 = vadd.f32 %v1676_v22, %v380_v3  ;;  %v1536_v45 = vadd.f32 %v2749_v29, %v3330_v30 }
 0x197   : > { %v2520_v63 = vpack.c.bf16 %v1793_v20, %v1793_v20  ;;  %v2103_v24 = vsel %vm322_vm0, %v2052_v15, 0.0  ;;  %v2518_v49 = vpack.c.bf16 %v1791_v25, %v1791_v25  ;;  %v2004_v4 = vsel %vm322_vm0, %v1791_v25, 0.0  ;;  %1759 = vst.msk [vmem:[#allocation2 + $0xc0] sm:$0xff] %vm322_vm0, %v1727_v50 }
 0x198   : > { %v2053_v1 = vmul.f32 %v1791_v25, %v1791_v25  ;;  %v2104_v55 = vadd.f32 %v2103_v24, %v2102_v27  ;;  %v2005_v43 = vadd.f32 %v2004_v4, %v2003_v11  ;;  %v2006_v52 = vsel %vm322_vm0, %v3553_v57, 0.0  ;;  %1762 = vst.msk [vmem:[#allocation2 + $0xd8] sm:$0xff] %vm322_vm0, %v1730_v17  ;;  %1760 = vst.msk [vmem:[#allocation2 + $0xc8] sm:$0xff] %vm322_vm0, %v1728_v33 }
 0x199   : > { %1954 = vst.msk [vmem:[%s3415_s10 + $0x5c] sm:$0xf] %vm1930_vm1, %v2520_v63  ;;  %1952 = vst.msk [vmem:[%s3415_s10 + $0x54] sm:$0xf] %vm1930_vm1, %v2518_v49  ;;  %v1689_v54 = vadd.f32 %v1688_v46, %v1528_v58  ;;  %v2752_v19 = vadd.f32 %v2751_v37, %v2750_v12  ;;  %v1697_v60 = vadd.f32 %v2811_v13, %v1536_v45  ;;  %v2107_v30 = vsel %vm322_vm0, %v2054_v38, 0.0 }
 0x19a   : > { %v2105_v44 = vsel %vm322_vm0, %v2053_v1, 0.0  ;;  %v1796_v53 = vld [vmem:[#allocation2 + $0xd0] sm:$0xff]  ;;  %v2007_v6 = vadd.f32 %v2006_v52, %v2005_v43  ;;  %v2055_v32 = vmul.f32 %v1793_v20, %v1793_v20  ;;  %v1692_v28 = vadd.f32 %v1691_v18, %v1531_v0 }
 0x19b   : > { %v2106_v48 = vadd.f32 %v2105_v44, %v2104_v55  ;;  %v2523_v14 = vpack.c.bf16 %v1796_v53, %v1796_v53  ;;  %v1731_v31 = vadd.f32 %v1689_v54, %v383_v42  ;;  %v1539_v57 = vadd.f32 %v2752_v19, %v3332_v36 }
 0x19c   : > { %v1733_v39 = vadd.f32 %v1697_v60, %v385_v51  ;;  %v2008_v61 = vsel %vm322_vm0, %v1793_v20, 0.0  ;;  %v1732_v35 = vadd.f32 %v1692_v28, %v384_v2  ;;  %v2109_v8 = vsel %vm322_vm0, %v2055_v32, 0.0 }
 0x19d   : > { %v2108_v59 = vadd.f32 %v2107_v30, %v2106_v48  ;;  %1957 = vst.msk [vmem:[%s3415_s10 + $0x68] sm:$0xf] %vm1930_vm1, %v2523_v14  ;;  %v1700_v56 = vadd.f32 %v2812_v23, %v1539_v57  ;;  %v2009_v7 = vadd.f32 %v2008_v61, %v2007_v6  ;;  %v2058_v16 = vmul.f32 %v1796_v53, %v1796_v53 }
 0x19e   : > { %1763 = vst.msk [vmem:[#allocation2 + $0xe0] sm:$0xff] %vm322_vm0, %v1731_v31  ;;  %1765 = vst.msk [vmem:[#allocation2 + $0xf0] sm:$0xff] %vm322_vm0, %v1733_v39  ;;  %v1794_v13 = vld [vmem:[#allocation2 + $0xc0] sm:$0xff]  ;;  %v2014_v20 = vsel %vm322_vm0, %v1796_v53, 0.0 }
 0x19f   : > { %v1734_v36 = vadd.f32 %v1700_v56, %v386_v10  ;;  %v2110_v40 = vadd.f32 %v2109_v8, %v2108_v59  ;;  %1764 = vst.msk [vmem:[#allocation2 + $0xe8] sm:$0xff] %vm322_vm0, %v1732_v35  ;;  %v2521_v41 = vpack.c.bf16 %v1794_v13, %v1794_v13  ;;  %v2010_v47 = vsel %vm322_vm0, %v1794_v13, 0.0  ;;  %v1797_v58 = vld [vmem:[#allocation2 + $0xd8] sm:$0xff]  ;;  %v1795_v46 = vld [vmem:[#allocation2 + $0xc8] sm:$0xff] }
 0x1a0   : > { %v2056_v34 = vmul.f32 %v1794_v13, %v1794_v13  ;;  %v2011_v9 = vadd.f32 %v2010_v47, %v2009_v7  ;;  %v2524_v22 = vpack.c.bf16 %v1797_v58, %v1797_v58  ;;  %v2059_v29 = vmul.f32 %v1797_v58, %v1797_v58 }
 0x1a1   : > { %1766 = vst.msk [vmem:[#allocation2 + $0xf8] sm:$0xff] %vm322_vm0, %v1734_v36  ;;  %v2522_v23 = vpack.c.bf16 %v1795_v46, %v1795_v46  ;;  %v2012_v0 = vsel %vm322_vm0, %v1795_v46, 0.0  ;;  %v2057_v21 = vmul.f32 %v1795_v46, %v1795_v46  ;;  %v2115_v3 = vsel %vm322_vm0, %v2058_v16, 0.0 }
 0x1a2   : > { %1955 = vst.msk [vmem:[%s3415_s10 + $0x60] sm:$0xf] %vm1930_vm1, %v2521_v41  ;;  %v2111_v12 = vsel %vm322_vm0, %v2056_v34, 0.0  ;;  %1958 = vst.msk [vmem:[%s3415_s10 + $0x6c] sm:$0xf] %vm1930_vm1, %v2524_v22  ;;  %v2013_v15 = vadd.f32 %v2012_v0, %v2011_v9  ;;  %v2016_v24 = vsel %vm322_vm0, %v1797_v58, 0.0 }
 0x1a3   : > { %v2112_v5 = vadd.f32 %v2111_v12, %v2110_v40  ;;  %1956 = vst.msk [vmem:[%s3415_s10 + $0x64] sm:$0xf] %vm1930_vm1, %v2522_v23  ;;  %v2113_v62 = vsel %vm322_vm0, %v2057_v21, 0.0  ;;  %v2117_v49 = vsel %vm322_vm0, %v2059_v29, 0.0 }
 0x1a4   : > { %v2015_v63 = vadd.f32 %v2014_v20, %v2013_v15 }
 0x1a5   : > { %v1798_v27 = vld [vmem:[#allocation2 + $0xe0] sm:$0xff]  ;;  %v1800_v37 = vld [vmem:[#allocation2 + $0xf0] sm:$0xff]  ;;  %v2114_v25 = vadd.f32 %v2113_v62, %v2112_v5 }
 0x1a6   : > { %v2525_v18 = vpack.c.bf16 %v1798_v27, %v1798_v27  ;;  %v2060_v11 = vmul.f32 %v1798_v27, %v1798_v27  ;;  %v2527_v26 = vpack.c.bf16 %v1800_v37, %v1800_v37  ;;  %v2018_v4 = vsel %vm322_vm0, %v1798_v27, 0.0  ;;  %v1799_v1 = vld [vmem:[#allocation2 + $0xe8] sm:$0xff] }
 0x1a7   : > { %v2116_v38 = vadd.f32 %v2115_v3, %v2114_v25  ;;  %v2062_v55 = vmul.f32 %v1800_v37, %v1800_v37  ;;  %v2017_v43 = vadd.f32 %v2016_v24, %v2015_v63  ;;  %v2526_v44 = vpack.c.bf16 %v1799_v1, %v1799_v1 }
 0x1a8   : > { %1959 = vst.msk [vmem:[%s3415_s10 + $0x70] sm:$0xf] %vm1930_vm1, %v2525_v18  ;;  %1961 = vst.msk [vmem:[%s3415_s10 + $0x78] sm:$0xf] %vm1930_vm1, %v2527_v26  ;;  %v1801_v50 = vld [vmem:[#allocation2 + $0xf8] sm:$0xff]  ;;  %v2119_v17 = vsel %vm322_vm0, %v2060_v11, 0.0  ;;  %v2061_v42 = vmul.f32 %v1799_v1, %v1799_v1 }
 0x1a9   : > { %v2528_v33 = vpack.c.bf16 %v1801_v50, %v1801_v50  ;;  %v2020_v45 = vsel %vm322_vm0, %v1799_v1, 0.0  ;;  %v2019_v52 = vadd.f32 %v2018_v4, %v2017_v43  ;;  %v2118_v48 = vadd.f32 %v2117_v49, %v2116_v38  ;;  %1960 = vst.msk [vmem:[%s3415_s10 + $0x74] sm:$0xf] %vm1930_vm1, %v2526_v44 }
 0x1aa   : > { %v2063_v53 = vmul.f32 %v1801_v50, %v1801_v50  ;;  %v2022_v51 = vsel %vm322_vm0, %v1800_v37, 0.0  ;;  %v2121_v54 = vsel %vm322_vm0, %v2061_v42, 0.0  ;;  %v2024_v14 = vsel %vm322_vm0, %v1801_v50, 0.0 }
 0x1ab   : > { %1962 = vst.msk [vmem:[%s3415_s10 + $0x7c] sm:$0xf] %vm1930_vm1, %v2528_v33  ;;  %v2120_v19 = vadd.f32 %v2119_v17, %v2118_v48  ;;  %v2021_v6 = vadd.f32 %v2020_v45, %v2019_v52  ;;  %v2123_v60 = vsel %vm322_vm0, %v2062_v55, 0.0 }
 0x1ac   : > { %v2125_v31 = vsel %vm322_vm0, %v2063_v53, 0.0 }
 0x1ad   : > { %v2023_v30 = vadd.f32 %v2022_v51, %v2021_v6  ;;  %v2122_v32 = vadd.f32 %v2121_v54, %v2120_v19 }
 0x1af   : > { %v2025_v57 = vadd.f32 %v2024_v14, %v2023_v30  ;;  %v2124_v2 = vadd.f32 %v2123_v60, %v2122_v32 }
 0x1b1   : > { %v2026_v59 = vrot.slane %v2025_v57, 4  ;;  %v2126_v39 = vadd.f32 %v2125_v31, %v2124_v2 }
 0x1b3   : > { %v2027_v10 = vadd.f32 %v2026_v59, %v2025_v57  ;;  %v2127_v28 = vrot.slane %v2126_v39, 4 }
 0x1b5   : > { %v2028_v61 = vrot.slane %v2027_v10, 2  ;;  %v2128_v56 = vadd.f32 %v2127_v28, %v2126_v39 }
 0x1b7   : > { %v2029_v7 = vadd.f32 %v2028_v61, %v2027_v10  ;;  %v2129_v35 = vrot.slane %v2128_v56, 2 }
 0x1b9   : > { %v2030_v8 = vrot.slane %v2029_v7, 1  ;;  %v2130_v36 = vadd.f32 %v2129_v35, %v2128_v56 }
 0x1bb   : > { %v2031_v13 = vadd.f32 %v2030_v8, %v2029_v7  ;;  %v2131_v40 = vrot.slane %v2130_v36, 1 }
 0x1bd   : > { %v2132_v41 = vadd.f32 %v2131_v40, %v2130_v36  ;;  %2133 = vst.msk [vmem:[%s309_s14] sm:$0xff] %vm322_vm0, %v2031_v13 }
 0x1bf   : > { %2134 = vst.msk [vmem:[%s316_s23] sm:$0xff] %vm322_vm0, %v2132_v41 }
 0x1c0 PF: > { %s15_s17 = sadd.s32 1, %s3025_s17   ;;  %s3656_s15 = smov %s3021_s16 }
 0x1c1   : > { %p12_p6 = scmp.ge.s32.totalorder %s15_s17, 4   ;;  %s3657_s16 = smov %s3659_s18 }
 0x1c3   :  { %14 = sbr.rel (!%p12_p6) target bundleno = 2 (0x2), region = 93 }

// kernel: net_forward.27
= control target key start
LH: loop header
LB: loop body
LE: loop exit
PB: predicated region body
PF: predicated region fallthrough
CT: control target
= control target key end

     0   :  { %s1608_s15 = smov 0   ;;  %s1610_s16 = smov 0   ;;  %s1786_s0 = inlined_call_operand.vmem [shape: bf16[128,576], index: 0, kind: input, shape index: {}]   ;;  %s1787_s1 = inlined_call_operand.vmem [shape: bf16[576,128], index: 1, kind: input, shape index: {}]   ;;  %s1788_s2 = inlined_call_operand.vmem [shape: bf16[128,128], index: 2, kind: output, shape index: {0}]   ;;  %s1789_s3 = inlined_call_operand.vmem [shape: f32[16,128], index: 3, kind: output, shape index: {1}]   ;;  %s1790_s4 = inlined_call_operand.vmem [shape: f32[16,128], index: 4, kind: output, shape index: {2}]  }
   0x1   :  { %s1612_s17 = smov 0  }
   0x2 LB: > { %s34_s18 = sadd.s32 1, %s1577_s16  ;;  %p1250_p0 = scmp.ge.s32.totalorder %s1581_s17, 1  ;;  %s1581_s17 = sphi %s1612_s17, %s15_s17   ;;  %s1577_s16 = sphi %s1610_s16, %s1792_s16   ;;  %s1573_s15 = sphi %s1608_s15, %s1791_s15  }
   0x3   : > { %p36_p1 = scmp.ge.s32.totalorder %s34_s18, 2  ;;  %p217_p2 = scmp.lt.s32.totalorder %s1581_s17, 3 }
   0x5   : > { %s1794_s18 = smov (%p36_p1, %s34_s18), 0  ;;  %p218_p3 = pnand %p1250_p0, %p217_p2 }
   0x6   : > { %v1495_v0 = vld [vmem:[%s1787_s1 + $0x40] sm:$0xff] (!%p218_p3)   ;;  %v1499_v4 = vld [vmem:[%s1787_s1 + $0x48] sm:$0xff] (!%p218_p3)   ;;  %v1503_v8 = vld [vmem:[%s1787_s1 + $0x50] sm:$0xff] (!%p218_p3)   ;;  %s1251_s27 = sshll.u32 (!%p218_p3), %s1573_s15, 3  ;;  %vm750_vm0 = vcmask (!%p218_p3), 523264   ;;  %p303_p5 = scmp.lt.s32.totalorder (!%p218_p3), %s1573_s15, 1 }
   0x7   : > { %221 = sbr.rel (%p218_p3) target bundleno = 318 (0x13e), region = 28  ;;  %v1496_v1 = vld [vmem:[%s1787_s1 + $0xc0] sm:$0xff] (!%p218_p3)   ;;  %1358 = vmatprep.subr.bf16.mxu0 (!%p218_p3), %v1495_v0  ;;  %v1500_v5 = vld [vmem:[%s1787_s1 + $0xc8] sm:$0xff] (!%p218_p3)   ;;  %v1504_v9 = vld [vmem:[%s1787_s1 + $0xd0] sm:$0xff] (!%p218_p3)   ;;  %p275_p4 = scmp.lt.s32.totalorder (!%p218_p3), %s1251_s27, 15 }
   0x8   : > { %v1497_v2 = vld [vmem:[%s1787_s1] sm:$0xff] (!%p218_p3)   ;;  %1398 = vmatprep.subr.bf16.mxu1 (!%p218_p3), %v1496_v1  ;;  %v1501_v6 = vld [vmem:[%s1787_s1 + $0x8] sm:$0xff] (!%p218_p3)   ;;  %v1505_v10 = vld [vmem:[%s1787_s1 + $0x10] sm:$0xff] (!%p218_p3)  }
   0x9   : > { %v1498_v3 = vld [vmem:[%s1787_s1 + $0x80] sm:$0xff] (!%p218_p3)   ;;  %1359 = vmatpush3.bf16.msra.mxu0 (!%p218_p3), %v1497_v2  ;;  %v1502_v7 = vld [vmem:[%s1787_s1 + $0x88] sm:$0xff] (!%p218_p3)   ;;  %v1506_v11 = vld [vmem:[%s1787_s1 + $0x90] sm:$0xff] (!%p218_p3)  }
   0xa   : > { %1399 = vmatpush3.bf16.msra.mxu1 (!%p218_p3), %v1498_v3  ;;  %1360 = vmatprep.subr.bf16.mxu0 (!%p218_p3), %v1499_v4  ;;  %v1507_v12 = vld [vmem:[%s1787_s1 + $0x58] sm:$0xff] (!%p218_p3)   ;;  %v1511_v16 = vld [vmem:[%s1787_s1 + $0x60] sm:$0xff] (!%p218_p3)   ;;  %v1515_v20 = vld [vmem:[%s1787_s1 + $0x68] sm:$0xff] (!%p218_p3)  }
   0xb   : > { %1400 = vmatprep.subr.bf16.mxu1 (!%p218_p3), %v1500_v5  ;;  %v1508_v13 = vld [vmem:[%s1787_s1 + $0xd8] sm:$0xff] (!%p218_p3)   ;;  %v1512_v17 = vld [vmem:[%s1787_s1 + $0xe0] sm:$0xff] (!%p218_p3)   ;;  %v1516_v21 = vld [vmem:[%s1787_s1 + $0xe8] sm:$0xff] (!%p218_p3)  }
   0xc   : > { %v1509_v14 = vld [vmem:[%s1787_s1 + $0x18] sm:$0xff] (!%p218_p3)   ;;  %v1513_v18 = vld [vmem:[%s1787_s1 + $0x20] sm:$0xff] (!%p218_p3)   ;;  %v1517_v22 = vld [vmem:[%s1787_s1 + $0x28] sm:$0xff] (!%p218_p3)  }
   0xd   : > { %1361 = vmatpush3.bf16.msra.mxu0 (!%p218_p3), %v1501_v6  ;;  %v1510_v15 = vld [vmem:[%s1787_s1 + $0x98] sm:$0xff] (!%p218_p3)   ;;  %v1514_v19 = vld [vmem:[%s1787_s1 + $0xa0] sm:$0xff] (!%p218_p3)   ;;  %v1518_v23 = vld [vmem:[%s1787_s1 + $0xa8] sm:$0xff] (!%p218_p3)  }
   0xe   : > { %1401 = vmatpush3.bf16.msra.mxu1 %v1502_v7  ;;  %1362 = vmatprep.subr.bf16.mxu0 %v1503_v8  ;;  %s1796_s27 = smov (!%p275_p4, %s1251_s27), 15  ;;  %v1519_v24 = vld [vmem:[%s1787_s1 + $0x70] sm:$0xff]   ;;  %v1523_v28 = vld [vmem:[%s1787_s1 + $0x78] sm:$0xff]   ;;  %v1533_v36 = vld [vmem:[%s1787_s1 + $0x100] sm:$0xff]   ;;  %s1798_s15 = smov (!%p303_p5, %s1573_s15), 1 }
   0xf   : > { %1402 = vmatprep.subr.bf16.mxu1 %v1504_v9  ;;  %v1520_v25 = vld [vmem:[%s1787_s1 + $0xf0] sm:$0xff]   ;;  %s1470_s29 = smul.u32 20, %s1796_s27  ;;  %v1524_v29 = vld [vmem:[%s1787_s1 + $0xf8] sm:$0xff]   ;;  %v1540_v39 = vld [vmem:[%s1787_s1 + $0x108] sm:$0xff]   ;;  %s1254_s6 = sshll.u32 %s1796_s27, 2 }
  0x10   : > { %v1521_v26 = vld [vmem:[%s1787_s1 + $0x30] sm:$0xff]   ;;  %v1525_v30 = vld [vmem:[%s1787_s1 + $0x38] sm:$0xff]   ;;  %s301_s9 = scalar_lea.vmem %s1788_s2, %s1254_s6  ;;  %s1255_s27 = sshll.u32 %s1798_s15, 3 }
  0x11   : > { %1363 = vmatpush3.bf16.msra.mxu0 %v1505_v10  ;;  %v1522_v27 = vld [vmem:[%s1787_s1 + $0xb0] sm:$0xff]   ;;  %s1725_s14 = scalar_lea.vmem %s1786_s0, %s1470_s29  ;;  %v1526_v31 = vld [vmem:[%s1787_s1 + $0xb8] sm:$0xff]   ;;  %s309_s12 = scalar_lea.vmem %s1789_s3, %s1255_s27 }
  0x12   : > { %1403 = vmatpush3.bf16.msra.mxu1 %v1506_v11  ;;  %1364 = vmatprep.subr.bf16.mxu0 %v1507_v12  ;;  %v1527_v32 = vld [vmem:[%s1725_s14] ss:$20 sps:$4 sm:$0xff]   ;;  %v1529_v33 = vld [vmem:[%s1725_s14 + $0x4] ss:$20 sps:$4 sm:$0xff]   ;;  %v1530_v34 = vld [vmem:[%s1725_s14 + $0x8] ss:$20 sps:$4 sm:$0xff]   ;;  %s316_s19 = scalar_lea.vmem %s1790_s4, %s1255_s27 }
  0x13   : > { %1404 = vmatprep.subr.bf16.mxu1 %v1508_v13  ;;  %v1532_v35 = vld [vmem:[%s1725_s14 + $0xc] ss:$20 sps:$4 sm:$0xff]   ;;  %795 = vmatprep.mubr.bf16.mxu0 %v1529_v33  ;;  %v1536_v38 = vld [vmem:[%s1725_s14 + $0x34] ss:$20 sps:$4 sm:$0xff]   ;;  %v1539_v41 = vld [vmem:[%s1725_s14 + $0x30] ss:$20 sps:$4 sm:$0xff]  }
  0x14   : > { %860 = vmatprep.mubr.bf16.mxu1 %v1532_v35  ;;  %v1534_v37 = vld [vmem:[%s1725_s14 + $0x2c] ss:$20 sps:$4 sm:$0xff]   ;;  %v1538_v40 = vld [vmem:[%s1725_s14 + $0x28] ss:$20 sps:$4 sm:$0xff]   ;;  %v1547_v44 = vld [vmem:[%s1787_s1 + $0x110] sm:$0xff]  }
  0x15   : > { %1365 = vmatpush3.bf16.msra.mxu0 %v1509_v14  ;;  %v1541_v42 = vld [vmem:[%s1725_s14 + $0x54] ss:$20 sps:$4 sm:$0xff]   ;;  %v1543_v43 = vld [vmem:[%s1725_s14 + $0x5c] ss:$20 sps:$4 sm:$0xff]   ;;  %v1546_v47 = vld [vmem:[%s1725_s14 + $0x58] ss:$20 sps:$4 sm:$0xff]  }
  0x16   : > { %1405 = vmatpush3.bf16.msra.mxu1 %v1510_v15  ;;  %1366 = vmatprep.subr.bf16.mxu0 %v1511_v16  ;;  %v1554_v45 = vld [vmem:[%s1787_s1 + $0x118] sm:$0xff]   ;;  %v1545_v46 = vld [vmem:[%s1725_s14 + $0x50] ss:$20 sps:$4 sm:$0xff]   ;;  %v1553_v51 = vld [vmem:[%s1725_s14 + $0x80] ss:$20 sps:$4 sm:$0xff]  }
  0x17   : > { %1406 = vmatprep.subr.bf16.mxu1 %v1512_v17  ;;  %v1548_v48 = vld [vmem:[%s1725_s14 + $0x7c] ss:$20 sps:$4 sm:$0xff]   ;;  %v1550_v49 = vld [vmem:[%s1725_s14 + $0x84] ss:$20 sps:$4 sm:$0xff]   ;;  %v1556_v53 = vld [vmem:[%s1725_s14 + $0x60] ss:$20 sps:$4 sm:$0xff]  }
  0x18   : > { %v1552_v50 = vld [vmem:[%s1725_s14 + $0x78] ss:$20 sps:$4 sm:$0xff]   ;;  %v1555_v52 = vld [vmem:[%s1725_s14 + $0x10] ss:$20 sps:$4 sm:$0xff]   ;;  %v1558_v55 = vld [vmem:[%s1725_s14 + $0x88] ss:$20 sps:$4 sm:$0xff]  }
  0x19   : > { %1367 = vmatpush3.bf16.msra.mxu0 %v1513_v18  ;;  %v1557_v54 = vld [vmem:[%s1725_s14 + $0x38] ss:$20 sps:$4 sm:$0xff]  }
  0x1a   : > { %1407 = vmatpush3.bf16.msra.mxu1 %v1514_v19  ;;  %1368 = vmatprep.subr.bf16.mxu0 %v1515_v20 }
  0x1b   : > { %1408 = vmatprep.subr.bf16.mxu1 %v1516_v21 }
  0x1d   : > { %1369 = vmatpush3.bf16.msra.mxu0 %v1517_v22 }
  0x1e   : > { %1409 = vmatpush3.bf16.msra.mxu1 %v1518_v23  ;;  %1370 = vmatprep.subr.bf16.mxu0 %v1519_v24 }
  0x1f   : > { %1410 = vmatprep.subr.bf16.mxu1 %v1520_v25 }
  0x21   : > { %1371 = vmatpush3.bf16.msra.mxu0 %v1521_v26 }
  0x22   : > { %1411 = vmatpush3.bf16.msra.mxu1 %v1522_v27  ;;  %1372 = vmatprep.subr.bf16.mxu0 %v1523_v28 }
  0x23   : > { %1412 = vmatprep.subr.bf16.mxu1 %v1524_v29 }
  0x25   : > { %1373 = vmatpush3.bf16.msra.mxu0 %v1525_v30 }
  0x26   : > { %1413 = vmatpush3.bf16.msra.mxu1 %v1526_v31  ;;  %1446 = vmatprep.subr.bf16.mxu0 %v1533_v36 }
  0x27   : > { %1462 = vmatprep.subr.bf16.mxu1 %v1533_v36 }
  0x28   : > { %796 = vmatmul.mubr.bf16.vlgmr.msra.gmra.mrb[0].mxu0 %v1527_v32 }
  0x29   : > { %861 = vmatmul.mubr.bf16.vlgmr.msra.gmra.mrb[0].mxu1 %v1530_v34  ;;  %1447 = vmatpush3.bf16.msra.mxu0 %v1533_v36 }
  0x2a   : > { %803 = vmatprep.mubr.bf16.mxu0 %v1534_v37  ;;  %868 = vmatprep.mubr.bf16.mxu1 %v1536_v38 }
  0x2b   : > { %1466 = vmatpush3.bf16.msra.mxu1 %v1533_v36  ;;  %1448 = vmatprep.subr.bf16.mxu0 %v1540_v39 }
  0x2c   : > { %1463 = vmatprep.subr.bf16.mxu1 %v1540_v39 }
  0x2d   : > { %1449 = vmatpush3.bf16.msra.mxu0 %v1540_v39 }
  0x2e   : > { %1450 = vmatprep.subr.bf16.mxu0 %v1547_v44 }
  0x2f   : > { %1467 = vmatpush3.bf16.msra.mxu1 %v1540_v39 }
  0x30   : > { %804 = vmatmul.mubr.bf16.gmra.mrb[4].mxu0 %v1538_v40  ;;  %1464 = vmatprep.subr.bf16.mxu1 %v1547_v44 }
  0x31   : > { %869 = vmatmul.mubr.bf16.gmra.mrb[4].mxu1 %v1539_v41  ;;  %811 = vmatprep.mubr.bf16.mxu0 %v1541_v42 }
  0x32   : > { %876 = vmatprep.mubr.bf16.mxu1 %v1543_v43  ;;  %1451 = vmatpush3.bf16.msra.mxu0 %v1547_v44 }
  0x33   : > { %1452 = vmatprep.subr.bf16.mxu0 %v1554_v45  ;;  %1468 = vmatpush3.bf16.msra.mxu1 %v1547_v44 }
  0x34   : > { %1465 = vmatprep.subr.bf16.mxu1 %v1554_v45 }
  0x36   : > { %1453 = vmatpush3.bf16.msra.mxu0 %v1554_v45 }
  0x37   : > { %1469 = vmatpush3.bf16.msra.mxu1 %v1554_v45 }
  0x38   : > { %812 = vmatmul.mubr.bf16.gmra.mrb[8].mxu0 %v1545_v46 }
  0x39   : > { %877 = vmatmul.mubr.bf16.gmra.mrb[8].mxu1 %v1546_v47  ;;  %819 = vmatprep.mubr.bf16.mxu0 %v1548_v48 }
  0x3a   : > { %884 = vmatprep.mubr.bf16.mxu1 %v1550_v49 }
  0x40   : > { %820 = vmatmul.mubr.bf16.gmra.mrb[12].mxu0 %v1552_v50 }
  0x41   : > { %885 = vmatmul.mubr.bf16.gmra.mrb[12].mxu1 %v1553_v51  ;;  %1454 = vmatprep.mubr.msk.bf16.mxu0 %vm750_vm0, %v1555_v52 }
  0x42   : > { %1458 = vmatprep.mubr.msk.bf16.mxu1 %vm750_vm0, %v1556_v53 }
  0x48   : > { %1455 = vmatmul.mubr.msk.bf16.vlgmr.msra.gmra.mrb[16].mxu0 %vm750_vm0, %v1557_v54 }
  0x49   : > { %1459 = vmatmul.mubr.msk.bf16.vlgmr.msra.gmra.mrb[16].mxu1 %vm750_vm0, %v1558_v55 }
  0xfb   : > { %v1374_v56 = vpop.f32.mrb[0].mxu0 }
  0xfc   : > { %v1414_v57 = vpop.f32.mrb[0].mxu1  ;;  %v1375_v58 = vpop.f32.mrb[1].mxu0 }
  0xfd   : > { %v1376_v59 = vadd.f32 %v1375_v58, %v1374_v56  ;;  %v1415_v60 = vpop.f32.mrb[1].mxu1  ;;  %v1377_v61 = vpop.f32.mrb[2].mxu0 }
  0xfe   : > { %v1416_v62 = vadd.f32 %v1415_v60, %v1414_v57  ;;  %v1417_v63 = vpop.f32.mrb[2].mxu1  ;;  %v1378_v0 = vpop.f32.mrb[3].mxu0 }
  0xff   : > { %v1379_v1 = vadd.f32 %v1378_v0, %v1377_v61  ;;  %v1418_v2 = vpop.f32.mrb[3].mxu1 }
 0x100   : > { %v1419_v3 = vadd.f32 %v1418_v2, %v1417_v63  ;;  %v863_v4 = vadd.f32 %v1416_v62, %v1376_v59 }
 0x102   : > { %v866_v5 = vadd.f32 %v1419_v3, %v1379_v1 }
 0x103   : > { %v1380_v6 = vpop.f32.mrb[4].mxu0 }
 0x104   : > { %v1420_v7 = vpop.f32.mrb[4].mxu1  ;;  %v1381_v8 = vpop.f32.mrb[5].mxu0 }
 0x105   : > { %v1382_v9 = vadd.f32 %v1381_v8, %v1380_v6  ;;  %v1421_v10 = vpop.f32.mrb[5].mxu1  ;;  %v1383_v11 = vpop.f32.mrb[6].mxu0 }
 0x106   : > { %v1422_v12 = vadd.f32 %v1421_v10, %v1420_v7  ;;  %v1423_v13 = vpop.f32.mrb[6].mxu1  ;;  %v1384_v14 = vpop.f32.mrb[7].mxu0 }
 0x107   : > { %v1385_v15 = vadd.f32 %v1384_v14, %v1383_v11  ;;  %v1424_v16 = vpop.f32.mrb[7].mxu1 }
 0x108   : > { %v1425_v17 = vadd.f32 %v1424_v16, %v1423_v13  ;;  %v871_v18 = vadd.f32 %v1422_v12, %v1382_v9 }
 0x10a   : > { %v874_v19 = vadd.f32 %v1425_v17, %v1385_v15 }
 0x10b   : > { %v1386_v20 = vpop.f32.mrb[8].mxu0 }
 0x10c   : > { %v1426_v21 = vpop.f32.mrb[8].mxu1  ;;  %v1387_v22 = vpop.f32.mrb[9].mxu0 }
 0x10d   : > { %v1388_v23 = vadd.f32 %v1387_v22, %v1386_v20  ;;  %v1427_v24 = vpop.f32.mrb[9].mxu1  ;;  %v1389_v25 = vpop.f32.mrb[10].mxu0 }
 0x10e   : > { %v1428_v26 = vadd.f32 %v1427_v24, %v1426_v21  ;;  %v1429_v27 = vpop.f32.mrb[10].mxu1  ;;  %v1390_v28 = vpop.f32.mrb[11].mxu0 }
 0x10f   : > { %v1391_v29 = vadd.f32 %v1390_v28, %v1389_v25  ;;  %v1430_v30 = vpop.f32.mrb[11].mxu1 }
 0x110   : > { %v1431_v31 = vadd.f32 %v1430_v30, %v1429_v27  ;;  %v879_v32 = vadd.f32 %v1428_v26, %v1388_v23 }
 0x112   : > { %v882_v33 = vadd.f32 %v1431_v31, %v1391_v29 }
 0x113   : > { %v1392_v34 = vpop.f32.mrb[12].mxu0 }
 0x114   : > { %v1432_v35 = vpop.f32.mrb[12].mxu1  ;;  %v1393_v36 = vpop.f32.mrb[13].mxu0 }
 0x115   : > { %v1394_v37 = vadd.f32 %v1393_v36, %v1392_v34  ;;  %v1433_v38 = vpop.f32.mrb[13].mxu1  ;;  %v1395_v39 = vpop.f32.mrb[14].mxu0 }
 0x116   : > { %v1434_v40 = vadd.f32 %v1433_v38, %v1432_v35  ;;  %v1435_v41 = vpop.f32.mrb[14].mxu1  ;;  %v1396_v42 = vpop.f32.mrb[15].mxu0 }
 0x117   : > { %v1397_v43 = vadd.f32 %v1396_v42, %v1395_v39  ;;  %v1436_v44 = vpop.f32.mrb[15].mxu1 }
 0x118   : > { %v1437_v45 = vadd.f32 %v1436_v44, %v1435_v41  ;;  %v887_v46 = vadd.f32 %v1434_v40, %v1394_v37 }
 0x11a   : > { %v890_v47 = vadd.f32 %v1437_v45, %v1397_v43 }
 0x11b   : > { %v1456_v48 = vpop.f32.mrb[16].mxu0 }
 0x11c   : > { %v936_v49 = vadd.f32 %v1456_v48, %v871_v18  ;;  %v1460_v50 = vpop.f32.mrb[16].mxu1  ;;  %v927_v51 = vpop.f32.mrb[17].mxu0 }
 0x11d   : > { %v952_v52 = vadd.f32 %v1460_v50, %v887_v46  ;;  %v928_v53 = vadd.f32 %v927_v51, %v863_v4  ;;  %v943_v54 = vpop.f32.mrb[17].mxu1  ;;  %v1457_v55 = vpop.f32.mrb[18].mxu0 }
 0x11e   : > { %v944_v56 = vadd.f32 %v943_v54, %v879_v32  ;;  %v939_v57 = vadd.f32 %v1457_v55, %v874_v19  ;;  %v1461_v58 = vpop.f32.mrb[18].mxu1  ;;  %v930_v59 = vpop.f32.mrb[19].mxu0  ;;  %v1040_v9 = vmul.f32 %v936_v49, %v936_v49 }
 0x11f   : > { %v955_v60 = vadd.f32 %v1461_v58, %v890_v47  ;;  %v931_v61 = vadd.f32 %v930_v59, %v866_v5  ;;  %v946_v62 = vpop.f32.mrb[19].mxu1  ;;  %v1038_v6 = vmul.f32 %v928_v53, %v928_v53  ;;  %v1044_v20 = vmul.f32 %v952_v52, %v952_v52 }
 0x120   : > { %v1343_v63 = vpack.c.bf16 %v939_v57, %v936_v49  ;;  %v947_v0 = vadd.f32 %v946_v62, %v882_v33  ;;  %v1041_v12 = vmul.f32 %v939_v57, %v939_v57  ;;  %v1042_v14 = vmul.f32 %v944_v56, %v944_v56 }
 0x121   : > { %v1353_v1 = vpack.c.bf16 %v955_v60, %v952_v52  ;;  %v1338_v2 = vpack.c.bf16 %v931_v61, %v928_v53  ;;  %v1025_v3 = vadd.f32 %v931_v61, %v928_v53  ;;  %v1039_v4 = vmul.f32 %v931_v61, %v931_v61 }
 0x122   : > { %1355 = vst [vmem:[%s301_s9 + $0x8] sm:$0xff] %v1343_v63   ;;  %v1348_v7 = vpack.c.bf16 %v947_v0, %v944_v56  ;;  %v1043_v17 = vmul.f32 %v947_v0, %v947_v0  ;;  %v1045_v23 = vmul.f32 %v955_v60, %v955_v60 }
 0x123   : > { %1357 = vst [vmem:[%s301_s9 + $0x18] sm:$0xff] %v1353_v1   ;;  %1339 = vst [vmem:[%s301_s9] sm:$0xff] %v1338_v2   ;;  %v1026_v8 = vadd.f32 %v1025_v3, %v936_v49  ;;  %v1046_v10 = vadd.f32 %v1039_v4, %v1038_v6 }
 0x124   : > { %1356 = vst [vmem:[%s301_s9 + $0x10] sm:$0xff] %v1348_v7  }
 0x125   : > { %v1027_v11 = vadd.f32 %v1026_v8, %v939_v57  ;;  %v1047_v5 = vadd.f32 %v1046_v10, %v1040_v9 }
 0x127   : > { %v1028_v13 = vadd.f32 %v1027_v11, %v944_v56  ;;  %v1048_v15 = vadd.f32 %v1047_v5, %v1041_v12 }
 0x129   : > { %v1029_v16 = vadd.f32 %v1028_v13, %v947_v0  ;;  %v1049_v18 = vadd.f32 %v1048_v15, %v1042_v14 }
 0x12b   : > { %v1030_v19 = vadd.f32 %v1029_v16, %v952_v52  ;;  %v1050_v21 = vadd.f32 %v1049_v18, %v1043_v17 }
 0x12d   : > { %v1031_v22 = vadd.f32 %v1030_v19, %v955_v60  ;;  %v1051_v24 = vadd.f32 %v1050_v21, %v1044_v20 }
 0x12f   : > { %v1032_v25 = vrot.slane %v1031_v22, 4  ;;  %v1052_v26 = vadd.f32 %v1051_v24, %v1045_v23 }
 0x131   : > { %v1033_v27 = vadd.f32 %v1032_v25, %v1031_v22  ;;  %v1053_v28 = vrot.slane %v1052_v26, 4 }
 0x133   : > { %v1034_v29 = vrot.slane %v1033_v27, 2  ;;  %v1054_v30 = vadd.f32 %v1053_v28, %v1052_v26 }
 0x135   : > { %v1035_v31 = vadd.f32 %v1034_v29, %v1033_v27  ;;  %v1055_v32 = vrot.slane %v1054_v30, 2 }
 0x137   : > { %v1036_v33 = vrot.slane %v1035_v31, 1  ;;  %v1056_v34 = vadd.f32 %v1055_v32, %v1054_v30 }
 0x139   : > { %v1037_v35 = vadd.f32 %v1036_v33, %v1035_v31  ;;  %v1057_v36 = vrot.slane %v1056_v34, 1 }
 0x13b   : > { %1059 = vst [vmem:[%s309_s12] sm:$0xff] %v1037_v35  ;;  %v1058_v37 = vadd.f32 %v1057_v36, %v1056_v34 }
 0x13d   : > { %1060 = vst [vmem:[%s316_s19] sm:$0xff] %v1058_v37 }
 0x13e PF: > { %s15_s17 = sadd.s32 1, %s1581_s17   ;;  %s1791_s15 = smov %s1577_s16 }
 0x13f   : > { %p12_p6 = scmp.ge.s32.totalorder %s15_s17, 4   ;;  %s1792_s16 = smov %s1794_s18 }
 0x141   :  { %14 = sbr.rel (!%p12_p6) target bundleno = 2 (0x2), region = 93 }

// kernel: net_forward.28
= control target key start
LH: loop header
LB: loop body
LE: loop exit
PB: predicated region body
PF: predicated region fallthrough
CT: control target
= control target key end

     0   :  { %s1118_s15 = smov 0   ;;  %s1120_s16 = smov 0   ;;  %s1248_s0 = inlined_call_operand.vmem [shape: bf16[128,1152], index: 0, kind: input, shape index: {}]   ;;  %s1249_s1 = inlined_call_operand.vmem [shape: bf16[1152,128], index: 1, kind: input, shape index: {}]   ;;  %s1250_s2 = inlined_call_operand.vmem [shape: bf16[128,128], index: 2, kind: output, shape index: {0}]   ;;  %s1251_s3 = inlined_call_operand.vmem [shape: f32[16,128], index: 3, kind: output, shape index: {1}]   ;;  %s1252_s4 = inlined_call_operand.vmem [shape: f32[16,128], index: 4, kind: output, shape index: {2}]  }
   0x1   :  { %s1122_s17 = smov 0   ;;  %s1124_s18 = smov 0  }
   0x2   :  { %s1126_s19 = smov 0   ;;  %s1128_s20 = smov 0  }
   0x3   :  { %s1130_s21 = smov 0  }
   0x4 LB: > { %s27_s22 = sadd.s32 1, %s1082_s19  ;;  %s34_s23 = sadd.s32 1, %s1086_s20  ;;  %s1090_s21 = sphi %s1130_s21, %s15_s21   ;;  %s1086_s20 = sphi %s1128_s20, %s1258_s20   ;;  %s1082_s19 = sphi %s1126_s19, %s1257_s19   ;;  %s1078_s18 = sphi %s1124_s18, %s1256_s18   ;;  %s1074_s17 = sphi %s1122_s17, %s1255_s17   ;;  %s1070_s16 = sphi %s1120_s16, %s1254_s16   ;;  %s1066_s15 = sphi %s1118_s15, %s1253_s15  }
   0x5   : > { %p28_p0 = scmp.ge.s32.totalorder %s27_s22, 9  ;;  %p50_p1 = scmp.ne.s32.totalorder %s1070_s16, %s1066_s15 }
   0x6   : > { %p51_p2 = scmp.eq.s32.totalorder %s1090_s21, 0  ;;  %s43_s27 = sadd.s32 1, %s1070_s16 }
   0x7   : > { %s1260_s22 = smov (%p28_p0, %s27_s22), 0  ;;  %s1262_s23 = smov (!%p28_p0, %s34_s23), %s1086_s20 }
   0x8   : > { %p52_p3 = por %p51_p2, %p50_p1  ;;  %p36_p4 = scmp.ge.s32.totalorder %s1262_s23, 2 }
   0x9   : > { %s39_s24 = ssub.s32 %s1082_s19, %s1260_s22  ;;  %p846_p6 = scmp.ge.s32.totalorder %s1090_s21, 18 }
   0xa   : > { %s1264_s23 = smov (%p36_p4, %s1262_s23), 0 }
   0xb   : > { %s38_s25 = ssub.s32 %s1086_s20, %s1264_s23  ;;  %188 = sbr.rel (%p846_p6) target bundleno = 30 (0x1e), region = 16 }
   0xc   : > { %s40_s26 = sor.u32 %s39_s24, %s38_s25 }
   0xd   : > { %p41_p5 = scmp.eq.s32.totalorder %s40_s26, 0 }
   0xf   : > { %s1169_s28 = scalar_select %p41_p5, %s1070_s16, %s43_s27  }
  0x12   : > { %191 = sbr.rel (!%p52_p3) target bundleno = 30 (0x1e), region = 20  ;;  %s193_s29 = sand.u32 (%p52_p3), 1, %s1070_s16  }
  0x13   : > { %s966_s30 = smul.u32 (%p52_p3), 72, %s1086_s20  ;;  %s847_s5 = sshll.u32 (%p52_p3), %s193_s29, 5 }
  0x14   : > { %s195_s11 = scalar_lea.vmem (%p52_p3), [#allocation3], %s847_s5 }
  0x15   : > { %s198_s6 = sadd.s32 (%p52_p3), %s1082_s19, %s966_s30 }
  0x16   : > { %s850_s7 = sshll.u32 (%p52_p3), %s198_s6, 2 }
  0x17   : > { %s200_s10 = scalar_lea.vmem (%p52_p3), %s1248_s0, %s850_s7 }
  0x18   : > { %v216_v0 = vld [vmem:[%s200_s10] sm:$0xf] (%p52_p3)  ;;  %v218_v1 = vld [vmem:[%s200_s10 + $0x24] sm:$0xf] (%p52_p3)  ;;  %v220_v2 = vld [vmem:[%s200_s10 + $0x48] sm:$0xf] (%p52_p3) }
  0x19   : > { %217 = vst [vmem:[%s195_s11] sm:$0xf] %v216_v0  ;;  %219 = vst [vmem:[%s195_s11 + $0x4] sm:$0xf] %v218_v1  ;;  %v222_v3 = vld [vmem:[%s200_s10 + $0x6c] sm:$0xf] }
  0x1a   : > { %221 = vst [vmem:[%s195_s11 + $0x8] sm:$0xf] %v220_v2  ;;  %v224_v4 = vld [vmem:[%s200_s10 + $0x90] sm:$0xf]  ;;  %v226_v5 = vld [vmem:[%s200_s10 + $0xb4] sm:$0xf] }
  0x1b   : > { %223 = vst [vmem:[%s195_s11 + $0xc] sm:$0xf] %v222_v3  ;;  %225 = vst [vmem:[%s195_s11 + $0x10] sm:$0xf] %v224_v4  ;;  %v228_v6 = vld [vmem:[%s200_s10 + $0xd8] sm:$0xf] }
  0x1c   : > { %227 = vst [vmem:[%s195_s11 + $0x14] sm:$0xf] %v226_v5  ;;  %v230_v7 = vld [vmem:[%s200_s10 + $0xfc] sm:$0xf]  ;;  %229 = vst [vmem:[%s195_s11 + $0x18] sm:$0xf] %v228_v6 }
  0x1d   : > { %231 = vst [vmem:[%s195_s11 + $0x1c] sm:$0xf] %v230_v7 }
  0x1e PF: > { %p851_p7 = scmp.ge.s32.totalorder %s1090_s21, 1  ;;  %p281_p8 = scmp.lt.s32.totalorder %s1090_s21, 19 }
  0x20   : > { %p282_p9 = pnand %p851_p7, %p281_p8 }
  0x21   : > { %s288_s12 = sand.u32 (!%p282_p9), 1, %s1066_s15   ;;  %s853_s13 = sshll.u32 (!%p282_p9), %s1074_s17, 4 }
  0x22   : > { %285 = sbr.rel (%p282_p9) target bundleno = 340 (0x154), region = 65  ;;  %s852_s14 = sshll.u32 (!%p282_p9), %s288_s12, 5 }
  0x23   : > { %p340_p10 = scmp.lt.s32.totalorder (!%p282_p9), %s853_s13, 143  ;;  %s855_s24 = sshll.u32 (!%p282_p9), %s1078_s18, 3 }
  0x24   : > { %p349_p11 = scmp.lt.s32.totalorder (!%p282_p9), %s855_s24, 15  ;;  %p357_p12 = scmp.lt.s32.totalorder (!%p282_p9), %s1078_s18, 1 }
  0x25   : > { %p859_p13 = scmp.ne.s32.totalorder (!%p282_p9), %s1074_s17, 0 }
  0x29   : > { %s1266_s13 = smov (!%p340_p10, %s853_s13), 143  ;;  %s1268_s24 = smov (!%p349_p11, %s855_s24), 15 }
  0x2a   : > { %s854_s25 = sshll.u32 %s1266_s13, 2  ;;  %s1270_s18 = smov (!%p357_p12, %s1078_s18), 1  ;;  %v1092_v8 = vmov (!%p859_p13), 0.0  }
  0x2b   : > { %s1187_s29 = scalar_lea.vmem %s1249_s1, %s854_s25  ;;  %s856_s30 = sshll.u32 %s1268_s24, 2  ;;  %376 = vst [vmem:[#allocation2] sm:$0xff] (!%p859_p13), %v1092_v8  ;;  %377 = vst [vmem:[#allocation2 + $0x8] sm:$0xff] (!%p859_p13), %v1092_v8 }
  0x2c   : > { %s1193_s15 = scalar_lea.vmem %s1250_s2, %s856_s30  ;;  %s857_s7 = sshll.u32 %s1270_s18, 3  ;;  %378 = vst [vmem:[#allocation2 + $0x10] sm:$0xff] (!%p859_p13), %v1092_v8  ;;  %379 = vst [vmem:[#allocation2 + $0x18] sm:$0xff] (!%p859_p13), %v1092_v8 }
  0x2d   : > { %s1198_s10 = scalar_lea.vmem %s1251_s3, %s857_s7  ;;  %s1203_s13 = scalar_lea.vmem %s1252_s4, %s857_s7  ;;  %380 = vst [vmem:[#allocation2 + $0x20] sm:$0xff] (!%p859_p13), %v1092_v8  ;;  %381 = vst [vmem:[#allocation2 + $0x28] sm:$0xff] (!%p859_p13), %v1092_v8 }
  0x2e   : > { %s1205_s25 = scalar_lea.vmem [#allocation3], %s852_s14  ;;  %375 = sbr.rel (%p859_p13) target bundleno = 53 (0x35), region = 73  ;;  %382 = vst [vmem:[#allocation2 + $0x30] sm:$0xff] (!%p859_p13), %v1092_v8  ;;  %383 = vst [vmem:[#allocation2 + $0x38] sm:$0xff] (!%p859_p13), %v1092_v8 }
  0x35 PF: > { %v1024_v9 = vld [vmem:[%s1187_s29] sm:$0xff]   ;;  %v1025_v10 = vld [vmem:[%s1187_s29 + $0x8] sm:$0xff]   ;;  %v1026_v11 = vld [vmem:[%s1187_s29 + $0x10] sm:$0xff]   ;;  %p872_p0 = scmp.ne.s32.totalorder %s1074_s17, 8 }
  0x36   : > { %926 = vmatprep.subr.bf16.mxu0 %v1024_v9  ;;  %950 = vmatprep.subr.bf16.mxu1 %v1024_v9  ;;  %v1027_v12 = vld [vmem:[%s1187_s29 + $0x18] sm:$0xff]   ;;  %v1032_v13 = vld [vmem:[%s1205_s25] sm:$0xff]   ;;  %v1033_v14 = vld [vmem:[%s1205_s25 + $0x10] sm:$0xff]  }
  0x37   : > { %927 = vmatpush3.bf16.msra.mxu0 %v1024_v9  ;;  %958 = vmatpush3.bf16.msra.mxu1 %v1024_v9  ;;  %v1028_v15 = vld [vmem:[%s1187_s29 + $0x20] sm:$0xff]   ;;  %v1029_v16 = vld [vmem:[%s1187_s29 + $0x28] sm:$0xff]   ;;  %v1030_v17 = vld [vmem:[%s1187_s29 + $0x30] sm:$0xff]  }
  0x38   : > { %928 = vmatprep.subr.bf16.mxu0 %v1025_v10  ;;  %951 = vmatprep.subr.bf16.mxu1 %v1025_v10  ;;  %v1031_v18 = vld [vmem:[%s1187_s29 + $0x38] sm:$0xff]   ;;  %v1034_v19 = vld [vmem:[%s1205_s25 + $0x8] sm:$0xff]   ;;  %v386_v21 = vld [vmem:[#allocation2 + $0x10] sm:$0xff] }
  0x39   : > { %942 = vmatprep.mubr.bf16.mxu0 %v1032_v13  ;;  %946 = vmatprep.mubr.bf16.mxu1 %v1033_v14  ;;  %v1035_v20 = vld [vmem:[%s1205_s25 + $0x18] sm:$0xff]   ;;  %v390_v22 = vld [vmem:[#allocation2 + $0x30] sm:$0xff]  ;;  %v384_v23 = vld [vmem:[#allocation2] sm:$0xff] }
  0x3a   : > { %v388_v24 = vld [vmem:[#allocation2 + $0x20] sm:$0xff]  ;;  %v387_v27 = vld [vmem:[#allocation2 + $0x18] sm:$0xff]  ;;  %v385_v33 = vld [vmem:[#allocation2 + $0x8] sm:$0xff] }
  0x3b   : > { %929 = vmatpush3.bf16.msra.mxu0 %v1025_v10  ;;  %959 = vmatpush3.bf16.msra.mxu1 %v1025_v10  ;;  %v391_v28 = vld [vmem:[#allocation2 + $0x38] sm:$0xff]  ;;  %v389_v34 = vld [vmem:[#allocation2 + $0x28] sm:$0xff] }
  0x3c   : > { %930 = vmatprep.subr.bf16.mxu0 %v1026_v11  ;;  %952 = vmatprep.subr.bf16.mxu1 %v1026_v11 }
  0x3f   : > { %931 = vmatpush3.bf16.msra.mxu0 %v1026_v11  ;;  %960 = vmatpush3.bf16.msra.mxu1 %v1026_v11 }
  0x40   : > { %932 = vmatprep.subr.bf16.mxu0 %v1027_v12  ;;  %953 = vmatprep.subr.bf16.mxu1 %v1027_v12 }
  0x43   : > { %933 = vmatpush3.bf16.msra.mxu0 %v1027_v12  ;;  %961 = vmatpush3.bf16.msra.mxu1 %v1027_v12 }
  0x44   : > { %934 = vmatprep.subr.bf16.mxu0 %v1028_v15  ;;  %954 = vmatprep.subr.bf16.mxu1 %v1028_v15 }
  0x47   : > { %935 = vmatpush3.bf16.msra.mxu0 %v1028_v15  ;;  %962 = vmatpush3.bf16.msra.mxu1 %v1028_v15 }
  0x48   : > { %936 = vmatprep.subr.bf16.mxu0 %v1029_v16  ;;  %955 = vmatprep.subr.bf16.mxu1 %v1029_v16 }
  0x4b   : > { %937 = vmatpush3.bf16.msra.mxu0 %v1029_v16  ;;  %963 = vmatpush3.bf16.msra.mxu1 %v1029_v16 }
  0x4c   : > { %938 = vmatprep.subr.bf16.mxu0 %v1030_v17  ;;  %956 = vmatprep.subr.bf16.mxu1 %v1030_v17 }
  0x4f   : > { %939 = vmatpush3.bf16.msra.mxu0 %v1030_v17  ;;  %964 = vmatpush3.bf16.msra.mxu1 %v1030_v17 }
  0x50   : > { %940 = vmatprep.subr.bf16.mxu0 %v1031_v18  ;;  %957 = vmatprep.subr.bf16.mxu1 %v1031_v18 }
  0x53   : > { %941 = vmatpush3.bf16.msra.mxu0 %v1031_v18  ;;  %965 = vmatpush3.bf16.msra.mxu1 %v1031_v18 }
  0x56   : > { %943 = vmatmul.mubr.bf16.vlgmr.msra.gmra.mrb[0].mxu0 %v1034_v19  ;;  %947 = vmatmul.mubr.bf16.vlgmr.msra.gmra.mrb[0].mxu1 %v1035_v20 }
 0x129   : > { %v944_v25 = vpop.f32.mrb[0].mxu0  ;;  %v948_v26 = vpop.f32.mrb[0].mxu1  ;;  %572 = sbr.rel (%p872_p0) target bundleno = 340 (0x154), region = 77 }
 0x12a   : > { %v555_v29 = vadd.f32 %v944_v25, %v386_v21  ;;  %v559_v30 = vadd.f32 %v948_v26, %v390_v22  ;;  %v522_v31 = vpop.f32.mrb[1].mxu0  ;;  %v538_v32 = vpop.f32.mrb[1].mxu1 }
 0x12b   : > { %v553_v35 = vadd.f32 %v522_v31, %v384_v23  ;;  %v557_v36 = vadd.f32 %v538_v32, %v388_v24  ;;  %v945_v37 = vpop.f32.mrb[2].mxu0  ;;  %v949_v38 = vpop.f32.mrb[2].mxu1 }
 0x12c   : > { %563 = vst [vmem:[#allocation2 + $0x10] sm:$0xff] %v555_v29  ;;  %567 = vst [vmem:[#allocation2 + $0x30] sm:$0xff] %v559_v30  ;;  %v556_v39 = vadd.f32 %v945_v37, %v387_v27  ;;  %v560_v40 = vadd.f32 %v949_v38, %v391_v28  ;;  %v525_v41 = vpop.f32.mrb[3].mxu0  ;;  %v541_v42 = vpop.f32.mrb[3].mxu1 }
 0x12d   : > { %561 = vst [vmem:[#allocation2] sm:$0xff] %v553_v35  ;;  %565 = vst [vmem:[#allocation2 + $0x20] sm:$0xff] %v557_v36  ;;  %v554_v43 = vadd.f32 %v525_v41, %v385_v33  ;;  %v558_v44 = vadd.f32 %v541_v42, %v389_v34 }
 0x12e   : > { %564 = vst [vmem:[#allocation2 + $0x18] sm:$0xff] %v556_v39  ;;  %568 = vst [vmem:[#allocation2 + $0x38] sm:$0xff] %v560_v40 }
 0x12f   : > { %562 = vst [vmem:[#allocation2 + $0x8] sm:$0xff] %v554_v43  ;;  %566 = vst [vmem:[#allocation2 + $0x28] sm:$0xff] %v558_v44 }
 0x133   : > { %v575_v47 = vld [vmem:[#allocation2 + $0x10] sm:$0xff] }
 0x134   : > { %v573_v45 = vld [vmem:[#allocation2] sm:$0xff]  ;;  %v636_v56 = vmul.f32 %v575_v47, %v575_v47  ;;  %v579_v61 = vld [vmem:[#allocation2 + $0x30] sm:$0xff] }
 0x135   : > { %v634_v50 = vmul.f32 %v573_v45, %v573_v45  ;;  %v576_v52 = vld [vmem:[#allocation2 + $0x18] sm:$0xff]  ;;  %v577_v53 = vld [vmem:[#allocation2 + $0x20] sm:$0xff]  ;;  %v640_v8 = vmul.f32 %v579_v61, %v579_v61 }
 0x136   : > { %v574_v46 = vld [vmem:[#allocation2 + $0x8] sm:$0xff]  ;;  %v899_v55 = vpack.c.bf16 %v576_v52, %v575_v47  ;;  %v637_v60 = vmul.f32 %v576_v52, %v576_v52  ;;  %v580_v62 = vld [vmem:[#allocation2 + $0x38] sm:$0xff]  ;;  %v638_v2 = vmul.f32 %v577_v53, %v577_v53 }
 0x137   : > { %v894_v48 = vpack.c.bf16 %v574_v46, %v573_v45  ;;  %v621_v49 = vadd.f32 %v574_v46, %v573_v45  ;;  %v635_v51 = vmul.f32 %v574_v46, %v574_v46  ;;  %v578_v54 = vld [vmem:[#allocation2 + $0x28] sm:$0xff]  ;;  %v909_v63 = vpack.c.bf16 %v580_v62, %v579_v61 }
 0x138   : > { %v904_v57 = vpack.c.bf16 %v578_v54, %v577_v53  ;;  %911 = vst [vmem:[%s1193_s15 + $0x8] sm:$0xff] %v899_v55   ;;  %v639_v5 = vmul.f32 %v578_v54, %v578_v54  ;;  %v641_v11 = vmul.f32 %v580_v62, %v580_v62 }
 0x139   : > { %895 = vst [vmem:[%s1193_s15] sm:$0xff] %v894_v48   ;;  %v642_v58 = vadd.f32 %v635_v51, %v634_v50  ;;  %v622_v59 = vadd.f32 %v621_v49, %v575_v47  ;;  %913 = vst [vmem:[%s1193_s15 + $0x18] sm:$0xff] %v909_v63  }
 0x13a   : > { %912 = vst [vmem:[%s1193_s15 + $0x10] sm:$0xff] %v904_v57  }
 0x13b   : > { %v623_v0 = vadd.f32 %v622_v59, %v576_v52  ;;  %v643_v1 = vadd.f32 %v642_v58, %v636_v56 }
 0x13d   : > { %v644_v3 = vadd.f32 %v643_v1, %v637_v60  ;;  %v624_v4 = vadd.f32 %v623_v0, %v577_v53 }
 0x13f   : > { %v625_v6 = vadd.f32 %v624_v4, %v578_v54  ;;  %v645_v7 = vadd.f32 %v644_v3, %v638_v2 }
 0x141   : > { %v646_v9 = vadd.f32 %v645_v7, %v639_v5  ;;  %v626_v10 = vadd.f32 %v625_v6, %v579_v61 }
 0x143   : > { %v627_v12 = vadd.f32 %v626_v10, %v580_v62  ;;  %v647_v13 = vadd.f32 %v646_v9, %v640_v8 }
 0x145   : > { %v628_v14 = vrot.slane %v627_v12, 4  ;;  %v648_v15 = vadd.f32 %v647_v13, %v641_v11 }
 0x147   : > { %v629_v16 = vadd.f32 %v628_v14, %v627_v12  ;;  %v649_v17 = vrot.slane %v648_v15, 4 }
 0x149   : > { %v630_v18 = vrot.slane %v629_v16, 2  ;;  %v650_v19 = vadd.f32 %v649_v17, %v648_v15 }
 0x14b   : > { %v631_v20 = vadd.f32 %v630_v18, %v629_v16  ;;  %v651_v21 = vrot.slane %v650_v19, 2 }
 0x14d   : > { %v632_v22 = vrot.slane %v631_v20, 1  ;;  %v652_v23 = vadd.f32 %v651_v21, %v650_v19 }
 0x14f   : > { %v633_v24 = vadd.f32 %v632_v22, %v631_v20  ;;  %v653_v25 = vrot.slane %v652_v23, 1 }
 0x151   : > { %655 = vst [vmem:[%s1198_s10] sm:$0xff] %v633_v24  ;;  %v654_v26 = vadd.f32 %v653_v25, %v652_v23 }
 0x153   : > { %656 = vst [vmem:[%s1203_s13] sm:$0xff] %v654_v26 }
 0x154 PF: > { %s15_s21 = sadd.s32 1, %s1090_s21   ;;  %s1253_s15 = smov %s1070_s16 }
 0x155   : > { %p12_p1 = scmp.ge.s32.totalorder %s15_s21, 20   ;;  %s1254_s16 = smov %s1169_s28 }
 0x156   : > { %s1255_s17 = smov %s1082_s19  ;;  %s1256_s18 = smov %s1086_s20 }
 0x157   : > { %s1257_s19 = smov %s1260_s22  ;;  %s1258_s20 = smov %s1264_s23 }
 0x158   :  { %14 = sbr.rel (!%p12_p1) target bundleno = 4 (0x4), region = 139 }

// kernel: net_forward.29
= control target key start
LH: loop header
LB: loop body
LE: loop exit
PB: predicated region body
PF: predicated region fallthrough
CT: control target
= control target key end

     0   :  { %s930_s15 = smov 0   ;;  %s932_s16 = smov 0   ;;  %s993_s0 = inlined_call_operand.vmem [shape: bf16[128,64], index: 0, kind: input, shape index: {}]   ;;  %s994_s1 = inlined_call_operand.vmem [shape: bf16[64,128], index: 1, kind: input, shape index: {}]   ;;  %s995_s2 = inlined_call_operand.vmem [shape: bf16[128,128], index: 2, kind: output, shape index: {0}]   ;;  %s996_s3 = inlined_call_operand.vmem [shape: f32[16,128], index: 3, kind: output, shape index: {1}]   ;;  %s997_s4 = inlined_call_operand.vmem [shape: f32[16,128], index: 4, kind: output, shape index: {2}]  }
   0x1   :  { %s934_s17 = smov 0  }
   0x2 LB: > { %s34_s18 = sadd.s32 1, %s899_s16  ;;  %p757_p0 = scmp.ge.s32.totalorder %s903_s17, 1  ;;  %s903_s17 = sphi %s934_s17, %s15_s17   ;;  %s899_s16 = sphi %s932_s16, %s999_s16   ;;  %s895_s15 = sphi %s930_s15, %s998_s15  }
   0x3   : > { %p36_p1 = scmp.ge.s32.totalorder %s34_s18, 2  ;;  %p214_p2 = scmp.lt.s32.totalorder %s903_s17, 3 }
   0x5   : > { %s1001_s18 = smov (%p36_p1, %s34_s18), 0  ;;  %p215_p3 = pnand %p757_p0, %p214_p2 }
   0x6   : > { %v873_v0 = vld [vmem:[%s994_s1] sm:$0xff] (!%p215_p3)   ;;  %s758_s21 = sshll.u32 (!%p215_p3), %s895_s15, 3  ;;  %v874_v1 = vld [vmem:[%s994_s1 + $0x8] sm:$0xff] (!%p215_p3)   ;;  %v875_v2 = vld [vmem:[%s994_s1 + $0x10] sm:$0xff] (!%p215_p3)   ;;  %vm390_vm0 = vcmask (!%p215_p3), 523264   ;;  %p295_p5 = scmp.lt.s32.totalorder (!%p215_p3), %s895_s15, 1 }
   0x7   : > { %218 = sbr.rel (%p215_p3) target bundleno = 267 (0x10b), region = 28  ;;  %p269_p4 = scmp.lt.s32.totalorder (!%p215_p3), %s758_s21, 15  ;;  %825 = vmatprep.subr.bf16.mxu0 (!%p215_p3), %v873_v0  ;;  %841 = vmatprep.subr.bf16.mxu1 (!%p215_p3), %v873_v0  ;;  %v876_v4 = vld [vmem:[%s994_s1 + $0x18] sm:$0xff] (!%p215_p3)  }
   0x8   : > { %826 = vmatpush3.bf16.msra.mxu0 (!%p215_p3), %v873_v0  ;;  %845 = vmatpush3.bf16.msra.mxu1 (!%p215_p3), %v873_v0 }
   0x9   : > { %827 = vmatprep.subr.bf16.mxu0 (!%p215_p3), %v874_v1  ;;  %842 = vmatprep.subr.bf16.mxu1 (!%p215_p3), %v874_v1 }
   0xc   : > { %828 = vmatpush3.bf16.msra.mxu0 (!%p215_p3), %v874_v1  ;;  %846 = vmatpush3.bf16.msra.mxu1 (!%p215_p3), %v874_v1 }
   0xd   : > { %829 = vmatprep.subr.bf16.mxu0 (!%p215_p3), %v875_v2  ;;  %843 = vmatprep.subr.bf16.mxu1 (!%p215_p3), %v875_v2 }
   0xe   : > { %s1003_s21 = smov (!%p269_p4, %s758_s21), 15  ;;  %s1005_s15 = smov (!%p295_p5, %s895_s15), 1 }
   0xf   : > { %s759_s26 = sshll.u32 %s1003_s21, 2  ;;  %s762_s9 = sshll.u32 %s1005_s15, 3 }
  0x10   : > { %s275_s29 = scalar_lea.vmem %s993_s0, %s759_s26  ;;  %830 = vmatpush3.bf16.msra.mxu0 %v875_v2  ;;  %847 = vmatpush3.bf16.msra.mxu1 %v875_v2  ;;  %s293_s8 = scalar_lea.vmem %s995_s2, %s759_s26 }
  0x11   : > { %v877_v3 = vld [vmem:[%s275_s29] sm:$0xff]   ;;  %v879_v5 = vld [vmem:[%s275_s29 + $0x10] sm:$0xff]   ;;  %831 = vmatprep.subr.bf16.mxu0 %v876_v4  ;;  %844 = vmatprep.subr.bf16.mxu1 %v876_v4  ;;  %v878_v6 = vld [vmem:[%s275_s29 + $0x8] sm:$0xff]   ;;  %s301_s12 = scalar_lea.vmem %s996_s3, %s762_s9  ;;  %s308_s19 = scalar_lea.vmem %s997_s4, %s762_s9 }
  0x12   : > { %833 = vmatprep.mubr.msk.bf16.mxu0 %vm390_vm0, %v877_v3  ;;  %837 = vmatprep.mubr.msk.bf16.mxu1 %vm390_vm0, %v879_v5  ;;  %v880_v7 = vld [vmem:[%s275_s29 + $0x18] sm:$0xff]  }
  0x14   : > { %832 = vmatpush3.bf16.msra.mxu0 %v876_v4  ;;  %848 = vmatpush3.bf16.msra.mxu1 %v876_v4 }
  0x17   : > { %834 = vmatmul.mubr.msk.bf16.vlgmr.msra.gmra.mrb[0].mxu0 %vm390_vm0, %v878_v6  ;;  %838 = vmatmul.mubr.msk.bf16.vlgmr.msra.gmra.mrb[0].mxu1 %vm390_vm0, %v880_v7 }
  0xea   : > { %v835_v8 = vpop.f32.mrb[0].mxu0  ;;  %v839_v9 = vpop.f32.mrb[0].mxu1 }
  0xeb   : > { %v437_v10 = vpop.f32.mrb[1].mxu0  ;;  %v453_v11 = vpop.f32.mrb[1].mxu1  ;;  %v550_v23 = vmul.f32 %v835_v8, %v835_v8  ;;  %v554_v35 = vmul.f32 %v839_v9, %v839_v9 }
  0xec   : > { %v836_v12 = vpop.f32.mrb[2].mxu0  ;;  %v840_v13 = vpop.f32.mrb[2].mxu1  ;;  %v548_v14 = vmul.f32 %v437_v10, %v437_v10  ;;  %v552_v29 = vmul.f32 %v453_v11, %v453_v11 }
  0xed   : > { %v802_v15 = vpack.c.bf16 %v836_v12, %v835_v8  ;;  %v440_v16 = vpop.f32.mrb[3].mxu0  ;;  %v812_v17 = vpack.c.bf16 %v840_v13, %v839_v9  ;;  %v456_v18 = vpop.f32.mrb[3].mxu1  ;;  %v551_v26 = vmul.f32 %v836_v12, %v836_v12  ;;  %v555_v38 = vmul.f32 %v840_v13, %v840_v13 }
  0xee   : > { %v797_v19 = vpack.c.bf16 %v440_v16, %v437_v10  ;;  %v535_v20 = vadd.f32 %v440_v16, %v437_v10  ;;  %v549_v21 = vmul.f32 %v440_v16, %v440_v16  ;;  %v807_v22 = vpack.c.bf16 %v456_v18, %v453_v11 }
  0xef   : > { %814 = vst [vmem:[%s293_s8 + $0x8] sm:$0xff] %v802_v15   ;;  %816 = vst [vmem:[%s293_s8 + $0x18] sm:$0xff] %v812_v17   ;;  %v553_v34 = vmul.f32 %v456_v18, %v456_v18 }
  0xf0   : > { %798 = vst [vmem:[%s293_s8] sm:$0xff] %v797_v19   ;;  %v536_v24 = vadd.f32 %v835_v8, %v535_v20  ;;  %v556_v25 = vadd.f32 %v549_v21, %v548_v14  ;;  %815 = vst [vmem:[%s293_s8 + $0x10] sm:$0xff] %v807_v22  }
  0xf2   : > { %v557_v27 = vadd.f32 %v556_v25, %v550_v23  ;;  %v537_v28 = vadd.f32 %v836_v12, %v536_v24 }
  0xf4   : > { %v538_v30 = vadd.f32 %v537_v28, %v453_v11  ;;  %v558_v31 = vadd.f32 %v557_v27, %v551_v26 }
  0xf6   : > { %v559_v32 = vadd.f32 %v558_v31, %v552_v29  ;;  %v539_v33 = vadd.f32 %v538_v30, %v456_v18 }
  0xf8   : > { %v540_v36 = vadd.f32 %v839_v9, %v539_v33  ;;  %v560_v37 = vadd.f32 %v559_v32, %v553_v34 }
  0xfa   : > { %v541_v39 = vadd.f32 %v840_v13, %v540_v36  ;;  %v561_v40 = vadd.f32 %v560_v37, %v554_v35 }
  0xfc   : > { %v542_v41 = vrot.slane %v541_v39, 4  ;;  %v562_v42 = vadd.f32 %v561_v40, %v555_v38 }
  0xfe   : > { %v543_v43 = vadd.f32 %v542_v41, %v541_v39  ;;  %v563_v44 = vrot.slane %v562_v42, 4 }
 0x100   : > { %v544_v45 = vrot.slane %v543_v43, 2  ;;  %v564_v46 = vadd.f32 %v563_v44, %v562_v42 }
 0x102   : > { %v545_v47 = vadd.f32 %v544_v45, %v543_v43  ;;  %v565_v48 = vrot.slane %v564_v46, 2 }
 0x104   : > { %v546_v49 = vrot.slane %v545_v47, 1  ;;  %v566_v50 = vadd.f32 %v565_v48, %v564_v46 }
 0x106   : > { %v547_v51 = vadd.f32 %v546_v49, %v545_v47  ;;  %v567_v52 = vrot.slane %v566_v50, 1 }
 0x108   : > { %v568_v53 = vadd.f32 %v567_v52, %v566_v50  ;;  %569 = vst [vmem:[%s301_s12] sm:$0xff] %v547_v51 }
 0x10a   : > { %570 = vst [vmem:[%s308_s19] sm:$0xff] %v568_v53 }
 0x10b PF: > { %s15_s17 = sadd.s32 1, %s903_s17   ;;  %s998_s15 = smov %s899_s16 }
 0x10c   : > { %p12_p6 = scmp.ge.s32.totalorder %s15_s17, 4   ;;  %s999_s16 = smov %s1001_s18 }
 0x10e   :  { %14 = sbr.rel (!%p12_p6) target bundleno = 2 (0x2), region = 93 }

// kernel: net_forward.32
= control target key start
LH: loop header
LB: loop body
LE: loop exit
PB: predicated region body
PF: predicated region fallthrough
CT: control target
= control target key end

     0   :  { %s1407_s0 = inlined_call_operand.vmem [shape: bf16[32,1152], index: 0, kind: input, shape index: {}]   ;;  %s1408_s1 = inlined_call_operand.vmem [shape: bf16[1152,256], index: 1, kind: input, shape index: {}]   ;;  %s1409_s2 = inlined_call_operand.vmem [shape: bf16[32,256], index: 2, kind: output, shape index: {0}]   ;;  %s1410_s3 = inlined_call_operand.vmem [shape: f32[8,256], index: 3, kind: output, shape index: {1}]   ;;  %s1411_s4 = inlined_call_operand.vmem [shape: f32[8,256], index: 4, kind: output, shape index: {2}]  }
   0x1   :  { %1415 = sst [smem:[#allocation9_spill]] %s1407_s0 }
   0x2   :  { %1416 = sst [smem:[#allocation10_spill]] %s1408_s1 }
   0x3   :  { %s1190_s15 = smov 0   ;;  %s1192_s16 = smov 0  }
   0x4   :  { %s1194_s17 = smov 0   ;;  %s1196_s18 = smov 0  }
   0x5   :  { %s1198_s19 = smov 0   ;;  %s1200_s20 = smov 0  }
   0x6   :  { %s1202_s21 = smov 0   ;;  %s1204_s22 = smov 0  }
   0x7   :  { %s1206_s23 = smov 0   ;;  %s1208_s24 = smov 0  }
   0x8   :  { %s1210_s25 = smov 0  }
   0x9 LB: > { %1417 = sst [smem:[#allocation6_spill]] %s1158_s24  ;;  %s895_s26 = sadd.s32 4294967295, %s1162_s25   ;;  %s1162_s25 = sphi %s1210_s25, %s15_s25   ;;  %s1158_s24 = sphi %s1208_s24, %s1436_s24   ;;  %s1154_s23 = sphi %s1206_s23, %s1435_s23   ;;  %s1150_s22 = sphi %s1204_s22, %s1425_s22   ;;  %s1146_s21 = sphi %s1202_s21, %s1434_s21   ;;  %s1142_s20 = sphi %s1200_s20, %s1433_s20   ;;  %s1138_s19 = sphi %s1198_s19, %s1432_s19   ;;  %s1134_s18 = sphi %s1196_s18, %s1431_s18   ;;  %s1130_s17 = sphi %s1194_s17, %s1430_s17   ;;  %s1126_s16 = sphi %s1192_s16, %s1429_s16   ;;  %s1122_s15 = sphi %s1190_s15, %s1428_s15  }
   0xa   : > { %s27_s27 = sadd.s32 1, %s1154_s23  ;;  %s30_s28 = sadd.s32 1, %s1158_s24 }
   0xb   : > { %p28_p0 = scmp.ge.s32.totalorder %s27_s27, 9  ;;  %s43_s29 = sadd.s32 1, %s1142_s20 }
   0xc   : > { %p50_p1 = scmp.ne.s32.totalorder %s1142_s20, %s1138_s19  ;;  %p51_p2 = scmp.eq.s32.totalorder %s1162_s25, 0 }
   0xd   : > { %s1438_s27 = smov (%p28_p0, %s27_s27), 0  ;;  %s1440_s28 = smov (!%p28_p0, %s30_s28), %s1158_s24 }
   0xe   : > { %1418 = sst [smem:[#allocation7_spill]] %s1438_s27  ;;  %s39_s30 = ssub.s32 %s1154_s23, %s1438_s27 }
   0xf   : > { %p32_p3 = scmp.ge.s32.totalorder %s1440_s28, 2  ;;  %p41_p4 = scmp.eq.s32.totalorder %s39_s30, 0 }
  0x10   : > { %p1257_p5 = por %p51_p2, %p50_p1  ;;  %s71_s6 = sadd.s32 1, %s1134_s18 }
  0x11   : > { %s1442_s28 = smov (%p32_p3, %s1440_s28), 0  ;;  %p78_p6 = scmp.ne.s32.totalorder %s1134_s18, %s1130_s17 }
  0x12   : > { %1420 = sst [smem:[#allocation8_spill]] %s1442_s28  ;;  %s67_s8 = ssub.s32 %s1158_s24, %s1442_s28 }
  0x13   : > { %s1265_s7 = scalar_select %p41_p4, %s1142_s20, %s43_s29  }
  0x14   : > { %s68_s9 = sor.u32 %s67_s8, %s39_s30  ;;  %p97_p7 = scmp.eq.s32.totalorder %s67_s8, 0 }
  0x15   : > { %p69_p8 = scmp.eq.s32.totalorder %s68_s9, 0  ;;  %p1271_p9 = por %p78_p6, %p51_p2 }
  0x16   : > { %s99_s11 = sadd.s32 1, %s1126_s16  ;;  %p109_p10 = scmp.ne.s32.totalorder %s1126_s16, %s1122_s15 }
  0x17   : > { %s1279_s12 = scalar_select %p69_p8, %s1134_s18, %s71_s6  }
  0x18   : > { %s1282_s13 = scalar_select %p97_p7, %s1126_s16, %s99_s11  }
  0x19   : > { %p110_p11 = scmp.eq.s32.totalorder %s895_s26, 17  ;;  %p898_p13 = scmp.ge.s32.totalorder %s1162_s25, 18 }
  0x1b   : > { %p1284_p12 = por %p110_p11, %p109_p10  ;;  %188 = sbr.rel (%p898_p13) target bundleno = 66 (0x42), region = 16 }
  0x22   : > { %191 = sbr.rel (!%p1257_p5) target bundleno = 46 (0x2e), region = 20  ;;  %s193_s29 = sand.u32 (%p1257_p5), 1, %s1142_s20  }
  0x23   : > { %s900_s30 = sshll.u32 (%p1257_p5), %s1154_s23, 2  ;;  %s899_s8 = sshll.u32 (%p1257_p5), %s193_s29, 4 }
  0x24   : > { %s1423_s0 = sld [smem:[#allocation9_spill]] (%p1257_p5)  ;;  %s195_s26 = scalar_lea.vmem (%p1257_p5), [#allocation3], %s899_s8 }
  0x2a   : > { %s200_s11 = scalar_lea.vmem %s1423_s0, %s900_s30 }
  0x2b   : > { %v216_v0 = vld [vmem:[%s200_s11] sm:$0xf]  ;;  %v218_v1 = vld [vmem:[%s200_s11 + $0x24] sm:$0xf]  ;;  %v220_v2 = vld [vmem:[%s200_s11 + $0x48] sm:$0xf] }
  0x2c   : > { %217 = vst [vmem:[%s195_s26] sm:$0xf] %v216_v0  ;;  %219 = vst [vmem:[%s195_s26 + $0x4] sm:$0xf] %v218_v1  ;;  %v222_v3 = vld [vmem:[%s200_s11 + $0x6c] sm:$0xf] }
  0x2d   : > { %221 = vst [vmem:[%s195_s26 + $0x8] sm:$0xf] %v220_v2  ;;  %223 = vst [vmem:[%s195_s26 + $0xc] sm:$0xf] %v222_v3 }
  0x2e PF: > { %254 = sbr.rel (!%p1271_p9) target bundleno = 66 (0x42), region = 61  ;;  %s256_s5 = sand.u32 (%p1271_p9), 1, %s1134_s18  }
  0x2f   : > { %s931_s29 = sshll.u32 (%p1271_p9), %s1154_s23, 5  ;;  %s901_s6 = sshll.u32 (%p1271_p9), %s256_s5, 6 }
  0x30   : > { %s261_s30 = sadd.s32 (%p1271_p9), %s1158_s24, %s931_s29  ;;  %s1424_s1 = sld [smem:[#allocation10_spill]] (%p1271_p9) }
  0x31   : > { %s904_s9 = sshll.u32 (%p1271_p9), %s261_s30, 2  ;;  %s258_s10 = scalar_lea.vmem (%p1271_p9), [#allocation4], %s901_s6 }
  0x36   : > { %s1304_s28 = scalar_lea.vmem %s1424_s1, %s904_s9 }
  0x37   : > { %v279_v4 = vld [vmem:[%s1304_s28] sm:$0xf]  ;;  %v281_v5 = vld [vmem:[%s1304_s28 + $0x8] sm:$0xf]  ;;  %v283_v6 = vld [vmem:[%s1304_s28 + $0x10] sm:$0xf] }
  0x38   : > { %280 = vst [vmem:[%s258_s10] sm:$0xf] %v279_v4  ;;  %282 = vst [vmem:[%s258_s10 + $0x4] sm:$0xf] %v281_v5  ;;  %v285_v7 = vld [vmem:[%s1304_s28 + $0x18] sm:$0xf] }
  0x39   : > { %284 = vst [vmem:[%s258_s10 + $0x8] sm:$0xf] %v283_v6  ;;  %v287_v8 = vld [vmem:[%s1304_s28 + $0x20] sm:$0xf]  ;;  %v289_v9 = vld [vmem:[%s1304_s28 + $0x28] sm:$0xf] }
  0x3a   : > { %286 = vst [vmem:[%s258_s10 + $0xc] sm:$0xf] %v285_v7  ;;  %288 = vst [vmem:[%s258_s10 + $0x10] sm:$0xf] %v287_v8  ;;  %v291_v10 = vld [vmem:[%s1304_s28 + $0x30] sm:$0xf] }
  0x3b   : > { %290 = vst [vmem:[%s258_s10 + $0x14] sm:$0xf] %v289_v9  ;;  %v293_v11 = vld [vmem:[%s1304_s28 + $0x38] sm:$0xf]  ;;  %v295_v12 = vld [vmem:[%s1304_s28 + $0x40] sm:$0xf] }
  0x3c   : > { %292 = vst [vmem:[%s258_s10 + $0x18] sm:$0xf] %v291_v10  ;;  %294 = vst [vmem:[%s258_s10 + $0x1c] sm:$0xf] %v293_v11  ;;  %v297_v13 = vld [vmem:[%s1304_s28 + $0x48] sm:$0xf] }
  0x3d   : > { %296 = vst [vmem:[%s258_s10 + $0x20] sm:$0xf] %v295_v12  ;;  %v299_v14 = vld [vmem:[%s1304_s28 + $0x50] sm:$0xf]  ;;  %v301_v15 = vld [vmem:[%s1304_s28 + $0x58] sm:$0xf] }
  0x3e   : > { %298 = vst [vmem:[%s258_s10 + $0x24] sm:$0xf] %v297_v13  ;;  %300 = vst [vmem:[%s258_s10 + $0x28] sm:$0xf] %v299_v14  ;;  %v303_v16 = vld [vmem:[%s1304_s28 + $0x60] sm:$0xf] }
  0x3f   : > { %302 = vst [vmem:[%s258_s10 + $0x2c] sm:$0xf] %v301_v15  ;;  %v305_v17 = vld [vmem:[%s1304_s28 + $0x68] sm:$0xf]  ;;  %v307_v18 = vld [vmem:[%s1304_s28 + $0x70] sm:$0xf] }
  0x40   : > { %304 = vst [vmem:[%s258_s10 + $0x30] sm:$0xf] %v303_v16  ;;  %306 = vst [vmem:[%s258_s10 + $0x34] sm:$0xf] %v305_v17  ;;  %v309_v19 = vld [vmem:[%s1304_s28 + $0x78] sm:$0xf] }
  0x41   : > { %308 = vst [vmem:[%s258_s10 + $0x38] sm:$0xf] %v307_v18  ;;  %310 = vst [vmem:[%s258_s10 + $0x3c] sm:$0xf] %v309_v19 }
  0x42 PF: > { %p905_p0 = scmp.ge.s32.totalorder %s1162_s25, 1  ;;  %p364_p1 = scmp.lt.s32.totalorder %s1162_s25, 19 }
  0x44   : > { %p365_p2 = pnand %p905_p0, %p364_p1 }
  0x45   : > { %s371_s0 = sand.u32 (!%p365_p2), 1, %s1138_s19   ;;  %s378_s11 = sand.u32 (!%p365_p2), 1, %s1130_s17  }
  0x46   : > { %368 = sbr.rel (%p365_p2) target bundleno = 371 (0x173), region = 102  ;;  %s1326_s26 = sshll.u32 (!%p365_p2), %s371_s0, 4 }
  0x47   : > { %s907_s28 = sshll.u32 (!%p365_p2), %s378_s11, 6  ;;  %s399_s5 = sand.u32 (!%p365_p2), 1, %s1122_s15  }
  0x48   : > { %p427_p3 = scmp.lt.s32.totalorder (!%p365_p2), %s1150_s22, 1  ;;  %s908_s29 = sshll.u32 (!%p365_p2), %s399_s5, 4 }
  0x49   : > { %s373_s17 = scalar_lea.vmem (!%p365_p2), [#allocation3], %s1326_s26  ;;  %s1342_s19 = scalar_lea.vmem (!%p365_p2), [#allocation4], %s907_s28 }
  0x4a   : > { %s1344_s0 = scalar_lea.vmem (!%p365_p2), [#allocation5], %s908_s29  ;;  %p911_p4 = scmp.ne.s32.totalorder (!%p365_p2), %s1146_s21, 0 }
  0x4d   : > { %s428_s6 = scalar_select %p427_p3, %s1150_s22, 1 }
  0x4e   : > { %445 = sbr.rel (%p911_p4) target bundleno = 85 (0x55), region = 114  ;;  %v1164_v20 = vmov (!%p911_p4), 0.0  }
  0x4f   : > { %s909_s30 = sshll.u32 %s428_s6, 3  ;;  %446 = vst [vmem:[#allocation2] sm:$0xff] (!%p911_p4), %v1164_v20  ;;  %447 = vst [vmem:[#allocation2 + $0x8] sm:$0xff] (!%p911_p4), %v1164_v20 }
  0x50   : > { %s1334_s10 = scalar_lea.vmem %s1410_s3, %s909_s30  ;;  %s1339_s24 = scalar_lea.vmem %s1411_s4, %s909_s30  ;;  %448 = vst [vmem:[#allocation2 + $0x10] sm:$0xff] (!%p911_p4), %v1164_v20  ;;  %449 = vst [vmem:[#allocation2 + $0x18] sm:$0xff] (!%p911_p4), %v1164_v20 }
  0x55 PF: > { %v1066_v21 = vld [vmem:[%s1342_s19] sm:$0xff]   ;;  %v1067_v22 = vld [vmem:[%s1342_s19 + $0x8] sm:$0xff]   ;;  %v1068_v23 = vld [vmem:[%s1342_s19 + $0x10] sm:$0xff]   ;;  %p922_p5 = scmp.ne.s32.totalorder %s1146_s21, 8 }
  0x56   : > { %957 = vmatprep.subr.bf16.mxu0 %v1066_v21  ;;  %v1069_v24 = vld [vmem:[%s1342_s19 + $0x18] sm:$0xff]   ;;  %v1074_v25 = vld [vmem:[%s373_s17] sm:$0xff]   ;;  %v1071_v27 = vld [vmem:[%s1342_s19 + $0x28] sm:$0xff]  }
  0x57   : > { %958 = vmatpush3.bf16.msra.mxu0 %v1066_v21  ;;  %973 = vmatprep.mubr.bf16.mxu0 %v1074_v25  ;;  %v1070_v26 = vld [vmem:[%s1342_s19 + $0x20] sm:$0xff]   ;;  %v1072_v28 = vld [vmem:[%s1342_s19 + $0x30] sm:$0xff]   ;;  %v1073_v29 = vld [vmem:[%s1342_s19 + $0x38] sm:$0xff]  }
  0x58   : > { %959 = vmatprep.subr.bf16.mxu0 %v1067_v22  ;;  %v1075_v30 = vld [vmem:[%s373_s17 + $0x8] sm:$0xff]   ;;  %v452_v31 = vld [vmem:[#allocation2 + $0x10] sm:$0xff]  ;;  %v450_v32 = vld [vmem:[#allocation2] sm:$0xff] }
  0x59   : > { %v453_v34 = vld [vmem:[#allocation2 + $0x18] sm:$0xff]  ;;  %v451_v37 = vld [vmem:[#allocation2 + $0x8] sm:$0xff] }
  0x5b   : > { %960 = vmatpush3.bf16.msra.mxu0 %v1067_v22 }
  0x5c   : > { %961 = vmatprep.subr.bf16.mxu0 %v1068_v23 }
  0x5f   : > { %962 = vmatpush3.bf16.msra.mxu0 %v1068_v23 }
  0x60   : > { %963 = vmatprep.subr.bf16.mxu0 %v1069_v24 }
  0x63   : > { %964 = vmatpush3.bf16.msra.mxu0 %v1069_v24 }
  0x64   : > { %965 = vmatprep.subr.bf16.mxu0 %v1070_v26 }
  0x67   : > { %966 = vmatpush3.bf16.msra.mxu0 %v1070_v26 }
  0x68   : > { %967 = vmatprep.subr.bf16.mxu0 %v1071_v27 }
  0x6b   : > { %968 = vmatpush3.bf16.msra.mxu0 %v1071_v27 }
  0x6c   : > { %969 = vmatprep.subr.bf16.mxu0 %v1072_v28 }
  0x6f   : > { %970 = vmatpush3.bf16.msra.mxu0 %v1072_v28 }
  0x70   : > { %971 = vmatprep.subr.bf16.mxu0 %v1073_v29 }
  0x73   : > { %972 = vmatpush3.bf16.msra.mxu0 %v1073_v29 }
  0x76   : > { %974 = vmatmul.mubr.bf16.vlgmr.msra.gmra.mrb[0].mxu0 %v1075_v30 }
 0x149   : > { %v975_v33 = vpop.f32.mrb[0].mxu0  ;;  %594 = sbr.rel (%p922_p5) target bundleno = 364 (0x16c), region = 118 }
 0x14a   : > { %v585_v35 = vadd.f32 %v975_v33, %v452_v31  ;;  %v568_v36 = vpop.f32.mrb[1].mxu0 }
 0x14b   : > { %v583_v38 = vadd.f32 %v568_v36, %v450_v32  ;;  %v976_v39 = vpop.f32.mrb[2].mxu0 }
 0x14c   : > { %589 = vst [vmem:[#allocation2 + $0x10] sm:$0xff] %v585_v35  ;;  %v586_v40 = vadd.f32 %v976_v39, %v453_v34  ;;  %v571_v41 = vpop.f32.mrb[3].mxu0 }
 0x14d   : > { %587 = vst [vmem:[#allocation2] sm:$0xff] %v583_v38  ;;  %v584_v42 = vadd.f32 %v571_v41, %v451_v37 }
 0x14e   : > { %590 = vst [vmem:[#allocation2 + $0x18] sm:$0xff] %v586_v40 }
 0x14f   : > { %588 = vst [vmem:[#allocation2 + $0x8] sm:$0xff] %v584_v42 }
 0x153   : > { %v597_v45 = vld [vmem:[#allocation2 + $0x10] sm:$0xff] }
 0x154   : > { %v595_v43 = vld [vmem:[#allocation2] sm:$0xff]  ;;  %v630_v52 = vmul.f32 %v597_v45, %v597_v45 }
 0x155   : > { %v628_v48 = vmul.f32 %v595_v43, %v595_v43  ;;  %v598_v50 = vld [vmem:[#allocation2 + $0x18] sm:$0xff] }
 0x156   : > { %v596_v44 = vld [vmem:[#allocation2 + $0x8] sm:$0xff]  ;;  %v944_v51 = vpack.c.bf16 %v598_v50, %v597_v45  ;;  %v631_v55 = vmul.f32 %v598_v50, %v598_v50 }
 0x157   : > { %v939_v46 = vpack.c.bf16 %v596_v44, %v595_v43  ;;  %v619_v47 = vadd.f32 %v596_v44, %v595_v43  ;;  %v629_v49 = vmul.f32 %v596_v44, %v596_v44 }
 0x158   : > { %946 = vst [vmem:[%s1344_s0 + $0x8] sm:$0xff] %v944_v51  }
 0x159   : > { %940 = vst [vmem:[%s1344_s0] sm:$0xff] %v939_v46   ;;  %v632_v53 = vadd.f32 %v629_v49, %v628_v48  ;;  %v620_v54 = vadd.f32 %v619_v47, %v597_v45 }
 0x15b   : > { %v621_v56 = vadd.f32 %v620_v54, %v598_v50  ;;  %v633_v57 = vadd.f32 %v632_v53, %v630_v52 }
 0x15d   : > { %v622_v58 = vrot.slane %v621_v56, 4  ;;  %v634_v59 = vadd.f32 %v633_v57, %v631_v55 }
 0x15f   : > { %v623_v60 = vadd.f32 %v622_v58, %v621_v56  ;;  %v635_v61 = vrot.slane %v634_v59, 4 }
 0x161   : > { %v624_v62 = vrot.slane %v623_v60, 2  ;;  %v636_v63 = vadd.f32 %v635_v61, %v634_v59 }
 0x163   : > { %v625_v0 = vadd.f32 %v624_v62, %v623_v60  ;;  %v637_v1 = vrot.slane %v636_v63, 2 }
 0x165   : > { %v626_v2 = vrot.slane %v625_v0, 1  ;;  %v638_v3 = vadd.f32 %v637_v1, %v636_v63 }
 0x167   : > { %v627_v4 = vadd.f32 %v626_v2, %v625_v0  ;;  %v639_v5 = vrot.slane %v638_v3, 1 }
 0x169   : > { %641 = vst [vmem:[%s1334_s10] sm:$0xff] %v627_v4  ;;  %v640_v6 = vadd.f32 %v639_v5, %v638_v3 }
 0x16b   : > { %642 = vst [vmem:[%s1339_s24] sm:$0xff] %v640_v6 }
 0x16c PF: > { %665 = sbr.rel (!%p1284_p12) target bundleno = 371 (0x173), region = 122  ;;  %s928_s1 = sshll.u32 (%p1284_p12), %s1150_s22, 2  ;;  %v686_v7 = vld [vmem:[%s1344_s0] sm:$0xf] (%p1284_p12)  ;;  %v688_v8 = vld [vmem:[%s1344_s0 + $0x4] sm:$0xf] (%p1284_p12) }
 0x16d   : > { %s670_s27 = scalar_lea.vmem (%p1284_p12), %s1409_s2, %s928_s1  ;;  %v690_v9 = vld [vmem:[%s1344_s0 + $0x8] sm:$0xf] (%p1284_p12)  ;;  %v692_v10 = vld [vmem:[%s1344_s0 + $0xc] sm:$0xf] (%p1284_p12) }
 0x16e   : > { %687 = vst [vmem:[%s670_s27] sm:$0xf] (%p1284_p12), %v686_v7  ;;  %689 = vst [vmem:[%s670_s27 + $0x8] sm:$0xf] (%p1284_p12), %v688_v8 }
 0x16f   : > { %691 = vst [vmem:[%s670_s27 + $0x10] sm:$0xf] (%p1284_p12), %v690_v9  ;;  %693 = vst [vmem:[%s670_s27 + $0x18] sm:$0xf] (%p1284_p12), %v692_v10 }
 0x173 PF: > { %s15_s25 = sadd.s32 1, %s1162_s25   ;;  %s1425_s22 = sld [smem:[#allocation6_spill]] }
 0x174   : > { %p12_p6 = scmp.ge.s32.totalorder %s15_s25, 20   ;;  %s1426_s24 = sld [smem:[#allocation7_spill]] }
 0x175   : > { %s1427_s14 = sld [smem:[#allocation8_spill]]  ;;  %s1428_s15 = smov %s1126_s16 }
 0x176   : > { %s1429_s16 = smov %s1282_s13  ;;  %s1430_s17 = smov %s1134_s18 }
 0x177   : > { %s1431_s18 = smov %s1279_s12  ;;  %s1432_s19 = smov %s1142_s20 }
 0x178   : > { %s1433_s20 = smov %s1265_s7  ;;  %s1434_s21 = smov %s1154_s23 }
 0x179   :  { %14 = sbr.rel (!%p12_p6) target bundleno = 9 (0x9), region = 226 }
 0x17a   : > { %s1435_s23 = smov %s1426_s24 }
 0x17b   : > { %s1436_s24 = smov %s1427_s14 }

// kernel: net_forward.33
= control target key start
LH: loop header
LB: loop body
LE: loop exit
PB: predicated region body
PF: predicated region fallthrough
CT: control target
= control target key end

     0   :  { %s1634_s0 = inlined_call_operand.vmem [shape: bf16[32,2304], index: 0, kind: input, shape index: {}]   ;;  %s1635_s1 = inlined_call_operand.vmem [shape: bf16[2304,256], index: 1, kind: input, shape index: {}]   ;;  %s1636_s2 = inlined_call_operand.vmem [shape: bf16[32,256], index: 2, kind: output, shape index: {0}]   ;;  %s1637_s3 = inlined_call_operand.vmem [shape: f32[8,256], index: 3, kind: output, shape index: {1}]   ;;  %s1638_s4 = inlined_call_operand.vmem [shape: f32[8,256], index: 4, kind: output, shape index: {2}]  }
   0x1   :  { %1643 = sst [smem:[#allocation10_spill]] %s1634_s0 }
   0x2   :  { %1644 = sst [smem:[#allocation11_spill]] %s1635_s1 }
   0x3   :  { %s1360_s15 = smov 0   ;;  %s1362_s16 = smov 0  }
   0x4   :  { %s1364_s17 = smov 0   ;;  %s1366_s18 = smov 0  }
   0x5   :  { %s1368_s19 = smov 0   ;;  %s1370_s20 = smov 0  }
   0x6   :  { %s1372_s21 = smov 0   ;;  %s1374_s22 = smov 0  }
   0x7   :  { %s1376_s23 = smov 0   ;;  %s1378_s24 = smov 0  }
   0x8   :  { %s1380_s25 = smov 0  }
   0x9 LB: > { %1645 = sst [smem:[#allocation6_spill]] %s1324_s23  ;;  %s1027_s26 = sadd.s32 4294967295, %s1332_s25   ;;  %s1332_s25 = sphi %s1380_s25, %s15_s25   ;;  %s1328_s24 = sphi %s1378_s24, %s1657_s24   ;;  %s1324_s23 = sphi %s1376_s23, %s1656_s23   ;;  %s1320_s22 = sphi %s1374_s22, %s1655_s22   ;;  %s1316_s21 = sphi %s1372_s21, %s1654_s21   ;;  %s1312_s20 = sphi %s1370_s20, %s1663_s20   ;;  %s1308_s19 = sphi %s1368_s19, %s1662_s19   ;;  %s1304_s18 = sphi %s1366_s18, %s1661_s18   ;;  %s1300_s17 = sphi %s1364_s17, %s1660_s17   ;;  %s1296_s16 = sphi %s1362_s16, %s1659_s16   ;;  %s1292_s15 = sphi %s1360_s15, %s1658_s15  }
   0xa   : > { %1646 = sst [smem:[#allocation7_spill]] %s1328_s24  ;;  %s27_s27 = sadd.s32 1, %s1324_s23 }
   0xb   : > { %p28_p0 = scmp.ge.s32.totalorder %s27_s27, 9  ;;  %s30_s28 = sadd.s32 1, %s1328_s24 }
   0xc   : > { %s43_s29 = sadd.s32 1, %s1312_s20  ;;  %p50_p1 = scmp.ne.s32.totalorder %s1312_s20, %s1308_s19 }
   0xd   : > { %s1665_s27 = smov (%p28_p0, %s27_s27), 0  ;;  %s1667_s28 = smov (!%p28_p0, %s30_s28), %s1328_s24 }
   0xe   : > { %1647 = sst [smem:[#allocation8_spill]] %s1665_s27  ;;  %s39_s30 = ssub.s32 %s1324_s23, %s1665_s27 }
   0xf   : > { %p51_p2 = scmp.eq.s32.totalorder %s1332_s25, 0  ;;  %p32_p3 = scmp.ge.s32.totalorder %s1667_s28, 2 }
  0x10   : > { %p41_p4 = scmp.eq.s32.totalorder %s39_s30, 0  ;;  %s71_s6 = sadd.s32 1, %s1304_s18 }
  0x11   : > { %p1427_p5 = por %p51_p2, %p50_p1  ;;  %s1669_s28 = smov (%p32_p3, %s1667_s28), 0 }
  0x12   : > { %1649 = sst [smem:[#allocation9_spill]] %s1669_s28  ;;  %s67_s8 = ssub.s32 %s1328_s24, %s1669_s28 }
  0x13   : > { %s1435_s7 = scalar_select %p41_p4, %s1312_s20, %s43_s29  }
  0x14   : > { %p78_p6 = scmp.ne.s32.totalorder %s1304_s18, %s1300_s17  ;;  %s68_s9 = sor.u32 %s67_s8, %s39_s30 }
  0x15   : > { %p97_p7 = scmp.eq.s32.totalorder %s67_s8, 0  ;;  %p69_p8 = scmp.eq.s32.totalorder %s68_s9, 0 }
  0x16   : > { %p1441_p9 = por %p78_p6, %p51_p2  ;;  %s99_s11 = sadd.s32 1, %s1296_s16 }
  0x17   : > { %p109_p10 = scmp.ne.s32.totalorder %s1296_s16, %s1292_s15  ;;  %p110_p11 = scmp.eq.s32.totalorder %s1027_s26, 17 }
  0x18   : > { %s1449_s12 = scalar_select %p69_p8, %s1304_s18, %s71_s6  }
  0x19   : > { %s1452_s13 = scalar_select %p97_p7, %s1296_s16, %s99_s11  }
  0x1a   : > { %p1454_p12 = por %p110_p11, %p109_p10  ;;  %p1030_p13 = scmp.ge.s32.totalorder %s1332_s25, 18 }
  0x1c   : > { %188 = sbr.rel (%p1030_p13) target bundleno = 78 (0x4e), region = 16 }
  0x23   : > { %191 = sbr.rel (!%p1427_p5) target bundleno = 47 (0x2f), region = 20  ;;  %s193_s29 = sand.u32 (%p1427_p5), 1, %s1312_s20  }
  0x24   : > { %s1074_s30 = sshll.u32 (%p1427_p5), %s1324_s23, 3  ;;  %s1031_s8 = sshll.u32 (%p1427_p5), %s193_s29, 5 }
  0x25   : > { %s1652_s0 = sld [smem:[#allocation10_spill]] (%p1427_p5)  ;;  %s195_s26 = scalar_lea.vmem (%p1427_p5), [#allocation3], %s1031_s8 }
  0x2b   : > { %s201_s11 = scalar_lea.vmem %s1652_s0, %s1074_s30 }
  0x2c   : > { %v235_v0 = vld [vmem:[%s201_s11] sm:$0xff]  ;;  %v237_v1 = vld [vmem:[%s201_s11 + $0x48] sm:$0xff]  ;;  %v239_v2 = vld [vmem:[%s201_s11 + $0x90] sm:$0xff] }
  0x2d   : > { %236 = vst [vmem:[%s195_s26] sm:$0xff] %v235_v0  ;;  %238 = vst [vmem:[%s195_s26 + $0x8] sm:$0xff] %v237_v1  ;;  %v241_v3 = vld [vmem:[%s201_s11 + $0xd8] sm:$0xff] }
  0x2e   : > { %240 = vst [vmem:[%s195_s26 + $0x10] sm:$0xff] %v239_v2  ;;  %242 = vst [vmem:[%s195_s26 + $0x18] sm:$0xff] %v241_v3 }
  0x2f PF: > { %248 = sbr.rel (!%p1441_p9) target bundleno = 78 (0x4e), region = 58  ;;  %s250_s5 = sand.u32 (%p1441_p9), 1, %s1304_s18  }
  0x30   : > { %s1075_s29 = sshll.u32 (%p1441_p9), %s1324_s23, 6  ;;  %s1034_s6 = sshll.u32 (%p1441_p9), %s250_s5, 7 }
  0x31   : > { %s255_s30 = sadd.s32 (%p1441_p9), %s1328_s24, %s1075_s29  ;;  %s1653_s1 = sld [smem:[#allocation11_spill]] (%p1441_p9) }
  0x32   : > { %s1037_s9 = sshll.u32 (%p1441_p9), %s255_s30, 2  ;;  %s1479_s10 = scalar_lea.vmem (%p1441_p9), [#allocation4], %s1034_s6 }
  0x37   : > { %s1474_s8 = scalar_lea.vmem %s1653_s1, %s1037_s9 }
  0x38   : > { %v273_v4 = vld [vmem:[%s1474_s8] sm:$0xf]  ;;  %v275_v5 = vld [vmem:[%s1474_s8 + $0x8] sm:$0xf]  ;;  %v277_v6 = vld [vmem:[%s1474_s8 + $0x10] sm:$0xf] }
  0x39   : > { %274 = vst [vmem:[%s1479_s10] sm:$0xf] %v273_v4  ;;  %276 = vst [vmem:[%s1479_s10 + $0x4] sm:$0xf] %v275_v5  ;;  %v279_v7 = vld [vmem:[%s1474_s8 + $0x18] sm:$0xf] }
  0x3a   : > { %278 = vst [vmem:[%s1479_s10 + $0x8] sm:$0xf] %v277_v6  ;;  %v281_v8 = vld [vmem:[%s1474_s8 + $0x20] sm:$0xf]  ;;  %v283_v9 = vld [vmem:[%s1474_s8 + $0x28] sm:$0xf] }
  0x3b   : > { %280 = vst [vmem:[%s1479_s10 + $0xc] sm:$0xf] %v279_v7  ;;  %282 = vst [vmem:[%s1479_s10 + $0x10] sm:$0xf] %v281_v8  ;;  %v285_v10 = vld [vmem:[%s1474_s8 + $0x30] sm:$0xf] }
  0x3c   : > { %284 = vst [vmem:[%s1479_s10 + $0x14] sm:$0xf] %v283_v9  ;;  %v287_v11 = vld [vmem:[%s1474_s8 + $0x38] sm:$0xf]  ;;  %v289_v12 = vld [vmem:[%s1474_s8 + $0x40] sm:$0xf] }
  0x3d   : > { %286 = vst [vmem:[%s1479_s10 + $0x18] sm:$0xf] %v285_v10  ;;  %288 = vst [vmem:[%s1479_s10 + $0x1c] sm:$0xf] %v287_v11  ;;  %v291_v13 = vld [vmem:[%s1474_s8 + $0x48] sm:$0xf] }
  0x3e   : > { %290 = vst [vmem:[%s1479_s10 + $0x20] sm:$0xf] %v289_v12  ;;  %v293_v14 = vld [vmem:[%s1474_s8 + $0x50] sm:$0xf]  ;;  %v295_v15 = vld [vmem:[%s1474_s8 + $0x58] sm:$0xf] }
  0x3f   : > { %292 = vst [vmem:[%s1479_s10 + $0x24] sm:$0xf] %v291_v13  ;;  %294 = vst [vmem:[%s1479_s10 + $0x28] sm:$0xf] %v293_v14  ;;  %v297_v16 = vld [vmem:[%s1474_s8 + $0x60] sm:$0xf] }
  0x40   : > { %296 = vst [vmem:[%s1479_s10 + $0x2c] sm:$0xf] %v295_v15  ;;  %v299_v17 = vld [vmem:[%s1474_s8 + $0x68] sm:$0xf]  ;;  %v301_v18 = vld [vmem:[%s1474_s8 + $0x70] sm:$0xf] }
  0x41   : > { %298 = vst [vmem:[%s1479_s10 + $0x30] sm:$0xf] %v297_v16  ;;  %300 = vst [vmem:[%s1479_s10 + $0x34] sm:$0xf] %v299_v17  ;;  %v303_v19 = vld [vmem:[%s1474_s8 + $0x78] sm:$0xf] }
  0x42   : > { %302 = vst [vmem:[%s1479_s10 + $0x38] sm:$0xf] %v301_v18  ;;  %v305_v20 = vld [vmem:[%s1474_s8 + $0x80] sm:$0xf]  ;;  %v307_v21 = vld [vmem:[%s1474_s8 + $0x88] sm:$0xf] }
  0x43   : > { %304 = vst [vmem:[%s1479_s10 + $0x3c] sm:$0xf] %v303_v19  ;;  %306 = vst [vmem:[%s1479_s10 + $0x40] sm:$0xf] %v305_v20  ;;  %v309_v22 = vld [vmem:[%s1474_s8 + $0x90] sm:$0xf] }
  0x44   : > { %308 = vst [vmem:[%s1479_s10 + $0x44] sm:$0xf] %v307_v21  ;;  %v311_v23 = vld [vmem:[%s1474_s8 + $0x98] sm:$0xf]  ;;  %v313_v24 = vld [vmem:[%s1474_s8 + $0xa0] sm:$0xf] }
  0x45   : > { %310 = vst [vmem:[%s1479_s10 + $0x48] sm:$0xf] %v309_v22  ;;  %312 = vst [vmem:[%s1479_s10 + $0x4c] sm:$0xf] %v311_v23  ;;  %v315_v25 = vld [vmem:[%s1474_s8 + $0xa8] sm:$0xf] }
  0x46   : > { %314 = vst [vmem:[%s1479_s10 + $0x50] sm:$0xf] %v313_v24  ;;  %v317_v26 = vld [vmem:[%s1474_s8 + $0xb0] sm:$0xf]  ;;  %v319_v27 = vld [vmem:[%s1474_s8 + $0xb8] sm:$0xf] }
  0x47   : > { %316 = vst [vmem:[%s1479_s10 + $0x54] sm:$0xf] %v315_v25  ;;  %318 = vst [vmem:[%s1479_s10 + $0x58] sm:$0xf] %v317_v26  ;;  %v321_v28 = vld [vmem:[%s1474_s8 + $0xc0] sm:$0xf] }
  0x48   : > { %320 = vst [vmem:[%s1479_s10 + $0x5c] sm:$0xf] %v319_v27  ;;  %v323_v29 = vld [vmem:[%s1474_s8 + $0xc8] sm:$0xf]  ;;  %v325_v30 = vld [vmem:[%s1474_s8 + $0xd0] sm:$0xf] }
  0x49   : > { %322 = vst [vmem:[%s1479_s10 + $0x60] sm:$0xf] %v321_v28  ;;  %324 = vst [vmem:[%s1479_s10 + $0x64] sm:$0xf] %v323_v29  ;;  %v327_v31 = vld [vmem:[%s1474_s8 + $0xd8] sm:$0xf] }
  0x4a   : > { %326 = vst [vmem:[%s1479_s10 + $0x68] sm:$0xf] %v325_v30  ;;  %v329_v32 = vld [vmem:[%s1474_s8 + $0xe0] sm:$0xf]  ;;  %v331_v33 = vld [vmem:[%s1474_s8 + $0xe8] sm:$0xf] }
  0x4b   : > { %328 = vst [vmem:[%s1479_s10 + $0x6c] sm:$0xf] %v327_v31  ;;  %330 = vst [vmem:[%s1479_s10 + $0x70] sm:$0xf] %v329_v32  ;;  %v333_v34 = vld [vmem:[%s1474_s8 + $0xf0] sm:$0xf] }
  0x4c   : > { %332 = vst [vmem:[%s1479_s10 + $0x74] sm:$0xf] %v331_v33  ;;  %v335_v35 = vld [vmem:[%s1474_s8 + $0xf8] sm:$0xf]  ;;  %334 = vst [vmem:[%s1479_s10 + $0x78] sm:$0xf] %v333_v34 }
  0x4d   : > { %336 = vst [vmem:[%s1479_s10 + $0x7c] sm:$0xf] %v335_v35 }
  0x4e PF: > { %p1038_p0 = scmp.ge.s32.totalorder %s1332_s25, 1  ;;  %p422_p1 = scmp.lt.s32.totalorder %s1332_s25, 19 }
  0x50   : > { %p423_p2 = pnand %p1038_p0, %p422_p1 }
  0x51   : > { %s429_s0 = sand.u32 (!%p423_p2), 1, %s1308_s19   ;;  %s436_s28 = sand.u32 (!%p423_p2), 1, %s1300_s17  }
  0x52   : > { %426 = sbr.rel (%p423_p2) target bundleno = 385 (0x181), region = 99  ;;  %s1039_s11 = sshll.u32 (!%p423_p2), %s429_s0, 5 }
  0x53   : > { %s1040_s26 = sshll.u32 (!%p423_p2), %s436_s28, 7  ;;  %s457_s5 = sand.u32 (!%p423_p2), 1, %s1292_s15  }
  0x54   : > { %p486_p3 = scmp.lt.s32.totalorder (!%p423_p2), %s1320_s22, 1  ;;  %s1041_s29 = sshll.u32 (!%p423_p2), %s457_s5, 4 }
  0x55   : > { %s1559_s23 = scalar_lea.vmem (!%p423_p2), [#allocation3], %s1039_s11  ;;  %s1561_s17 = scalar_lea.vmem (!%p423_p2), [#allocation4], %s1040_s26 }
  0x56   : > { %s1563_s19 = scalar_lea.vmem (!%p423_p2), [#allocation5], %s1041_s29  ;;  %p1044_p4 = scmp.ne.s32.totalorder (!%p423_p2), %s1316_s21, 0 }
  0x59   : > { %s487_s6 = scalar_select %p486_p3, %s1320_s22, 1 }
  0x5a   : > { %504 = sbr.rel (%p1044_p4) target bundleno = 97 (0x61), region = 111  ;;  %v1334_v36 = vmov (!%p1044_p4), 0.0  }
  0x5b   : > { %s1042_s30 = sshll.u32 %s487_s6, 3  ;;  %505 = vst [vmem:[#allocation2] sm:$0xff] (!%p1044_p4), %v1334_v36  ;;  %506 = vst [vmem:[#allocation2 + $0x8] sm:$0xff] (!%p1044_p4), %v1334_v36 }
  0x5c   : > { %s1552_s10 = scalar_lea.vmem %s1637_s3, %s1042_s30  ;;  %s1557_s24 = scalar_lea.vmem %s1638_s4, %s1042_s30  ;;  %507 = vst [vmem:[#allocation2 + $0x10] sm:$0xff] (!%p1044_p4), %v1334_v36  ;;  %508 = vst [vmem:[#allocation2 + $0x18] sm:$0xff] (!%p1044_p4), %v1334_v36 }
  0x61 PF: > { %v1224_v37 = vld [vmem:[%s1561_s17 + $0x40] sm:$0xff]   ;;  %v1226_v39 = vld [vmem:[%s1561_s17 + $0x48] sm:$0xff]   ;;  %v1228_v41 = vld [vmem:[%s1561_s17 + $0x50] sm:$0xff]   ;;  %p1065_p5 = scmp.ne.s32.totalorder %s1316_s21, 8 }
  0x62   : > { %v1225_v38 = vld [vmem:[%s1561_s17] sm:$0xff]   ;;  %1091 = vmatprep.subr.bf16.mxu0 %v1224_v37  ;;  %1119 = vmatprep.subr.bf16.mxu1 %v1224_v37  ;;  %v1227_v40 = vld [vmem:[%s1561_s17 + $0x8] sm:$0xff]   ;;  %v1229_v42 = vld [vmem:[%s1561_s17 + $0x10] sm:$0xff]  }
  0x63   : > { %1092 = vmatpush3.bf16.msra.mxu0 %v1225_v38  ;;  %1127 = vmatpush3.bf16.msra.mxu1 %v1225_v38  ;;  %v1230_v43 = vld [vmem:[%s1561_s17 + $0x58] sm:$0xff]   ;;  %v1232_v45 = vld [vmem:[%s1561_s17 + $0x60] sm:$0xff]   ;;  %v1234_v47 = vld [vmem:[%s1561_s17 + $0x68] sm:$0xff]  }
  0x64   : > { %1093 = vmatprep.subr.bf16.mxu0 %v1226_v39  ;;  %1120 = vmatprep.subr.bf16.mxu1 %v1226_v39  ;;  %v1231_v44 = vld [vmem:[%s1561_s17 + $0x18] sm:$0xff]   ;;  %v1233_v46 = vld [vmem:[%s1561_s17 + $0x20] sm:$0xff]   ;;  %v1235_v50 = vld [vmem:[%s1561_s17 + $0x28] sm:$0xff]  }
  0x65   : > { %v1242_v48 = vld [vmem:[%s1559_s23 + $0x4] ss:$8 sps:$4 sm:$0xff]   ;;  %v1245_v49 = vld [vmem:[%s1559_s23 + $0x14] ss:$8 sps:$4 sm:$0xff]   ;;  %v1240_v55 = vld [vmem:[%s1559_s23] ss:$8 sps:$4 sm:$0xff]  }
  0x66   : > { %v1236_v51 = vld [vmem:[%s1561_s17 + $0x70] sm:$0xff]   ;;  %697 = vmatprep.mubr.bf16.mxu0 %v1242_v48  ;;  %705 = vmatprep.mubr.bf16.mxu1 %v1245_v49  ;;  %v1238_v53 = vld [vmem:[%s1561_s17 + $0x78] sm:$0xff]   ;;  %v509_v59 = vld [vmem:[#allocation2] sm:$0xff] }
  0x67   : > { %1094 = vmatpush3.bf16.msra.mxu0 %v1227_v40  ;;  %1128 = vmatpush3.bf16.msra.mxu1 %v1227_v40  ;;  %v1237_v52 = vld [vmem:[%s1561_s17 + $0x30] sm:$0xff]   ;;  %v1239_v54 = vld [vmem:[%s1561_s17 + $0x38] sm:$0xff]   ;;  %v510_v3 = vld [vmem:[#allocation2 + $0x8] sm:$0xff] }
  0x68   : > { %1095 = vmatprep.subr.bf16.mxu0 %v1228_v41  ;;  %1121 = vmatprep.subr.bf16.mxu1 %v1228_v41  ;;  %v1243_v56 = vld [vmem:[%s1559_s23 + $0x10] ss:$8 sps:$4 sm:$0xff]  }
  0x69   : > { %v511_v61 = vld [vmem:[#allocation2 + $0x10] sm:$0xff]  ;;  %v512_v5 = vld [vmem:[#allocation2 + $0x18] sm:$0xff] }
  0x6b   : > { %1096 = vmatpush3.bf16.msra.mxu0 %v1229_v42  ;;  %1129 = vmatpush3.bf16.msra.mxu1 %v1229_v42 }
  0x6c   : > { %1097 = vmatprep.subr.bf16.mxu0 %v1230_v43  ;;  %1122 = vmatprep.subr.bf16.mxu1 %v1230_v43 }
  0x6f   : > { %1098 = vmatpush3.bf16.msra.mxu0 %v1231_v44  ;;  %1130 = vmatpush3.bf16.msra.mxu1 %v1231_v44 }
  0x70   : > { %1099 = vmatprep.subr.bf16.mxu0 %v1232_v45  ;;  %1123 = vmatprep.subr.bf16.mxu1 %v1232_v45 }
  0x73   : > { %1100 = vmatpush3.bf16.msra.mxu0 %v1233_v46  ;;  %1131 = vmatpush3.bf16.msra.mxu1 %v1233_v46 }
  0x74   : > { %1101 = vmatprep.subr.bf16.mxu0 %v1234_v47  ;;  %1124 = vmatprep.subr.bf16.mxu1 %v1234_v47 }
  0x77   : > { %1102 = vmatpush3.bf16.msra.mxu0 %v1235_v50  ;;  %1132 = vmatpush3.bf16.msra.mxu1 %v1235_v50 }
  0x78   : > { %1103 = vmatprep.subr.bf16.mxu0 %v1236_v51  ;;  %1125 = vmatprep.subr.bf16.mxu1 %v1236_v51 }
  0x7b   : > { %1104 = vmatpush3.bf16.msra.mxu0 %v1237_v52  ;;  %1133 = vmatpush3.bf16.msra.mxu1 %v1237_v52 }
  0x7c   : > { %1105 = vmatprep.subr.bf16.mxu0 %v1238_v53  ;;  %1126 = vmatprep.subr.bf16.mxu1 %v1238_v53 }
  0x7f   : > { %1106 = vmatpush3.bf16.msra.mxu0 %v1239_v54  ;;  %1134 = vmatpush3.bf16.msra.mxu1 %v1239_v54 }
  0x82   : > { %698 = vmatmul.mubr.bf16.vlgmr.msra.gmra.mrb[0].mxu0 %v1240_v55  ;;  %706 = vmatmul.mubr.bf16.vlgmr.msra.gmra.mrb[0].mxu1 %v1243_v56 }
 0x155   : > { %v1107_v57 = vpop.f32.mrb[0].mxu0  ;;  %v1113_v58 = vpop.f32.mrb[0].mxu1 }
 0x156   : > { %v1108_v60 = vpop.f32.mrb[1].mxu0  ;;  %v1114_v62 = vpop.f32.mrb[1].mxu1 }
 0x157   : > { %v1109_v63 = vadd.f32 %v1108_v60, %v1107_v57  ;;  %v1115_v0 = vadd.f32 %v1114_v62, %v1113_v58  ;;  %v1110_v1 = vpop.f32.mrb[2].mxu0  ;;  %v1116_v2 = vpop.f32.mrb[2].mxu1  ;;  %725 = sbr.rel (%p1065_p5) target bundleno = 378 (0x17a), region = 115 }
 0x158   : > { %v1111_v4 = vpop.f32.mrb[3].mxu0  ;;  %v1117_v6 = vpop.f32.mrb[3].mxu1 }
 0x159   : > { %v714_v7 = vadd.f32 %v1109_v63, %v509_v59  ;;  %v716_v8 = vadd.f32 %v1115_v0, %v511_v61  ;;  %v1112_v9 = vadd.f32 %v1111_v4, %v1110_v1  ;;  %v1118_v10 = vadd.f32 %v1117_v6, %v1116_v2 }
 0x15b   : > { %718 = vst [vmem:[#allocation2] sm:$0xff] %v714_v7  ;;  %720 = vst [vmem:[#allocation2 + $0x10] sm:$0xff] %v716_v8  ;;  %v715_v11 = vadd.f32 %v1112_v9, %v510_v3  ;;  %v717_v12 = vadd.f32 %v1118_v10, %v512_v5 }
 0x15d   : > { %719 = vst [vmem:[#allocation2 + $0x8] sm:$0xff] %v715_v11  ;;  %721 = vst [vmem:[#allocation2 + $0x18] sm:$0xff] %v717_v12 }
 0x162   : > { %v726_v13 = vld [vmem:[#allocation2] sm:$0xff]  ;;  %v728_v15 = vld [vmem:[#allocation2 + $0x10] sm:$0xff] }
 0x163   : > { %v759_v18 = vmul.f32 %v726_v13, %v726_v13  ;;  %v761_v22 = vmul.f32 %v728_v15, %v728_v15 }
 0x164   : > { %v727_v14 = vld [vmem:[#allocation2 + $0x8] sm:$0xff]  ;;  %v729_v20 = vld [vmem:[#allocation2 + $0x18] sm:$0xff] }
 0x165   : > { %v1083_v16 = vpack.c.bf16 %v727_v14, %v726_v13  ;;  %v750_v17 = vadd.f32 %v727_v14, %v726_v13  ;;  %v760_v19 = vmul.f32 %v727_v14, %v727_v14  ;;  %v1088_v21 = vpack.c.bf16 %v729_v20, %v728_v15 }
 0x166   : > { %v762_v25 = vmul.f32 %v729_v20, %v729_v20 }
 0x167   : > { %1084 = vst [vmem:[%s1563_s19] sm:$0xff] %v1083_v16   ;;  %v763_v23 = vadd.f32 %v760_v19, %v759_v18  ;;  %v751_v24 = vadd.f32 %v750_v17, %v728_v15  ;;  %1090 = vst [vmem:[%s1563_s19 + $0x8] sm:$0xff] %v1088_v21  }
 0x169   : > { %v752_v26 = vadd.f32 %v751_v24, %v729_v20  ;;  %v764_v27 = vadd.f32 %v763_v23, %v761_v22 }
 0x16b   : > { %v753_v28 = vrot.slane %v752_v26, 4  ;;  %v765_v29 = vadd.f32 %v764_v27, %v762_v25 }
 0x16d   : > { %v754_v30 = vadd.f32 %v753_v28, %v752_v26  ;;  %v766_v31 = vrot.slane %v765_v29, 4 }
 0x16f   : > { %v755_v32 = vrot.slane %v754_v30, 2  ;;  %v767_v33 = vadd.f32 %v766_v31, %v765_v29 }
 0x171   : > { %v756_v34 = vadd.f32 %v755_v32, %v754_v30  ;;  %v768_v35 = vrot.slane %v767_v33, 2 }
 0x173   : > { %v757_v36 = vrot.slane %v756_v34, 1  ;;  %v769_v37 = vadd.f32 %v768_v35, %v767_v33 }
 0x175   : > { %v758_v38 = vadd.f32 %v757_v36, %v756_v34  ;;  %v770_v39 = vrot.slane %v769_v37, 1 }
 0x177   : > { %772 = vst [vmem:[%s1552_s10] sm:$0xff] %v758_v38  ;;  %v771_v40 = vadd.f32 %v770_v39, %v769_v37 }
 0x179   : > { %773 = vst [vmem:[%s1557_s24] sm:$0xff] %v771_v40 }
 0x17a PF: > { %796 = sbr.rel (!%p1454_p12) target bundleno = 385 (0x181), region = 119  ;;  %s1071_s1 = sshll.u32 (%p1454_p12), %s1320_s22, 2  ;;  %v817_v41 = vld [vmem:[%s1563_s19] sm:$0xf] (%p1454_p12)  ;;  %v819_v42 = vld [vmem:[%s1563_s19 + $0x4] sm:$0xf] (%p1454_p12) }
 0x17b   : > { %s801_s23 = scalar_lea.vmem (%p1454_p12), %s1636_s2, %s1071_s1  ;;  %v821_v43 = vld [vmem:[%s1563_s19 + $0x8] sm:$0xf] (%p1454_p12)  ;;  %v823_v44 = vld [vmem:[%s1563_s19 + $0xc] sm:$0xf] (%p1454_p12) }
 0x17c   : > { %818 = vst [vmem:[%s801_s23] sm:$0xf] (%p1454_p12), %v817_v41  ;;  %820 = vst [vmem:[%s801_s23 + $0x8] sm:$0xf] (%p1454_p12), %v819_v42 }
 0x17d   : > { %822 = vst [vmem:[%s801_s23 + $0x10] sm:$0xf] (%p1454_p12), %v821_v43  ;;  %824 = vst [vmem:[%s801_s23 + $0x18] sm:$0xf] (%p1454_p12), %v823_v44 }
 0x181 PF: > { %s15_s25 = sadd.s32 1, %s1332_s25   ;;  %s1654_s21 = sld [smem:[#allocation6_spill]] }
 0x182   : > { %p12_p6 = scmp.ge.s32.totalorder %s15_s25, 20   ;;  %s1655_s22 = sld [smem:[#allocation7_spill]] }
 0x183   : > { %s1656_s23 = sld [smem:[#allocation8_spill]]  ;;  %s1657_s24 = sld [smem:[#allocation9_spill]] }
 0x184   : > { %s1658_s15 = smov %s1296_s16  ;;  %s1659_s16 = smov %s1452_s13 }
 0x185   : > { %s1660_s17 = smov %s1304_s18  ;;  %s1661_s18 = smov %s1449_s12 }
 0x186   : > { %s1662_s19 = smov %s1312_s20  ;;  %s1663_s20 = smov %s1435_s7 }
 0x187   :  { %14 = sbr.rel (!%p12_p6) target bundleno = 9 (0x9), region = 223 }

// kernel: net_forward.34
= control target key start
LH: loop header
LB: loop body
LE: loop exit
PB: predicated region body
PF: predicated region fallthrough
CT: control target
= control target key end

     0   :  { %s1033_s15 = smov 0   ;;  %s1035_s16 = smov 0   ;;  %s1149_s0 = inlined_call_operand.vmem [shape: bf16[32,128], index: 0, kind: input, shape index: {}]   ;;  %s1150_s1 = inlined_call_operand.vmem [shape: bf16[128,256], index: 1, kind: input, shape index: {}]   ;;  %s1151_s2 = inlined_call_operand.vmem [shape: bf16[32,256], index: 2, kind: output, shape index: {0}]   ;;  %s1152_s3 = inlined_call_operand.vmem [shape: f32[8,256], index: 3, kind: output, shape index: {1}]   ;;  %s1153_s4 = inlined_call_operand.vmem [shape: f32[8,256], index: 4, kind: output, shape index: {2}]  }
   0x1   :  { %s1037_s17 = smov 0   ;;  %s1039_s18 = smov 0  }
   0x2   :  { %s1041_s19 = smov 0  }
   0x3 LB: > { %s30_s20 = sadd.s32 1, %s1002_s18  ;;  %s843_s21 = sadd.s32 4294967295, %s1006_s19   ;;  %s1006_s19 = sphi %s1041_s19, %s15_s19   ;;  %s1002_s18 = sphi %s1039_s18, %s1158_s18   ;;  %s998_s17 = sphi %s1037_s17, %s1157_s17   ;;  %s994_s16 = sphi %s1035_s16, %s1156_s16   ;;  %s990_s15 = sphi %s1033_s15, %s1155_s15  }
   0x4   : > { %p32_p0 = scmp.ge.s32.totalorder %s30_s20, 2  ;;  %p78_p1 = scmp.ne.s32.totalorder %s994_s16, %s990_s15 }
   0x5   : > { %p79_p2 = scmp.eq.s32.totalorder %s1006_s19, 0  ;;  %p110_p4 = scmp.eq.s32.totalorder %s843_s21, 1 }
   0x6   : > { %s1160_s20 = smov (%p32_p0, %s30_s20), 0  ;;  %s71_s23 = sadd.s32 1, %s994_s16 }
   0x7   : > { %p80_p3 = por %p79_p2, %p78_p1  ;;  %s67_s22 = ssub.s32 %s1002_s18, %s1160_s20 }
   0x8   : > { %p69_p5 = scmp.eq.s32.totalorder %s67_s22, 0  ;;  %p1068_p6 = por %p110_p4, %p78_p1 }
   0x9   : > { %p847_p7 = scmp.ge.s32.totalorder %s1006_s19, 2 }
   0xa   : > { %s1073_s25 = scalar_select %p69_p5, %s994_s16, %s71_s23  }
   0xb   : > { %200 = sbr.rel (%p847_p7) target bundleno = 32 (0x20), region = 20 }
  0x12   : > { %203 = sbr.rel (!%p80_p3) target bundleno = 32 (0x20), region = 24  ;;  %s205_s26 = sand.u32 (%p80_p3), 1, %s994_s16  }
  0x13   : > { %s849_s27 = sshll.u32 (%p80_p3), %s1002_s18, 2  ;;  %s848_s28 = sshll.u32 (%p80_p3), %s205_s26, 6 }
  0x14   : > { %s1081_s5 = scalar_lea.vmem (%p80_p3), %s1150_s1, %s849_s27  ;;  %s207_s6 = scalar_lea.vmem (%p80_p3), [#allocation3], %s848_s28 }
  0x15   : > { %v228_v0 = vld [vmem:[%s1081_s5] sm:$0xf] (%p80_p3)  ;;  %v230_v1 = vld [vmem:[%s1081_s5 + $0x8] sm:$0xf] (%p80_p3)  ;;  %v232_v2 = vld [vmem:[%s1081_s5 + $0x10] sm:$0xf] (%p80_p3) }
  0x16   : > { %229 = vst [vmem:[%s207_s6] sm:$0xf] (%p80_p3), %v228_v0  ;;  %231 = vst [vmem:[%s207_s6 + $0x4] sm:$0xf] (%p80_p3), %v230_v1  ;;  %v234_v3 = vld [vmem:[%s1081_s5 + $0x18] sm:$0xf] (%p80_p3) }
  0x17   : > { %v236_v4 = vld [vmem:[%s1081_s5 + $0x20] sm:$0xf] (%p80_p3)  ;;  %233 = vst [vmem:[%s207_s6 + $0x8] sm:$0xf] (%p80_p3), %v232_v2  ;;  %235 = vst [vmem:[%s207_s6 + $0xc] sm:$0xf] (%p80_p3), %v234_v3 }
  0x18   : > { %237 = vst [vmem:[%s207_s6 + $0x10] sm:$0xf] (%p80_p3), %v236_v4  ;;  %v238_v5 = vld [vmem:[%s1081_s5 + $0x28] sm:$0xf] (%p80_p3)  ;;  %v240_v6 = vld [vmem:[%s1081_s5 + $0x30] sm:$0xf] (%p80_p3) }
  0x19   : > { %v242_v7 = vld [vmem:[%s1081_s5 + $0x38] sm:$0xf]  ;;  %239 = vst [vmem:[%s207_s6 + $0x14] sm:$0xf] %v238_v5  ;;  %241 = vst [vmem:[%s207_s6 + $0x18] sm:$0xf] %v240_v6 }
  0x1a   : > { %243 = vst [vmem:[%s207_s6 + $0x1c] sm:$0xf] %v242_v7  ;;  %v244_v8 = vld [vmem:[%s1081_s5 + $0x40] sm:$0xf]  ;;  %v246_v9 = vld [vmem:[%s1081_s5 + $0x48] sm:$0xf] }
  0x1b   : > { %v248_v10 = vld [vmem:[%s1081_s5 + $0x50] sm:$0xf]  ;;  %245 = vst [vmem:[%s207_s6 + $0x20] sm:$0xf] %v244_v8  ;;  %247 = vst [vmem:[%s207_s6 + $0x24] sm:$0xf] %v246_v9 }
  0x1c   : > { %249 = vst [vmem:[%s207_s6 + $0x28] sm:$0xf] %v248_v10  ;;  %v250_v11 = vld [vmem:[%s1081_s5 + $0x58] sm:$0xf]  ;;  %v252_v12 = vld [vmem:[%s1081_s5 + $0x60] sm:$0xf] }
  0x1d   : > { %v254_v13 = vld [vmem:[%s1081_s5 + $0x68] sm:$0xf]  ;;  %251 = vst [vmem:[%s207_s6 + $0x2c] sm:$0xf] %v250_v11  ;;  %253 = vst [vmem:[%s207_s6 + $0x30] sm:$0xf] %v252_v12 }
  0x1e   : > { %255 = vst [vmem:[%s207_s6 + $0x34] sm:$0xf] %v254_v13  ;;  %v256_v14 = vld [vmem:[%s1081_s5 + $0x70] sm:$0xf]  ;;  %v258_v15 = vld [vmem:[%s1081_s5 + $0x78] sm:$0xf] }
  0x1f   : > { %257 = vst [vmem:[%s207_s6 + $0x38] sm:$0xf] %v256_v14  ;;  %259 = vst [vmem:[%s207_s6 + $0x3c] sm:$0xf] %v258_v15 }
  0x20 PF: > { %p850_p8 = scmp.ge.s32.totalorder %s1006_s19, 1  ;;  %p313_p9 = scmp.lt.s32.totalorder %s1006_s19, 3 }
  0x22   : > { %p314_p10 = pnand %p850_p8, %p313_p9 }
  0x23   : > { %s320_s7 = sand.u32 (!%p314_p10), 1, %s990_s15   ;;  %v966_v16 = vld [vmem:[%s1149_s0] sm:$0xff] (!%p314_p10)   ;;  %v967_v25 = vld [vmem:[%s1149_s0 + $0x8] sm:$0xff] (!%p314_p10)   ;;  %p381_p11 = scmp.lt.s32.totalorder (!%p314_p10), %s998_s17, 1 }
  0x24   : > { %317 = sbr.rel (%p314_p10) target bundleno = 307 (0x133), region = 65  ;;  %s851_s10 = sshll.u32 (!%p314_p10), %s320_s7, 6  ;;  %914 = vmatprep.mubr.bf16.mxu0 (!%p314_p10), %v966_v16 }
  0x25   : > { %s322_s11 = scalar_lea.vmem (!%p314_p10), [#allocation3], %s851_s10  ;;  %s852_s14 = sshll.u32 (!%p314_p10), %s320_s7, 4 }
  0x26   : > { %v958_v17 = vld [vmem:[%s322_s11] sm:$0xff] (!%p314_p10)   ;;  %v959_v18 = vld [vmem:[%s322_s11 + $0x8] sm:$0xff] (!%p314_p10)   ;;  %v960_v19 = vld [vmem:[%s322_s11 + $0x10] sm:$0xff] (!%p314_p10)   ;;  %s1112_s21 = scalar_lea.vmem (!%p314_p10), [#allocation4], %s852_s14 }
  0x27   : > { %898 = vmatprep.subr.bf16.mxu0 (!%p314_p10), %v958_v17  ;;  %v961_v20 = vld [vmem:[%s322_s11 + $0x18] sm:$0xff] (!%p314_p10)   ;;  %v962_v21 = vld [vmem:[%s322_s11 + $0x20] sm:$0xff] (!%p314_p10)   ;;  %v963_v22 = vld [vmem:[%s322_s11 + $0x28] sm:$0xff] (!%p314_p10)  }
  0x28   : > { %899 = vmatpush3.bf16.msra.mxu0 (!%p314_p10), %v958_v17  ;;  %v964_v23 = vld [vmem:[%s322_s11 + $0x30] sm:$0xff] (!%p314_p10)   ;;  %v965_v24 = vld [vmem:[%s322_s11 + $0x38] sm:$0xff] (!%p314_p10)  }
  0x29   : > { %900 = vmatprep.subr.bf16.mxu0 (!%p314_p10), %v959_v18 }
  0x2b   : > { %s382_s15 = scalar_select %p381_p11, %s998_s17, 1 }
  0x2c   : > { %901 = vmatpush3.bf16.msra.mxu0 %v959_v18  ;;  %s870_s5 = sshll.u32 (%p1068_p6), %s998_s17, 2 }
  0x2d   : > { %902 = vmatprep.subr.bf16.mxu0 %v960_v19  ;;  %s853_s22 = sshll.u32 %s382_s15, 3  ;;  %s623_s8 = scalar_lea.vmem (%p1068_p6), %s1151_s2, %s870_s5 }
  0x2e   : > { %s386_s27 = scalar_lea.vmem %s1152_s3, %s853_s22  ;;  %s394_s30 = scalar_lea.vmem %s1153_s4, %s853_s22 }
  0x30   : > { %903 = vmatpush3.bf16.msra.mxu0 %v960_v19 }
  0x31   : > { %904 = vmatprep.subr.bf16.mxu0 %v961_v20 }
  0x34   : > { %905 = vmatpush3.bf16.msra.mxu0 %v961_v20 }
  0x35   : > { %906 = vmatprep.subr.bf16.mxu0 %v962_v21 }
  0x38   : > { %907 = vmatpush3.bf16.msra.mxu0 %v962_v21 }
  0x39   : > { %908 = vmatprep.subr.bf16.mxu0 %v963_v22 }
  0x3c   : > { %909 = vmatpush3.bf16.msra.mxu0 %v963_v22 }
  0x3d   : > { %910 = vmatprep.subr.bf16.mxu0 %v964_v23 }
  0x40   : > { %911 = vmatpush3.bf16.msra.mxu0 %v964_v23 }
  0x41   : > { %912 = vmatprep.subr.bf16.mxu0 %v965_v24 }
  0x44   : > { %913 = vmatpush3.bf16.msra.mxu0 %v965_v24 }
  0x47   : > { %915 = vmatmul.mubr.bf16.vlgmr.msra.gmra.mrb[0].mxu0 %v967_v25 }
 0x11a   : > { %v916_v26 = vpop.f32.mrb[0].mxu0 }
 0x11b   : > { %v522_v27 = vpop.f32.mrb[1].mxu0  ;;  %v583_v35 = vmul.f32 %v916_v26, %v916_v26 }
 0x11c   : > { %v917_v28 = vpop.f32.mrb[2].mxu0  ;;  %v581_v31 = vmul.f32 %v522_v27, %v522_v27 }
 0x11d   : > { %v885_v29 = vpack.c.bf16 %v917_v28, %v916_v26  ;;  %v525_v30 = vpop.f32.mrb[3].mxu0  ;;  %v584_v38 = vmul.f32 %v917_v28, %v917_v28 }
 0x11e   : > { %v880_v32 = vpack.c.bf16 %v525_v30, %v522_v27  ;;  %v572_v33 = vadd.f32 %v525_v30, %v522_v27  ;;  %v582_v34 = vmul.f32 %v525_v30, %v525_v30 }
 0x11f   : > { %887 = vst [vmem:[%s1112_s21 + $0x8] sm:$0xff] %v885_v29  }
 0x120   : > { %881 = vst [vmem:[%s1112_s21] sm:$0xff] %v880_v32   ;;  %v573_v36 = vadd.f32 %v916_v26, %v572_v33  ;;  %v585_v37 = vadd.f32 %v582_v34, %v581_v31 }
 0x122   : > { %v574_v39 = vadd.f32 %v917_v28, %v573_v36  ;;  %v586_v40 = vadd.f32 %v585_v37, %v583_v35 }
 0x124   : > { %v575_v41 = vrot.slane %v574_v39, 4  ;;  %v587_v42 = vadd.f32 %v586_v40, %v584_v38 }
 0x126   : > { %v576_v43 = vadd.f32 %v575_v41, %v574_v39  ;;  %v588_v44 = vrot.slane %v587_v42, 4  ;;  %v643_v56 = vld [vmem:[%s1112_s21 + $0x8] sm:$0xf] (%p1068_p6)  ;;  %v645_v57 = vld [vmem:[%s1112_s21 + $0xc] sm:$0xf] (%p1068_p6) }
 0x127   : > { %v639_v54 = vld [vmem:[%s1112_s21] sm:$0xf] (%p1068_p6)  ;;  %v641_v55 = vld [vmem:[%s1112_s21 + $0x4] sm:$0xf] (%p1068_p6)  ;;  %644 = vst [vmem:[%s623_s8 + $0x10] sm:$0xf] (%p1068_p6), %v643_v56 }
 0x128   : > { %v577_v45 = vrot.slane %v576_v43, 2  ;;  %v589_v46 = vadd.f32 %v588_v44, %v587_v42  ;;  %640 = vst [vmem:[%s623_s8] sm:$0xf] (%p1068_p6), %v639_v54  ;;  %642 = vst [vmem:[%s623_s8 + $0x8] sm:$0xf] (%p1068_p6), %v641_v55 }
 0x129   : > { %646 = vst [vmem:[%s623_s8 + $0x18] sm:$0xf] (%p1068_p6), %v645_v57 }
 0x12a   : > { %v578_v47 = vadd.f32 %v577_v45, %v576_v43  ;;  %v590_v48 = vrot.slane %v589_v46, 2 }
 0x12c   : > { %v579_v49 = vrot.slane %v578_v47, 1  ;;  %v591_v50 = vadd.f32 %v590_v48, %v589_v46  ;;  %618 = sbr.rel (!%p1068_p6) target bundleno = 307 (0x133), region = 81 }
 0x12e   : > { %v580_v51 = vadd.f32 %v579_v49, %v578_v47  ;;  %v592_v52 = vrot.slane %v591_v50, 1 }
 0x130   : > { %v593_v53 = vadd.f32 %v592_v52, %v591_v50  ;;  %594 = vst [vmem:[%s386_s27] sm:$0xff] %v580_v51 }
 0x132   : > { %595 = vst [vmem:[%s394_s30] sm:$0xff] %v593_v53 }
 0x133 PF: > { %s15_s19 = sadd.s32 1, %s1006_s19   ;;  %s1155_s15 = smov %s994_s16 }
 0x134   : > { %p12_p12 = scmp.ge.s32.totalorder %s15_s19, 4   ;;  %s1156_s16 = smov %s1073_s25 }
 0x135   : > { %s1157_s17 = smov %s1002_s18  ;;  %s1158_s18 = smov %s1160_s20 }
 0x136   :  { %14 = sbr.rel (!%p12_p12) target bundleno = 3 (0x3), region = 180 }

// kernel: net_forward.40
= control target key start
LH: loop header
LB: loop body
LE: loop exit
PB: predicated region body
PF: predicated region fallthrough
CT: control target
= control target key end

     0   :  { %s986_s15 = smov 0   ;;  %s988_s16 = smov 0   ;;  %s1122_s0 = inlined_call_operand.vmem [shape: bf16[32,2304], index: 0, kind: input, shape index: {}]   ;;  %s1123_s1 = inlined_call_operand.vmem [shape: bf16[2304,128], index: 1, kind: input, shape index: {}]   ;;  %s1124_s2 = inlined_call_operand.vmem [shape: bf16[32,128], index: 2, kind: output, shape index: {0}]   ;;  %s1125_s3 = inlined_call_operand.vmem [shape: f32[16,128], index: 3, kind: output, shape index: {1}]   ;;  %s1126_s4 = inlined_call_operand.vmem [shape: f32[16,128], index: 4, kind: output, shape index: {2}]  }
   0x1   :  { %s990_s17 = smov 0   ;;  %s992_s18 = smov 0  }
   0x2   :  { %s994_s19 = smov 0   ;;  %s996_s20 = smov 0  }
   0x3   :  { %s998_s21 = smov 0  }
   0x4 LB: > { %s27_s22 = sadd.s32 1, %s950_s19  ;;  %s34_s23 = sadd.s32 1, %s954_s20  ;;  %s958_s21 = sphi %s998_s21, %s15_s21   ;;  %s954_s20 = sphi %s996_s20, %s1132_s20   ;;  %s950_s19 = sphi %s994_s19, %s1131_s19   ;;  %s946_s18 = sphi %s992_s18, %s1130_s18   ;;  %s942_s17 = sphi %s990_s17, %s1129_s17   ;;  %s938_s16 = sphi %s988_s16, %s1128_s16   ;;  %s934_s15 = sphi %s986_s15, %s1127_s15  }
   0x5   : > { %p28_p0 = scmp.ge.s32.totalorder %s27_s22, 9  ;;  %p50_p1 = scmp.ne.s32.totalorder %s938_s16, %s934_s15 }
   0x6   : > { %p51_p2 = scmp.eq.s32.totalorder %s958_s21, 0  ;;  %s43_s27 = sadd.s32 1, %s938_s16 }
   0x7   : > { %s1134_s22 = smov (%p28_p0, %s27_s22), 0  ;;  %s1136_s23 = smov (!%p28_p0, %s34_s23), %s954_s20 }
   0x8   : > { %p52_p3 = por %p51_p2, %p50_p1  ;;  %p36_p4 = scmp.ge.s32.totalorder %s1136_s23, 2 }
   0x9   : > { %s39_s24 = ssub.s32 %s950_s19, %s1134_s22  ;;  %p760_p6 = scmp.ge.s32.totalorder %s958_s21, 18 }
   0xa   : > { %s1138_s23 = smov (%p36_p4, %s1136_s23), 0 }
   0xb   : > { %s38_s25 = ssub.s32 %s954_s20, %s1138_s23  ;;  %188 = sbr.rel (%p760_p6) target bundleno = 27 (0x1b), region = 16 }
   0xc   : > { %s40_s26 = sor.u32 %s39_s24, %s38_s25 }
   0xd   : > { %p41_p5 = scmp.eq.s32.totalorder %s40_s26, 0 }
   0xf   : > { %s1037_s28 = scalar_select %p41_p5, %s938_s16, %s43_s27  }
  0x12   : > { %191 = sbr.rel (!%p52_p3) target bundleno = 27 (0x1b), region = 20  ;;  %s193_s29 = sand.u32 (%p52_p3), 1, %s938_s16  }
  0x13   : > { %s763_s30 = sshll.u32 (%p52_p3), %s950_s19, 1  ;;  %s761_s5 = sshll.u32 (%p52_p3), %s193_s29, 4 }
  0x14   : > { %s827_s6 = smul.u32 (%p52_p3), 36, %s954_s20  ;;  %s195_s12 = scalar_lea.vmem (%p52_p3), [#allocation3], %s761_s5 }
  0x16   : > { %s199_s7 = sadd.s32 (%p52_p3), %s827_s6, %s763_s30 }
  0x17   : > { %s765_s8 = sshll.u32 (%p52_p3), %s199_s7, 2 }
  0x18   : > { %s201_s11 = scalar_lea.vmem (%p52_p3), %s1122_s0, %s765_s8 }
  0x19   : > { %v231_v0 = vld [vmem:[%s201_s11] sm:$0xff]  ;;  %v233_v1 = vld [vmem:[%s201_s11 + $0x48] sm:$0xff] }
  0x1a   : > { %232 = vst [vmem:[%s195_s12] sm:$0xff] %v231_v0  ;;  %234 = vst [vmem:[%s195_s12 + $0x8] sm:$0xff] %v233_v1 }
  0x1b PF: > { %p766_p7 = scmp.ge.s32.totalorder %s958_s21, 1  ;;  %p251_p8 = scmp.lt.s32.totalorder %s958_s21, 19 }
  0x1d   : > { %p252_p9 = pnand %p766_p7, %p251_p8 }
  0x1e   : > { %s258_s13 = sand.u32 (!%p252_p9), 1, %s934_s15   ;;  %s768_s14 = sshll.u32 (!%p252_p9), %s942_s17, 5 }
  0x1f   : > { %255 = sbr.rel (%p252_p9) target bundleno = 327 (0x147), region = 62  ;;  %s1050_s24 = sshll.u32 (!%p252_p9), %s258_s13, 4 }
  0x20   : > { %p311_p10 = scmp.lt.s32.totalorder (!%p252_p9), %s768_s14, 287  ;;  %s770_s25 = sshll.u32 (!%p252_p9), %s946_s18, 1 }
  0x21   : > { %p320_p11 = scmp.lt.s32.totalorder (!%p252_p9), %s770_s25, 3  ;;  %p328_p12 = scmp.lt.s32.totalorder (!%p252_p9), %s946_s18, 1 }
  0x22   : > { %p774_p13 = scmp.ne.s32.totalorder (!%p252_p9), %s942_s17, 0 }
  0x26   : > { %s1140_s14 = smov (!%p311_p10, %s768_s14), 287  ;;  %s1142_s25 = smov (!%p320_p11, %s770_s25), 3 }
  0x27   : > { %s769_s26 = sshll.u32 %s1140_s14, 2  ;;  %s1144_s18 = smov (!%p328_p12, %s946_s18), 1  ;;  %v960_v2 = vmov (!%p774_p13), 0.0  }
  0x28   : > { %s1057_s30 = scalar_lea.vmem %s1123_s1, %s769_s26  ;;  %s771_s5 = sshll.u32 %s1142_s25, 2  ;;  %347 = vst [vmem:[#allocation2] sm:$0xff] (!%p774_p13), %v960_v2  ;;  %348 = vst [vmem:[#allocation2 + $0x8] sm:$0xff] (!%p774_p13), %v960_v2 }
  0x29   : > { %s1063_s7 = scalar_lea.vmem %s1124_s2, %s771_s5  ;;  %s772_s8 = sshll.u32 %s1144_s18, 3 }
  0x2a   : > { %s1068_s11 = scalar_lea.vmem %s1125_s3, %s772_s8  ;;  %s1073_s14 = scalar_lea.vmem %s1126_s4, %s772_s8 }
  0x2b   : > { %s260_s26 = scalar_lea.vmem [#allocation3], %s1050_s24  ;;  %346 = sbr.rel (%p774_p13) target bundleno = 50 (0x32), region = 70 }
  0x32 PF: > { %v885_v3 = vld [vmem:[%s1057_s30 + $0x40] sm:$0xff]   ;;  %v887_v5 = vld [vmem:[%s1057_s30 + $0x48] sm:$0xff]   ;;  %v889_v7 = vld [vmem:[%s1057_s30 + $0x50] sm:$0xff]   ;;  %p793_p0 = scmp.ne.s32.totalorder %s942_s17, 8 }
  0x33   : > { %v886_v4 = vld [vmem:[%s1057_s30] sm:$0xff]   ;;  %805 = vmatprep.subr.bf16.mxu0 %v885_v3  ;;  %v888_v6 = vld [vmem:[%s1057_s30 + $0x8] sm:$0xff]   ;;  %v890_v8 = vld [vmem:[%s1057_s30 + $0x10] sm:$0xff]  }
  0x34   : > { %806 = vmatpush3.bf16.msra.mxu0 %v886_v4  ;;  %v891_v9 = vld [vmem:[%s1057_s30 + $0x58] sm:$0xff]   ;;  %v893_v11 = vld [vmem:[%s1057_s30 + $0x60] sm:$0xff]   ;;  %v895_v13 = vld [vmem:[%s1057_s30 + $0x68] sm:$0xff]  }
  0x35   : > { %807 = vmatprep.subr.bf16.mxu0 %v887_v5  ;;  %v892_v10 = vld [vmem:[%s1057_s30 + $0x18] sm:$0xff]   ;;  %v894_v12 = vld [vmem:[%s1057_s30 + $0x20] sm:$0xff]   ;;  %v896_v15 = vld [vmem:[%s1057_s30 + $0x28] sm:$0xff]  }
  0x36   : > { %v903_v14 = vld [vmem:[%s260_s26 + $0x4] ss:$8 sps:$4 sm:$0xff]   ;;  %v901_v20 = vld [vmem:[%s260_s26] ss:$8 sps:$4 sm:$0xff]  }
  0x37   : > { %523 = vmatprep.mubr.bf16.mxu0 %v903_v14  ;;  %v897_v16 = vld [vmem:[%s1057_s30 + $0x70] sm:$0xff]   ;;  %v899_v18 = vld [vmem:[%s1057_s30 + $0x78] sm:$0xff]   ;;  %v349_v22 = vld [vmem:[#allocation2] sm:$0xff] }
  0x38   : > { %808 = vmatpush3.bf16.msra.mxu0 %v888_v6  ;;  %v898_v17 = vld [vmem:[%s1057_s30 + $0x30] sm:$0xff]   ;;  %v900_v19 = vld [vmem:[%s1057_s30 + $0x38] sm:$0xff]   ;;  %v350_v26 = vld [vmem:[#allocation2 + $0x8] sm:$0xff] }
  0x39   : > { %809 = vmatprep.subr.bf16.mxu0 %v889_v7 }
  0x3c   : > { %810 = vmatpush3.bf16.msra.mxu0 %v890_v8 }
  0x3d   : > { %811 = vmatprep.subr.bf16.mxu0 %v891_v9 }
  0x40   : > { %812 = vmatpush3.bf16.msra.mxu0 %v892_v10 }
  0x41   : > { %813 = vmatprep.subr.bf16.mxu0 %v893_v11 }
  0x44   : > { %814 = vmatpush3.bf16.msra.mxu0 %v894_v12 }
  0x45   : > { %815 = vmatprep.subr.bf16.mxu0 %v895_v13 }
  0x48   : > { %816 = vmatpush3.bf16.msra.mxu0 %v896_v15 }
  0x49   : > { %817 = vmatprep.subr.bf16.mxu0 %v897_v16 }
  0x4c   : > { %818 = vmatpush3.bf16.msra.mxu0 %v898_v17 }
  0x4d   : > { %819 = vmatprep.subr.bf16.mxu0 %v899_v18 }
  0x50   : > { %820 = vmatpush3.bf16.msra.mxu0 %v900_v19 }
  0x53   : > { %524 = vmatmul.mubr.bf16.vlgmr.msra.gmra.mrb[0].mxu0 %v901_v20 }
 0x126   : > { %v821_v21 = vpop.f32.mrb[0].mxu0 }
 0x127   : > { %v822_v23 = vpop.f32.mrb[1].mxu0 }
 0x128   : > { %v823_v24 = vadd.f32 %v822_v23, %v821_v21  ;;  %v824_v25 = vpop.f32.mrb[2].mxu0  ;;  %539 = sbr.rel (%p793_p0) target bundleno = 327 (0x147), region = 74 }
 0x129   : > { %v825_v27 = vpop.f32.mrb[3].mxu0 }
 0x12a   : > { %v532_v28 = vadd.f32 %v823_v24, %v349_v22  ;;  %v826_v29 = vadd.f32 %v825_v27, %v824_v25 }
 0x12c   : > { %534 = vst [vmem:[#allocation2] sm:$0xff] %v532_v28  ;;  %v533_v30 = vadd.f32 %v826_v29, %v350_v26 }
 0x12e   : > { %535 = vst [vmem:[#allocation2 + $0x8] sm:$0xff] %v533_v30 }
 0x133   : > { %v540_v31 = vld [vmem:[#allocation2] sm:$0xff] }
 0x134   : > { %v559_v35 = vmul.f32 %v540_v31, %v540_v31 }
 0x135   : > { %v541_v32 = vld [vmem:[#allocation2 + $0x8] sm:$0xff] }
 0x136   : > { %v803_v33 = vpack.c.bf16 %v541_v32, %v540_v31  ;;  %v552_v34 = vadd.f32 %v541_v32, %v540_v31  ;;  %v560_v36 = vmul.f32 %v541_v32, %v541_v32 }
 0x138   : > { %804 = vst [vmem:[%s1063_s7] sm:$0xff] %v803_v33   ;;  %v553_v37 = vrot.slane %v552_v34, 4  ;;  %v561_v38 = vadd.f32 %v560_v36, %v559_v35 }
 0x13a   : > { %v554_v39 = vadd.f32 %v553_v37, %v552_v34  ;;  %v562_v40 = vrot.slane %v561_v38, 4 }
 0x13c   : > { %v555_v41 = vrot.slane %v554_v39, 2  ;;  %v563_v42 = vadd.f32 %v562_v40, %v561_v38 }
 0x13e   : > { %v556_v43 = vadd.f32 %v555_v41, %v554_v39  ;;  %v564_v44 = vrot.slane %v563_v42, 2 }
 0x140   : > { %v557_v45 = vrot.slane %v556_v43, 1  ;;  %v565_v46 = vadd.f32 %v564_v44, %v563_v42 }
 0x142   : > { %v558_v47 = vadd.f32 %v557_v45, %v556_v43  ;;  %v566_v48 = vrot.slane %v565_v46, 1 }
 0x144   : > { %568 = vst [vmem:[%s1068_s11] sm:$0xff] %v558_v47  ;;  %v567_v49 = vadd.f32 %v566_v48, %v565_v46 }
 0x146   : > { %569 = vst [vmem:[%s1073_s14] sm:$0xff] %v567_v49 }
 0x147 PF: > { %s15_s21 = sadd.s32 1, %s958_s21   ;;  %s1127_s15 = smov %s938_s16 }
 0x148   : > { %p12_p1 = scmp.ge.s32.totalorder %s15_s21, 20   ;;  %s1128_s16 = smov %s1037_s28 }
 0x149   : > { %s1129_s17 = smov %s950_s19  ;;  %s1130_s18 = smov %s954_s20 }
 0x14a   : > { %s1131_s19 = smov %s1134_s22  ;;  %s1132_s20 = smov %s1138_s23 }
 0x14b   :  { %14 = sbr.rel (!%p12_p1) target bundleno = 4 (0x4), region = 136 }

// kernel: net_forward.37
= control target key start
LH: loop header
LB: loop body
LE: loop exit
PB: predicated region body
PF: predicated region fallthrough
CT: control target
= control target key end

     0   :  { %s885_s15 = smov 0   ;;  %s887_s16 = smov 0   ;;  %s981_s0 = inlined_call_operand.vmem [shape: bf16[32,256], index: 0, kind: input, shape index: {}]   ;;  %s982_s1 = inlined_call_operand.vmem [shape: bf16[256,128], index: 1, kind: input, shape index: {}]   ;;  %s983_s2 = inlined_call_operand.vmem [shape: bf16[32,128], index: 2, kind: output, shape index: {0}]   ;;  %s984_s3 = inlined_call_operand.vmem [shape: f32[16,128], index: 3, kind: output, shape index: {1}]   ;;  %s985_s4 = inlined_call_operand.vmem [shape: f32[16,128], index: 4, kind: output, shape index: {2}]  }
   0x1   :  { %s889_s17 = smov 0  }
   0x2 LB: > { %s34_s18 = sadd.s32 1, %s854_s16  ;;  %p733_p0 = scmp.ge.s32.totalorder %s858_s17, 1  ;;  %s858_s17 = sphi %s889_s17, %s15_s17   ;;  %s854_s16 = sphi %s887_s16, %s987_s16   ;;  %s850_s15 = sphi %s885_s15, %s986_s15  }
   0x3   : > { %p36_p1 = scmp.ge.s32.totalorder %s34_s18, 2  ;;  %p217_p2 = scmp.lt.s32.totalorder %s858_s17, 3 }
   0x5   : > { %s989_s18 = smov (%p36_p1, %s34_s18), 0  ;;  %p218_p3 = pnand %p733_p0, %p217_p2 }
   0x6   : > { %v817_v0 = vld [vmem:[%s982_s1 + $0x40] sm:$0xff] (!%p218_p3)   ;;  %s734_s21 = sshll.u32 (!%p218_p3), %s850_s15, 1  ;;  %v819_v2 = vld [vmem:[%s982_s1 + $0x48] sm:$0xff] (!%p218_p3)   ;;  %v821_v4 = vld [vmem:[%s982_s1 + $0x50] sm:$0xff] (!%p218_p3)   ;;  %p303_p5 = scmp.lt.s32.totalorder (!%p218_p3), %s850_s15, 1 }
   0x7   : > { %221 = sbr.rel (%p218_p3) target bundleno = 273 (0x111), region = 28  ;;  %v818_v1 = vld [vmem:[%s982_s1] sm:$0xff] (!%p218_p3)   ;;  %771 = vmatprep.subr.bf16.mxu0 (!%p218_p3), %v817_v0  ;;  %v820_v3 = vld [vmem:[%s982_s1 + $0x8] sm:$0xff] (!%p218_p3)   ;;  %p275_p4 = scmp.lt.s32.totalorder (!%p218_p3), %s734_s21, 3  ;;  %v822_v5 = vld [vmem:[%s982_s1 + $0x10] sm:$0xff] (!%p218_p3)  }
   0x8   : > { %772 = vmatpush3.bf16.msra.mxu0 (!%p218_p3), %v818_v1  ;;  %v823_v6 = vld [vmem:[%s982_s1 + $0x58] sm:$0xff] (!%p218_p3)   ;;  %v825_v8 = vld [vmem:[%s982_s1 + $0x60] sm:$0xff] (!%p218_p3)   ;;  %v827_v10 = vld [vmem:[%s982_s1 + $0x68] sm:$0xff] (!%p218_p3)  }
   0x9   : > { %773 = vmatprep.subr.bf16.mxu0 (!%p218_p3), %v819_v2  ;;  %v824_v7 = vld [vmem:[%s982_s1 + $0x18] sm:$0xff] (!%p218_p3)   ;;  %v826_v9 = vld [vmem:[%s982_s1 + $0x20] sm:$0xff] (!%p218_p3)   ;;  %v828_v12 = vld [vmem:[%s982_s1 + $0x28] sm:$0xff] (!%p218_p3)  }
   0xa   : > { %v829_v13 = vld [vmem:[%s982_s1 + $0x70] sm:$0xff] (!%p218_p3)   ;;  %v831_v15 = vld [vmem:[%s982_s1 + $0x78] sm:$0xff] (!%p218_p3)  }
   0xb   : > { %v830_v14 = vld [vmem:[%s982_s1 + $0x30] sm:$0xff] (!%p218_p3)   ;;  %v832_v16 = vld [vmem:[%s982_s1 + $0x38] sm:$0xff] (!%p218_p3)  }
   0xc   : > { %774 = vmatpush3.bf16.msra.mxu0 (!%p218_p3), %v820_v3 }
   0xd   : > { %775 = vmatprep.subr.bf16.mxu0 (!%p218_p3), %v821_v4 }
   0xe   : > { %s991_s21 = smov (!%p275_p4, %s734_s21), 3  ;;  %s993_s15 = smov (!%p303_p5, %s850_s15), 1 }
   0xf   : > { %s763_s10 = sshll.u32 %s991_s21, 3  ;;  %s738_s9 = sshll.u32 %s991_s21, 2 }
  0x10   : > { %776 = vmatpush3.bf16.msra.mxu0 %v822_v5  ;;  %s282_s19 = scalar_lea.vmem %s981_s0, %s763_s10  ;;  %s301_s12 = scalar_lea.vmem %s983_s2, %s738_s9 }
  0x11   : > { %777 = vmatprep.subr.bf16.mxu0 %v823_v6  ;;  %v835_v11 = vld [vmem:[%s282_s19 + $0x4] ss:$8 sps:$4 sm:$0xff]   ;;  %v833_v17 = vld [vmem:[%s282_s19] ss:$8 sps:$4 sm:$0xff]   ;;  %s739_s21 = sshll.u32 %s993_s15, 3 }
  0x12   : > { %498 = vmatprep.mubr.bf16.mxu0 %v835_v11  ;;  %s309_s19 = scalar_lea.vmem %s984_s3, %s739_s21  ;;  %s316_s23 = scalar_lea.vmem %s985_s4, %s739_s21 }
  0x14   : > { %778 = vmatpush3.bf16.msra.mxu0 %v824_v7 }
  0x15   : > { %779 = vmatprep.subr.bf16.mxu0 %v825_v8 }
  0x18   : > { %780 = vmatpush3.bf16.msra.mxu0 %v826_v9 }
  0x19   : > { %781 = vmatprep.subr.bf16.mxu0 %v827_v10 }
  0x1c   : > { %782 = vmatpush3.bf16.msra.mxu0 %v828_v12 }
  0x1d   : > { %783 = vmatprep.subr.bf16.mxu0 %v829_v13 }
  0x20   : > { %784 = vmatpush3.bf16.msra.mxu0 %v830_v14 }
  0x21   : > { %785 = vmatprep.subr.bf16.mxu0 %v831_v15 }
  0x24   : > { %786 = vmatpush3.bf16.msra.mxu0 %v832_v16 }
  0x27   : > { %499 = vmatmul.mubr.bf16.vlgmr.msra.gmra.mrb[0].mxu0 %v833_v17 }
  0xfa   : > { %v787_v18 = vpop.f32.mrb[0].mxu0 }
  0xfb   : > { %v788_v19 = vpop.f32.mrb[1].mxu0 }
  0xfc   : > { %v789_v20 = vadd.f32 %v788_v19, %v787_v18  ;;  %v790_v21 = vpop.f32.mrb[2].mxu0 }
  0xfd   : > { %v791_v22 = vpop.f32.mrb[3].mxu0 }
  0xfe   : > { %v792_v23 = vadd.f32 %v791_v22, %v790_v21  ;;  %v533_v24 = vmul.f32 %v789_v20, %v789_v20 }
 0x100   : > { %v769_v25 = vpack.c.bf16 %v792_v23, %v789_v20  ;;  %v526_v26 = vadd.f32 %v792_v23, %v789_v20  ;;  %v534_v27 = vmul.f32 %v792_v23, %v792_v23 }
 0x102   : > { %770 = vst [vmem:[%s301_s12] sm:$0xff] %v769_v25   ;;  %v527_v28 = vrot.slane %v526_v26, 4  ;;  %v535_v29 = vadd.f32 %v534_v27, %v533_v24 }
 0x104   : > { %v528_v30 = vadd.f32 %v527_v28, %v526_v26  ;;  %v536_v31 = vrot.slane %v535_v29, 4 }
 0x106   : > { %v529_v32 = vrot.slane %v528_v30, 2  ;;  %v537_v33 = vadd.f32 %v536_v31, %v535_v29 }
 0x108   : > { %v530_v34 = vadd.f32 %v529_v32, %v528_v30  ;;  %v538_v35 = vrot.slane %v537_v33, 2 }
 0x10a   : > { %v531_v36 = vrot.slane %v530_v34, 1  ;;  %v539_v37 = vadd.f32 %v538_v35, %v537_v33 }
 0x10c   : > { %v532_v38 = vadd.f32 %v531_v36, %v530_v34  ;;  %v540_v39 = vrot.slane %v539_v37, 1 }
 0x10e   : > { %v541_v40 = vadd.f32 %v540_v39, %v539_v37  ;;  %542 = vst [vmem:[%s309_s19] sm:$0xff] %v532_v38 }
 0x110   : > { %543 = vst [vmem:[%s316_s23] sm:$0xff] %v541_v40 }
 0x111 PF: > { %s15_s17 = sadd.s32 1, %s858_s17   ;;  %s986_s15 = smov %s854_s16 }
 0x112   : > { %p12_p6 = scmp.ge.s32.totalorder %s15_s17, 4   ;;  %s987_s16 = smov %s989_s18 }
 0x114   :  { %14 = sbr.rel (!%p12_p6) target bundleno = 2 (0x2), region = 93 }

// kernel: net_forward.41
= control target key start
LH: loop header
LB: loop body
LE: loop exit
PB: predicated region body
PF: predicated region fallthrough
CT: control target
= control target key end

     0   :  { %s1842_s15 = smov 0   ;;  %s1844_s16 = smov 0   ;;  %s2170_s0 = inlined_call_operand.vmem [shape: bf16[32,640], index: 0, kind: input, shape index: {}]   ;;  %s2171_s1 = inlined_call_operand.vmem [shape: bf16[640,256], index: 1, kind: input, shape index: {}]   ;;  %s2172_s2 = inlined_call_operand.vmem [shape: bf16[32,256], index: 2, kind: output, shape index: {0}]   ;;  %s2173_s3 = inlined_call_operand.vmem [shape: f32[8,256], index: 3, kind: output, shape index: {1}]   ;;  %s2174_s4 = inlined_call_operand.vmem [shape: f32[8,256], index: 4, kind: output, shape index: {2}]  }
   0x1   :  { %s1846_s17 = smov 0   ;;  %s1848_s18 = smov 0  }
   0x2   :  { %s1850_s19 = smov 0  }
   0x3 LB: > { %s30_s20 = sadd.s32 1, %s1811_s18  ;;  %s1512_s21 = sadd.s32 4294967295, %s1815_s19   ;;  %s1815_s19 = sphi %s1850_s19, %s15_s19   ;;  %s1811_s18 = sphi %s1848_s18, %s2179_s18   ;;  %s1807_s17 = sphi %s1846_s17, %s2178_s17   ;;  %s1803_s16 = sphi %s1844_s16, %s2177_s16   ;;  %s1799_s15 = sphi %s1842_s15, %s2176_s15  }
   0x4   : > { %p32_p0 = scmp.ge.s32.totalorder %s30_s20, 2  ;;  %p78_p1 = scmp.ne.s32.totalorder %s1803_s16, %s1799_s15 }
   0x5   : > { %p79_p2 = scmp.eq.s32.totalorder %s1815_s19, 0  ;;  %p110_p4 = scmp.eq.s32.totalorder %s1512_s21, 1 }
   0x6   : > { %s2181_s20 = smov (%p32_p0, %s30_s20), 0  ;;  %s71_s23 = sadd.s32 1, %s1803_s16 }
   0x7   : > { %p80_p3 = por %p79_p2, %p78_p1  ;;  %s67_s22 = ssub.s32 %s1811_s18, %s2181_s20 }
   0x8   : > { %p69_p5 = scmp.eq.s32.totalorder %s67_s22, 0  ;;  %p1877_p6 = por %p110_p4, %p78_p1 }
   0x9   : > { %p1516_p7 = scmp.ge.s32.totalorder %s1815_s19, 2 }
   0xa   : > { %s1882_s25 = scalar_select %p69_p5, %s1803_s16, %s71_s23  }
   0xb   : > { %203 = sbr.rel (%p1516_p7) target bundleno = 75 (0x4b), region = 20 }
  0x12   : > { %206 = sbr.rel (!%p80_p3) target bundleno = 75 (0x4b), region = 24  ;;  %s208_s26 = sand.u32 (%p80_p3), 1, %s1803_s16  }
  0x13   : > { %s1517_s27 = sshll.u32 (%p80_p3), %s1811_s18, 2  ;;  %s1681_s28 = smul.u32 (%p80_p3), 320, %s208_s26 }
  0x14   : > { %s1890_s5 = scalar_lea.vmem (%p80_p3), %s2171_s1, %s1517_s27 }
  0x15   : > { %v231_v0 = vld [vmem:[%s1890_s5] sm:$0xf] (%p80_p3)  ;;  %v233_v1 = vld [vmem:[%s1890_s5 + $0x8] sm:$0xf] (%p80_p3)  ;;  %v235_v2 = vld [vmem:[%s1890_s5 + $0x10] sm:$0xf] (%p80_p3) }
  0x16   : > { %v237_v3 = vld [vmem:[%s1890_s5 + $0x18] sm:$0xf] (%p80_p3)  ;;  %v239_v4 = vld [vmem:[%s1890_s5 + $0x20] sm:$0xf] (%p80_p3)  ;;  %s1897_s6 = scalar_lea.vmem (%p80_p3), [#allocation3], %s1681_s28 }
  0x17   : > { %232 = vst [vmem:[%s1897_s6] sm:$0xf] (%p80_p3), %v231_v0  ;;  %234 = vst [vmem:[%s1897_s6 + $0x4] sm:$0xf] (%p80_p3), %v233_v1  ;;  %v241_v5 = vld [vmem:[%s1890_s5 + $0x28] sm:$0xf] (%p80_p3) }
  0x18   : > { %236 = vst [vmem:[%s1897_s6 + $0x8] sm:$0xf] (%p80_p3), %v235_v2  ;;  %238 = vst [vmem:[%s1897_s6 + $0xc] sm:$0xf] (%p80_p3), %v237_v3  ;;  %v243_v6 = vld [vmem:[%s1890_s5 + $0x30] sm:$0xf] (%p80_p3) }
  0x19   : > { %240 = vst [vmem:[%s1897_s6 + $0x10] sm:$0xf] %v239_v4  ;;  %v245_v7 = vld [vmem:[%s1890_s5 + $0x38] sm:$0xf]  ;;  %242 = vst [vmem:[%s1897_s6 + $0x14] sm:$0xf] %v241_v5 }
  0x1a   : > { %244 = vst [vmem:[%s1897_s6 + $0x18] sm:$0xf] %v243_v6  ;;  %246 = vst [vmem:[%s1897_s6 + $0x1c] sm:$0xf] %v245_v7  ;;  %v247_v8 = vld [vmem:[%s1890_s5 + $0x40] sm:$0xf] }
  0x1b   : > { %v249_v9 = vld [vmem:[%s1890_s5 + $0x48] sm:$0xf]  ;;  %v251_v10 = vld [vmem:[%s1890_s5 + $0x50] sm:$0xf]  ;;  %248 = vst [vmem:[%s1897_s6 + $0x20] sm:$0xf] %v247_v8 }
  0x1c   : > { %250 = vst [vmem:[%s1897_s6 + $0x24] sm:$0xf] %v249_v9  ;;  %252 = vst [vmem:[%s1897_s6 + $0x28] sm:$0xf] %v251_v10  ;;  %v253_v11 = vld [vmem:[%s1890_s5 + $0x58] sm:$0xf] }
  0x1d   : > { %v255_v12 = vld [vmem:[%s1890_s5 + $0x60] sm:$0xf]  ;;  %v257_v13 = vld [vmem:[%s1890_s5 + $0x68] sm:$0xf]  ;;  %254 = vst [vmem:[%s1897_s6 + $0x2c] sm:$0xf] %v253_v11 }
  0x1e   : > { %256 = vst [vmem:[%s1897_s6 + $0x30] sm:$0xf] %v255_v12  ;;  %258 = vst [vmem:[%s1897_s6 + $0x34] sm:$0xf] %v257_v13  ;;  %v259_v14 = vld [vmem:[%s1890_s5 + $0x70] sm:$0xf] }
  0x1f   : > { %v261_v15 = vld [vmem:[%s1890_s5 + $0x78] sm:$0xf]  ;;  %v263_v16 = vld [vmem:[%s1890_s5 + $0x80] sm:$0xf]  ;;  %260 = vst [vmem:[%s1897_s6 + $0x38] sm:$0xf] %v259_v14 }
  0x20   : > { %262 = vst [vmem:[%s1897_s6 + $0x3c] sm:$0xf] %v261_v15  ;;  %264 = vst [vmem:[%s1897_s6 + $0x40] sm:$0xf] %v263_v16  ;;  %v265_v17 = vld [vmem:[%s1890_s5 + $0x88] sm:$0xf] }
  0x21   : > { %v267_v18 = vld [vmem:[%s1890_s5 + $0x90] sm:$0xf]  ;;  %v269_v19 = vld [vmem:[%s1890_s5 + $0x98] sm:$0xf]  ;;  %266 = vst [vmem:[%s1897_s6 + $0x44] sm:$0xf] %v265_v17 }
  0x22   : > { %268 = vst [vmem:[%s1897_s6 + $0x48] sm:$0xf] %v267_v18  ;;  %270 = vst [vmem:[%s1897_s6 + $0x4c] sm:$0xf] %v269_v19  ;;  %v271_v20 = vld [vmem:[%s1890_s5 + $0xa0] sm:$0xf] }
  0x23   : > { %v273_v21 = vld [vmem:[%s1890_s5 + $0xa8] sm:$0xf]  ;;  %v275_v22 = vld [vmem:[%s1890_s5 + $0xb0] sm:$0xf]  ;;  %272 = vst [vmem:[%s1897_s6 + $0x50] sm:$0xf] %v271_v20 }
  0x24   : > { %274 = vst [vmem:[%s1897_s6 + $0x54] sm:$0xf] %v273_v21  ;;  %276 = vst [vmem:[%s1897_s6 + $0x58] sm:$0xf] %v275_v22  ;;  %v277_v23 = vld [vmem:[%s1890_s5 + $0xb8] sm:$0xf] }
  0x25   : > { %v279_v24 = vld [vmem:[%s1890_s5 + $0xc0] sm:$0xf]  ;;  %v281_v25 = vld [vmem:[%s1890_s5 + $0xc8] sm:$0xf]  ;;  %278 = vst [vmem:[%s1897_s6 + $0x5c] sm:$0xf] %v277_v23 }
  0x26   : > { %280 = vst [vmem:[%s1897_s6 + $0x60] sm:$0xf] %v279_v24  ;;  %282 = vst [vmem:[%s1897_s6 + $0x64] sm:$0xf] %v281_v25  ;;  %v283_v26 = vld [vmem:[%s1890_s5 + $0xd0] sm:$0xf] }
  0x27   : > { %v285_v27 = vld [vmem:[%s1890_s5 + $0xd8] sm:$0xf]  ;;  %v287_v28 = vld [vmem:[%s1890_s5 + $0xe0] sm:$0xf]  ;;  %284 = vst [vmem:[%s1897_s6 + $0x68] sm:$0xf] %v283_v26 }
  0x28   : > { %286 = vst [vmem:[%s1897_s6 + $0x6c] sm:$0xf] %v285_v27  ;;  %288 = vst [vmem:[%s1897_s6 + $0x70] sm:$0xf] %v287_v28  ;;  %v289_v29 = vld [vmem:[%s1890_s5 + $0xe8] sm:$0xf] }
  0x29   : > { %v291_v30 = vld [vmem:[%s1890_s5 + $0xf0] sm:$0xf]  ;;  %v293_v31 = vld [vmem:[%s1890_s5 + $0xf8] sm:$0xf]  ;;  %290 = vst [vmem:[%s1897_s6 + $0x74] sm:$0xf] %v289_v29 }
  0x2a   : > { %292 = vst [vmem:[%s1897_s6 + $0x78] sm:$0xf] %v291_v30  ;;  %294 = vst [vmem:[%s1897_s6 + $0x7c] sm:$0xf] %v293_v31  ;;  %v295_v32 = vld [vmem:[%s1890_s5 + $0x100] sm:$0xf] }
  0x2b   : > { %v297_v33 = vld [vmem:[%s1890_s5 + $0x108] sm:$0xf]  ;;  %v299_v34 = vld [vmem:[%s1890_s5 + $0x110] sm:$0xf]  ;;  %296 = vst [vmem:[%s1897_s6 + $0x80] sm:$0xf] %v295_v32 }
  0x2c   : > { %298 = vst [vmem:[%s1897_s6 + $0x84] sm:$0xf] %v297_v33  ;;  %300 = vst [vmem:[%s1897_s6 + $0x88] sm:$0xf] %v299_v34  ;;  %v301_v35 = vld [vmem:[%s1890_s5 + $0x118] sm:$0xf] }
  0x2d   : > { %v303_v36 = vld [vmem:[%s1890_s5 + $0x120] sm:$0xf]  ;;  %v305_v37 = vld [vmem:[%s1890_s5 + $0x128] sm:$0xf]  ;;  %302 = vst [vmem:[%s1897_s6 + $0x8c] sm:$0xf] %v301_v35 }
  0x2e   : > { %304 = vst [vmem:[%s1897_s6 + $0x90] sm:$0xf] %v303_v36  ;;  %306 = vst [vmem:[%s1897_s6 + $0x94] sm:$0xf] %v305_v37  ;;  %v307_v38 = vld [vmem:[%s1890_s5 + $0x130] sm:$0xf] }
  0x2f   : > { %v309_v39 = vld [vmem:[%s1890_s5 + $0x138] sm:$0xf]  ;;  %v311_v40 = vld [vmem:[%s1890_s5 + $0x140] sm:$0xf]  ;;  %308 = vst [vmem:[%s1897_s6 + $0x98] sm:$0xf] %v307_v38 }
  0x30   : > { %310 = vst [vmem:[%s1897_s6 + $0x9c] sm:$0xf] %v309_v39  ;;  %312 = vst [vmem:[%s1897_s6 + $0xa0] sm:$0xf] %v311_v40  ;;  %v313_v41 = vld [vmem:[%s1890_s5 + $0x148] sm:$0xf] }
  0x31   : > { %v315_v42 = vld [vmem:[%s1890_s5 + $0x150] sm:$0xf]  ;;  %v317_v43 = vld [vmem:[%s1890_s5 + $0x158] sm:$0xf]  ;;  %314 = vst [vmem:[%s1897_s6 + $0xa4] sm:$0xf] %v313_v41 }
  0x32   : > { %316 = vst [vmem:[%s1897_s6 + $0xa8] sm:$0xf] %v315_v42  ;;  %318 = vst [vmem:[%s1897_s6 + $0xac] sm:$0xf] %v317_v43  ;;  %v319_v44 = vld [vmem:[%s1890_s5 + $0x160] sm:$0xf] }
  0x33   : > { %v321_v45 = vld [vmem:[%s1890_s5 + $0x168] sm:$0xf]  ;;  %v323_v46 = vld [vmem:[%s1890_s5 + $0x170] sm:$0xf]  ;;  %320 = vst [vmem:[%s1897_s6 + $0xb0] sm:$0xf] %v319_v44 }
  0x34   : > { %322 = vst [vmem:[%s1897_s6 + $0xb4] sm:$0xf] %v321_v45  ;;  %324 = vst [vmem:[%s1897_s6 + $0xb8] sm:$0xf] %v323_v46  ;;  %v325_v47 = vld [vmem:[%s1890_s5 + $0x178] sm:$0xf] }
  0x35   : > { %v327_v48 = vld [vmem:[%s1890_s5 + $0x180] sm:$0xf]  ;;  %v329_v49 = vld [vmem:[%s1890_s5 + $0x188] sm:$0xf]  ;;  %326 = vst [vmem:[%s1897_s6 + $0xbc] sm:$0xf] %v325_v47 }
  0x36   : > { %328 = vst [vmem:[%s1897_s6 + $0xc0] sm:$0xf] %v327_v48  ;;  %330 = vst [vmem:[%s1897_s6 + $0xc4] sm:$0xf] %v329_v49  ;;  %v331_v50 = vld [vmem:[%s1890_s5 + $0x190] sm:$0xf] }
  0x37   : > { %v333_v51 = vld [vmem:[%s1890_s5 + $0x198] sm:$0xf]  ;;  %v335_v52 = vld [vmem:[%s1890_s5 + $0x1a0] sm:$0xf]  ;;  %332 = vst [vmem:[%s1897_s6 + $0xc8] sm:$0xf] %v331_v50 }
  0x38   : > { %334 = vst [vmem:[%s1897_s6 + $0xcc] sm:$0xf] %v333_v51  ;;  %336 = vst [vmem:[%s1897_s6 + $0xd0] sm:$0xf] %v335_v52  ;;  %v337_v53 = vld [vmem:[%s1890_s5 + $0x1a8] sm:$0xf] }
  0x39   : > { %v339_v54 = vld [vmem:[%s1890_s5 + $0x1b0] sm:$0xf]  ;;  %v341_v55 = vld [vmem:[%s1890_s5 + $0x1b8] sm:$0xf]  ;;  %338 = vst [vmem:[%s1897_s6 + $0xd4] sm:$0xf] %v337_v53 }
  0x3a   : > { %340 = vst [vmem:[%s1897_s6 + $0xd8] sm:$0xf] %v339_v54  ;;  %342 = vst [vmem:[%s1897_s6 + $0xdc] sm:$0xf] %v341_v55  ;;  %v343_v56 = vld [vmem:[%s1890_s5 + $0x1c0] sm:$0xf] }
  0x3b   : > { %v345_v57 = vld [vmem:[%s1890_s5 + $0x1c8] sm:$0xf]  ;;  %v347_v58 = vld [vmem:[%s1890_s5 + $0x1d0] sm:$0xf]  ;;  %344 = vst [vmem:[%s1897_s6 + $0xe0] sm:$0xf] %v343_v56 }
  0x3c   : > { %346 = vst [vmem:[%s1897_s6 + $0xe4] sm:$0xf] %v345_v57  ;;  %348 = vst [vmem:[%s1897_s6 + $0xe8] sm:$0xf] %v347_v58  ;;  %v349_v59 = vld [vmem:[%s1890_s5 + $0x1d8] sm:$0xf] }
  0x3d   : > { %v351_v60 = vld [vmem:[%s1890_s5 + $0x1e0] sm:$0xf]  ;;  %v353_v61 = vld [vmem:[%s1890_s5 + $0x1e8] sm:$0xf]  ;;  %350 = vst [vmem:[%s1897_s6 + $0xec] sm:$0xf] %v349_v59 }
  0x3e   : > { %352 = vst [vmem:[%s1897_s6 + $0xf0] sm:$0xf] %v351_v60  ;;  %354 = vst [vmem:[%s1897_s6 + $0xf4] sm:$0xf] %v353_v61  ;;  %v355_v62 = vld [vmem:[%s1890_s5 + $0x1f0] sm:$0xf] }
  0x3f   : > { %v357_v63 = vld [vmem:[%s1890_s5 + $0x1f8] sm:$0xf]  ;;  %v359_v0 = vld [vmem:[%s1890_s5 + $0x200] sm:$0xf]  ;;  %356 = vst [vmem:[%s1897_s6 + $0xf8] sm:$0xf] %v355_v62 }
  0x40   : > { %358 = vst [vmem:[%s1897_s6 + $0xfc] sm:$0xf] %v357_v63  ;;  %360 = vst [vmem:[%s1897_s6 + $0x100] sm:$0xf] %v359_v0  ;;  %v361_v1 = vld [vmem:[%s1890_s5 + $0x208] sm:$0xf] }
  0x41   : > { %v363_v2 = vld [vmem:[%s1890_s5 + $0x210] sm:$0xf]  ;;  %v365_v3 = vld [vmem:[%s1890_s5 + $0x218] sm:$0xf]  ;;  %362 = vst [vmem:[%s1897_s6 + $0x104] sm:$0xf] %v361_v1 }
  0x42   : > { %364 = vst [vmem:[%s1897_s6 + $0x108] sm:$0xf] %v363_v2  ;;  %366 = vst [vmem:[%s1897_s6 + $0x10c] sm:$0xf] %v365_v3  ;;  %v367_v4 = vld [vmem:[%s1890_s5 + $0x220] sm:$0xf] }
  0x43   : > { %v369_v5 = vld [vmem:[%s1890_s5 + $0x228] sm:$0xf]  ;;  %v371_v6 = vld [vmem:[%s1890_s5 + $0x230] sm:$0xf]  ;;  %368 = vst [vmem:[%s1897_s6 + $0x110] sm:$0xf] %v367_v4 }
  0x44   : > { %370 = vst [vmem:[%s1897_s6 + $0x114] sm:$0xf] %v369_v5  ;;  %372 = vst [vmem:[%s1897_s6 + $0x118] sm:$0xf] %v371_v6  ;;  %v373_v7 = vld [vmem:[%s1890_s5 + $0x238] sm:$0xf] }
  0x45   : > { %v375_v8 = vld [vmem:[%s1890_s5 + $0x240] sm:$0xf]  ;;  %v377_v9 = vld [vmem:[%s1890_s5 + $0x248] sm:$0xf]  ;;  %374 = vst [vmem:[%s1897_s6 + $0x11c] sm:$0xf] %v373_v7 }
  0x46   : > { %376 = vst [vmem:[%s1897_s6 + $0x120] sm:$0xf] %v375_v8  ;;  %378 = vst [vmem:[%s1897_s6 + $0x124] sm:$0xf] %v377_v9  ;;  %v379_v10 = vld [vmem:[%s1890_s5 + $0x250] sm:$0xf] }
  0x47   : > { %v381_v11 = vld [vmem:[%s1890_s5 + $0x258] sm:$0xf]  ;;  %v383_v12 = vld [vmem:[%s1890_s5 + $0x260] sm:$0xf]  ;;  %380 = vst [vmem:[%s1897_s6 + $0x128] sm:$0xf] %v379_v10 }
  0x48   : > { %382 = vst [vmem:[%s1897_s6 + $0x12c] sm:$0xf] %v381_v11  ;;  %384 = vst [vmem:[%s1897_s6 + $0x130] sm:$0xf] %v383_v12  ;;  %v385_v13 = vld [vmem:[%s1890_s5 + $0x268] sm:$0xf] }
  0x49   : > { %v387_v14 = vld [vmem:[%s1890_s5 + $0x270] sm:$0xf]  ;;  %v389_v15 = vld [vmem:[%s1890_s5 + $0x278] sm:$0xf]  ;;  %386 = vst [vmem:[%s1897_s6 + $0x134] sm:$0xf] %v385_v13 }
  0x4a   : > { %388 = vst [vmem:[%s1897_s6 + $0x138] sm:$0xf] %v387_v14  ;;  %390 = vst [vmem:[%s1897_s6 + $0x13c] sm:$0xf] %v389_v15 }
  0x4b PF: > { %p1518_p8 = scmp.ge.s32.totalorder %s1815_s19, 1  ;;  %p572_p9 = scmp.lt.s32.totalorder %s1815_s19, 3 }
  0x4d   : > { %p573_p10 = pnand %p1518_p8, %p572_p9 }
  0x4e   : > { %s579_s7 = sand.u32 (!%p573_p10), 1, %s1799_s15   ;;  %v1757_v16 = vld [vmem:[%s2170_s0 + $0x4] ss:$20 sps:$4 sm:$0xff] (!%p573_p10)   ;;  %v1760_v17 = vld [vmem:[%s2170_s0 + $0xc] ss:$20 sps:$4 sm:$0xff] (!%p573_p10)   ;;  %p645_p11 = scmp.lt.s32.totalorder (!%p573_p10), %s1807_s17, 1 }
  0x4f   : > { %576 = sbr.rel (%p573_p10) target bundleno = 387 (0x183), region = 65  ;;  %1088 = vmatprep.mubr.bf16.mxu0 (!%p573_p10), %v1757_v16  ;;  %1137 = vmatprep.mubr.bf16.mxu1 (!%p573_p10), %v1760_v17  ;;  %v1755_v48 = vld [vmem:[%s2170_s0] ss:$20 sps:$4 sm:$0xff] (!%p573_p10)   ;;  %v1758_v50 = vld [vmem:[%s2170_s0 + $0x8] ss:$20 sps:$4 sm:$0xff] (!%p573_p10)  }
  0x50   : > { %s1682_s8 = smul.u32 (!%p573_p10), 320, %s579_s7  ;;  %v1766_v52 = vld [vmem:[%s2170_s0 + $0x2c] ss:$20 sps:$4 sm:$0xff] (!%p573_p10)   ;;  %v1768_v56 = vld [vmem:[%s2170_s0 + $0x34] ss:$20 sps:$4 sm:$0xff] (!%p573_p10)  }
  0x51   : > { %v1771_v57 = vld [vmem:[%s2170_s0 + $0x28] ss:$20 sps:$4 sm:$0xff] (!%p573_p10)   ;;  %v1772_v58 = vld [vmem:[%s2170_s0 + $0x30] ss:$20 sps:$4 sm:$0xff] (!%p573_p10)   ;;  %v1776_v1 = vld [vmem:[%s2170_s0 + $0x38] ss:$20 sps:$4 sm:$0xff] (!%p573_p10)  }
  0x52   : > { %s2065_s13 = scalar_lea.vmem (!%p573_p10), [#allocation3], %s1682_s8  ;;  %v1775_v60 = vld [vmem:[%s2170_s0 + $0x10] ss:$20 sps:$4 sm:$0xff] (!%p573_p10)  }
  0x53   : > { %v1723_v18 = vld [vmem:[%s2065_s13 + $0x40] sm:$0xff] (!%p573_p10)   ;;  %v1727_v22 = vld [vmem:[%s2065_s13 + $0x48] sm:$0xff] (!%p573_p10)   ;;  %v1731_v26 = vld [vmem:[%s2065_s13 + $0x50] sm:$0xff] (!%p573_p10)  }
  0x54   : > { %v1724_v19 = vld [vmem:[%s2065_s13 + $0xc0] sm:$0xff] (!%p573_p10)   ;;  %1595 = vmatprep.subr.bf16.mxu0 (!%p573_p10), %v1723_v18  ;;  %v1728_v23 = vld [vmem:[%s2065_s13 + $0xc8] sm:$0xff] (!%p573_p10)   ;;  %v1732_v27 = vld [vmem:[%s2065_s13 + $0xd0] sm:$0xff] (!%p573_p10)  }
  0x55   : > { %v1725_v20 = vld [vmem:[%s2065_s13] sm:$0xff] (!%p573_p10)   ;;  %1623 = vmatprep.subr.bf16.mxu1 (!%p573_p10), %v1724_v19  ;;  %v1729_v24 = vld [vmem:[%s2065_s13 + $0x8] sm:$0xff] (!%p573_p10)   ;;  %v1733_v28 = vld [vmem:[%s2065_s13 + $0x10] sm:$0xff] (!%p573_p10)  }
  0x56   : > { %v1726_v21 = vld [vmem:[%s2065_s13 + $0x80] sm:$0xff]   ;;  %1596 = vmatpush3.bf16.msra.mxu0 %v1725_v20  ;;  %v1730_v25 = vld [vmem:[%s2065_s13 + $0x88] sm:$0xff]   ;;  %v1734_v29 = vld [vmem:[%s2065_s13 + $0x90] sm:$0xff]   ;;  %s646_s15 = scalar_select %p645_p11, %s1807_s17, 1 }
  0x57   : > { %1624 = vmatpush3.bf16.msra.mxu1 %v1726_v21  ;;  %1597 = vmatprep.subr.bf16.mxu0 %v1727_v22  ;;  %v1735_v30 = vld [vmem:[%s2065_s13 + $0x58] sm:$0xff]   ;;  %v1739_v34 = vld [vmem:[%s2065_s13 + $0x60] sm:$0xff]   ;;  %v1743_v38 = vld [vmem:[%s2065_s13 + $0x68] sm:$0xff]   ;;  %s1577_s29 = sshll.u32 (%p1877_p6), %s1807_s17, 2 }
  0x58   : > { %1625 = vmatprep.subr.bf16.mxu1 %v1728_v23  ;;  %v1736_v31 = vld [vmem:[%s2065_s13 + $0xd8] sm:$0xff]   ;;  %v1740_v35 = vld [vmem:[%s2065_s13 + $0xe0] sm:$0xff]   ;;  %v1744_v39 = vld [vmem:[%s2065_s13 + $0xe8] sm:$0xff]   ;;  %s1289_s6 = scalar_lea.vmem (%p1877_p6), %s2172_s2, %s1577_s29 }
  0x59   : > { %v1737_v32 = vld [vmem:[%s2065_s13 + $0x18] sm:$0xff]   ;;  %v1741_v36 = vld [vmem:[%s2065_s13 + $0x20] sm:$0xff]   ;;  %v1745_v40 = vld [vmem:[%s2065_s13 + $0x28] sm:$0xff]  }
  0x5a   : > { %1598 = vmatpush3.bf16.msra.mxu0 %v1729_v24  ;;  %v1738_v33 = vld [vmem:[%s2065_s13 + $0x98] sm:$0xff]   ;;  %v1742_v37 = vld [vmem:[%s2065_s13 + $0xa0] sm:$0xff]   ;;  %v1746_v41 = vld [vmem:[%s2065_s13 + $0xa8] sm:$0xff]  }
  0x5b   : > { %1626 = vmatpush3.bf16.msra.mxu1 %v1730_v25  ;;  %1599 = vmatprep.subr.bf16.mxu0 %v1731_v26  ;;  %v1747_v42 = vld [vmem:[%s2065_s13 + $0x70] sm:$0xff]   ;;  %v1751_v46 = vld [vmem:[%s2065_s13 + $0x78] sm:$0xff]   ;;  %v1761_v53 = vld [vmem:[%s2065_s13 + $0x100] sm:$0xff]  }
  0x5c   : > { %1627 = vmatprep.subr.bf16.mxu1 %v1732_v27  ;;  %v1748_v43 = vld [vmem:[%s2065_s13 + $0xf0] sm:$0xff]   ;;  %v1752_v47 = vld [vmem:[%s2065_s13 + $0xf8] sm:$0xff]   ;;  %v1762_v54 = vld [vmem:[%s2065_s13 + $0x108] sm:$0xff]  }
  0x5d   : > { %v1749_v44 = vld [vmem:[%s2065_s13 + $0x30] sm:$0xff]   ;;  %v1753_v49 = vld [vmem:[%s2065_s13 + $0x38] sm:$0xff]   ;;  %v1765_v61 = vld [vmem:[%s2065_s13 + $0x120] sm:$0xff]  }
  0x5e   : > { %1600 = vmatpush3.bf16.msra.mxu0 %v1733_v28  ;;  %v1750_v45 = vld [vmem:[%s2065_s13 + $0xb0] sm:$0xff]   ;;  %v1754_v51 = vld [vmem:[%s2065_s13 + $0xb8] sm:$0xff]   ;;  %v1770_v62 = vld [vmem:[%s2065_s13 + $0x128] sm:$0xff]  }
  0x5f   : > { %1628 = vmatpush3.bf16.msra.mxu1 %v1734_v29  ;;  %1601 = vmatprep.subr.bf16.mxu0 %v1735_v30  ;;  %v1763_v55 = vld [vmem:[%s2065_s13 + $0x110] sm:$0xff]   ;;  %v1764_v59 = vld [vmem:[%s2065_s13 + $0x118] sm:$0xff]  }
  0x60   : > { %1629 = vmatprep.subr.bf16.mxu1 %v1736_v31  ;;  %v1773_v63 = vld [vmem:[%s2065_s13 + $0x130] sm:$0xff]   ;;  %v1774_v0 = vld [vmem:[%s2065_s13 + $0x138] sm:$0xff]   ;;  %s1519_s13 = sshll.u32 %s579_s7, 4  ;;  %s1520_s7 = sshll.u32 %s646_s15, 3 }
  0x61   : > { %s2133_s14 = scalar_lea.vmem [#allocation4], %s1519_s13  ;;  %s650_s23 = scalar_lea.vmem %s2173_s3, %s1520_s7 }
  0x62   : > { %1602 = vmatpush3.bf16.msra.mxu0 %v1737_v32  ;;  %s658_s28 = scalar_lea.vmem %s2174_s4, %s1520_s7 }
  0x63   : > { %1630 = vmatpush3.bf16.msra.mxu1 %v1738_v33  ;;  %1603 = vmatprep.subr.bf16.mxu0 %v1739_v34 }
  0x64   : > { %1631 = vmatprep.subr.bf16.mxu1 %v1740_v35 }
  0x66   : > { %1604 = vmatpush3.bf16.msra.mxu0 %v1741_v36 }
  0x67   : > { %1632 = vmatpush3.bf16.msra.mxu1 %v1742_v37  ;;  %1605 = vmatprep.subr.bf16.mxu0 %v1743_v38 }
  0x68   : > { %1633 = vmatprep.subr.bf16.mxu1 %v1744_v39 }
  0x6a   : > { %1606 = vmatpush3.bf16.msra.mxu0 %v1745_v40 }
  0x6b   : > { %1634 = vmatpush3.bf16.msra.mxu1 %v1746_v41  ;;  %1607 = vmatprep.subr.bf16.mxu0 %v1747_v42 }
  0x6c   : > { %1635 = vmatprep.subr.bf16.mxu1 %v1748_v43 }
  0x6e   : > { %1608 = vmatpush3.bf16.msra.mxu0 %v1749_v44 }
  0x6f   : > { %1636 = vmatpush3.bf16.msra.mxu1 %v1750_v45  ;;  %1609 = vmatprep.subr.bf16.mxu0 %v1751_v46 }
  0x70   : > { %1637 = vmatprep.subr.bf16.mxu1 %v1752_v47 }
  0x72   : > { %1610 = vmatpush3.bf16.msra.mxu0 %v1753_v49 }
  0x73   : > { %1638 = vmatpush3.bf16.msra.mxu1 %v1754_v51  ;;  %1661 = vmatprep.subr.bf16.mxu0 %v1761_v53 }
  0x75   : > { %1089 = vmatmul.mubr.bf16.vlgmr.msra.gmra.mrb[0].mxu0 %v1755_v48 }
  0x76   : > { %1138 = vmatmul.mubr.bf16.vlgmr.msra.gmra.mrb[0].mxu1 %v1758_v50  ;;  %1662 = vmatpush3.bf16.msra.mxu0 %v1761_v53 }
  0x77   : > { %1663 = vmatprep.subr.bf16.mxu0 %v1762_v54  ;;  %1096 = vmatprep.mubr.bf16.mxu0 %v1766_v52 }
  0x78   : > { %1145 = vmatprep.mubr.bf16.mxu1 %v1768_v56 }
  0x7a   : > { %1664 = vmatpush3.bf16.msra.mxu0 %v1762_v54 }
  0x7b   : > { %1665 = vmatprep.subr.bf16.mxu0 %v1763_v55 }
  0x7d   : > { %1097 = vmatmul.mubr.bf16.gmra.mrb[4].mxu0 %v1771_v57 }
  0x7e   : > { %1666 = vmatpush3.bf16.msra.mxu0 %v1763_v55  ;;  %1146 = vmatmul.mubr.bf16.gmra.mrb[4].mxu1 %v1772_v58 }
  0x7f   : > { %1667 = vmatprep.subr.bf16.mxu0 %v1764_v59  ;;  %1677 = vmatprep.mubr.bf16.mxu0 %v1775_v60 }
  0x82   : > { %1668 = vmatpush3.bf16.msra.mxu0 %v1764_v59 }
  0x83   : > { %1669 = vmatprep.subr.bf16.mxu0 %v1765_v61 }
  0x86   : > { %1670 = vmatpush3.bf16.msra.mxu0 %v1765_v61 }
  0x87   : > { %1671 = vmatprep.subr.bf16.mxu0 %v1770_v62 }
  0x8a   : > { %1672 = vmatpush3.bf16.msra.mxu0 %v1770_v62 }
  0x8b   : > { %1673 = vmatprep.subr.bf16.mxu0 %v1773_v63 }
  0x8e   : > { %1674 = vmatpush3.bf16.msra.mxu0 %v1773_v63 }
  0x8f   : > { %1675 = vmatprep.subr.bf16.mxu0 %v1774_v0 }
  0x92   : > { %1676 = vmatpush3.bf16.msra.mxu0 %v1774_v0 }
  0x95   : > { %1678 = vmatmul.mubr.bf16.vlgmr.msra.gmra.mrb[8].mxu0 %v1776_v1 }
 0x148   : > { %v1611_v2 = vpop.f32.mrb[0].mxu0 }
 0x149   : > { %v1639_v3 = vpop.f32.mrb[0].mxu1  ;;  %v1612_v4 = vpop.f32.mrb[1].mxu0 }
 0x14a   : > { %v1613_v5 = vadd.f32 %v1612_v4, %v1611_v2  ;;  %v1640_v6 = vpop.f32.mrb[1].mxu1  ;;  %v1614_v7 = vpop.f32.mrb[2].mxu0 }
 0x14b   : > { %v1641_v8 = vadd.f32 %v1640_v6, %v1639_v3  ;;  %v1642_v9 = vpop.f32.mrb[2].mxu1  ;;  %v1615_v10 = vpop.f32.mrb[3].mxu0 }
 0x14c   : > { %v1616_v11 = vadd.f32 %v1615_v10, %v1614_v7  ;;  %v1643_v12 = vpop.f32.mrb[3].mxu1 }
 0x14d   : > { %v1644_v13 = vadd.f32 %v1643_v12, %v1642_v9  ;;  %v1140_v14 = vadd.f32 %v1641_v8, %v1613_v5 }
 0x14f   : > { %v1143_v15 = vadd.f32 %v1644_v13, %v1616_v11 }
 0x150   : > { %v1617_v16 = vpop.f32.mrb[4].mxu0 }
 0x151   : > { %v1645_v17 = vpop.f32.mrb[4].mxu1  ;;  %v1618_v18 = vpop.f32.mrb[5].mxu0 }
 0x152   : > { %v1619_v19 = vadd.f32 %v1618_v18, %v1617_v16  ;;  %v1646_v20 = vpop.f32.mrb[5].mxu1  ;;  %v1620_v21 = vpop.f32.mrb[6].mxu0 }
 0x153   : > { %v1647_v22 = vadd.f32 %v1646_v20, %v1645_v17  ;;  %v1648_v23 = vpop.f32.mrb[6].mxu1  ;;  %v1621_v24 = vpop.f32.mrb[7].mxu0 }
 0x154   : > { %v1622_v25 = vadd.f32 %v1621_v24, %v1620_v21  ;;  %v1649_v26 = vpop.f32.mrb[7].mxu1 }
 0x155   : > { %v1650_v27 = vadd.f32 %v1649_v26, %v1648_v23  ;;  %v1148_v28 = vadd.f32 %v1647_v22, %v1619_v19 }
 0x157   : > { %v1151_v29 = vadd.f32 %v1650_v27, %v1622_v25 }
 0x168   : > { %v1679_v30 = vpop.f32.mrb[8].mxu0 }
 0x169   : > { %v1197_v31 = vadd.f32 %v1679_v30, %v1148_v28  ;;  %v1188_v32 = vpop.f32.mrb[9].mxu0 }
 0x16a   : > { %v1189_v33 = vadd.f32 %v1188_v32, %v1140_v14  ;;  %v1680_v34 = vpop.f32.mrb[10].mxu0 }
 0x16b   : > { %v1200_v35 = vadd.f32 %v1680_v34, %v1151_v29  ;;  %v1191_v36 = vpop.f32.mrb[11].mxu0  ;;  %v1249_v43 = vmul.f32 %v1197_v31, %v1197_v31 }
 0x16c   : > { %v1192_v37 = vadd.f32 %v1191_v36, %v1143_v15  ;;  %v1247_v39 = vmul.f32 %v1189_v33, %v1189_v33 }
 0x16d   : > { %v1592_v38 = vpack.c.bf16 %v1200_v35, %v1197_v31  ;;  %v1250_v46 = vmul.f32 %v1200_v35, %v1200_v35 }
 0x16e   : > { %v1587_v40 = vpack.c.bf16 %v1192_v37, %v1189_v33  ;;  %v1238_v41 = vadd.f32 %v1192_v37, %v1189_v33  ;;  %v1248_v42 = vmul.f32 %v1192_v37, %v1192_v37 }
 0x16f   : > { %1594 = vst [vmem:[%s2133_s14 + $0x8] sm:$0xff] %v1592_v38  }
 0x170   : > { %1588 = vst [vmem:[%s2133_s14] sm:$0xff] %v1587_v40   ;;  %v1239_v44 = vadd.f32 %v1238_v41, %v1197_v31  ;;  %v1251_v45 = vadd.f32 %v1248_v42, %v1247_v39 }
 0x172   : > { %v1240_v47 = vadd.f32 %v1239_v44, %v1200_v35  ;;  %v1252_v48 = vadd.f32 %v1251_v45, %v1249_v43 }
 0x174   : > { %v1241_v49 = vrot.slane %v1240_v47, 4  ;;  %v1253_v50 = vadd.f32 %v1252_v48, %v1250_v46 }
 0x176   : > { %v1242_v51 = vadd.f32 %v1241_v49, %v1240_v47  ;;  %v1254_v52 = vrot.slane %v1253_v50, 4  ;;  %v1309_v0 = vld [vmem:[%s2133_s14 + $0x8] sm:$0xf] (%p1877_p6)  ;;  %v1311_v1 = vld [vmem:[%s2133_s14 + $0xc] sm:$0xf] (%p1877_p6) }
 0x177   : > { %v1305_v62 = vld [vmem:[%s2133_s14] sm:$0xf] (%p1877_p6)  ;;  %v1307_v63 = vld [vmem:[%s2133_s14 + $0x4] sm:$0xf] (%p1877_p6)  ;;  %1310 = vst [vmem:[%s1289_s6 + $0x10] sm:$0xf] (%p1877_p6), %v1309_v0 }
 0x178   : > { %v1243_v53 = vrot.slane %v1242_v51, 2  ;;  %v1255_v54 = vadd.f32 %v1254_v52, %v1253_v50  ;;  %1306 = vst [vmem:[%s1289_s6] sm:$0xf] (%p1877_p6), %v1305_v62  ;;  %1308 = vst [vmem:[%s1289_s6 + $0x8] sm:$0xf] (%p1877_p6), %v1307_v63 }
 0x179   : > { %1312 = vst [vmem:[%s1289_s6 + $0x18] sm:$0xf] (%p1877_p6), %v1311_v1 }
 0x17a   : > { %v1244_v55 = vadd.f32 %v1243_v53, %v1242_v51  ;;  %v1256_v56 = vrot.slane %v1255_v54, 2 }
 0x17c   : > { %v1245_v57 = vrot.slane %v1244_v55, 1  ;;  %v1257_v58 = vadd.f32 %v1256_v56, %v1255_v54  ;;  %1284 = sbr.rel (!%p1877_p6) target bundleno = 387 (0x183), region = 81 }
 0x17e   : > { %v1246_v59 = vadd.f32 %v1245_v57, %v1244_v55  ;;  %v1258_v60 = vrot.slane %v1257_v58, 1 }
 0x180   : > { %v1259_v61 = vadd.f32 %v1258_v60, %v1257_v58  ;;  %1260 = vst [vmem:[%s650_s23] sm:$0xff] %v1246_v59 }
 0x182   : > { %1261 = vst [vmem:[%s658_s28] sm:$0xff] %v1259_v61 }
 0x183 PF: > { %s15_s19 = sadd.s32 1, %s1815_s19   ;;  %s2176_s15 = smov %s1803_s16 }
 0x184   : > { %p12_p12 = scmp.ge.s32.totalorder %s15_s19, 4   ;;  %s2177_s16 = smov %s1882_s25 }
 0x185   : > { %s2178_s17 = smov %s1811_s18  ;;  %s2179_s18 = smov %s2181_s20 }
 0x186   :  { %14 = sbr.rel (!%p12_p12) target bundleno = 3 (0x3), region = 180 }

// kernel: net_forward.42
= control target key start
LH: loop header
LB: loop body
LE: loop exit
PB: predicated region body
PF: predicated region fallthrough
CT: control target
= control target key end

     0   :  { %s852_s12 = smov 0   ;;  %s854_s13 = smov 0   ;;  %s977_s0 = inlined_call_operand.vmem [shape: bf16[32,2304], index: 0, kind: input, shape index: {}]   ;;  %s978_s1 = inlined_call_operand.vmem [shape: bf16[2304,128], index: 1, kind: input, shape index: {}]   ;;  %s979_s2 = inlined_call_operand.vmem [shape: f32[1,128], index: 2, kind: input, shape index: {}]   ;;  %s980_s3 = inlined_call_operand.vmem [shape: bf16[32,128], index: 3, kind: output, shape index: {}]  }
   0x1   :  { %s856_s14 = smov 0   ;;  %s858_s15 = smov 0  }
   0x2   :  { %s860_s16 = smov 0   ;;  %s862_s17 = smov 0  }
   0x3   :  { %s864_s18 = smov 0  }
   0x4 LB: > { %s25_s19 = sadd.s32 1, %s821_s16  ;;  %s32_s20 = sadd.s32 1, %s825_s17  ;;  %s829_s18 = sphi %s864_s18, %s13_s18   ;;  %s825_s17 = sphi %s862_s17, %s986_s17   ;;  %s821_s16 = sphi %s860_s16, %s985_s16   ;;  %s817_s15 = sphi %s858_s15, %s984_s15   ;;  %s813_s14 = sphi %s856_s14, %s983_s14   ;;  %s809_s13 = sphi %s854_s13, %s982_s13   ;;  %s805_s12 = sphi %s852_s12, %s981_s12  }
   0x5   : > { %p26_p0 = scmp.ge.s32.totalorder %s25_s19, 9  ;;  %p48_p1 = scmp.ne.s32.totalorder %s809_s13, %s805_s12 }
   0x6   : > { %p49_p2 = scmp.eq.s32.totalorder %s829_s18, 0  ;;  %s41_s24 = sadd.s32 1, %s809_s13 }
   0x7   : > { %s988_s19 = smov (%p26_p0, %s25_s19), 0  ;;  %s990_s20 = smov (!%p26_p0, %s32_s20), %s825_s17 }
   0x8   : > { %p50_p3 = por %p49_p2, %p48_p1  ;;  %p34_p4 = scmp.ge.s32.totalorder %s990_s20, 2 }
   0x9   : > { %s37_s21 = ssub.s32 %s821_s16, %s988_s19  ;;  %p632_p6 = scmp.ge.s32.totalorder %s829_s18, 18 }
   0xa   : > { %s992_s20 = smov (%p34_p4, %s990_s20), 0 }
   0xb   : > { %s36_s22 = ssub.s32 %s825_s17, %s992_s20  ;;  %162 = sbr.rel (%p632_p6) target bundleno = 27 (0x1b), region = 20 }
   0xc   : > { %s38_s23 = sor.u32 %s37_s21, %s36_s22 }
   0xd   : > { %p39_p5 = scmp.eq.s32.totalorder %s38_s23, 0 }
   0xf   : > { %s903_s25 = scalar_select %p39_p5, %s809_s13, %s41_s24  }
  0x12   : > { %165 = sbr.rel (!%p50_p3) target bundleno = 27 (0x1b), region = 24  ;;  %s167_s26 = sand.u32 (%p50_p3), 1, %s809_s13  }
  0x13   : > { %s635_s27 = sshll.u32 (%p50_p3), %s821_s16, 1  ;;  %s633_s28 = sshll.u32 (%p50_p3), %s167_s26, 4 }
  0x14   : > { %s698_s29 = smul.u32 (%p50_p3), 36, %s825_s17  ;;  %s169_s8 = scalar_lea.vmem (%p50_p3), [#allocation3], %s633_s28 }
  0x16   : > { %s173_s30 = sadd.s32 (%p50_p3), %s698_s29, %s635_s27 }
  0x17   : > { %s637_s4 = sshll.u32 (%p50_p3), %s173_s30, 2 }
  0x18   : > { %s175_s7 = scalar_lea.vmem (%p50_p3), %s977_s0, %s637_s4 }
  0x19   : > { %v205_v0 = vld [vmem:[%s175_s7] sm:$0xff]  ;;  %v207_v1 = vld [vmem:[%s175_s7 + $0x48] sm:$0xff] }
  0x1a   : > { %206 = vst [vmem:[%s169_s8] sm:$0xff] %v205_v0  ;;  %208 = vst [vmem:[%s169_s8 + $0x8] sm:$0xff] %v207_v1 }
  0x1b PF: > { %p638_p7 = scmp.ge.s32.totalorder %s829_s18, 1  ;;  %p225_p8 = scmp.lt.s32.totalorder %s829_s18, 19 }
  0x1d   : > { %p226_p9 = pnand %p638_p7, %p225_p8 }
  0x1e   : > { %s232_s9 = sand.u32 (!%p226_p9), 1, %s805_s12   ;;  %s640_s10 = sshll.u32 (!%p226_p9), %s813_s14, 5 }
  0x1f   : > { %229 = sbr.rel (%p226_p9) target bundleno = 313 (0x139), region = 66  ;;  %s916_s11 = sshll.u32 (!%p226_p9), %s232_s9, 4 }
  0x20   : > { %p272_p10 = scmp.lt.s32.totalorder (!%p226_p9), %s640_s10, 287  ;;  %s642_s21 = sshll.u32 (!%p226_p9), %s817_s15, 1 }
  0x21   : > { %p284_p11 = scmp.lt.s32.totalorder (!%p226_p9), %s642_s21, 3  ;;  %s234_s30 = scalar_lea.vmem (!%p226_p9), [#allocation3], %s916_s11 }
  0x22   : > { %p644_p12 = scmp.ne.s32.totalorder (!%p226_p9), %s813_s14, 0 }
  0x26   : > { %s994_s10 = smov (!%p272_p10, %s640_s10), 287  ;;  %s996_s21 = smov (!%p284_p11, %s642_s21), 3 }
  0x27   : > { %s641_s22 = sshll.u32 %s994_s10, 2  ;;  %s643_s27 = sshll.u32 %s996_s21, 2  ;;  %v831_v2 = vmov (!%p644_p12), 0.0  }
  0x28   : > { %s922_s26 = scalar_lea.vmem %s978_s1, %s641_s22  ;;  %s927_s12 = scalar_lea.vmem %s980_s3, %s643_s27  ;;  %297 = vst [vmem:[#allocation2] sm:$0xff] (!%p644_p12), %v831_v2  ;;  %298 = vst [vmem:[#allocation2 + $0x8] sm:$0xff] (!%p644_p12), %v831_v2 }
  0x29   : > { %296 = sbr.rel (%p644_p12) target bundleno = 48 (0x30), region = 74 }
  0x30 PF: > { %v756_v3 = vld [vmem:[%s922_s26 + $0x40] sm:$0xff]   ;;  %v758_v5 = vld [vmem:[%s922_s26 + $0x48] sm:$0xff]   ;;  %v760_v7 = vld [vmem:[%s922_s26 + $0x50] sm:$0xff]   ;;  %p663_p13 = scmp.ne.s32.totalorder %s813_s14, 8 }
  0x31   : > { %v757_v4 = vld [vmem:[%s922_s26] sm:$0xff]   ;;  %676 = vmatprep.subr.bf16.mxu0 %v756_v3  ;;  %v759_v6 = vld [vmem:[%s922_s26 + $0x8] sm:$0xff]   ;;  %v761_v8 = vld [vmem:[%s922_s26 + $0x10] sm:$0xff]  }
  0x32   : > { %677 = vmatpush3.bf16.msra.mxu0 %v757_v4  ;;  %v762_v9 = vld [vmem:[%s922_s26 + $0x58] sm:$0xff]   ;;  %v764_v11 = vld [vmem:[%s922_s26 + $0x60] sm:$0xff]   ;;  %v766_v13 = vld [vmem:[%s922_s26 + $0x68] sm:$0xff]  }
  0x33   : > { %678 = vmatprep.subr.bf16.mxu0 %v758_v5  ;;  %v763_v10 = vld [vmem:[%s922_s26 + $0x18] sm:$0xff]   ;;  %v765_v12 = vld [vmem:[%s922_s26 + $0x20] sm:$0xff]   ;;  %v767_v15 = vld [vmem:[%s922_s26 + $0x28] sm:$0xff]  }
  0x34   : > { %v774_v14 = vld [vmem:[%s234_s30 + $0x4] ss:$8 sps:$4 sm:$0xff]   ;;  %v772_v20 = vld [vmem:[%s234_s30] ss:$8 sps:$4 sm:$0xff]  }
  0x35   : > { %473 = vmatprep.mubr.bf16.mxu0 %v774_v14  ;;  %v768_v16 = vld [vmem:[%s922_s26 + $0x70] sm:$0xff]   ;;  %v770_v18 = vld [vmem:[%s922_s26 + $0x78] sm:$0xff]   ;;  %v299_v22 = vld [vmem:[#allocation2] sm:$0xff] }
  0x36   : > { %679 = vmatpush3.bf16.msra.mxu0 %v759_v6  ;;  %v769_v17 = vld [vmem:[%s922_s26 + $0x30] sm:$0xff]   ;;  %v771_v19 = vld [vmem:[%s922_s26 + $0x38] sm:$0xff]   ;;  %v300_v26 = vld [vmem:[#allocation2 + $0x8] sm:$0xff] }
  0x37   : > { %680 = vmatprep.subr.bf16.mxu0 %v760_v7  ;;  %v664_v33 = vld [vmem:[%s979_s2] ss:$0 sm:$0xff] (!%p663_p13) }
  0x3a   : > { %681 = vmatpush3.bf16.msra.mxu0 %v761_v8 }
  0x3b   : > { %682 = vmatprep.subr.bf16.mxu0 %v762_v9 }
  0x3e   : > { %683 = vmatpush3.bf16.msra.mxu0 %v763_v10 }
  0x3f   : > { %684 = vmatprep.subr.bf16.mxu0 %v764_v11 }
  0x42   : > { %685 = vmatpush3.bf16.msra.mxu0 %v765_v12 }
  0x43   : > { %686 = vmatprep.subr.bf16.mxu0 %v766_v13 }
  0x46   : > { %687 = vmatpush3.bf16.msra.mxu0 %v767_v15 }
  0x47   : > { %688 = vmatprep.subr.bf16.mxu0 %v768_v16 }
  0x4a   : > { %689 = vmatpush3.bf16.msra.mxu0 %v769_v17 }
  0x4b   : > { %690 = vmatprep.subr.bf16.mxu0 %v770_v18 }
  0x4e   : > { %691 = vmatpush3.bf16.msra.mxu0 %v771_v19 }
  0x51   : > { %474 = vmatmul.mubr.bf16.vlgmr.msra.gmra.mrb[0].mxu0 %v772_v20 }
 0x124   : > { %v692_v21 = vpop.f32.mrb[0].mxu0 }
 0x125   : > { %v693_v23 = vpop.f32.mrb[1].mxu0 }
 0x126   : > { %v694_v24 = vadd.f32 %v693_v23, %v692_v21  ;;  %v695_v25 = vpop.f32.mrb[2].mxu0  ;;  %489 = sbr.rel (%p663_p13) target bundleno = 313 (0x139), region = 78 }
 0x127   : > { %v696_v27 = vpop.f32.mrb[3].mxu0 }
 0x128   : > { %v482_v28 = vadd.f32 %v694_v24, %v299_v22  ;;  %v697_v29 = vadd.f32 %v696_v27, %v695_v25 }
 0x12a   : > { %484 = vst [vmem:[#allocation2] sm:$0xff] %v482_v28  ;;  %v483_v30 = vadd.f32 %v697_v29, %v300_v26 }
 0x12c   : > { %485 = vst [vmem:[#allocation2 + $0x8] sm:$0xff] %v483_v30 }
 0x131   : > { %v490_v31 = vld [vmem:[#allocation2] sm:$0xff] }
 0x132   : > { %v499_v34 = vadd.f32 %v664_v33, %v490_v31 }
 0x133   : > { %v491_v32 = vld [vmem:[#allocation2 + $0x8] sm:$0xff] }
 0x134   : > { %v500_v35 = vadd.f32 %v664_v33, %v491_v32 }
 0x136   : > { %v674_v36 = vpack.c.bf16 %v500_v35, %v499_v34 }
 0x138   : > { %675 = vst [vmem:[%s927_s12] sm:$0xff] %v674_v36  }
 0x139 PF: > { %s13_s18 = sadd.s32 1, %s829_s18   ;;  %s981_s12 = smov %s809_s13 }
 0x13a   : > { %p10_p0 = scmp.ge.s32.totalorder %s13_s18, 20   ;;  %s982_s13 = smov %s903_s25 }
 0x13b   : > { %s983_s14 = smov %s821_s16  ;;  %s984_s15 = smov %s825_s17 }
 0x13c   : > { %s985_s16 = smov %s988_s19  ;;  %s986_s17 = smov %s992_s20 }
 0x13d   :  { %12 = sbr.rel (!%p10_p0) target bundleno = 4 (0x4), region = 119 }

// kernel: net_forward.43
= control target key start
LH: loop header
LB: loop body
LE: loop exit
PB: predicated region body
PF: predicated region fallthrough
CT: control target
= control target key end

     0   :  { %s1081_s12 = smov 0   ;;  %s1083_s13 = smov 0   ;;  %s1212_s0 = inlined_call_operand.vmem [shape: bf16[128,2304], index: 0, kind: input, shape index: {}]   ;;  %s1213_s1 = inlined_call_operand.vmem [shape: bf16[2304,128], index: 1, kind: input, shape index: {}]   ;;  %s1214_s2 = inlined_call_operand.vmem [shape: f32[1,128], index: 2, kind: input, shape index: {}]   ;;  %s1215_s3 = inlined_call_operand.vmem [shape: bf16[128,128], index: 3, kind: output, shape index: {}]  }
   0x1   :  { %s1085_s14 = smov 0   ;;  %s1087_s15 = smov 0  }
   0x2   :  { %s1089_s16 = smov 0   ;;  %s1091_s17 = smov 0  }
   0x3   :  { %s1093_s18 = smov 0  }
   0x4 LB: > { %s25_s19 = sadd.s32 1, %s1050_s16  ;;  %s32_s20 = sadd.s32 1, %s1054_s17  ;;  %s1058_s18 = sphi %s1093_s18, %s13_s18   ;;  %s1054_s17 = sphi %s1091_s17, %s1221_s17   ;;  %s1050_s16 = sphi %s1089_s16, %s1220_s16   ;;  %s1046_s15 = sphi %s1087_s15, %s1219_s15   ;;  %s1042_s14 = sphi %s1085_s14, %s1218_s14   ;;  %s1038_s13 = sphi %s1083_s13, %s1217_s13   ;;  %s1034_s12 = sphi %s1081_s12, %s1216_s12  }
   0x5   : > { %p26_p0 = scmp.ge.s32.totalorder %s25_s19, 9  ;;  %p48_p1 = scmp.ne.s32.totalorder %s1038_s13, %s1034_s12 }
   0x6   : > { %p49_p2 = scmp.eq.s32.totalorder %s1058_s18, 0  ;;  %s41_s24 = sadd.s32 1, %s1038_s13 }
   0x7   : > { %s1223_s19 = smov (%p26_p0, %s25_s19), 0  ;;  %s1225_s20 = smov (!%p26_p0, %s32_s20), %s1054_s17 }
   0x8   : > { %p50_p3 = por %p49_p2, %p48_p1  ;;  %p34_p4 = scmp.ge.s32.totalorder %s1225_s20, 2 }
   0x9   : > { %s37_s21 = ssub.s32 %s1050_s16, %s1223_s19  ;;  %p782_p6 = scmp.ge.s32.totalorder %s1058_s18, 18 }
   0xa   : > { %s1227_s20 = smov (%p34_p4, %s1225_s20), 0 }
   0xb   : > { %s36_s22 = ssub.s32 %s1054_s17, %s1227_s20  ;;  %162 = sbr.rel (%p782_p6) target bundleno = 30 (0x1e), region = 20 }
   0xc   : > { %s38_s23 = sor.u32 %s37_s21, %s36_s22 }
   0xd   : > { %p39_p5 = scmp.eq.s32.totalorder %s38_s23, 0 }
   0xf   : > { %s1132_s25 = scalar_select %p39_p5, %s1038_s13, %s41_s24  }
  0x12   : > { %165 = sbr.rel (!%p50_p3) target bundleno = 30 (0x1e), region = 24  ;;  %s167_s26 = sand.u32 (%p50_p3), 1, %s1038_s13  }
  0x13   : > { %s785_s27 = sshll.u32 (%p50_p3), %s1050_s16, 1  ;;  %s783_s28 = sshll.u32 (%p50_p3), %s167_s26, 6 }
  0x14   : > { %s918_s29 = smul.u32 (%p50_p3), 144, %s1054_s17  ;;  %s169_s8 = scalar_lea.vmem (%p50_p3), [#allocation3], %s783_s28 }
  0x16   : > { %s173_s30 = sadd.s32 (%p50_p3), %s918_s29, %s785_s27 }
  0x17   : > { %s787_s4 = sshll.u32 (%p50_p3), %s173_s30, 2 }
  0x18   : > { %s175_s7 = scalar_lea.vmem (%p50_p3), %s1212_s0, %s787_s4 }
  0x19   : > { %v217_v0 = vld [vmem:[%s175_s7] sm:$0xff]  ;;  %v219_v1 = vld [vmem:[%s175_s7 + $0x48] sm:$0xff]  ;;  %v221_v2 = vld [vmem:[%s175_s7 + $0x90] sm:$0xff] }
  0x1a   : > { %218 = vst [vmem:[%s169_s8] sm:$0xff] %v217_v0  ;;  %220 = vst [vmem:[%s169_s8 + $0x8] sm:$0xff] %v219_v1  ;;  %v223_v3 = vld [vmem:[%s175_s7 + $0xd8] sm:$0xff]  ;;  %v225_v4 = vld [vmem:[%s175_s7 + $0x120] sm:$0xff] }
  0x1b   : > { %222 = vst [vmem:[%s169_s8 + $0x10] sm:$0xff] %v221_v2  ;;  %v227_v5 = vld [vmem:[%s175_s7 + $0x168] sm:$0xff]  ;;  %224 = vst [vmem:[%s169_s8 + $0x18] sm:$0xff] %v223_v3  ;;  %v229_v6 = vld [vmem:[%s175_s7 + $0x1b0] sm:$0xff] }
  0x1c   : > { %226 = vst [vmem:[%s169_s8 + $0x20] sm:$0xff] %v225_v4  ;;  %228 = vst [vmem:[%s169_s8 + $0x28] sm:$0xff] %v227_v5  ;;  %v231_v7 = vld [vmem:[%s175_s7 + $0x1f8] sm:$0xff] }
  0x1d   : > { %230 = vst [vmem:[%s169_s8 + $0x30] sm:$0xff] %v229_v6  ;;  %232 = vst [vmem:[%s169_s8 + $0x38] sm:$0xff] %v231_v7 }
  0x1e PF: > { %p788_p7 = scmp.ge.s32.totalorder %s1058_s18, 1  ;;  %p249_p8 = scmp.lt.s32.totalorder %s1058_s18, 19 }
  0x20   : > { %p250_p9 = pnand %p788_p7, %p249_p8 }
  0x21   : > { %s256_s9 = sand.u32 (!%p250_p9), 1, %s1034_s12   ;;  %s790_s10 = sshll.u32 (!%p250_p9), %s1042_s14, 5 }
  0x22   : > { %253 = sbr.rel (%p250_p9) target bundleno = 325 (0x145), region = 66  ;;  %s789_s11 = sshll.u32 (!%p250_p9), %s256_s9, 6 }
  0x23   : > { %p296_p10 = scmp.lt.s32.totalorder (!%p250_p9), %s790_s10, 287  ;;  %s792_s21 = sshll.u32 (!%p250_p9), %s1046_s15, 3 }
  0x24   : > { %p308_p11 = scmp.lt.s32.totalorder (!%p250_p9), %s792_s21, 15  ;;  %s1156_s12 = scalar_lea.vmem (!%p250_p9), [#allocation3], %s789_s11 }
  0x25   : > { %p794_p12 = scmp.ne.s32.totalorder (!%p250_p9), %s1042_s14, 0 }
  0x29   : > { %s1229_s10 = smov (!%p296_p10, %s790_s10), 287  ;;  %s1231_s21 = smov (!%p308_p11, %s792_s21), 15 }
  0x2a   : > { %s791_s22 = sshll.u32 %s1229_s10, 2  ;;  %s793_s27 = sshll.u32 %s1231_s21, 2  ;;  %v1060_v8 = vmov (!%p794_p12), 0.0  }
  0x2b   : > { %s1149_s26 = scalar_lea.vmem %s1213_s1, %s791_s22  ;;  %s1154_s30 = scalar_lea.vmem %s1215_s3, %s793_s27  ;;  %321 = vst [vmem:[#allocation2] sm:$0xff] (!%p794_p12), %v1060_v8  ;;  %322 = vst [vmem:[#allocation2 + $0x8] sm:$0xff] (!%p794_p12), %v1060_v8 }
  0x2c   : > { %320 = sbr.rel (%p794_p12) target bundleno = 51 (0x33), region = 74  ;;  %323 = vst [vmem:[#allocation2 + $0x10] sm:$0xff] (!%p794_p12), %v1060_v8  ;;  %324 = vst [vmem:[#allocation2 + $0x18] sm:$0xff] (!%p794_p12), %v1060_v8 }
  0x2d   : > { %325 = vst [vmem:[#allocation2 + $0x20] sm:$0xff] (!%p794_p12), %v1060_v8  ;;  %326 = vst [vmem:[#allocation2 + $0x28] sm:$0xff] (!%p794_p12), %v1060_v8 }
  0x2e   : > { %327 = vst [vmem:[#allocation2 + $0x30] sm:$0xff] (!%p794_p12), %v1060_v8  ;;  %328 = vst [vmem:[#allocation2 + $0x38] sm:$0xff] (!%p794_p12), %v1060_v8 }
  0x33 PF: > { %v976_v9 = vld [vmem:[%s1149_s26 + $0x40] sm:$0xff]   ;;  %v978_v11 = vld [vmem:[%s1149_s26 + $0x48] sm:$0xff]   ;;  %v980_v13 = vld [vmem:[%s1149_s26 + $0x50] sm:$0xff]   ;;  %p819_p13 = scmp.ne.s32.totalorder %s1042_s14, 8 }
  0x34   : > { %v977_v10 = vld [vmem:[%s1149_s26] sm:$0xff]   ;;  %862 = vmatprep.subr.bf16.mxu0 %v976_v9  ;;  %902 = vmatprep.subr.bf16.mxu1 %v976_v9  ;;  %v979_v12 = vld [vmem:[%s1149_s26 + $0x8] sm:$0xff]   ;;  %v981_v14 = vld [vmem:[%s1149_s26 + $0x10] sm:$0xff]  }
  0x35   : > { %863 = vmatpush3.bf16.msra.mxu0 %v977_v10  ;;  %910 = vmatpush3.bf16.msra.mxu1 %v977_v10  ;;  %v982_v15 = vld [vmem:[%s1149_s26 + $0x58] sm:$0xff]   ;;  %v984_v17 = vld [vmem:[%s1149_s26 + $0x60] sm:$0xff]   ;;  %v986_v19 = vld [vmem:[%s1149_s26 + $0x68] sm:$0xff]  }
  0x36   : > { %864 = vmatprep.subr.bf16.mxu0 %v978_v11  ;;  %903 = vmatprep.subr.bf16.mxu1 %v978_v11  ;;  %v983_v16 = vld [vmem:[%s1149_s26 + $0x18] sm:$0xff]   ;;  %v985_v18 = vld [vmem:[%s1149_s26 + $0x20] sm:$0xff]   ;;  %v987_v22 = vld [vmem:[%s1149_s26 + $0x28] sm:$0xff]  }
  0x37   : > { %v994_v20 = vld [vmem:[%s1156_s12 + $0x4] ss:$8 sps:$4 sm:$0xff]   ;;  %v988_v23 = vld [vmem:[%s1149_s26 + $0x70] sm:$0xff]   ;;  %v990_v25 = vld [vmem:[%s1149_s26 + $0x78] sm:$0xff]  }
  0x38   : > { %v997_v21 = vld [vmem:[%s1156_s12 + $0x24] ss:$8 sps:$4 sm:$0xff]   ;;  %545 = vmatprep.mubr.bf16.mxu0 %v994_v20  ;;  %v989_v24 = vld [vmem:[%s1149_s26 + $0x30] sm:$0xff]   ;;  %v991_v26 = vld [vmem:[%s1149_s26 + $0x38] sm:$0xff]  }
  0x39   : > { %865 = vmatpush3.bf16.msra.mxu0 %v979_v12  ;;  %911 = vmatpush3.bf16.msra.mxu1 %v979_v12  ;;  %v992_v27 = vld [vmem:[%s1156_s12] ss:$8 sps:$4 sm:$0xff]   ;;  %v998_v29 = vld [vmem:[%s1156_s12 + $0x14] ss:$8 sps:$4 sm:$0xff]   ;;  %v1002_v31 = vld [vmem:[%s1156_s12 + $0x10] ss:$8 sps:$4 sm:$0xff]  }
  0x3a   : > { %866 = vmatprep.subr.bf16.mxu0 %v980_v13  ;;  %904 = vmatprep.subr.bf16.mxu1 %v980_v13  ;;  %v995_v28 = vld [vmem:[%s1156_s12 + $0x20] ss:$8 sps:$4 sm:$0xff]   ;;  %v1000_v30 = vld [vmem:[%s1156_s12 + $0x34] ss:$8 sps:$4 sm:$0xff]   ;;  %v1003_v32 = vld [vmem:[%s1156_s12 + $0x30] ss:$8 sps:$4 sm:$0xff]  }
  0x3b   : > { %561 = vmatprep.mubr.bf16.mxu1 %v997_v21  ;;  %v329_v35 = vld [vmem:[#allocation2] sm:$0xff]  ;;  %v330_v43 = vld [vmem:[#allocation2 + $0x8] sm:$0xff]  ;;  %v331_v55 = vld [vmem:[#allocation2 + $0x10] sm:$0xff] }
  0x3c   : > { %v333_v37 = vld [vmem:[#allocation2 + $0x20] sm:$0xff]  ;;  %v334_v45 = vld [vmem:[#allocation2 + $0x28] sm:$0xff]  ;;  %v335_v57 = vld [vmem:[#allocation2 + $0x30] sm:$0xff] }
  0x3d   : > { %867 = vmatpush3.bf16.msra.mxu0 %v981_v14  ;;  %912 = vmatpush3.bf16.msra.mxu1 %v981_v14  ;;  %v332_v63 = vld [vmem:[#allocation2 + $0x18] sm:$0xff]  ;;  %v820_v11 = vld [vmem:[%s1214_s2] ss:$0 sm:$0xff] (!%p819_p13) }
  0x3e   : > { %868 = vmatprep.subr.bf16.mxu0 %v982_v15  ;;  %905 = vmatprep.subr.bf16.mxu1 %v982_v15  ;;  %v336_v1 = vld [vmem:[#allocation2 + $0x38] sm:$0xff] }
  0x41   : > { %869 = vmatpush3.bf16.msra.mxu0 %v983_v16  ;;  %913 = vmatpush3.bf16.msra.mxu1 %v983_v16 }
  0x42   : > { %870 = vmatprep.subr.bf16.mxu0 %v984_v17  ;;  %906 = vmatprep.subr.bf16.mxu1 %v984_v17 }
  0x45   : > { %871 = vmatpush3.bf16.msra.mxu0 %v985_v18  ;;  %914 = vmatpush3.bf16.msra.mxu1 %v985_v18 }
  0x46   : > { %872 = vmatprep.subr.bf16.mxu0 %v986_v19  ;;  %907 = vmatprep.subr.bf16.mxu1 %v986_v19 }
  0x49   : > { %873 = vmatpush3.bf16.msra.mxu0 %v987_v22  ;;  %915 = vmatpush3.bf16.msra.mxu1 %v987_v22 }
  0x4a   : > { %874 = vmatprep.subr.bf16.mxu0 %v988_v23  ;;  %908 = vmatprep.subr.bf16.mxu1 %v988_v23 }
  0x4d   : > { %875 = vmatpush3.bf16.msra.mxu0 %v989_v24  ;;  %916 = vmatpush3.bf16.msra.mxu1 %v989_v24 }
  0x4e   : > { %876 = vmatprep.subr.bf16.mxu0 %v990_v25  ;;  %909 = vmatprep.subr.bf16.mxu1 %v990_v25 }
  0x51   : > { %877 = vmatpush3.bf16.msra.mxu0 %v991_v26  ;;  %917 = vmatpush3.bf16.msra.mxu1 %v991_v26 }
  0x54   : > { %546 = vmatmul.mubr.bf16.vlgmr.msra.gmra.mrb[0].mxu0 %v992_v27  ;;  %562 = vmatmul.mubr.bf16.vlgmr.msra.gmra.mrb[0].mxu1 %v995_v28 }
  0x55   : > { %553 = vmatprep.mubr.bf16.mxu0 %v998_v29  ;;  %569 = vmatprep.mubr.bf16.mxu1 %v1000_v30 }
  0x5c   : > { %554 = vmatmul.mubr.bf16.gmra.mrb[4].mxu0 %v1002_v31  ;;  %570 = vmatmul.mubr.bf16.gmra.mrb[4].mxu1 %v1003_v32 }
 0x127   : > { %v878_v33 = vpop.f32.mrb[0].mxu0  ;;  %v890_v34 = vpop.f32.mrb[0].mxu1 }
 0x128   : > { %v879_v36 = vpop.f32.mrb[1].mxu0  ;;  %v891_v38 = vpop.f32.mrb[1].mxu1 }
 0x129   : > { %v880_v39 = vadd.f32 %v879_v36, %v878_v33  ;;  %v892_v40 = vadd.f32 %v891_v38, %v890_v34  ;;  %v881_v41 = vpop.f32.mrb[2].mxu0  ;;  %v893_v42 = vpop.f32.mrb[2].mxu1 }
 0x12a   : > { %v882_v44 = vpop.f32.mrb[3].mxu0  ;;  %v894_v46 = vpop.f32.mrb[3].mxu1 }
 0x12b   : > { %v578_v47 = vadd.f32 %v880_v39, %v329_v35  ;;  %v582_v48 = vadd.f32 %v892_v40, %v333_v37  ;;  %v883_v49 = vadd.f32 %v882_v44, %v881_v41  ;;  %v895_v50 = vadd.f32 %v894_v46, %v893_v42 }
 0x12d   : > { %586 = vst [vmem:[#allocation2] sm:$0xff] %v578_v47  ;;  %590 = vst [vmem:[#allocation2 + $0x20] sm:$0xff] %v582_v48  ;;  %v579_v51 = vadd.f32 %v883_v49, %v330_v43  ;;  %v583_v52 = vadd.f32 %v895_v50, %v334_v45 }
 0x12f   : > { %587 = vst [vmem:[#allocation2 + $0x8] sm:$0xff] %v579_v51  ;;  %591 = vst [vmem:[#allocation2 + $0x28] sm:$0xff] %v583_v52  ;;  %v884_v53 = vpop.f32.mrb[4].mxu0  ;;  %v896_v54 = vpop.f32.mrb[4].mxu1 }
 0x130   : > { %v885_v56 = vpop.f32.mrb[5].mxu0  ;;  %v897_v58 = vpop.f32.mrb[5].mxu1 }
 0x131   : > { %v886_v59 = vadd.f32 %v885_v56, %v884_v53  ;;  %v898_v60 = vadd.f32 %v897_v58, %v896_v54  ;;  %v887_v61 = vpop.f32.mrb[6].mxu0  ;;  %v899_v62 = vpop.f32.mrb[6].mxu1  ;;  %597 = sbr.rel (%p819_p13) target bundleno = 325 (0x145), region = 78 }
 0x132   : > { %v888_v0 = vpop.f32.mrb[7].mxu0  ;;  %v900_v2 = vpop.f32.mrb[7].mxu1 }
 0x133   : > { %v580_v3 = vadd.f32 %v886_v59, %v331_v55  ;;  %v584_v4 = vadd.f32 %v898_v60, %v335_v57  ;;  %v889_v5 = vadd.f32 %v888_v0, %v887_v61  ;;  %v901_v6 = vadd.f32 %v900_v2, %v899_v62 }
 0x134   : > { %v598_v9 = vld [vmem:[#allocation2] sm:$0xff] (!%p819_p13) }
 0x135   : > { %588 = vst [vmem:[#allocation2 + $0x10] sm:$0xff] %v580_v3  ;;  %592 = vst [vmem:[#allocation2 + $0x30] sm:$0xff] %v584_v4  ;;  %v581_v7 = vadd.f32 %v889_v5, %v332_v63  ;;  %v585_v8 = vadd.f32 %v901_v6, %v336_v1  ;;  %v613_v12 = vadd.f32 (!%p819_p13), %v820_v11, %v598_v9  ;;  %v602_v16 = vld [vmem:[#allocation2 + $0x20] sm:$0xff] (!%p819_p13) }
 0x136   : > { %v599_v10 = vld [vmem:[#allocation2 + $0x8] sm:$0xff] (!%p819_p13)  ;;  %v617_v20 = vadd.f32 (!%p819_p13), %v820_v11, %v602_v16 }
 0x137   : > { %589 = vst [vmem:[#allocation2 + $0x18] sm:$0xff] %v581_v7  ;;  %593 = vst [vmem:[#allocation2 + $0x38] sm:$0xff] %v585_v8  ;;  %v614_v13 = vadd.f32 (!%p819_p13), %v820_v11, %v599_v10  ;;  %v603_v19 = vld [vmem:[#allocation2 + $0x28] sm:$0xff] (!%p819_p13) }
 0x138   : > { %v618_v24 = vadd.f32 %v820_v11, %v603_v19 }
 0x139   : > { %v842_v23 = vpack.c.bf16 %v614_v13, %v613_v12 }
 0x13a   : > { %v852_v28 = vpack.c.bf16 %v618_v24, %v617_v20 }
 0x13b   : > { %843 = vst [vmem:[%s1154_s30] sm:$0xff] %v842_v23  }
 0x13c   : > { %v600_v14 = vld [vmem:[#allocation2 + $0x10] sm:$0xff]  ;;  %860 = vst [vmem:[%s1154_s30 + $0x10] sm:$0xff] %v852_v28  }
 0x13d   : > { %v615_v17 = vadd.f32 %v820_v11, %v600_v14  ;;  %v604_v21 = vld [vmem:[#allocation2 + $0x30] sm:$0xff] }
 0x13e   : > { %v601_v15 = vld [vmem:[#allocation2 + $0x18] sm:$0xff]  ;;  %v619_v25 = vadd.f32 %v820_v11, %v604_v21 }
 0x13f   : > { %v616_v18 = vadd.f32 %v820_v11, %v601_v15  ;;  %v605_v22 = vld [vmem:[#allocation2 + $0x38] sm:$0xff] }
 0x140   : > { %v620_v26 = vadd.f32 %v820_v11, %v605_v22 }
 0x141   : > { %v847_v27 = vpack.c.bf16 %v616_v18, %v615_v17 }
 0x142   : > { %v857_v29 = vpack.c.bf16 %v620_v26, %v619_v25 }
 0x143   : > { %859 = vst [vmem:[%s1154_s30 + $0x8] sm:$0xff] %v847_v27  }
 0x144   : > { %861 = vst [vmem:[%s1154_s30 + $0x18] sm:$0xff] %v857_v29  }
 0x145 PF: > { %s13_s18 = sadd.s32 1, %s1058_s18   ;;  %s1216_s12 = smov %s1038_s13 }
 0x146   : > { %p10_p0 = scmp.ge.s32.totalorder %s13_s18, 20   ;;  %s1217_s13 = smov %s1132_s25 }
 0x147   : > { %s1218_s14 = smov %s1050_s16  ;;  %s1219_s15 = smov %s1054_s17 }
 0x148   : > { %s1220_s16 = smov %s1223_s19  ;;  %s1221_s17 = smov %s1227_s20 }
 0x149   :  { %12 = sbr.rel (!%p10_p0) target bundleno = 4 (0x4), region = 119 }

// kernel: net_forward.44
= control target key start
LH: loop header
LB: loop body
LE: loop exit
PB: predicated region body
PF: predicated region fallthrough
CT: control target
= control target key end

     0   :  { %s952_s12 = smov 0   ;;  %s954_s13 = smov 0   ;;  %s1091_s0 = inlined_call_operand.vmem [shape: bf16[128,1152], index: 0, kind: input, shape index: {}]   ;;  %s1092_s1 = inlined_call_operand.vmem [shape: bf16[1152,64], index: 1, kind: input, shape index: {}]   ;;  %s1093_s2 = inlined_call_operand.vmem [shape: f32[1,64], index: 2, kind: input, shape index: {}]   ;;  %s1094_s3 = inlined_call_operand.vmem [shape: bf16[128,64], index: 3, kind: output, shape index: {}]  }
   0x1   :  { %s956_s14 = smov 0   ;;  %s958_s15 = smov 0  }
   0x2   :  { %s960_s16 = smov 0   ;;  %s962_s17 = smov 0  }
   0x3   :  { %s964_s18 = smov 0  }
   0x4 LB: > { %s25_s19 = sadd.s32 1, %s921_s16  ;;  %s32_s20 = sadd.s32 1, %s925_s17  ;;  %s929_s18 = sphi %s964_s18, %s13_s18   ;;  %s925_s17 = sphi %s962_s17, %s1100_s17   ;;  %s921_s16 = sphi %s960_s16, %s1099_s16   ;;  %s917_s15 = sphi %s958_s15, %s1098_s15   ;;  %s913_s14 = sphi %s956_s14, %s1097_s14   ;;  %s909_s13 = sphi %s954_s13, %s1096_s13   ;;  %s905_s12 = sphi %s952_s12, %s1095_s12  }
   0x5   : > { %p26_p0 = scmp.ge.s32.totalorder %s25_s19, 9  ;;  %p48_p1 = scmp.ne.s32.totalorder %s909_s13, %s905_s12 }
   0x6   : > { %p49_p2 = scmp.eq.s32.totalorder %s929_s18, 0  ;;  %s41_s24 = sadd.s32 1, %s909_s13 }
   0x7   : > { %s1102_s19 = smov (%p26_p0, %s25_s19), 0  ;;  %s1104_s20 = smov (!%p26_p0, %s32_s20), %s925_s17 }
   0x8   : > { %p50_p3 = por %p49_p2, %p48_p1  ;;  %p34_p4 = scmp.ge.s32.totalorder %s1104_s20, 2 }
   0x9   : > { %s37_s21 = ssub.s32 %s921_s16, %s1102_s19  ;;  %p709_p6 = scmp.ge.s32.totalorder %s929_s18, 18 }
   0xa   : > { %s1106_s20 = smov (%p34_p4, %s1104_s20), 0 }
   0xb   : > { %s36_s22 = ssub.s32 %s925_s17, %s1106_s20  ;;  %162 = sbr.rel (%p709_p6) target bundleno = 30 (0x1e), region = 20 }
   0xc   : > { %s38_s23 = sor.u32 %s37_s21, %s36_s22 }
   0xd   : > { %p39_p5 = scmp.eq.s32.totalorder %s38_s23, 0 }
   0xf   : > { %s1003_s25 = scalar_select %p39_p5, %s909_s13, %s41_s24  }
  0x12   : > { %165 = sbr.rel (!%p50_p3) target bundleno = 30 (0x1e), region = 24  ;;  %s167_s26 = sand.u32 (%p50_p3), 1, %s909_s13  }
  0x13   : > { %s805_s27 = smul.u32 (%p50_p3), 72, %s925_s17  ;;  %s710_s28 = sshll.u32 (%p50_p3), %s167_s26, 5 }
  0x14   : > { %s169_s7 = scalar_lea.vmem (%p50_p3), [#allocation3], %s710_s28 }
  0x15   : > { %s172_s29 = sadd.s32 (%p50_p3), %s921_s16, %s805_s27 }
  0x16   : > { %s713_s30 = sshll.u32 (%p50_p3), %s172_s29, 2 }
  0x17   : > { %s174_s6 = scalar_lea.vmem (%p50_p3), %s1091_s0, %s713_s30 }
  0x18   : > { %v190_v0 = vld [vmem:[%s174_s6] sm:$0xf] (%p50_p3)  ;;  %v192_v1 = vld [vmem:[%s174_s6 + $0x24] sm:$0xf] (%p50_p3)  ;;  %v194_v2 = vld [vmem:[%s174_s6 + $0x48] sm:$0xf] (%p50_p3) }
  0x19   : > { %191 = vst [vmem:[%s169_s7] sm:$0xf] %v190_v0  ;;  %193 = vst [vmem:[%s169_s7 + $0x4] sm:$0xf] %v192_v1  ;;  %v196_v3 = vld [vmem:[%s174_s6 + $0x6c] sm:$0xf] }
  0x1a   : > { %195 = vst [vmem:[%s169_s7 + $0x8] sm:$0xf] %v194_v2  ;;  %v198_v4 = vld [vmem:[%s174_s6 + $0x90] sm:$0xf]  ;;  %v200_v5 = vld [vmem:[%s174_s6 + $0xb4] sm:$0xf] }
  0x1b   : > { %197 = vst [vmem:[%s169_s7 + $0xc] sm:$0xf] %v196_v3  ;;  %199 = vst [vmem:[%s169_s7 + $0x10] sm:$0xf] %v198_v4  ;;  %v202_v6 = vld [vmem:[%s174_s6 + $0xd8] sm:$0xf] }
  0x1c   : > { %201 = vst [vmem:[%s169_s7 + $0x14] sm:$0xf] %v200_v5  ;;  %v204_v7 = vld [vmem:[%s174_s6 + $0xfc] sm:$0xf]  ;;  %203 = vst [vmem:[%s169_s7 + $0x18] sm:$0xf] %v202_v6 }
  0x1d   : > { %205 = vst [vmem:[%s169_s7 + $0x1c] sm:$0xf] %v204_v7 }
  0x1e PF: > { %p714_p7 = scmp.ge.s32.totalorder %s929_s18, 1  ;;  %p255_p8 = scmp.lt.s32.totalorder %s929_s18, 19 }
  0x20   : > { %p256_p9 = pnand %p714_p7, %p255_p8 }
  0x21   : > { %s262_s8 = sand.u32 (!%p256_p9), 1, %s905_s12   ;;  %s716_s9 = sshll.u32 (!%p256_p9), %s913_s14, 4 }
  0x22   : > { %259 = sbr.rel (%p256_p9) target bundleno = 315 (0x13b), region = 69  ;;  %s715_s10 = sshll.u32 (!%p256_p9), %s262_s8, 5 }
  0x23   : > { %p301_p10 = scmp.lt.s32.totalorder (!%p256_p9), %s716_s9, 143  ;;  %s718_s11 = sshll.u32 (!%p256_p9), %s917_s15, 3 }
  0x24   : > { %p313_p11 = scmp.lt.s32.totalorder (!%p256_p9), %s718_s11, 15  ;;  %s1027_s12 = scalar_lea.vmem (!%p256_p9), [#allocation3], %s715_s10 }
  0x25   : > { %p720_p12 = scmp.ne.s32.totalorder (!%p256_p9), %s913_s14, 0 }
  0x29   : > { %s1108_s9 = smov (!%p301_p10, %s716_s9), 143  ;;  %s1110_s11 = smov (!%p313_p11, %s718_s11), 15 }
  0x2a   : > { %s717_s21 = sshll.u32 %s1108_s9, 2  ;;  %s719_s26 = sshll.u32 %s1110_s11, 2  ;;  %vm326_vm0 = vcmask (!%p720_p12), 523264   ;;  %v931_v8 = vmov (!%p720_p12), 0.0  }
  0x2b   : > { %s1020_s24 = scalar_lea.vmem %s1092_s1, %s717_s21  ;;  %s1025_s29 = scalar_lea.vmem %s1094_s3, %s719_s26  ;;  %327 = vst.msk [vmem:[#allocation2] sm:$0xff] (!%p720_p12), %vm326_vm0, %v931_v8  ;;  %328 = vst.msk [vmem:[#allocation2 + $0x8] sm:$0xff] (!%p720_p12), %vm326_vm0, %v931_v8 }
  0x2c   : > { %325 = sbr.rel (%p720_p12) target bundleno = 51 (0x33), region = 77  ;;  %329 = vst.msk [vmem:[#allocation2 + $0x10] sm:$0xff] (!%p720_p12), %vm326_vm0, %v931_v8  ;;  %330 = vst.msk [vmem:[#allocation2 + $0x18] sm:$0xff] (!%p720_p12), %vm326_vm0, %v931_v8 }
  0x2d   : > { %331 = vst.msk [vmem:[#allocation2 + $0x20] sm:$0xff] (!%p720_p12), %vm326_vm0, %v931_v8  ;;  %332 = vst.msk [vmem:[#allocation2 + $0x28] sm:$0xff] (!%p720_p12), %vm326_vm0, %v931_v8 }
  0x2e   : > { %333 = vst.msk [vmem:[#allocation2 + $0x30] sm:$0xff] (!%p720_p12), %vm326_vm0, %v931_v8  ;;  %334 = vst.msk [vmem:[#allocation2 + $0x38] sm:$0xff] (!%p720_p12), %vm326_vm0, %v931_v8 }
  0x33 PF: > { %v863_v9 = vld [vmem:[%s1020_s24] sm:$0xff]   ;;  %v864_v10 = vld [vmem:[%s1020_s24 + $0x8] sm:$0xff]   ;;  %v865_v11 = vld [vmem:[%s1020_s24 + $0x10] sm:$0xff]   ;;  %vm512_vm1 = vcmask 523264   ;;  %p733_p13 = scmp.ne.s32.totalorder %s913_s14, 8 }
  0x34   : > { %765 = vmatprep.subr.bf16.mxu0 %v863_v9  ;;  %789 = vmatprep.subr.bf16.mxu1 %v863_v9  ;;  %v866_v12 = vld [vmem:[%s1020_s24 + $0x18] sm:$0xff]   ;;  %v871_v13 = vld [vmem:[%s1027_s12] sm:$0xff]   ;;  %v872_v14 = vld [vmem:[%s1027_s12 + $0x10] sm:$0xff]   ;;  %vm580_vm2 = vcmask (!%p733_p13), 519168  }
  0x35   : > { %766 = vmatpush3.bf16.msra.mxu0 %v863_v9  ;;  %797 = vmatpush3.bf16.msra.mxu1 %v863_v9  ;;  %v867_v15 = vld [vmem:[%s1020_s24 + $0x20] sm:$0xff]   ;;  %v868_v16 = vld [vmem:[%s1020_s24 + $0x28] sm:$0xff]   ;;  %v869_v17 = vld [vmem:[%s1020_s24 + $0x30] sm:$0xff]  }
  0x36   : > { %767 = vmatprep.subr.bf16.mxu0 %v864_v10  ;;  %790 = vmatprep.subr.bf16.mxu1 %v864_v10  ;;  %v870_v18 = vld [vmem:[%s1020_s24 + $0x38] sm:$0xff]   ;;  %v873_v19 = vld [vmem:[%s1027_s12 + $0x8] sm:$0xff]   ;;  %v337_v21 = vld [vmem:[#allocation2 + $0x10] sm:$0xff] }
  0x37   : > { %781 = vmatprep.mubr.bf16.mxu0 %v871_v13  ;;  %785 = vmatprep.mubr.bf16.mxu1 %v872_v14  ;;  %v874_v20 = vld [vmem:[%s1027_s12 + $0x18] sm:$0xff]   ;;  %v341_v22 = vld [vmem:[#allocation2 + $0x30] sm:$0xff]  ;;  %v335_v23 = vld [vmem:[#allocation2] sm:$0xff] }
  0x38   : > { %v339_v24 = vld [vmem:[#allocation2 + $0x20] sm:$0xff]  ;;  %v338_v27 = vld [vmem:[#allocation2 + $0x18] sm:$0xff]  ;;  %v336_v33 = vld [vmem:[#allocation2 + $0x8] sm:$0xff] }
  0x39   : > { %768 = vmatpush3.bf16.msra.mxu0 %v864_v10  ;;  %798 = vmatpush3.bf16.msra.mxu1 %v864_v10  ;;  %v342_v28 = vld [vmem:[#allocation2 + $0x38] sm:$0xff]  ;;  %v340_v34 = vld [vmem:[#allocation2 + $0x28] sm:$0xff]  ;;  %v734_v46 = vld [vmem:[%s1093_s2] ss:$0 sm:$0xff] (!%p733_p13) }
  0x3a   : > { %769 = vmatprep.subr.bf16.mxu0 %v865_v11  ;;  %791 = vmatprep.subr.bf16.mxu1 %v865_v11 }
  0x3d   : > { %770 = vmatpush3.bf16.msra.mxu0 %v865_v11  ;;  %799 = vmatpush3.bf16.msra.mxu1 %v865_v11 }
  0x3e   : > { %771 = vmatprep.subr.bf16.mxu0 %v866_v12  ;;  %792 = vmatprep.subr.bf16.mxu1 %v866_v12 }
  0x41   : > { %772 = vmatpush3.bf16.msra.mxu0 %v866_v12  ;;  %800 = vmatpush3.bf16.msra.mxu1 %v866_v12 }
  0x42   : > { %773 = vmatprep.subr.bf16.mxu0 %v867_v15  ;;  %793 = vmatprep.subr.bf16.mxu1 %v867_v15 }
  0x45   : > { %774 = vmatpush3.bf16.msra.mxu0 %v867_v15  ;;  %801 = vmatpush3.bf16.msra.mxu1 %v867_v15 }
  0x46   : > { %775 = vmatprep.subr.bf16.mxu0 %v868_v16  ;;  %794 = vmatprep.subr.bf16.mxu1 %v868_v16 }
  0x49   : > { %776 = vmatpush3.bf16.msra.mxu0 %v868_v16  ;;  %802 = vmatpush3.bf16.msra.mxu1 %v868_v16 }
  0x4a   : > { %777 = vmatprep.subr.bf16.mxu0 %v869_v17  ;;  %795 = vmatprep.subr.bf16.mxu1 %v869_v17 }
  0x4d   : > { %778 = vmatpush3.bf16.msra.mxu0 %v869_v17  ;;  %803 = vmatpush3.bf16.msra.mxu1 %v869_v17 }
  0x4e   : > { %779 = vmatprep.subr.bf16.mxu0 %v870_v18  ;;  %796 = vmatprep.subr.bf16.mxu1 %v870_v18 }
  0x51   : > { %780 = vmatpush3.bf16.msra.mxu0 %v870_v18  ;;  %804 = vmatpush3.bf16.msra.mxu1 %v870_v18 }
  0x54   : > { %782 = vmatmul.mubr.bf16.vlgmr.msra.gmra.mrb[0].mxu0 %v873_v19  ;;  %786 = vmatmul.mubr.bf16.vlgmr.msra.gmra.mrb[0].mxu1 %v874_v20 }
 0x127   : > { %v783_v25 = vpop.f32.mrb[0].mxu0  ;;  %v787_v26 = vpop.f32.mrb[0].mxu1  ;;  %524 = sbr.rel (%p733_p13) target bundleno = 315 (0x13b), region = 81 }
 0x128   : > { %v506_v29 = vadd.f32 %v783_v25, %v337_v21  ;;  %v510_v30 = vadd.f32 %v787_v26, %v341_v22  ;;  %v473_v31 = vpop.f32.mrb[1].mxu0  ;;  %v489_v32 = vpop.f32.mrb[1].mxu1 }
 0x129   : > { %v504_v35 = vadd.f32 %v473_v31, %v335_v23  ;;  %v508_v36 = vadd.f32 %v489_v32, %v339_v24  ;;  %v784_v37 = vpop.f32.mrb[2].mxu0  ;;  %v788_v38 = vpop.f32.mrb[2].mxu1 }
 0x12a   : > { %515 = vst.msk [vmem:[#allocation2 + $0x10] sm:$0xff] %vm512_vm1, %v506_v29  ;;  %519 = vst.msk [vmem:[#allocation2 + $0x30] sm:$0xff] %vm512_vm1, %v510_v30  ;;  %v507_v39 = vadd.f32 %v784_v37, %v338_v27  ;;  %v511_v40 = vadd.f32 %v788_v38, %v342_v28  ;;  %v476_v41 = vpop.f32.mrb[3].mxu0  ;;  %v492_v42 = vpop.f32.mrb[3].mxu1 }
 0x12b   : > { %513 = vst.msk [vmem:[#allocation2] sm:$0xff] %vm512_vm1, %v504_v35  ;;  %517 = vst.msk [vmem:[#allocation2 + $0x20] sm:$0xff] %vm512_vm1, %v508_v36  ;;  %v505_v43 = vadd.f32 %v476_v41, %v336_v33  ;;  %v509_v44 = vadd.f32 %v492_v42, %v340_v34 }
 0x12c   : > { %516 = vst.msk [vmem:[#allocation2 + $0x18] sm:$0xff] %vm512_vm1, %v507_v39  ;;  %520 = vst.msk [vmem:[#allocation2 + $0x38] sm:$0xff] %vm512_vm1, %v511_v40 }
 0x12d   : > { %514 = vst.msk [vmem:[#allocation2 + $0x8] sm:$0xff] %vm512_vm1, %v505_v43  ;;  %518 = vst.msk [vmem:[#allocation2 + $0x28] sm:$0xff] %vm512_vm1, %v509_v44 }
 0x131   : > { %v527_v50 = vld [vmem:[#allocation2 + $0x10] sm:$0xff] }
 0x132   : > { %v525_v45 = vld [vmem:[#allocation2] sm:$0xff]  ;;  %v542_v53 = vadd.f32 %v734_v46, %v527_v50  ;;  %v531_v57 = vld [vmem:[#allocation2 + $0x30] sm:$0xff] }
 0x133   : > { %v540_v48 = vadd.f32 %v734_v46, %v525_v45  ;;  %v528_v51 = vld [vmem:[#allocation2 + $0x18] sm:$0xff]  ;;  %v529_v52 = vld [vmem:[#allocation2 + $0x20] sm:$0xff]  ;;  %v546_v62 = vadd.f32 %v734_v46, %v531_v57 }
 0x134   : > { %v526_v47 = vld [vmem:[#allocation2 + $0x8] sm:$0xff]  ;;  %v543_v54 = vadd.f32 %v734_v46, %v528_v51  ;;  %v544_v55 = vadd.f32 %v734_v46, %v529_v52  ;;  %v532_v58 = vld [vmem:[#allocation2 + $0x38] sm:$0xff]  ;;  %v747_v63 = vpack.c.bf16 %v542_v53, %v542_v53 }
 0x135   : > { %v541_v49 = vadd.f32 %v734_v46, %v526_v47  ;;  %v530_v56 = vld [vmem:[#allocation2 + $0x28] sm:$0xff]  ;;  %v745_v59 = vpack.c.bf16 %v540_v48, %v540_v48  ;;  %v547_v2 = vadd.f32 %v734_v46, %v532_v58  ;;  %v751_v4 = vpack.c.bf16 %v546_v62, %v546_v62 }
 0x136   : > { %v545_v61 = vadd.f32 %v734_v46, %v530_v56  ;;  %v748_v0 = vpack.c.bf16 %v543_v54, %v543_v54  ;;  %v749_v1 = vpack.c.bf16 %v544_v55, %v544_v55  ;;  %583 = vst.msk [vmem:[%s1025_s29 + $0x8] sm:$0xf] %vm580_vm2, %v747_v63 }
 0x137   : > { %v746_v60 = vpack.c.bf16 %v541_v49, %v541_v49  ;;  %581 = vst.msk [vmem:[%s1025_s29] sm:$0xf] %vm580_vm2, %v745_v59  ;;  %v752_v5 = vpack.c.bf16 %v547_v2, %v547_v2  ;;  %587 = vst.msk [vmem:[%s1025_s29 + $0x18] sm:$0xf] %vm580_vm2, %v751_v4 }
 0x138   : > { %v750_v3 = vpack.c.bf16 %v545_v61, %v545_v61  ;;  %584 = vst.msk [vmem:[%s1025_s29 + $0xc] sm:$0xf] %vm580_vm2, %v748_v0  ;;  %585 = vst.msk [vmem:[%s1025_s29 + $0x10] sm:$0xf] %vm580_vm2, %v749_v1 }
 0x139   : > { %582 = vst.msk [vmem:[%s1025_s29 + $0x4] sm:$0xf] %vm580_vm2, %v746_v60  ;;  %588 = vst.msk [vmem:[%s1025_s29 + $0x1c] sm:$0xf] %vm580_vm2, %v752_v5 }
 0x13a   : > { %586 = vst.msk [vmem:[%s1025_s29 + $0x14] sm:$0xf] %vm580_vm2, %v750_v3 }
 0x13b PF: > { %s13_s18 = sadd.s32 1, %s929_s18   ;;  %s1095_s12 = smov %s909_s13 }
 0x13c   : > { %p10_p0 = scmp.ge.s32.totalorder %s13_s18, 20   ;;  %s1096_s13 = smov %s1003_s25 }
 0x13d   : > { %s1097_s14 = smov %s921_s16  ;;  %s1098_s15 = smov %s925_s17 }
 0x13e   : > { %s1099_s16 = smov %s1102_s19  ;;  %s1100_s17 = smov %s1106_s20 }
 0x13f   :  { %12 = sbr.rel (!%p10_p0) target bundleno = 4 (0x4), region = 122 }

// kernel: net_forward.45
= control target key start
LH: loop header
LB: loop body
LE: loop exit
PB: predicated region body
PF: predicated region fallthrough
CT: control target
= control target key end

     0   :  { %s1612_s12 = smov 0   ;;  %s1614_s13 = smov 0   ;;  %s1969_s0 = inlined_call_operand.vmem [shape: bf16[512,1152], index: 0, kind: input, shape index: {}]   ;;  %s1970_s1 = inlined_call_operand.vmem [shape: bf16[1152,64], index: 1, kind: input, shape index: {}]   ;;  %s1971_s2 = inlined_call_operand.vmem [shape: f32[1,64], index: 2, kind: input, shape index: {}]   ;;  %s1972_s3 = inlined_call_operand.vmem [shape: bf16[512,64], index: 3, kind: output, shape index: {}]  }
   0x1   :  { %s1616_s14 = smov 0   ;;  %s1618_s15 = smov 0  }
   0x2   :  { %s1620_s16 = smov 0   ;;  %s1622_s17 = smov 0  }
   0x3   :  { %s1624_s18 = smov 0  }
   0x4 LB: > { %s25_s19 = sadd.s32 1, %s1581_s16  ;;  %s32_s20 = sadd.s32 1, %s1585_s17  ;;  %s1589_s18 = sphi %s1624_s18, %s13_s18   ;;  %s1585_s17 = sphi %s1622_s17, %s1978_s17   ;;  %s1581_s16 = sphi %s1620_s16, %s1977_s16   ;;  %s1577_s15 = sphi %s1618_s15, %s1976_s15   ;;  %s1573_s14 = sphi %s1616_s14, %s1975_s14   ;;  %s1569_s13 = sphi %s1614_s13, %s1974_s13   ;;  %s1565_s12 = sphi %s1612_s12, %s1973_s12  }
   0x5   : > { %p26_p0 = scmp.ge.s32.totalorder %s25_s19, 9  ;;  %p48_p1 = scmp.ne.s32.totalorder %s1569_s13, %s1565_s12 }
   0x6   : > { %p49_p2 = scmp.eq.s32.totalorder %s1589_s18, 0  ;;  %s41_s24 = sadd.s32 1, %s1569_s13 }
   0x7   : > { %s1980_s19 = smov (%p26_p0, %s25_s19), 0  ;;  %s1982_s20 = smov (!%p26_p0, %s32_s20), %s1585_s17 }
   0x8   : > { %p50_p3 = por %p49_p2, %p48_p1  ;;  %p34_p4 = scmp.ge.s32.totalorder %s1982_s20, 2 }
   0x9   : > { %s37_s21 = ssub.s32 %s1581_s16, %s1980_s19  ;;  %p1261_p6 = scmp.ge.s32.totalorder %s1589_s18, 18 }
   0xa   : > { %s1984_s20 = smov (%p34_p4, %s1982_s20), 0 }
   0xb   : > { %s36_s22 = ssub.s32 %s1585_s17, %s1984_s20  ;;  %162 = sbr.rel (%p1261_p6) target bundleno = 46 (0x2e), region = 20 }
   0xc   : > { %s38_s23 = sor.u32 %s37_s21, %s36_s22 }
   0xd   : > { %p39_p5 = scmp.eq.s32.totalorder %s38_s23, 0 }
   0xf   : > { %s1663_s25 = scalar_select %p39_p5, %s1569_s13, %s41_s24  }
  0x12   : > { %165 = sbr.rel (!%p50_p3) target bundleno = 46 (0x2e), region = 24  ;;  %s167_s26 = sand.u32 (%p50_p3), 1, %s1569_s13  }
  0x13   : > { %s1453_s27 = smul.u32 (%p50_p3), 288, %s1585_s17  ;;  %s1262_s28 = sshll.u32 (%p50_p3), %s167_s26, 7 }
  0x14   : > { %s1677_s7 = scalar_lea.vmem (%p50_p3), [#allocation3], %s1262_s28 }
  0x15   : > { %s172_s29 = sadd.s32 (%p50_p3), %s1581_s16, %s1453_s27 }
  0x16   : > { %s1265_s30 = sshll.u32 (%p50_p3), %s172_s29, 2 }
  0x17   : > { %s1672_s6 = scalar_lea.vmem (%p50_p3), %s1969_s0, %s1265_s30 }
  0x18   : > { %v190_v0 = vld [vmem:[%s1672_s6] sm:$0xf] (%p50_p3)  ;;  %v192_v1 = vld [vmem:[%s1672_s6 + $0x24] sm:$0xf] (%p50_p3)  ;;  %v194_v2 = vld [vmem:[%s1672_s6 + $0x48] sm:$0xf] (%p50_p3) }
  0x19   : > { %191 = vst [vmem:[%s1677_s7] sm:$0xf] %v190_v0  ;;  %193 = vst [vmem:[%s1677_s7 + $0x4] sm:$0xf] %v192_v1  ;;  %v196_v3 = vld [vmem:[%s1672_s6 + $0x6c] sm:$0xf] }
  0x1a   : > { %195 = vst [vmem:[%s1677_s7 + $0x8] sm:$0xf] %v194_v2  ;;  %v198_v4 = vld [vmem:[%s1672_s6 + $0x90] sm:$0xf]  ;;  %v200_v5 = vld [vmem:[%s1672_s6 + $0xb4] sm:$0xf] }
  0x1b   : > { %197 = vst [vmem:[%s1677_s7 + $0xc] sm:$0xf] %v196_v3  ;;  %199 = vst [vmem:[%s1677_s7 + $0x10] sm:$0xf] %v198_v4  ;;  %v202_v6 = vld [vmem:[%s1672_s6 + $0xd8] sm:$0xf] }
  0x1c   : > { %201 = vst [vmem:[%s1677_s7 + $0x14] sm:$0xf] %v200_v5  ;;  %v204_v7 = vld [vmem:[%s1672_s6 + $0xfc] sm:$0xf]  ;;  %v206_v8 = vld [vmem:[%s1672_s6 + $0x120] sm:$0xf] }
  0x1d   : > { %203 = vst [vmem:[%s1677_s7 + $0x18] sm:$0xf] %v202_v6  ;;  %205 = vst [vmem:[%s1677_s7 + $0x1c] sm:$0xf] %v204_v7  ;;  %v208_v9 = vld [vmem:[%s1672_s6 + $0x144] sm:$0xf] }
  0x1e   : > { %207 = vst [vmem:[%s1677_s7 + $0x20] sm:$0xf] %v206_v8  ;;  %v210_v10 = vld [vmem:[%s1672_s6 + $0x168] sm:$0xf]  ;;  %v212_v11 = vld [vmem:[%s1672_s6 + $0x18c] sm:$0xf] }
  0x1f   : > { %209 = vst [vmem:[%s1677_s7 + $0x24] sm:$0xf] %v208_v9  ;;  %211 = vst [vmem:[%s1677_s7 + $0x28] sm:$0xf] %v210_v10  ;;  %v214_v12 = vld [vmem:[%s1672_s6 + $0x1b0] sm:$0xf] }
  0x20   : > { %213 = vst [vmem:[%s1677_s7 + $0x2c] sm:$0xf] %v212_v11  ;;  %v216_v13 = vld [vmem:[%s1672_s6 + $0x1d4] sm:$0xf]  ;;  %v218_v14 = vld [vmem:[%s1672_s6 + $0x1f8] sm:$0xf] }
  0x21   : > { %215 = vst [vmem:[%s1677_s7 + $0x30] sm:$0xf] %v214_v12  ;;  %217 = vst [vmem:[%s1677_s7 + $0x34] sm:$0xf] %v216_v13  ;;  %v220_v15 = vld [vmem:[%s1672_s6 + $0x21c] sm:$0xf] }
  0x22   : > { %219 = vst [vmem:[%s1677_s7 + $0x38] sm:$0xf] %v218_v14  ;;  %v222_v16 = vld [vmem:[%s1672_s6 + $0x240] sm:$0xf]  ;;  %v224_v17 = vld [vmem:[%s1672_s6 + $0x264] sm:$0xf] }
  0x23   : > { %221 = vst [vmem:[%s1677_s7 + $0x3c] sm:$0xf] %v220_v15  ;;  %223 = vst [vmem:[%s1677_s7 + $0x40] sm:$0xf] %v222_v16  ;;  %v226_v18 = vld [vmem:[%s1672_s6 + $0x288] sm:$0xf] }
  0x24   : > { %225 = vst [vmem:[%s1677_s7 + $0x44] sm:$0xf] %v224_v17  ;;  %v228_v19 = vld [vmem:[%s1672_s6 + $0x2ac] sm:$0xf]  ;;  %v230_v20 = vld [vmem:[%s1672_s6 + $0x2d0] sm:$0xf] }
  0x25   : > { %227 = vst [vmem:[%s1677_s7 + $0x48] sm:$0xf] %v226_v18  ;;  %229 = vst [vmem:[%s1677_s7 + $0x4c] sm:$0xf] %v228_v19  ;;  %v232_v21 = vld [vmem:[%s1672_s6 + $0x2f4] sm:$0xf] }
  0x26   : > { %231 = vst [vmem:[%s1677_s7 + $0x50] sm:$0xf] %v230_v20  ;;  %v234_v22 = vld [vmem:[%s1672_s6 + $0x318] sm:$0xf]  ;;  %v236_v23 = vld [vmem:[%s1672_s6 + $0x33c] sm:$0xf] }
  0x27   : > { %233 = vst [vmem:[%s1677_s7 + $0x54] sm:$0xf] %v232_v21  ;;  %235 = vst [vmem:[%s1677_s7 + $0x58] sm:$0xf] %v234_v22  ;;  %v238_v24 = vld [vmem:[%s1672_s6 + $0x360] sm:$0xf] }
  0x28   : > { %237 = vst [vmem:[%s1677_s7 + $0x5c] sm:$0xf] %v236_v23  ;;  %v240_v25 = vld [vmem:[%s1672_s6 + $0x384] sm:$0xf]  ;;  %v242_v26 = vld [vmem:[%s1672_s6 + $0x3a8] sm:$0xf] }
  0x29   : > { %239 = vst [vmem:[%s1677_s7 + $0x60] sm:$0xf] %v238_v24  ;;  %241 = vst [vmem:[%s1677_s7 + $0x64] sm:$0xf] %v240_v25  ;;  %v244_v27 = vld [vmem:[%s1672_s6 + $0x3cc] sm:$0xf] }
  0x2a   : > { %243 = vst [vmem:[%s1677_s7 + $0x68] sm:$0xf] %v242_v26  ;;  %v246_v28 = vld [vmem:[%s1672_s6 + $0x3f0] sm:$0xf]  ;;  %v248_v29 = vld [vmem:[%s1672_s6 + $0x414] sm:$0xf] }
  0x2b   : > { %245 = vst [vmem:[%s1677_s7 + $0x6c] sm:$0xf] %v244_v27  ;;  %247 = vst [vmem:[%s1677_s7 + $0x70] sm:$0xf] %v246_v28  ;;  %v250_v30 = vld [vmem:[%s1672_s6 + $0x438] sm:$0xf] }
  0x2c   : > { %249 = vst [vmem:[%s1677_s7 + $0x74] sm:$0xf] %v248_v29  ;;  %v252_v31 = vld [vmem:[%s1672_s6 + $0x45c] sm:$0xf]  ;;  %251 = vst [vmem:[%s1677_s7 + $0x78] sm:$0xf] %v250_v30 }
  0x2d   : > { %253 = vst [vmem:[%s1677_s7 + $0x7c] sm:$0xf] %v252_v31 }
  0x2e PF: > { %p1266_p7 = scmp.ge.s32.totalorder %s1589_s18, 1  ;;  %p351_p8 = scmp.lt.s32.totalorder %s1589_s18, 19 }
  0x30   : > { %p352_p9 = pnand %p1266_p7, %p351_p8 }
  0x31   : > { %s358_s8 = sand.u32 (!%p352_p9), 1, %s1565_s12   ;;  %s1268_s9 = sshll.u32 (!%p352_p9), %s1573_s14, 4 }
  0x32   : > { %355 = sbr.rel (%p352_p9) target bundleno = 365 (0x16d), region = 69  ;;  %s1267_s10 = sshll.u32 (!%p352_p9), %s358_s8, 7 }
  0x33   : > { %p397_p10 = scmp.lt.s32.totalorder (!%p352_p9), %s1268_s9, 143  ;;  %s1270_s11 = sshll.u32 (!%p352_p9), %s1577_s15, 5 }
  0x34   : > { %p409_p11 = scmp.lt.s32.totalorder (!%p352_p9), %s1270_s11, 63  ;;  %s1755_s12 = scalar_lea.vmem (!%p352_p9), [#allocation3], %s1267_s10 }
  0x35   : > { %p1272_p12 = scmp.ne.s32.totalorder (!%p352_p9), %s1573_s14, 0 }
  0x39   : > { %s1986_s9 = smov (!%p397_p10, %s1268_s9), 143  ;;  %s1988_s11 = smov (!%p409_p11, %s1270_s11), 63 }
  0x3a   : > { %s1269_s21 = sshll.u32 %s1986_s9, 2  ;;  %s1271_s26 = sshll.u32 %s1988_s11, 2  ;;  %vm422_vm0 = vcmask (!%p1272_p12), 523264   ;;  %v1591_v32 = vmov (!%p1272_p12), 0.0  }
  0x3b   : > { %s1748_s24 = scalar_lea.vmem %s1970_s1, %s1269_s21  ;;  %s1753_s29 = scalar_lea.vmem %s1972_s3, %s1271_s26  ;;  %423 = vst.msk [vmem:[#allocation2] sm:$0xff] (!%p1272_p12), %vm422_vm0, %v1591_v32  ;;  %424 = vst.msk [vmem:[#allocation2 + $0x8] sm:$0xff] (!%p1272_p12), %vm422_vm0, %v1591_v32 }
  0x3c   : > { %421 = sbr.rel (%p1272_p12) target bundleno = 75 (0x4b), region = 77  ;;  %425 = vst.msk [vmem:[#allocation2 + $0x10] sm:$0xff] (!%p1272_p12), %vm422_vm0, %v1591_v32  ;;  %426 = vst.msk [vmem:[#allocation2 + $0x18] sm:$0xff] (!%p1272_p12), %vm422_vm0, %v1591_v32 }
  0x3d   : > { %427 = vst.msk [vmem:[#allocation2 + $0x20] sm:$0xff] (!%p1272_p12), %vm422_vm0, %v1591_v32  ;;  %428 = vst.msk [vmem:[#allocation2 + $0x28] sm:$0xff] (!%p1272_p12), %vm422_vm0, %v1591_v32 }
  0x3e   : > { %429 = vst.msk [vmem:[#allocation2 + $0x30] sm:$0xff] (!%p1272_p12), %vm422_vm0, %v1591_v32  ;;  %430 = vst.msk [vmem:[#allocation2 + $0x38] sm:$0xff] (!%p1272_p12), %vm422_vm0, %v1591_v32 }
  0x3f   : > { %431 = vst.msk [vmem:[#allocation2 + $0x40] sm:$0xff] (!%p1272_p12), %vm422_vm0, %v1591_v32  ;;  %432 = vst.msk [vmem:[#allocation2 + $0x48] sm:$0xff] (!%p1272_p12), %vm422_vm0, %v1591_v32 }
  0x40   : > { %433 = vst.msk [vmem:[#allocation2 + $0x50] sm:$0xff] (!%p1272_p12), %vm422_vm0, %v1591_v32  ;;  %434 = vst.msk [vmem:[#allocation2 + $0x58] sm:$0xff] (!%p1272_p12), %vm422_vm0, %v1591_v32 }
  0x41   : > { %435 = vst.msk [vmem:[#allocation2 + $0x60] sm:$0xff] (!%p1272_p12), %vm422_vm0, %v1591_v32  ;;  %436 = vst.msk [vmem:[#allocation2 + $0x68] sm:$0xff] (!%p1272_p12), %vm422_vm0, %v1591_v32 }
  0x42   : > { %437 = vst.msk [vmem:[#allocation2 + $0x70] sm:$0xff] (!%p1272_p12), %vm422_vm0, %v1591_v32  ;;  %438 = vst.msk [vmem:[#allocation2 + $0x78] sm:$0xff] (!%p1272_p12), %vm422_vm0, %v1591_v32 }
  0x43   : > { %439 = vst.msk [vmem:[#allocation2 + $0x80] sm:$0xff] %vm422_vm0, %v1591_v32  ;;  %440 = vst.msk [vmem:[#allocation2 + $0x88] sm:$0xff] %vm422_vm0, %v1591_v32 }
  0x44   : > { %441 = vst.msk [vmem:[#allocation2 + $0x90] sm:$0xff] %vm422_vm0, %v1591_v32  ;;  %442 = vst.msk [vmem:[#allocation2 + $0x98] sm:$0xff] %vm422_vm0, %v1591_v32 }
  0x45   : > { %443 = vst.msk [vmem:[#allocation2 + $0xa0] sm:$0xff] %vm422_vm0, %v1591_v32  ;;  %444 = vst.msk [vmem:[#allocation2 + $0xa8] sm:$0xff] %vm422_vm0, %v1591_v32 }
  0x46   : > { %445 = vst.msk [vmem:[#allocation2 + $0xb0] sm:$0xff] %vm422_vm0, %v1591_v32  ;;  %446 = vst.msk [vmem:[#allocation2 + $0xb8] sm:$0xff] %vm422_vm0, %v1591_v32 }
  0x47   : > { %447 = vst.msk [vmem:[#allocation2 + $0xc0] sm:$0xff] %vm422_vm0, %v1591_v32  ;;  %448 = vst.msk [vmem:[#allocation2 + $0xc8] sm:$0xff] %vm422_vm0, %v1591_v32 }
  0x48   : > { %449 = vst.msk [vmem:[#allocation2 + $0xd0] sm:$0xff] %vm422_vm0, %v1591_v32  ;;  %450 = vst.msk [vmem:[#allocation2 + $0xd8] sm:$0xff] %vm422_vm0, %v1591_v32 }
  0x49   : > { %451 = vst.msk [vmem:[#allocation2 + $0xe0] sm:$0xff] %vm422_vm0, %v1591_v32  ;;  %452 = vst.msk [vmem:[#allocation2 + $0xe8] sm:$0xff] %vm422_vm0, %v1591_v32 }
  0x4a   : > { %453 = vst.msk [vmem:[#allocation2 + $0xf0] sm:$0xff] %vm422_vm0, %v1591_v32  ;;  %454 = vst.msk [vmem:[#allocation2 + $0xf8] sm:$0xff] %vm422_vm0, %v1591_v32 }
  0x4b PF: > { %v1511_v33 = vld [vmem:[%s1748_s24] sm:$0xff]   ;;  %v1512_v34 = vld [vmem:[%s1748_s24 + $0x8] sm:$0xff]   ;;  %v1513_v35 = vld [vmem:[%s1748_s24 + $0x10] sm:$0xff]   ;;  %vm872_vm1 = vcmask 523264   ;;  %p1297_p13 = scmp.ne.s32.totalorder %s1573_s14, 8 }
  0x4c   : > { %1389 = vmatprep.subr.bf16.mxu0 %v1511_v33  ;;  %1437 = vmatprep.subr.bf16.mxu1 %v1511_v33  ;;  %v1514_v36 = vld [vmem:[%s1748_s24 + $0x18] sm:$0xff]   ;;  %v1519_v37 = vld [vmem:[%s1755_s12] sm:$0xff]   ;;  %v1516_v40 = vld [vmem:[%s1748_s24 + $0x28] sm:$0xff]   ;;  %vm1108_vm2 = vcmask (!%p1297_p13), 519168  }
  0x4d   : > { %1390 = vmatpush3.bf16.msra.mxu0 %v1511_v33  ;;  %1445 = vmatpush3.bf16.msra.mxu1 %v1511_v33  ;;  %v1520_v38 = vld [vmem:[%s1755_s12 + $0x40] sm:$0xff]   ;;  %v1517_v41 = vld [vmem:[%s1748_s24 + $0x30] sm:$0xff]   ;;  %v1518_v42 = vld [vmem:[%s1748_s24 + $0x38] sm:$0xff]  }
  0x4e   : > { %1391 = vmatprep.subr.bf16.mxu0 %v1512_v34  ;;  %1438 = vmatprep.subr.bf16.mxu1 %v1512_v34  ;;  %v1515_v39 = vld [vmem:[%s1748_s24 + $0x20] sm:$0xff]   ;;  %v1521_v43 = vld [vmem:[%s1755_s12 + $0x8] sm:$0xff]   ;;  %v1523_v45 = vld [vmem:[%s1755_s12 + $0x10] sm:$0xff]  }
  0x4f   : > { %1405 = vmatprep.mubr.bf16.mxu0 %v1519_v37  ;;  %1421 = vmatprep.mubr.bf16.mxu1 %v1520_v38  ;;  %v1522_v44 = vld [vmem:[%s1755_s12 + $0x48] sm:$0xff]   ;;  %v1524_v46 = vld [vmem:[%s1755_s12 + $0x50] sm:$0xff]   ;;  %v1525_v47 = vld [vmem:[%s1755_s12 + $0x18] sm:$0xff]  }
  0x50   : > { %v1526_v48 = vld [vmem:[%s1755_s12 + $0x58] sm:$0xff]   ;;  %v1527_v49 = vld [vmem:[%s1755_s12 + $0x20] sm:$0xff]   ;;  %v1529_v51 = vld [vmem:[%s1755_s12 + $0x28] sm:$0xff]  }
  0x51   : > { %1392 = vmatpush3.bf16.msra.mxu0 %v1512_v34  ;;  %1446 = vmatpush3.bf16.msra.mxu1 %v1512_v34  ;;  %v1528_v50 = vld [vmem:[%s1755_s12 + $0x60] sm:$0xff]   ;;  %v1530_v52 = vld [vmem:[%s1755_s12 + $0x68] sm:$0xff]   ;;  %v1531_v53 = vld [vmem:[%s1755_s12 + $0x30] sm:$0xff]  }
  0x52   : > { %1393 = vmatprep.subr.bf16.mxu0 %v1513_v35  ;;  %1439 = vmatprep.subr.bf16.mxu1 %v1513_v35  ;;  %v1532_v54 = vld [vmem:[%s1755_s12 + $0x70] sm:$0xff]   ;;  %v1533_v55 = vld [vmem:[%s1755_s12 + $0x38] sm:$0xff]   ;;  %v455_v59 = vld [vmem:[#allocation2] sm:$0xff] }
  0x53   : > { %v1534_v56 = vld [vmem:[%s1755_s12 + $0x78] sm:$0xff]   ;;  %v457_v57 = vld [vmem:[#allocation2 + $0x10] sm:$0xff]  ;;  %v471_v60 = vld [vmem:[#allocation2 + $0x80] sm:$0xff] }
  0x54   : > { %v473_v58 = vld [vmem:[#allocation2 + $0x90] sm:$0xff]  ;;  %v458_v63 = vld [vmem:[#allocation2 + $0x18] sm:$0xff]  ;;  %v456_v5 = vld [vmem:[#allocation2 + $0x8] sm:$0xff] }
  0x55   : > { %1394 = vmatpush3.bf16.msra.mxu0 %v1513_v35  ;;  %1447 = vmatpush3.bf16.msra.mxu1 %v1513_v35  ;;  %v474_v0 = vld [vmem:[#allocation2 + $0x98] sm:$0xff]  ;;  %v472_v6 = vld [vmem:[#allocation2 + $0x88] sm:$0xff]  ;;  %v461_v17 = vld [vmem:[#allocation2 + $0x30] sm:$0xff] }
  0x56   : > { %1395 = vmatprep.subr.bf16.mxu0 %v1514_v36  ;;  %1440 = vmatprep.subr.bf16.mxu1 %v1514_v36  ;;  %v477_v18 = vld [vmem:[#allocation2 + $0xb0] sm:$0xff]  ;;  %v459_v19 = vld [vmem:[#allocation2 + $0x20] sm:$0xff]  ;;  %v462_v23 = vld [vmem:[#allocation2 + $0x38] sm:$0xff] }
  0x57   : > { %v475_v20 = vld [vmem:[#allocation2 + $0xa0] sm:$0xff]  ;;  %v478_v24 = vld [vmem:[#allocation2 + $0xb8] sm:$0xff]  ;;  %v460_v29 = vld [vmem:[#allocation2 + $0x28] sm:$0xff] }
  0x58   : > { %v476_v30 = vld [vmem:[#allocation2 + $0xa8] sm:$0xff] }
  0x59   : > { %1396 = vmatpush3.bf16.msra.mxu0 %v1514_v36  ;;  %1448 = vmatpush3.bf16.msra.mxu1 %v1514_v36 }
  0x5a   : > { %1397 = vmatprep.subr.bf16.mxu0 %v1515_v39  ;;  %1441 = vmatprep.subr.bf16.mxu1 %v1515_v39 }
  0x5d   : > { %1398 = vmatpush3.bf16.msra.mxu0 %v1515_v39  ;;  %1449 = vmatpush3.bf16.msra.mxu1 %v1515_v39 }
  0x5e   : > { %1399 = vmatprep.subr.bf16.mxu0 %v1516_v40  ;;  %1442 = vmatprep.subr.bf16.mxu1 %v1516_v40 }
  0x61   : > { %1400 = vmatpush3.bf16.msra.mxu0 %v1516_v40  ;;  %1450 = vmatpush3.bf16.msra.mxu1 %v1516_v40 }
  0x62   : > { %1401 = vmatprep.subr.bf16.mxu0 %v1517_v41  ;;  %1443 = vmatprep.subr.bf16.mxu1 %v1517_v41 }
  0x65   : > { %1402 = vmatpush3.bf16.msra.mxu0 %v1517_v41  ;;  %1451 = vmatpush3.bf16.msra.mxu1 %v1517_v41  ;;  %v465_v41 = vld [vmem:[#allocation2 + $0x50] sm:$0xff] }
  0x66   : > { %1403 = vmatprep.subr.bf16.mxu0 %v1518_v42  ;;  %1444 = vmatprep.subr.bf16.mxu1 %v1518_v42 }
  0x69   : > { %1404 = vmatpush3.bf16.msra.mxu0 %v1518_v42  ;;  %1452 = vmatpush3.bf16.msra.mxu1 %v1518_v42  ;;  %v481_v42 = vld [vmem:[#allocation2 + $0xd0] sm:$0xff] }
  0x6c   : > { %1406 = vmatmul.mubr.bf16.vlgmr.msra.gmra.mrb[0].mxu0 %v1521_v43  ;;  %1422 = vmatmul.mubr.bf16.vlgmr.msra.gmra.mrb[0].mxu1 %v1522_v44  ;;  %v463_v43 = vld [vmem:[#allocation2 + $0x40] sm:$0xff] }
  0x6d   : > { %1409 = vmatprep.mubr.bf16.mxu0 %v1523_v45  ;;  %1425 = vmatprep.mubr.bf16.mxu1 %v1524_v46  ;;  %v479_v44 = vld [vmem:[#allocation2 + $0xc0] sm:$0xff] }
  0x74   : > { %1410 = vmatmul.mubr.bf16.gmra.mrb[4].mxu0 %v1525_v47  ;;  %1426 = vmatmul.mubr.bf16.gmra.mrb[4].mxu1 %v1526_v48  ;;  %v466_v47 = vld [vmem:[#allocation2 + $0x58] sm:$0xff] }
  0x75   : > { %1413 = vmatprep.mubr.bf16.mxu0 %v1527_v49  ;;  %1429 = vmatprep.mubr.bf16.mxu1 %v1528_v50  ;;  %v482_v48 = vld [vmem:[#allocation2 + $0xd8] sm:$0xff] }
  0x7c   : > { %1414 = vmatmul.mubr.bf16.gmra.mrb[8].mxu0 %v1529_v51  ;;  %1430 = vmatmul.mubr.bf16.gmra.mrb[8].mxu1 %v1530_v52 }
  0x7d   : > { %1417 = vmatprep.mubr.bf16.mxu0 %v1531_v53  ;;  %1433 = vmatprep.mubr.bf16.mxu1 %v1532_v54  ;;  %v464_v53 = vld [vmem:[#allocation2 + $0x48] sm:$0xff] }
  0x7e   : > { %v480_v54 = vld [vmem:[#allocation2 + $0xc8] sm:$0xff] }
  0x84   : > { %1418 = vmatmul.mubr.bf16.gmra.mrb[12].mxu0 %v1533_v55  ;;  %1434 = vmatmul.mubr.bf16.gmra.mrb[12].mxu1 %v1534_v56 }
 0x13f   : > { %v1407_v61 = vpop.f32.mrb[0].mxu0  ;;  %v1423_v62 = vpop.f32.mrb[0].mxu1 }
 0x140   : > { %v842_v1 = vadd.f32 %v1407_v61, %v457_v57  ;;  %v858_v2 = vadd.f32 %v1423_v62, %v473_v58  ;;  %v713_v3 = vpop.f32.mrb[1].mxu0  ;;  %v777_v4 = vpop.f32.mrb[1].mxu1 }
 0x141   : > { %v840_v7 = vadd.f32 %v713_v3, %v455_v59  ;;  %v856_v8 = vadd.f32 %v777_v4, %v471_v60  ;;  %v1408_v9 = vpop.f32.mrb[2].mxu0  ;;  %v1424_v10 = vpop.f32.mrb[2].mxu1  ;;  %v467_v3 = vld [vmem:[#allocation2 + $0x60] sm:$0xff] }
 0x142   : > { %875 = vst.msk [vmem:[#allocation2 + $0x10] sm:$0xff] %vm872_vm1, %v842_v1  ;;  %891 = vst.msk [vmem:[#allocation2 + $0x90] sm:$0xff] %vm872_vm1, %v858_v2  ;;  %v843_v11 = vadd.f32 %v1408_v9, %v458_v63  ;;  %v859_v12 = vadd.f32 %v1424_v10, %v474_v0  ;;  %v716_v13 = vpop.f32.mrb[3].mxu0  ;;  %v780_v14 = vpop.f32.mrb[3].mxu1  ;;  %v469_v1 = vld [vmem:[#allocation2 + $0x70] sm:$0xff]  ;;  %v483_v4 = vld [vmem:[#allocation2 + $0xe0] sm:$0xff] }
 0x143   : > { %873 = vst.msk [vmem:[#allocation2] sm:$0xff] %vm872_vm1, %v840_v7  ;;  %889 = vst.msk [vmem:[#allocation2 + $0x80] sm:$0xff] %vm872_vm1, %v856_v8  ;;  %v841_v15 = vadd.f32 %v716_v13, %v456_v5  ;;  %v857_v16 = vadd.f32 %v780_v14, %v472_v6  ;;  %v485_v2 = vld [vmem:[#allocation2 + $0xf0] sm:$0xff]  ;;  %v470_v7 = vld [vmem:[#allocation2 + $0x78] sm:$0xff] }
 0x144   : > { %876 = vst.msk [vmem:[#allocation2 + $0x18] sm:$0xff] %vm872_vm1, %v843_v11  ;;  %892 = vst.msk [vmem:[#allocation2 + $0x98] sm:$0xff] %vm872_vm1, %v859_v12  ;;  %v486_v8 = vld [vmem:[#allocation2 + $0xf8] sm:$0xff]  ;;  %v468_v13 = vld [vmem:[#allocation2 + $0x68] sm:$0xff] }
 0x145   : > { %874 = vst.msk [vmem:[#allocation2 + $0x8] sm:$0xff] %vm872_vm1, %v841_v15  ;;  %890 = vst.msk [vmem:[#allocation2 + $0x88] sm:$0xff] %vm872_vm1, %v857_v16  ;;  %v484_v14 = vld [vmem:[#allocation2 + $0xe8] sm:$0xff] }
 0x147   : > { %v1411_v21 = vpop.f32.mrb[4].mxu0  ;;  %v1427_v22 = vpop.f32.mrb[4].mxu1 }
 0x148   : > { %v846_v25 = vadd.f32 %v1411_v21, %v461_v17  ;;  %v862_v26 = vadd.f32 %v1427_v22, %v477_v18  ;;  %v729_v27 = vpop.f32.mrb[5].mxu0  ;;  %v793_v28 = vpop.f32.mrb[5].mxu1 }
 0x149   : > { %v844_v31 = vadd.f32 %v729_v27, %v459_v19  ;;  %v860_v32 = vadd.f32 %v793_v28, %v475_v20  ;;  %v1412_v33 = vpop.f32.mrb[6].mxu0  ;;  %v1428_v34 = vpop.f32.mrb[6].mxu1 }
 0x14a   : > { %879 = vst.msk [vmem:[#allocation2 + $0x30] sm:$0xff] %vm872_vm1, %v846_v25  ;;  %895 = vst.msk [vmem:[#allocation2 + $0xb0] sm:$0xff] %vm872_vm1, %v862_v26  ;;  %v847_v35 = vadd.f32 %v1412_v33, %v462_v23  ;;  %v863_v36 = vadd.f32 %v1428_v34, %v478_v24  ;;  %v732_v37 = vpop.f32.mrb[7].mxu0  ;;  %v796_v38 = vpop.f32.mrb[7].mxu1  ;;  %v909_v25 = vld [vmem:[#allocation2] sm:$0xff] (!%p1297_p13) }
 0x14b   : > { %877 = vst.msk [vmem:[#allocation2 + $0x20] sm:$0xff] %vm872_vm1, %v844_v31  ;;  %893 = vst.msk [vmem:[#allocation2 + $0xa0] sm:$0xff] %vm872_vm1, %v860_v32  ;;  %v845_v39 = vadd.f32 %v732_v37, %v460_v29  ;;  %v861_v40 = vadd.f32 %v796_v38, %v476_v30  ;;  %v1850_v26 = vld [vmem:[%s1971_s2] ss:$0 sm:$0xff] (!%p1297_p13)  ;;  %v911_v30 = vld [vmem:[#allocation2 + $0x10] sm:$0xff] (!%p1297_p13) }
 0x14c   : > { %880 = vst.msk [vmem:[#allocation2 + $0x38] sm:$0xff] %vm872_vm1, %v847_v35  ;;  %896 = vst.msk [vmem:[#allocation2 + $0xb8] sm:$0xff] %vm872_vm1, %v863_v36  ;;  %v910_v27 = vld [vmem:[#allocation2 + $0x8] sm:$0xff] (!%p1297_p13)  ;;  %v948_v28 = vadd.f32 (!%p1297_p13), %v1850_v26, %v909_v25  ;;  %v912_v31 = vld [vmem:[#allocation2 + $0x18] sm:$0xff] (!%p1297_p13)  ;;  %v950_v33 = vadd.f32 (!%p1297_p13), %v1850_v26, %v911_v30 }
 0x14d   : > { %878 = vst.msk [vmem:[#allocation2 + $0x28] sm:$0xff] %vm872_vm1, %v845_v39  ;;  %894 = vst.msk [vmem:[#allocation2 + $0xa8] sm:$0xff] %vm872_vm1, %v861_v40  ;;  %v949_v29 = vadd.f32 (!%p1297_p13), %v1850_v26, %v910_v27  ;;  %v951_v34 = vadd.f32 (!%p1297_p13), %v1850_v26, %v912_v31 }
 0x14e   : > { %v1333_v39 = vpack.c.bf16 (!%p1297_p13), %v948_v28, %v948_v28 }
 0x14f   : > { %v1415_v45 = vpop.f32.mrb[8].mxu0  ;;  %v1431_v46 = vpop.f32.mrb[8].mxu1  ;;  %v1334_v40 = vpack.c.bf16 (!%p1297_p13), %v949_v29, %v949_v29 }
 0x150   : > { %v850_v49 = vadd.f32 %v1415_v45, %v465_v41  ;;  %v866_v50 = vadd.f32 %v1431_v46, %v481_v42  ;;  %v745_v51 = vpop.f32.mrb[9].mxu0  ;;  %v809_v52 = vpop.f32.mrb[9].mxu1  ;;  %v1335_v46 = vpack.c.bf16 (!%p1297_p13), %v950_v33, %v950_v33  ;;  %1109 = vst.msk [vmem:[%s1753_s29] sm:$0xf] (!%p1297_p13), %vm1108_vm2, %v1333_v39 }
 0x151   : > { %v848_v55 = vadd.f32 %v745_v51, %v463_v43  ;;  %v864_v56 = vadd.f32 %v809_v52, %v479_v44  ;;  %v1416_v57 = vpop.f32.mrb[10].mxu0  ;;  %v1432_v58 = vpop.f32.mrb[10].mxu1  ;;  %v915_v37 = vld [vmem:[#allocation2 + $0x30] sm:$0xff] (!%p1297_p13)  ;;  %1110 = vst.msk [vmem:[%s1753_s29 + $0x4] sm:$0xf] (!%p1297_p13), %vm1108_vm2, %v1334_v40 }
 0x152   : > { %883 = vst.msk [vmem:[#allocation2 + $0x50] sm:$0xff] %vm872_vm1, %v850_v49  ;;  %899 = vst.msk [vmem:[#allocation2 + $0xd0] sm:$0xff] %vm872_vm1, %v866_v50  ;;  %v851_v59 = vadd.f32 %v1416_v57, %v466_v47  ;;  %v867_v60 = vadd.f32 %v1432_v58, %v482_v48  ;;  %v748_v61 = vpop.f32.mrb[11].mxu0  ;;  %v812_v62 = vpop.f32.mrb[11].mxu1  ;;  %v913_v32 = vld [vmem:[#allocation2 + $0x20] sm:$0xff] (!%p1297_p13)  ;;  %v954_v42 = vadd.f32 (!%p1297_p13), %v1850_v26, %v915_v37 }
 0x153   : > { %881 = vst.msk [vmem:[#allocation2 + $0x40] sm:$0xff] %vm872_vm1, %v848_v55  ;;  %897 = vst.msk [vmem:[#allocation2 + $0xc0] sm:$0xff] %vm872_vm1, %v864_v56  ;;  %v849_v63 = vadd.f32 %v748_v61, %v464_v53  ;;  %v865_v0 = vadd.f32 %v812_v62, %v480_v54  ;;  %v952_v35 = vadd.f32 (!%p1297_p13), %v1850_v26, %v913_v32  ;;  %v916_v38 = vld [vmem:[#allocation2 + $0x38] sm:$0xff] (!%p1297_p13) }
 0x154   : > { %884 = vst.msk [vmem:[#allocation2 + $0x58] sm:$0xff] %vm872_vm1, %v851_v59  ;;  %900 = vst.msk [vmem:[#allocation2 + $0xd8] sm:$0xff] %vm872_vm1, %v867_v60  ;;  %v914_v36 = vld [vmem:[#allocation2 + $0x28] sm:$0xff] (!%p1297_p13)  ;;  %v1336_v47 = vpack.c.bf16 (!%p1297_p13), %v951_v34, %v951_v34  ;;  %v955_v49 = vadd.f32 (!%p1297_p13), %v1850_v26, %v916_v38  ;;  %v1339_v54 = vpack.c.bf16 (!%p1297_p13), %v954_v42, %v954_v42 }
 0x155   : > { %882 = vst.msk [vmem:[#allocation2 + $0x48] sm:$0xff] %vm872_vm1, %v849_v63  ;;  %898 = vst.msk [vmem:[#allocation2 + $0xc8] sm:$0xff] %vm872_vm1, %v865_v0  ;;  %v953_v41 = vadd.f32 (!%p1297_p13), %v1850_v26, %v914_v36  ;;  %v1337_v48 = vpack.c.bf16 (!%p1297_p13), %v952_v35, %v952_v35  ;;  %v925_v63 = vld [vmem:[#allocation2 + $0x80] sm:$0xff] (!%p1297_p13)  ;;  %v926_v0 = vld [vmem:[#allocation2 + $0x88] sm:$0xff] (!%p1297_p13) }
 0x156   : > { %1111 = vst.msk [vmem:[%s1753_s29 + $0x8] sm:$0xf] (!%p1297_p13), %vm1108_vm2, %v1335_v46  ;;  %1112 = vst.msk [vmem:[%s1753_s29 + $0xc] sm:$0xf] (!%p1297_p13), %vm1108_vm2, %v1336_v47  ;;  %v1340_v59 = vpack.c.bf16 (!%p1297_p13), %v955_v49, %v955_v49 }
 0x157   : > { %v1419_v5 = vpop.f32.mrb[12].mxu0  ;;  %v1435_v6 = vpop.f32.mrb[12].mxu1  ;;  %908 = sbr.rel (%p1297_p13) target bundleno = 365 (0x16d), region = 81  ;;  %v1338_v53 = vpack.c.bf16 (!%p1297_p13), %v953_v41, %v953_v41  ;;  %1113 = vst.msk [vmem:[%s1753_s29 + $0x10] sm:$0xf] (!%p1297_p13), %vm1108_vm2, %v1337_v48 }
 0x158   : > { %v854_v9 = vadd.f32 %v1419_v5, %v469_v1  ;;  %v870_v10 = vadd.f32 %v1435_v6, %v485_v2  ;;  %v761_v11 = vpop.f32.mrb[13].mxu0  ;;  %v825_v12 = vpop.f32.mrb[13].mxu1  ;;  %1115 = vst.msk [vmem:[%s1753_s29 + $0x18] sm:$0xf] (!%p1297_p13), %vm1108_vm2, %v1339_v54  ;;  %v927_v5 = vld [vmem:[#allocation2 + $0x90] sm:$0xff] (!%p1297_p13)  ;;  %v928_v6 = vld [vmem:[#allocation2 + $0x98] sm:$0xff] (!%p1297_p13) }
 0x159   : > { %v852_v15 = vadd.f32 %v761_v11, %v467_v3  ;;  %v868_v16 = vadd.f32 %v825_v12, %v483_v4  ;;  %v1420_v17 = vpop.f32.mrb[14].mxu0  ;;  %v1436_v18 = vpop.f32.mrb[14].mxu1  ;;  %v919_v45 = vld [vmem:[#allocation2 + $0x50] sm:$0xff] (!%p1297_p13)  ;;  %1114 = vst.msk [vmem:[%s1753_s29 + $0x14] sm:$0xf] (!%p1297_p13), %vm1108_vm2, %v1338_v53  ;;  %v930_v12 = vld [vmem:[#allocation2 + $0xa8] sm:$0xff] (!%p1297_p13) }
 0x15a   : > { %887 = vst.msk [vmem:[#allocation2 + $0x70] sm:$0xff] %vm872_vm1, %v854_v9  ;;  %903 = vst.msk [vmem:[#allocation2 + $0xf0] sm:$0xff] %vm872_vm1, %v870_v10  ;;  %v855_v19 = vadd.f32 %v1420_v17, %v470_v7  ;;  %v871_v20 = vadd.f32 %v1436_v18, %v486_v8  ;;  %v764_v21 = vpop.f32.mrb[15].mxu0  ;;  %v828_v22 = vpop.f32.mrb[15].mxu1  ;;  %v917_v43 = vld [vmem:[#allocation2 + $0x40] sm:$0xff] (!%p1297_p13)  ;;  %v958_v60 = vadd.f32 (!%p1297_p13), %v1850_v26, %v919_v45  ;;  %v932_v18 = vld [vmem:[#allocation2 + $0xb8] sm:$0xff] (!%p1297_p13) }
 0x15b   : > { %885 = vst.msk [vmem:[#allocation2 + $0x60] sm:$0xff] %vm872_vm1, %v852_v15  ;;  %901 = vst.msk [vmem:[#allocation2 + $0xe0] sm:$0xff] %vm872_vm1, %v868_v16  ;;  %v853_v23 = vadd.f32 %v764_v21, %v468_v13  ;;  %v869_v24 = vadd.f32 %v828_v22, %v484_v14  ;;  %v920_v50 = vld [vmem:[#allocation2 + $0x58] sm:$0xff] (!%p1297_p13)  ;;  %v956_v55 = vadd.f32 (!%p1297_p13), %v1850_v26, %v917_v43  ;;  %v929_v7 = vld [vmem:[#allocation2 + $0xa0] sm:$0xff] (!%p1297_p13) }
 0x15c   : > { %888 = vst.msk [vmem:[#allocation2 + $0x78] sm:$0xff] %vm872_vm1, %v855_v19  ;;  %904 = vst.msk [vmem:[#allocation2 + $0xf8] sm:$0xff] %vm872_vm1, %v871_v20  ;;  %v918_v44 = vld [vmem:[#allocation2 + $0x48] sm:$0xff] (!%p1297_p13)  ;;  %v959_v61 = vadd.f32 (!%p1297_p13), %v1850_v26, %v920_v50  ;;  %v1343_v8 = vpack.c.bf16 (!%p1297_p13), %v958_v60, %v958_v60  ;;  %v931_v13 = vld [vmem:[#allocation2 + $0xb0] sm:$0xff] (!%p1297_p13)  ;;  %v964_v16 = vadd.f32 (!%p1297_p13), %v1850_v26, %v925_v63 }
 0x15d   : > { %886 = vst.msk [vmem:[#allocation2 + $0x68] sm:$0xff] %vm872_vm1, %v853_v23  ;;  %902 = vst.msk [vmem:[#allocation2 + $0xe8] sm:$0xff] %vm872_vm1, %v869_v24  ;;  %v957_v56 = vadd.f32 (!%p1297_p13), %v1850_v26, %v918_v44  ;;  %v1341_v1 = vpack.c.bf16 (!%p1297_p13), %v956_v55, %v956_v55  ;;  %v965_v17 = vadd.f32 (!%p1297_p13), %v1850_v26, %v926_v0  ;;  %v933_v23 = vld [vmem:[#allocation2 + $0xc0] sm:$0xff] (!%p1297_p13)  ;;  %v934_v24 = vld [vmem:[#allocation2 + $0xc8] sm:$0xff] (!%p1297_p13) }
 0x15e   : > { %1116 = vst.msk [vmem:[%s1753_s29 + $0x1c] sm:$0xf] %vm1108_vm2, %v1340_v59  ;;  %v1344_v9 = vpack.c.bf16 %v959_v61, %v959_v61  ;;  %1119 = vst.msk [vmem:[%s1753_s29 + $0x28] sm:$0xf] %vm1108_vm2, %v1343_v8  ;;  %v966_v20 = vadd.f32 %v1850_v26, %v927_v5  ;;  %v967_v21 = vadd.f32 %v1850_v26, %v928_v6  ;;  %v935_v30 = vld [vmem:[#allocation2 + $0xd0] sm:$0xff]  ;;  %v936_v31 = vld [vmem:[#allocation2 + $0xd8] sm:$0xff] }
 0x15f   : > { %v1342_v2 = vpack.c.bf16 %v957_v56, %v957_v56  ;;  %1117 = vst.msk [vmem:[%s1753_s29 + $0x20] sm:$0xf] %vm1108_vm2, %v1341_v1  ;;  %v968_v22 = vadd.f32 %v1850_v26, %v929_v7  ;;  %v1349_v25 = vpack.c.bf16 %v964_v16, %v964_v16  ;;  %v1350_v27 = vpack.c.bf16 %v965_v17, %v965_v17 }
 0x160   : > { %1120 = vst.msk [vmem:[%s1753_s29 + $0x2c] sm:$0xf] %vm1108_vm2, %v1344_v9  ;;  %v969_v28 = vadd.f32 %v1850_v26, %v930_v12  ;;  %v970_v29 = vadd.f32 %v1850_v26, %v931_v13  ;;  %v1351_v33 = vpack.c.bf16 %v966_v20, %v966_v20  ;;  %v1352_v34 = vpack.c.bf16 %v967_v21, %v967_v21 }
 0x161   : > { %v923_v57 = vld [vmem:[#allocation2 + $0x70] sm:$0xff]  ;;  %1118 = vst.msk [vmem:[%s1753_s29 + $0x24] sm:$0xf] %vm1108_vm2, %v1342_v2  ;;  %v1353_v35 = vpack.c.bf16 %v968_v22, %v968_v22  ;;  %v971_v36 = vadd.f32 %v1850_v26, %v932_v18  ;;  %1125 = vst.msk [vmem:[%s1753_s29 + $0x40] sm:$0xf] %vm1108_vm2, %v1349_v25  ;;  %v972_v41 = vadd.f32 %v1850_v26, %v933_v23 }
 0x162   : > { %v921_v51 = vld [vmem:[#allocation2 + $0x60] sm:$0xff]  ;;  %v962_v4 = vadd.f32 %v1850_v26, %v923_v57  ;;  %v939_v38 = vld [vmem:[#allocation2 + $0xf0] sm:$0xff]  ;;  %1126 = vst.msk [vmem:[%s1753_s29 + $0x44] sm:$0xf] %vm1108_vm2, %v1350_v27  ;;  %v1354_v39 = vpack.c.bf16 %v969_v28, %v969_v28  ;;  %v1355_v40 = vpack.c.bf16 %v970_v29, %v970_v29  ;;  %v973_v42 = vadd.f32 %v1850_v26, %v934_v24 }
 0x163   : > { %v924_v58 = vld [vmem:[#allocation2 + $0x78] sm:$0xff]  ;;  %v960_v62 = vadd.f32 %v1850_v26, %v921_v51  ;;  %v937_v32 = vld [vmem:[#allocation2 + $0xe0] sm:$0xff]  ;;  %1127 = vst.msk [vmem:[%s1753_s29 + $0x48] sm:$0xf] %vm1108_vm2, %v1351_v33  ;;  %1128 = vst.msk [vmem:[%s1753_s29 + $0x4c] sm:$0xf] %vm1108_vm2, %v1352_v34  ;;  %v1356_v44 = vpack.c.bf16 %v971_v36, %v971_v36  ;;  %v974_v45 = vadd.f32 %v1850_v26, %v935_v30 }
 0x164   : > { %v922_v52 = vld [vmem:[#allocation2 + $0x68] sm:$0xff]  ;;  %v963_v11 = vadd.f32 %v1850_v26, %v924_v58  ;;  %v1347_v15 = vpack.c.bf16 %v962_v4, %v962_v4  ;;  %v940_v43 = vld [vmem:[#allocation2 + $0xf8] sm:$0xff]  ;;  %1129 = vst.msk [vmem:[%s1753_s29 + $0x50] sm:$0xf] %vm1108_vm2, %v1353_v35  ;;  %v975_v46 = vadd.f32 %v1850_v26, %v936_v31  ;;  %v976_v47 = vadd.f32 %v1850_v26, %v937_v32 }
 0x165   : > { %v961_v3 = vadd.f32 %v1850_v26, %v922_v52  ;;  %v1345_v10 = vpack.c.bf16 %v960_v62, %v960_v62  ;;  %v938_v37 = vld [vmem:[#allocation2 + $0xe8] sm:$0xff]  ;;  %1130 = vst.msk [vmem:[%s1753_s29 + $0x54] sm:$0xf] %vm1108_vm2, %v1354_v39  ;;  %1131 = vst.msk [vmem:[%s1753_s29 + $0x58] sm:$0xf] %vm1108_vm2, %v1355_v40  ;;  %v1357_v48 = vpack.c.bf16 %v972_v41, %v972_v41 }
 0x166   : > { %v1348_v19 = vpack.c.bf16 %v963_v11, %v963_v11  ;;  %1123 = vst.msk [vmem:[%s1753_s29 + $0x38] sm:$0xf] %vm1108_vm2, %v1347_v15  ;;  %v1358_v49 = vpack.c.bf16 %v973_v42, %v973_v42  ;;  %v977_v50 = vadd.f32 %v1850_v26, %v938_v37  ;;  %v978_v51 = vadd.f32 %v1850_v26, %v939_v38 }
 0x167   : > { %v1346_v14 = vpack.c.bf16 %v961_v3, %v961_v3  ;;  %1121 = vst.msk [vmem:[%s1753_s29 + $0x30] sm:$0xf] %vm1108_vm2, %v1345_v10  ;;  %1132 = vst.msk [vmem:[%s1753_s29 + $0x5c] sm:$0xf] %vm1108_vm2, %v1356_v44  ;;  %v1359_v52 = vpack.c.bf16 %v974_v45, %v974_v45  ;;  %v1360_v53 = vpack.c.bf16 %v975_v46, %v975_v46 }
 0x168   : > { %1124 = vst.msk [vmem:[%s1753_s29 + $0x3c] sm:$0xf] %vm1108_vm2, %v1348_v19  ;;  %v1361_v54 = vpack.c.bf16 %v976_v47, %v976_v47  ;;  %v979_v55 = vadd.f32 %v1850_v26, %v940_v43  ;;  %1133 = vst.msk [vmem:[%s1753_s29 + $0x60] sm:$0xf] %vm1108_vm2, %v1357_v48  ;;  %v1362_v56 = vpack.c.bf16 %v977_v50, %v977_v50 }
 0x169   : > { %1122 = vst.msk [vmem:[%s1753_s29 + $0x34] sm:$0xf] %vm1108_vm2, %v1346_v14  ;;  %1134 = vst.msk [vmem:[%s1753_s29 + $0x64] sm:$0xf] %vm1108_vm2, %v1358_v49  ;;  %v1363_v57 = vpack.c.bf16 %v978_v51, %v978_v51 }
 0x16a   : > { %1135 = vst.msk [vmem:[%s1753_s29 + $0x68] sm:$0xf] %vm1108_vm2, %v1359_v52  ;;  %1136 = vst.msk [vmem:[%s1753_s29 + $0x6c] sm:$0xf] %vm1108_vm2, %v1360_v53  ;;  %v1364_v58 = vpack.c.bf16 %v979_v55, %v979_v55 }
 0x16b   : > { %1137 = vst.msk [vmem:[%s1753_s29 + $0x70] sm:$0xf] %vm1108_vm2, %v1361_v54  ;;  %1138 = vst.msk [vmem:[%s1753_s29 + $0x74] sm:$0xf] %vm1108_vm2, %v1362_v56 }
 0x16c   : > { %1139 = vst.msk [vmem:[%s1753_s29 + $0x78] sm:$0xf] %vm1108_vm2, %v1363_v57  ;;  %1140 = vst.msk [vmem:[%s1753_s29 + $0x7c] sm:$0xf] %vm1108_vm2, %v1364_v58 }
 0x16d PF: > { %s13_s18 = sadd.s32 1, %s1589_s18   ;;  %s1973_s12 = smov %s1569_s13 }
 0x16e   : > { %p10_p0 = scmp.ge.s32.totalorder %s13_s18, 20   ;;  %s1974_s13 = smov %s1663_s25 }
 0x16f   : > { %s1975_s14 = smov %s1581_s16  ;;  %s1976_s15 = smov %s1585_s17 }
 0x170   : > { %s1977_s16 = smov %s1980_s19  ;;  %s1978_s17 = smov %s1984_s20 }
 0x171   :  { %12 = sbr.rel (!%p10_p0) target bundleno = 4 (0x4), region = 122 }

</bundles_post_ra>
